<compile_context>
chip_gen: v7x
topology: tpu7x:2x2x1
jax: 0.10.0
libtpu: 0.0.40
codegen_flags: <defaults>
</compile_context>

<pallas_src>
import functools

import jax
import jax.numpy as jnp
from jax.experimental import pallas as pl
from jax.experimental.pallas import tpu as pltpu


# ------------------------------ small helpers -------------------------------

def _cdiv(a, b):
    return -(-a // b)


def _round_up(a, b):
    return _cdiv(a, b) * b


# ------------------------------ Pallas kernel -------------------------------

def _conv_bn_lrelu_kernel(x_ref, w_ref, scale_ref, bias_ref, o_ref, col_ref,
                          *, taps, tile_rows, wo, cin, cpad, cout, slope):
    """Fused 3x3 conv (as one im2col matmul) + folded BN + LeakyReLU.

    x_ref     : (P, TH_in, W_in, Cin)  halo'd input strip (P parity planes)
    w_ref     : (9*Cpad, Cout)         weights, tap-major along K (resident)
    scale_ref : (1, Cout) f32          folded BN scale
    bias_ref  : (1, Cout) f32          folded BN bias
    o_ref     : (TH, Wo, Cout)         output strip
    col_ref   : (TH, Wo, 9*Cpad) VMEM  im2col scratch (compute dtype)
    """
    # Build the im2col tile: 9 contiguous shifted windows -> lane-aligned
    # column blocks of the scratch.
    for t, (plane, roff, coff) in enumerate(taps):
        patch = x_ref[plane, roff:roff + tile_rows, coff:coff + wo, :]
        if cpad != cin:  # zero-pad K so every column block is 128-lane aligned
            patch = jnp.concatenate(
                [patch, jnp.zeros((tile_rows, wo, cpad - cin), patch.dtype)],
                axis=-1)
        col_ref[:, :, t * cpad:(t + 1) * cpad] = patch

    # One fat MXU matmul: (TH*Wo, 9*Cpad) x (9*Cpad, Cout), f32 accumulation.
    lhs = col_ref[...].reshape(tile_rows * wo, 9 * cpad)
    acc = jnp.dot(lhs, w_ref[...], preferred_element_type=jnp.float32)

    # Folded BatchNorm + LeakyReLU(0.1) in f32.
    acc = acc * scale_ref[...] + bias_ref[...]
    acc = jnp.where(acc >= 0.0, acc, acc * slope)

    o_ref[...] = acc.reshape(tile_rows, wo, cout).astype(o_ref.dtype)


# ------------------------ wrapper-side strip building ------------------------

def _halo_strips_stride1(x, tile_rows):
    """(N,H,W,C) -> (N,S,1,TH+2,W+2,C): zero-padded, halo'd output strips."""
    n, h, w, c = x.shape
    s = _cdiv(h, tile_rows)
    pad_bottom = s * tile_rows - h
    xp = jnp.pad(x, ((0, 0), (1, 1 + pad_bottom), (1, 1), (0, 0)))
    strips = [xp[:, i * tile_rows:i * tile_rows + tile_rows + 2]
              for i in range(s)]
    xs = jnp.stack(strips, axis=1)            # (N, S, TH+2, W+2, C)
    return xs[:, :, None], s                  # plane axis P = 1


def _halo_strips_stride2(x, tile_rows):
    """(N,H,W,C) -> (N,S,4,TH+1,W//2+1,C): padded + parity-split (space-to-
    depth) strips, so the stride-2 conv becomes unit-stride slicing in VMEM."""
    n, h, w, c = x.shape
    assert h % 2 == 0 and w % 2 == 0, "stride-2 layers expect even H, W"
    ho, wo = h // 2, w // 2
    s = _cdiv(ho, tile_rows)
    extra = s * tile_rows + 1 - (ho + 1)      # extra parity-plane rows needed
    xp = jnp.pad(x, ((0, 0), (1, 1 + 2 * extra), (1, 1), (0, 0)))
    hh = (h + 2 + 2 * extra) // 2             # = s*tile_rows + 1
    wh = (w + 2) // 2                         # = wo + 1
    planes = xp.reshape(n, hh, 2, wh, 2, c).transpose(0, 2, 4, 1, 3, 5)
    planes = planes.reshape(n, 4, hh, wh, c)  # plane = (dy%2)*2 + (dx%2)
    strips = [planes[:, :, i * tile_rows:i * tile_rows + tile_rows + 1]
              for i in range(s)]
    return jnp.stack(strips, axis=1), s       # (N, S, 4, TH+1, wh, C)


def _choose_tile_rows(ho, wo, win, planes, cin, cpad, cout, cmp_itemsize,
                      vmem_budget_bytes, max_tile_rows):
    """Pick output-strip height so the per-step working set fits the budget.

    The 8 MiB default is conservative enough for v7x (64 MiB physical /
    32 MiB default scoped VMEM) with double buffering; it can be raised on
    v5e/v6e (128 MiB VMEM)."""
    per_row = (2 * planes * win * cin * cmp_itemsize   # double-buffered input
               + wo * 9 * cpad * cmp_itemsize          # im2col scratch
               + wo * cout * 4                         # f32 matmul result
               + 2 * wo * cout * 4)                    # double-buffered output
    tile = max(1, int(vmem_budget_bytes // max(per_row, 1)))
    tile = min(tile, ho)
    if max_tile_rows is not None:
        tile = min(tile, int(max_tile_rows))
    return tile


# ------------------------------- layer wrapper -------------------------------

def conv_bn_lrelu(x_nhwc, w_hwio, scale, bias, *, stride, slope=0.1,
                  compute_dtype=jnp.float32,
                  vmem_budget_bytes=8 * 1024 * 1024, max_tile_rows=None):
    """One fused Conv3x3(pad=1, no bias) + folded BN + LeakyReLU layer."""
    n, h, w, cin = x_nhwc.shape
    cout = w_hwio.shape[-1]
    out_dtype = x_nhwc.dtype
    cpad = _round_up(cin, 128)                 # lane-aligned K per tap

    if stride == 1:
        ho, wo = h, w
        planes, win = 1, w + 2
        taps = tuple((0, dy, dx) for dy in range(3) for dx in range(3))
    elif stride == 2:
        ho, wo = h // 2, w // 2
        planes, win = 4, w // 2 + 1
        taps = tuple(((dy % 2) * 2 + (dx % 2), dy // 2, dx // 2)
                     for dy in range(3) for dx in range(3))
    else:
        raise ValueError("only stride 1 or 2 is supported")

    cmp_isize = jnp.dtype(compute_dtype).itemsize
    tile_rows = _choose_tile_rows(ho, wo, win, planes, cin, cpad, cout,
                                  cmp_isize, vmem_budget_bytes, max_tile_rows)

    if stride == 1:
        xs, s = _halo_strips_stride1(x_nhwc, tile_rows)
        th_in = tile_rows + 2
    else:
        xs, s = _halo_strips_stride2(x_nhwc, tile_rows)
        th_in = tile_rows + 1
    xs = xs.astype(compute_dtype)              # bf16 halves strip DMA traffic

    # Weights in tap-major (9*Cpad, Cout) matmul layout; BN scale/bias in f32.
    w9 = w_hwio.reshape(9, cin, cout)
    if cpad != cin:
        w9 = jnp.pad(w9, ((0, 0), (0, cpad - cin), (0, 0)))
    wmat = w9.reshape(9 * cpad, cout).astype(compute_dtype)
    sc = scale.reshape(1, cout).astype(jnp.float32)
    bi = bias.reshape(1, cout).astype(jnp.float32)

    kern = functools.partial(_conv_bn_lrelu_kernel, taps=taps,
                             tile_rows=tile_rows, wo=wo, cin=cin, cpad=cpad,
                             cout=cout, slope=slope)

    out = pl.pallas_call(
        kern,
        out_shape=jax.ShapeDtypeStruct((n, s, tile_rows, wo, cout), out_dtype),
        grid_spec=pltpu.PrefetchScalarGridSpec(
            num_scalar_prefetch=0,
            grid=(n, s),
            in_specs=[
                # halo'd input strip for (batch ni, strip si)
                pl.BlockSpec((None, None, planes, th_in, win, cin),
                             lambda ni, si: (ni, si, 0, 0, 0, 0)),
                # weights / BN params: constant index -> stay resident in VMEM
                pl.BlockSpec((9 * cpad, cout), lambda ni, si: (0, 0)),
                pl.BlockSpec((1, cout), lambda ni, si: (0, 0)),
                pl.BlockSpec((1, cout), lambda ni, si: (0, 0)),
            ],
            out_specs=pl.BlockSpec((None, None, tile_rows, wo, cout),
                                   lambda ni, si: (ni, si, 0, 0, 0)),
            scratch_shapes=[pltpu.VMEM((tile_rows, wo, 9 * cpad),
                                       compute_dtype)],
        ),
        compiler_params=pltpu.CompilerParams(
            dimension_semantics=("parallel", "parallel")),
    )(xs, wmat, sc, bi)

    # (N, S, TH, Wo, Cout) -> (N, Ho, Wo, Cout); drop padded bottom rows.
    return out.reshape(n, s * tile_rows, wo, cout)[:, :ho]


# ------------------------------- full Decoder --------------------------------

_STRIDES = (1, 1, 2, 2, 1, 1)   # conv1..conv6 of the PyTorch Decoder
_BN_EPS = 1e-5


def fold_batchnorm(w_oihw, gamma, beta, mean, var, eps=_BN_EPS):
    """PyTorch OIHW conv weight + BN running stats -> HWIO weight, scale, bias."""
    w_hwio = jnp.transpose(w_oihw, (2, 3, 1, 0)).astype(jnp.float32)
    scale = (gamma / jnp.sqrt(var + eps)).astype(jnp.float32)
    bias = (beta - mean * scale).astype(jnp.float32)
    return w_hwio, scale, bias


def decoder_forward(x_nchw, params, *, compute_dtype=jnp.float32,
                    max_tile_rows=None):
    """Pallas implementation of Decoder.forward (NCHW in / NCHW out).

    BatchNorm is applied in inference mode (running statistics folded into a
    per-channel scale/bias)."""
    x = jnp.transpose(x_nchw, (0, 2, 3, 1))          # NCHW -> NHWC
    for layer, stride in zip(params["layers"], _STRIDES):
        w_hwio, scale, bias = fold_batchnorm(layer["w"], layer["gamma"],
                                             layer["beta"], layer["mean"],
                                             layer["var"])
        x = conv_bn_lrelu(x, w_hwio, scale, bias, stride=stride,
                          compute_dtype=compute_dtype,
                          max_tile_rows=max_tile_rows)
    return jnp.transpose(x, (0, 3, 1, 2))            # NHWC -> NCHW


# ----------------------------- pure-JAX reference ----------------------------

def decoder_reference(x_nchw, params, *, operand_dtype=jnp.float32,
                      eps=_BN_EPS):
    x = jnp.transpose(x_nchw, (0, 2, 3, 1)).astype(jnp.float32)
    for layer, stride in zip(params["layers"], _STRIDES):
        w_hwio = jnp.transpose(layer["w"], (2, 3, 1, 0))
        y = jax.lax.conv_general_dilated(
            x.astype(operand_dtype), w_hwio.astype(operand_dtype),
            window_strides=(stride, stride), padding=((1, 1), (1, 1)),
            dimension_numbers=("NHWC", "HWIO", "NHWC"),
            preferred_element_type=jnp.float32)
        y = ((y - layer["mean"]) / jnp.sqrt(layer["var"] + eps)
             * layer["gamma"] + layer["beta"])
        x = jnp.where(y >= 0.0, y, 0.1 * y)
    return jnp.transpose(x, (0, 3, 1, 2))


# ----------------------------------- main ------------------------------------

if __name__ == "__main__":
    N, H, W = 2, 16, 16
    # (Cin, Cout) of conv1..conv6 as in the PyTorch Decoder.
    cfg = [(64, 64), (64, 128), (128, 128), (128, 256), (256, 128), (128, 64)]

    key = jax.random.PRNGKey(0)
    layers = []
    for cin, cout in cfg:
        key, kw, kg, kb, km, kv = jax.random.split(key, 6)
        layers.append({
            "w": jax.random.normal(kw, (cout, cin, 3, 3), jnp.float32)
                 * (2.0 / (9 * cin)) ** 0.5,                        # OIHW
            "gamma": 1.0 + 0.1 * jax.random.normal(kg, (cout,), jnp.float32),
            "beta": 0.1 * jax.random.normal(kb, (cout,), jnp.float32),
            "mean": 0.1 * jax.random.normal(km, (cout,), jnp.float32),
            "var": jax.random.uniform(kv, (cout,), jnp.float32, 0.5, 1.5),
        })
    params = {"layers": layers}

    key, kx = jax.random.split(key)
    x = jax.random.normal(kx, (N, 64, H, W), jnp.float32)            # NCHW

    # --- f32 path: checked tightly against the XLA conv reference. ---
    fwd_f32 = jax.jit(functools.partial(decoder_forward,
                                        compute_dtype=jnp.float32,
                                        max_tile_rows=8))
    out_f32 = jax.block_until_ready(fwd_f32(x, params))
    ref_f32 = decoder_reference(x, params, operand_dtype=jnp.float32)
    assert out_f32.shape == (N, 64, H // 4, W // 4), out_f32.shape
    assert out_f32.dtype == x.dtype
    err_f32 = float(jnp.max(jnp.abs(out_f32 - ref_f32)))
    assert jnp.allclose(out_f32, ref_f32, atol=1e-3, rtol=1e-3), \
        f"f32 max abs err {err_f32}"

    # --- bf16-operand path (v6e/v7x MXU setting), f32 accumulation. ---
    # Checked against a reference that also feeds bf16 operands into an
    # f32-accumulating conv (same semantics as the kernel).
    fwd_bf16 = jax.jit(functools.partial(decoder_forward,
                                         compute_dtype=jnp.bfloat16,
                                         max_tile_rows=8))
    out_bf16 = jax.block_until_ready(fwd_bf16(x, params))
    ref_bf16 = decoder_reference(x, params, operand_dtype=jnp.bfloat16)
    err_bf16 = float(jnp.max(jnp.abs(out_bf16 - ref_bf16)))
    assert jnp.allclose(out_bf16, ref_bf16, atol=2e-2, rtol=2e-2), \
        f"bf16 max abs err {err_bf16}"

    print("KERNEL_OK")
</pallas_src>

<mosaic_0001>
module attributes {stable_mosaic.version = 11 : i64} {
  func.func @_conv_bn_lrelu_kernel(%arg0: i32, %arg1: i32, %arg2: memref<1x1x1x10x18x64xf32, #tpu.memory_space<vmem>>, %arg3: memref<1152x64xf32, #tpu.memory_space<vmem>>, %arg4: memref<1x64xf32, #tpu.memory_space<vmem>>, %arg5: memref<1x64xf32, #tpu.memory_space<vmem>>, %arg6: memref<1x1x8x16x64xf32, #tpu.memory_space<vmem>>, %arg7: memref<8x16x1152xf32, #tpu.memory_space<vmem>>) attributes {dimension_semantics = [#tpu.dimension_semantics<parallel>, #tpu.dimension_semantics<parallel>], iteration_bounds = array<i64: 2, 2>, scalar_prefetch = 0 : i64, scratch_operands = 1 : i64, tpu.core_type = #tpu.core_type<tc>, window_params = [{transform_indices = @transform_0, window_bounds = array<i64: 1, 1, 1, 10, 18, 64>}, {pipeline_mode = #tpu.pipeline_mode<synchronous>, transform_indices = @transform_1, window_bounds = array<i64: 1152, 64>}, {pipeline_mode = #tpu.pipeline_mode<synchronous>, transform_indices = @transform_2, window_bounds = array<i64: 1, 64>}, {pipeline_mode = #tpu.pipeline_mode<synchronous>, transform_indices = @transform_3, window_bounds = array<i64: 1, 64>}, {transform_indices = @transform_4, window_bounds = array<i64: 1, 1, 8, 16, 64>}]} {
    %c0 = arith.constant 0 : index
    %c0_0 = arith.constant 0 : index
    %c0_1 = arith.constant 0 : index
    %c0_2 = arith.constant 0 : index
    %c0_3 = arith.constant 0 : index
    %c0_4 = arith.constant 0 : index
    %0 = vector.load %arg2[%c0, %c0_0, %c0_1, %c0_2, %c0_3, %c0_4] : memref<1x1x1x10x18x64xf32, #tpu.memory_space<vmem>>, vector<1x1x1x8x16x64xf32>
    %1 = vector.shape_cast %0 : vector<1x1x1x8x16x64xf32> to vector<8x16x64xf32>
    %cst = arith.constant 0.000000e+00 : f32
    %2 = vector.broadcast %cst : f32 to vector<8x16x64xf32>
    %3 = tpu.concatenate %1, %2 in 2 : vector<8x16x64xf32>, vector<8x16x64xf32> -> vector<8x16x128xf32>
    %c0_5 = arith.constant 0 : index
    %c0_6 = arith.constant 0 : index
    %c0_7 = arith.constant 0 : index
    %4 = vector.load %arg7[%c0_5, %c0_6, %c0_7] : memref<8x16x1152xf32, #tpu.memory_space<vmem>>, vector<8x16x128xf32>
    tpu.vector_store %arg7[%c0_5, %c0_6, %c0_7], %3 {strides = array<i32>} : memref<8x16x1152xf32, #tpu.memory_space<vmem>>, vector<8x16x128xf32>,
    %c0_8 = arith.constant 0 : index
    %c0_9 = arith.constant 0 : index
    %c0_10 = arith.constant 0 : index
    %c0_11 = arith.constant 0 : index
    %c1 = arith.constant 1 : index
    %c0_12 = arith.constant 0 : index
    %5 = vector.load %arg2[%c0_8, %c0_9, %c0_10, %c0_11, %c1, %c0_12] : memref<1x1x1x10x18x64xf32, #tpu.memory_space<vmem>>, vector<1x1x1x8x16x64xf32>
    %6 = vector.shape_cast %5 : vector<1x1x1x8x16x64xf32> to vector<8x16x64xf32>
    %cst_13 = arith.constant 0.000000e+00 : f32
    %7 = vector.broadcast %cst_13 : f32 to vector<8x16x64xf32>
    %8 = tpu.concatenate %6, %7 in 2 : vector<8x16x64xf32>, vector<8x16x64xf32> -> vector<8x16x128xf32>
    %c0_14 = arith.constant 0 : index
    %c0_15 = arith.constant 0 : index
    %c128 = arith.constant 128 : index
    %9 = vector.load %arg7[%c0_14, %c0_15, %c128] : memref<8x16x1152xf32, #tpu.memory_space<vmem>>, vector<8x16x128xf32>
    tpu.vector_store %arg7[%c0_14, %c0_15, %c128], %8 {strides = array<i32>} : memref<8x16x1152xf32, #tpu.memory_space<vmem>>, vector<8x16x128xf32>,
    %c0_16 = arith.constant 0 : index
    %c0_17 = arith.constant 0 : index
    %c0_18 = arith.constant 0 : index
    %c0_19 = arith.constant 0 : index
    %c2 = arith.constant 2 : index
    %c0_20 = arith.constant 0 : index
    %10 = vector.load %arg2[%c0_16, %c0_17, %c0_18, %c0_19, %c2, %c0_20] : memref<1x1x1x10x18x64xf32, #tpu.memory_space<vmem>>, vector<1x1x1x8x16x64xf32>
    %11 = vector.shape_cast %10 : vector<1x1x1x8x16x64xf32> to vector<8x16x64xf32>
    %cst_21 = arith.constant 0.000000e+00 : f32
    %12 = vector.broadcast %cst_21 : f32 to vector<8x16x64xf32>
    %13 = tpu.concatenate %11, %12 in 2 : vector<8x16x64xf32>, vector<8x16x64xf32> -> vector<8x16x128xf32>
    %c0_22 = arith.constant 0 : index
    %c0_23 = arith.constant 0 : index
    %c256 = arith.constant 256 : index
    %14 = vector.load %arg7[%c0_22, %c0_23, %c256] : memref<8x16x1152xf32, #tpu.memory_space<vmem>>, vector<8x16x128xf32>
    tpu.vector_store %arg7[%c0_22, %c0_23, %c256], %13 {strides = array<i32>} : memref<8x16x1152xf32, #tpu.memory_space<vmem>>, vector<8x16x128xf32>,
    %c0_24 = arith.constant 0 : index
    %c0_25 = arith.constant 0 : index
    %c0_26 = arith.constant 0 : index
    %c1_27 = arith.constant 1 : index
    %c0_28 = arith.constant 0 : index
    %c0_29 = arith.constant 0 : index
    %15 = vector.load %arg2[%c0_24, %c0_25, %c0_26, %c1_27, %c0_28, %c0_29] : memref<1x1x1x10x18x64xf32, #tpu.memory_space<vmem>>, vector<1x1x1x8x16x64xf32>
    %16 = vector.shape_cast %15 : vector<1x1x1x8x16x64xf32> to vector<8x16x64xf32>
    %cst_30 = arith.constant 0.000000e+00 : f32
    %17 = vector.broadcast %cst_30 : f32 to vector<8x16x64xf32>
    %18 = tpu.concatenate %16, %17 in 2 : vector<8x16x64xf32>, vector<8x16x64xf32> -> vector<8x16x128xf32>
    %c0_31 = arith.constant 0 : index
    %c0_32 = arith.constant 0 : index
    %c384 = arith.constant 384 : index
    %19 = vector.load %arg7[%c0_31, %c0_32, %c384] : memref<8x16x1152xf32, #tpu.memory_space<vmem>>, vector<8x16x128xf32>
    tpu.vector_store %arg7[%c0_31, %c0_32, %c384], %18 {strides = array<i32>} : memref<8x16x1152xf32, #tpu.memory_space<vmem>>, vector<8x16x128xf32>,
    %c0_33 = arith.constant 0 : index
    %c0_34 = arith.constant 0 : index
    %c0_35 = arith.constant 0 : index
    %c1_36 = arith.constant 1 : index
    %c1_37 = arith.constant 1 : index
    %c0_38 = arith.constant 0 : index
    %20 = vector.load %arg2[%c0_33, %c0_34, %c0_35, %c1_36, %c1_37, %c0_38] : memref<1x1x1x10x18x64xf32, #tpu.memory_space<vmem>>, vector<1x1x1x8x16x64xf32>
    %21 = vector.shape_cast %20 : vector<1x1x1x8x16x64xf32> to vector<8x16x64xf32>
    %cst_39 = arith.constant 0.000000e+00 : f32
    %22 = vector.broadcast %cst_39 : f32 to vector<8x16x64xf32>
    %23 = tpu.concatenate %21, %22 in 2 : vector<8x16x64xf32>, vector<8x16x64xf32> -> vector<8x16x128xf32>
    %c0_40 = arith.constant 0 : index
    %c0_41 = arith.constant 0 : index
    %c512 = arith.constant 512 : index
    %24 = vector.load %arg7[%c0_40, %c0_41, %c512] : memref<8x16x1152xf32, #tpu.memory_space<vmem>>, vector<8x16x128xf32>
    tpu.vector_store %arg7[%c0_40, %c0_41, %c512], %23 {strides = array<i32>} : memref<8x16x1152xf32, #tpu.memory_space<vmem>>, vector<8x16x128xf32>,
    %c0_42 = arith.constant 0 : index
    %c0_43 = arith.constant 0 : index
    %c0_44 = arith.constant 0 : index
    %c1_45 = arith.constant 1 : index
    %c2_46 = arith.constant 2 : index
    %c0_47 = arith.constant 0 : index
    %25 = vector.load %arg2[%c0_42, %c0_43, %c0_44, %c1_45, %c2_46, %c0_47] : memref<1x1x1x10x18x64xf32, #tpu.memory_space<vmem>>, vector<1x1x1x8x16x64xf32>
    %26 = vector.shape_cast %25 : vector<1x1x1x8x16x64xf32> to vector<8x16x64xf32>
    %cst_48 = arith.constant 0.000000e+00 : f32
    %27 = vector.broadcast %cst_48 : f32 to vector<8x16x64xf32>
    %28 = tpu.concatenate %26, %27 in 2 : vector<8x16x64xf32>, vector<8x16x64xf32> -> vector<8x16x128xf32>
    %c0_49 = arith.constant 0 : index
    %c0_50 = arith.constant 0 : index
    %c640 = arith.constant 640 : index
    %29 = vector.load %arg7[%c0_49, %c0_50, %c640] : memref<8x16x1152xf32, #tpu.memory_space<vmem>>, vector<8x16x128xf32>
    tpu.vector_store %arg7[%c0_49, %c0_50, %c640], %28 {strides = array<i32>} : memref<8x16x1152xf32, #tpu.memory_space<vmem>>, vector<8x16x128xf32>,
    %c0_51 = arith.constant 0 : index
    %c0_52 = arith.constant 0 : index
    %c0_53 = arith.constant 0 : index
    %c2_54 = arith.constant 2 : index
    %c0_55 = arith.constant 0 : index
    %c0_56 = arith.constant 0 : index
    %30 = vector.load %arg2[%c0_51, %c0_52, %c0_53, %c2_54, %c0_55, %c0_56] : memref<1x1x1x10x18x64xf32, #tpu.memory_space<vmem>>, vector<1x1x1x8x16x64xf32>
    %31 = vector.shape_cast %30 : vector<1x1x1x8x16x64xf32> to vector<8x16x64xf32>
    %cst_57 = arith.constant 0.000000e+00 : f32
    %32 = vector.broadcast %cst_57 : f32 to vector<8x16x64xf32>
    %33 = tpu.concatenate %31, %32 in 2 : vector<8x16x64xf32>, vector<8x16x64xf32> -> vector<8x16x128xf32>
    %c0_58 = arith.constant 0 : index
    %c0_59 = arith.constant 0 : index
    %c768 = arith.constant 768 : index
    %34 = vector.load %arg7[%c0_58, %c0_59, %c768] : memref<8x16x1152xf32, #tpu.memory_space<vmem>>, vector<8x16x128xf32>
    tpu.vector_store %arg7[%c0_58, %c0_59, %c768], %33 {strides = array<i32>} : memref<8x16x1152xf32, #tpu.memory_space<vmem>>, vector<8x16x128xf32>,
    %c0_60 = arith.constant 0 : index
    %c0_61 = arith.constant 0 : index
    %c0_62 = arith.constant 0 : index
    %c2_63 = arith.constant 2 : index
    %c1_64 = arith.constant 1 : index
    %c0_65 = arith.constant 0 : index
    %35 = vector.load %arg2[%c0_60, %c0_61, %c0_62, %c2_63, %c1_64, %c0_65] : memref<1x1x1x10x18x64xf32, #tpu.memory_space<vmem>>, vector<1x1x1x8x16x64xf32>
    %36 = vector.shape_cast %35 : vector<1x1x1x8x16x64xf32> to vector<8x16x64xf32>
    %cst_66 = arith.constant 0.000000e+00 : f32
    %37 = vector.broadcast %cst_66 : f32 to vector<8x16x64xf32>
    %38 = tpu.concatenate %36, %37 in 2 : vector<8x16x64xf32>, vector<8x16x64xf32> -> vector<8x16x128xf32>
    %c0_67 = arith.constant 0 : index
    %c0_68 = arith.constant 0 : index
    %c896 = arith.constant 896 : index
    %39 = vector.load %arg7[%c0_67, %c0_68, %c896] : memref<8x16x1152xf32, #tpu.memory_space<vmem>>, vector<8x16x128xf32>
    tpu.vector_store %arg7[%c0_67, %c0_68, %c896], %38 {strides = array<i32>} : memref<8x16x1152xf32, #tpu.memory_space<vmem>>, vector<8x16x128xf32>,
    %c0_69 = arith.constant 0 : index
    %c0_70 = arith.constant 0 : index
    %c0_71 = arith.constant 0 : index
    %c2_72 = arith.constant 2 : index
    %c2_73 = arith.constant 2 : index
    %c0_74 = arith.constant 0 : index
    %40 = vector.load %arg2[%c0_69, %c0_70, %c0_71, %c2_72, %c2_73, %c0_74] : memref<1x1x1x10x18x64xf32, #tpu.memory_space<vmem>>, vector<1x1x1x8x16x64xf32>
    %41 = vector.shape_cast %40 : vector<1x1x1x8x16x64xf32> to vector<8x16x64xf32>
    %cst_75 = arith.constant 0.000000e+00 : f32
    %42 = vector.broadcast %cst_75 : f32 to vector<8x16x64xf32>
    %43 = tpu.concatenate %41, %42 in 2 : vector<8x16x64xf32>, vector<8x16x64xf32> -> vector<8x16x128xf32>
    %c0_76 = arith.constant 0 : index
    %c0_77 = arith.constant 0 : index
    %c1024 = arith.constant 1024 : index
    %44 = vector.load %arg7[%c0_76, %c0_77, %c1024] : memref<8x16x1152xf32, #tpu.memory_space<vmem>>, vector<8x16x128xf32>
    tpu.vector_store %arg7[%c0_76, %c0_77, %c1024], %43 {strides = array<i32>} : memref<8x16x1152xf32, #tpu.memory_space<vmem>>, vector<8x16x128xf32>,
    %c0_78 = arith.constant 0 : index
    %c0_79 = arith.constant 0 : index
    %c0_80 = arith.constant 0 : index
    %45 = vector.load %arg7[%c0_78, %c0_79, %c0_80] : memref<8x16x1152xf32, #tpu.memory_space<vmem>>, vector<8x16x1152xf32>
    %46 = vector.shape_cast %45 : vector<8x16x1152xf32> to vector<128x1152xf32>
    %c0_81 = arith.constant 0 : index
    %c0_82 = arith.constant 0 : index
    %47 = vector.load %arg3[%c0_81, %c0_82] : memref<1152x64xf32, #tpu.memory_space<vmem>>, vector<1152x64xf32>
    %cst_83 = arith.constant dense<0.000000e+00> : vector<128x64xf32>
    %48 = tpu.matmul %46, %47, %cst_83 {dimension_numbers = #tpu.dot_dimension_numbers<[1], [0], [0], [1], [0, 0, 1, 1], [], []>} : vector<128x1152xf32>, vector<1152x64xf32>, vector<128x64xf32> -> vector<128x64xf32>
    %c0_84 = arith.constant 0 : index
    %c0_85 = arith.constant 0 : index
    %49 = vector.load %arg4[%c0_84, %c0_85] : memref<1x64xf32, #tpu.memory_space<vmem>>, vector<1x64xf32>
    %50 = vector.broadcast %49 : vector<1x64xf32> to vector<128x64xf32>
    %51 = arith.mulf %48, %50 : vector<128x64xf32>
    %c0_86 = arith.constant 0 : index
    %c0_87 = arith.constant 0 : index
    %52 = vector.load %arg5[%c0_86, %c0_87] : memref<1x64xf32, #tpu.memory_space<vmem>>, vector<1x64xf32>
    %53 = vector.broadcast %52 : vector<1x64xf32> to vector<128x64xf32>
    %54 = arith.addf %51, %53 : vector<128x64xf32>
    %cst_88 = arith.constant 0.000000e+00 : f32
    %55 = vector.broadcast %cst_88 : f32 to vector<128x64xf32>
    %56 = arith.cmpf oge, %54, %55 : vector<128x64xf32>
    %cst_89 = arith.constant 1.000000e-01 : f32
    %57 = vector.broadcast %cst_89 : f32 to vector<128x64xf32>
    %58 = arith.mulf %54, %57 : vector<128x64xf32>
    %59 = arith.select %56, %54, %58 : vector<128x64xi1>, vector<128x64xf32>
    %60 = vector.shape_cast %59 : vector<128x64xf32> to vector<8x16x64xf32>
    %c0_90 = arith.constant 0 : index
    %c0_91 = arith.constant 0 : index
    %c0_92 = arith.constant 0 : index
    %c0_93 = arith.constant 0 : index
    %c0_94 = arith.constant 0 : index
    %61 = vector.load %arg6[%c0_90, %c0_91, %c0_92, %c0_93, %c0_94] : memref<1x1x8x16x64xf32, #tpu.memory_space<vmem>>, vector<1x1x8x16x64xf32>
    %62 = vector.shape_cast %61 : vector<1x1x8x16x64xf32> to vector<8x16x64xf32>
    %63 = vector.shape_cast %60 : vector<8x16x64xf32> to vector<1x1x8x16x64xf32>
    tpu.vector_store %arg6[%c0_90, %c0_91, %c0_92, %c0_93, %c0_94], %63 {strides = array<i32>} : memref<1x1x8x16x64xf32, #tpu.memory_space<vmem>>, vector<1x1x8x16x64xf32>,
    return
  }
  func.func @transform_0(%arg0: i32, %arg1: i32) -> (i32, i32, i32, i32, i32, i32) {
    %c0_i32 = arith.constant 0 : i32
    %c0_i32_0 = arith.constant 0 : i32
    %c0_i32_1 = arith.constant 0 : i32
    %c0_i32_2 = arith.constant 0 : i32
    %c0_i32_3 = arith.constant 0 : i32
    return %arg0, %arg1, %c0_i32, %c0_i32_0, %c0_i32_1, %c0_i32_2 : i32, i32, i32, i32, i32, i32
  }
  func.func @transform_1(%arg0: i32, %arg1: i32) -> (i32, i32) {
    %c0_i32 = arith.constant 0 : i32
    %c0_i32_0 = arith.constant 0 : i32
    %c0_i32_1 = arith.constant 0 : i32
    return %c0_i32, %c0_i32_0 : i32, i32
  }
  func.func @transform_2(%arg0: i32, %arg1: i32) -> (i32, i32) {
    %c0_i32 = arith.constant 0 : i32
    %c0_i32_0 = arith.constant 0 : i32
    %c0_i32_1 = arith.constant 0 : i32
    return %c0_i32, %c0_i32_0 : i32, i32
  }
  func.func @transform_3(%arg0: i32, %arg1: i32) -> (i32, i32) {
    %c0_i32 = arith.constant 0 : i32
    %c0_i32_0 = arith.constant 0 : i32
    %c0_i32_1 = arith.constant 0 : i32
    return %c0_i32, %c0_i32_0 : i32, i32
  }
  func.func @transform_4(%arg0: i32, %arg1: i32) -> (i32, i32, i32, i32, i32) {
    %c0_i32 = arith.constant 0 : i32
    %c0_i32_0 = arith.constant 0 : i32
    %c0_i32_1 = arith.constant 0 : i32
    %c0_i32_2 = arith.constant 0 : i32
    return %arg0, %arg1, %c0_i32, %c0_i32_0, %c0_i32_1 : i32, i32, i32, i32, i32
  }
}

module attributes {stable_mosaic.version = 11 : i64} {
  func.func @_conv_bn_lrelu_kernel(%arg0: i32, %arg1: i32, %arg2: memref<1x1x1x10x18x64xf32, #tpu.memory_space<vmem>>, %arg3: memref<1152x128xf32, #tpu.memory_space<vmem>>, %arg4: memref<1x128xf32, #tpu.memory_space<vmem>>, %arg5: memref<1x128xf32, #tpu.memory_space<vmem>>, %arg6: memref<1x1x8x16x128xf32, #tpu.memory_space<vmem>>, %arg7: memref<8x16x1152xf32, #tpu.memory_space<vmem>>) attributes {dimension_semantics = [#tpu.dimension_semantics<parallel>, #tpu.dimension_semantics<parallel>], iteration_bounds = array<i64: 2, 2>, scalar_prefetch = 0 : i64, scratch_operands = 1 : i64, tpu.core_type = #tpu.core_type<tc>, window_params = [{transform_indices = @transform_0, window_bounds = array<i64: 1, 1, 1, 10, 18, 64>}, {pipeline_mode = #tpu.pipeline_mode<synchronous>, transform_indices = @transform_1, window_bounds = array<i64: 1152, 128>}, {pipeline_mode = #tpu.pipeline_mode<synchronous>, transform_indices = @transform_2, window_bounds = array<i64: 1, 128>}, {pipeline_mode = #tpu.pipeline_mode<synchronous>, transform_indices = @transform_3, window_bounds = array<i64: 1, 128>}, {transform_indices = @transform_4, window_bounds = array<i64: 1, 1, 8, 16, 128>}]} {
    %c0 = arith.constant 0 : index
    %c0_0 = arith.constant 0 : index
    %c0_1 = arith.constant 0 : index
    %c0_2 = arith.constant 0 : index
    %c0_3 = arith.constant 0 : index
    %c0_4 = arith.constant 0 : index
    %0 = vector.load %arg2[%c0, %c0_0, %c0_1, %c0_2, %c0_3, %c0_4] : memref<1x1x1x10x18x64xf32, #tpu.memory_space<vmem>>, vector<1x1x1x8x16x64xf32>
    %1 = vector.shape_cast %0 : vector<1x1x1x8x16x64xf32> to vector<8x16x64xf32>
    %cst = arith.constant 0.000000e+00 : f32
    %2 = vector.broadcast %cst : f32 to vector<8x16x64xf32>
    %3 = tpu.concatenate %1, %2 in 2 : vector<8x16x64xf32>, vector<8x16x64xf32> -> vector<8x16x128xf32>
    %c0_5 = arith.constant 0 : index
    %c0_6 = arith.constant 0 : index
    %c0_7 = arith.constant 0 : index
    %4 = vector.load %arg7[%c0_5, %c0_6, %c0_7] : memref<8x16x1152xf32, #tpu.memory_space<vmem>>, vector<8x16x128xf32>
    tpu.vector_store %arg7[%c0_5, %c0_6, %c0_7], %3 {strides = array<i32>} : memref<8x16x1152xf32, #tpu.memory_space<vmem>>, vector<8x16x128xf32>,
    %c0_8 = arith.constant 0 : index
    %c0_9 = arith.constant 0 : index
    %c0_10 = arith.constant 0 : index
    %c0_11 = arith.constant 0 : index
    %c1 = arith.constant 1 : index
    %c0_12 = arith.constant 0 : index
    %5 = vector.load %arg2[%c0_8, %c0_9, %c0_10, %c0_11, %c1, %c0_12] : memref<1x1x1x10x18x64xf32, #tpu.memory_space<vmem>>, vector<1x1x1x8x16x64xf32>
    %6 = vector.shape_cast %5 : vector<1x1x1x8x16x64xf32> to vector<8x16x64xf32>
    %cst_13 = arith.constant 0.000000e+00 : f32
    %7 = vector.broadcast %cst_13 : f32 to vector<8x16x64xf32>
    %8 = tpu.concatenate %6, %7 in 2 : vector<8x16x64xf32>, vector<8x16x64xf32> -> vector<8x16x128xf32>
    %c0_14 = arith.constant 0 : index
    %c0_15 = arith.constant 0 : index
    %c128 = arith.constant 128 : index
    %9 = vector.load %arg7[%c0_14, %c0_15, %c128] : memref<8x16x1152xf32, #tpu.memory_space<vmem>>, vector<8x16x128xf32>
    tpu.vector_store %arg7[%c0_14, %c0_15, %c128], %8 {strides = array<i32>} : memref<8x16x1152xf32, #tpu.memory_space<vmem>>, vector<8x16x128xf32>,
    %c0_16 = arith.constant 0 : index
    %c0_17 = arith.constant 0 : index
    %c0_18 = arith.constant 0 : index
    %c0_19 = arith.constant 0 : index
    %c2 = arith.constant 2 : index
    %c0_20 = arith.constant 0 : index
    %10 = vector.load %arg2[%c0_16, %c0_17, %c0_18, %c0_19, %c2, %c0_20] : memref<1x1x1x10x18x64xf32, #tpu.memory_space<vmem>>, vector<1x1x1x8x16x64xf32>
    %11 = vector.shape_cast %10 : vector<1x1x1x8x16x64xf32> to vector<8x16x64xf32>
    %cst_21 = arith.constant 0.000000e+00 : f32
    %12 = vector.broadcast %cst_21 : f32 to vector<8x16x64xf32>
    %13 = tpu.concatenate %11, %12 in 2 : vector<8x16x64xf32>, vector<8x16x64xf32> -> vector<8x16x128xf32>
    %c0_22 = arith.constant 0 : index
    %c0_23 = arith.constant 0 : index
    %c256 = arith.constant 256 : index
    %14 = vector.load %arg7[%c0_22, %c0_23, %c256] : memref<8x16x1152xf32, #tpu.memory_space<vmem>>, vector<8x16x128xf32>
    tpu.vector_store %arg7[%c0_22, %c0_23, %c256], %13 {strides = array<i32>} : memref<8x16x1152xf32, #tpu.memory_space<vmem>>, vector<8x16x128xf32>,
    %c0_24 = arith.constant 0 : index
    %c0_25 = arith.constant 0 : index
    %c0_26 = arith.constant 0 : index
    %c1_27 = arith.constant 1 : index
    %c0_28 = arith.constant 0 : index
    %c0_29 = arith.constant 0 : index
    %15 = vector.load %arg2[%c0_24, %c0_25, %c0_26, %c1_27, %c0_28, %c0_29] : memref<1x1x1x10x18x64xf32, #tpu.memory_space<vmem>>, vector<1x1x1x8x16x64xf32>
    %16 = vector.shape_cast %15 : vector<1x1x1x8x16x64xf32> to vector<8x16x64xf32>
    %cst_30 = arith.constant 0.000000e+00 : f32
    %17 = vector.broadcast %cst_30 : f32 to vector<8x16x64xf32>
    %18 = tpu.concatenate %16, %17 in 2 : vector<8x16x64xf32>, vector<8x16x64xf32> -> vector<8x16x128xf32>
    %c0_31 = arith.constant 0 : index
    %c0_32 = arith.constant 0 : index
    %c384 = arith.constant 384 : index
    %19 = vector.load %arg7[%c0_31, %c0_32, %c384] : memref<8x16x1152xf32, #tpu.memory_space<vmem>>, vector<8x16x128xf32>
    tpu.vector_store %arg7[%c0_31, %c0_32, %c384], %18 {strides = array<i32>} : memref<8x16x1152xf32, #tpu.memory_space<vmem>>, vector<8x16x128xf32>,
    %c0_33 = arith.constant 0 : index
    %c0_34 = arith.constant 0 : index
    %c0_35 = arith.constant 0 : index
    %c1_36 = arith.constant 1 : index
    %c1_37 = arith.constant 1 : index
    %c0_38 = arith.constant 0 : index
    %20 = vector.load %arg2[%c0_33, %c0_34, %c0_35, %c1_36, %c1_37, %c0_38] : memref<1x1x1x10x18x64xf32, #tpu.memory_space<vmem>>, vector<1x1x1x8x16x64xf32>
    %21 = vector.shape_cast %20 : vector<1x1x1x8x16x64xf32> to vector<8x16x64xf32>
    %cst_39 = arith.constant 0.000000e+00 : f32
    %22 = vector.broadcast %cst_39 : f32 to vector<8x16x64xf32>
    %23 = tpu.concatenate %21, %22 in 2 : vector<8x16x64xf32>, vector<8x16x64xf32> -> vector<8x16x128xf32>
    %c0_40 = arith.constant 0 : index
    %c0_41 = arith.constant 0 : index
    %c512 = arith.constant 512 : index
    %24 = vector.load %arg7[%c0_40, %c0_41, %c512] : memref<8x16x1152xf32, #tpu.memory_space<vmem>>, vector<8x16x128xf32>
    tpu.vector_store %arg7[%c0_40, %c0_41, %c512], %23 {strides = array<i32>} : memref<8x16x1152xf32, #tpu.memory_space<vmem>>, vector<8x16x128xf32>,
    %c0_42 = arith.constant 0 : index
    %c0_43 = arith.constant 0 : index
    %c0_44 = arith.constant 0 : index
    %c1_45 = arith.constant 1 : index
    %c2_46 = arith.constant 2 : index
    %c0_47 = arith.constant 0 : index
    %25 = vector.load %arg2[%c0_42, %c0_43, %c0_44, %c1_45, %c2_46, %c0_47] : memref<1x1x1x10x18x64xf32, #tpu.memory_space<vmem>>, vector<1x1x1x8x16x64xf32>
    %26 = vector.shape_cast %25 : vector<1x1x1x8x16x64xf32> to vector<8x16x64xf32>
    %cst_48 = arith.constant 0.000000e+00 : f32
    %27 = vector.broadcast %cst_48 : f32 to vector<8x16x64xf32>
    %28 = tpu.concatenate %26, %27 in 2 : vector<8x16x64xf32>, vector<8x16x64xf32> -> vector<8x16x128xf32>
    %c0_49 = arith.constant 0 : index
    %c0_50 = arith.constant 0 : index
    %c640 = arith.constant 640 : index
    %29 = vector.load %arg7[%c0_49, %c0_50, %c640] : memref<8x16x1152xf32, #tpu.memory_space<vmem>>, vector<8x16x128xf32>
    tpu.vector_store %arg7[%c0_49, %c0_50, %c640], %28 {strides = array<i32>} : memref<8x16x1152xf32, #tpu.memory_space<vmem>>, vector<8x16x128xf32>,
    %c0_51 = arith.constant 0 : index
    %c0_52 = arith.constant 0 : index
    %c0_53 = arith.constant 0 : index
    %c2_54 = arith.constant 2 : index
    %c0_55 = arith.constant 0 : index
    %c0_56 = arith.constant 0 : index
    %30 = vector.load %arg2[%c0_51, %c0_52, %c0_53, %c2_54, %c0_55, %c0_56] : memref<1x1x1x10x18x64xf32, #tpu.memory_space<vmem>>, vector<1x1x1x8x16x64xf32>
    %31 = vector.shape_cast %30 : vector<1x1x1x8x16x64xf32> to vector<8x16x64xf32>
    %cst_57 = arith.constant 0.000000e+00 : f32
    %32 = vector.broadcast %cst_57 : f32 to vector<8x16x64xf32>
    %33 = tpu.concatenate %31, %32 in 2 : vector<8x16x64xf32>, vector<8x16x64xf32> -> vector<8x16x128xf32>
    %c0_58 = arith.constant 0 : index
    %c0_59 = arith.constant 0 : index
    %c768 = arith.constant 768 : index
    %34 = vector.load %arg7[%c0_58, %c0_59, %c768] : memref<8x16x1152xf32, #tpu.memory_space<vmem>>, vector<8x16x128xf32>
    tpu.vector_store %arg7[%c0_58, %c0_59, %c768], %33 {strides = array<i32>} : memref<8x16x1152xf32, #tpu.memory_space<vmem>>, vector<8x16x128xf32>,
    %c0_60 = arith.constant 0 : index
    %c0_61 = arith.constant 0 : index
    %c0_62 = arith.constant 0 : index
    %c2_63 = arith.constant 2 : index
    %c1_64 = arith.constant 1 : index
    %c0_65 = arith.constant 0 : index
    %35 = vector.load %arg2[%c0_60, %c0_61, %c0_62, %c2_63, %c1_64, %c0_65] : memref<1x1x1x10x18x64xf32, #tpu.memory_space<vmem>>, vector<1x1x1x8x16x64xf32>
    %36 = vector.shape_cast %35 : vector<1x1x1x8x16x64xf32> to vector<8x16x64xf32>
    %cst_66 = arith.constant 0.000000e+00 : f32
    %37 = vector.broadcast %cst_66 : f32 to vector<8x16x64xf32>
    %38 = tpu.concatenate %36, %37 in 2 : vector<8x16x64xf32>, vector<8x16x64xf32> -> vector<8x16x128xf32>
    %c0_67 = arith.constant 0 : index
    %c0_68 = arith.constant 0 : index
    %c896 = arith.constant 896 : index
    %39 = vector.load %arg7[%c0_67, %c0_68, %c896] : memref<8x16x1152xf32, #tpu.memory_space<vmem>>, vector<8x16x128xf32>
    tpu.vector_store %arg7[%c0_67, %c0_68, %c896], %38 {strides = array<i32>} : memref<8x16x1152xf32, #tpu.memory_space<vmem>>, vector<8x16x128xf32>,
    %c0_69 = arith.constant 0 : index
    %c0_70 = arith.constant 0 : index
    %c0_71 = arith.constant 0 : index
    %c2_72 = arith.constant 2 : index
    %c2_73 = arith.constant 2 : index
    %c0_74 = arith.constant 0 : index
    %40 = vector.load %arg2[%c0_69, %c0_70, %c0_71, %c2_72, %c2_73, %c0_74] : memref<1x1x1x10x18x64xf32, #tpu.memory_space<vmem>>, vector<1x1x1x8x16x64xf32>
    %41 = vector.shape_cast %40 : vector<1x1x1x8x16x64xf32> to vector<8x16x64xf32>
    %cst_75 = arith.constant 0.000000e+00 : f32
    %42 = vector.broadcast %cst_75 : f32 to vector<8x16x64xf32>
    %43 = tpu.concatenate %41, %42 in 2 : vector<8x16x64xf32>, vector<8x16x64xf32> -> vector<8x16x128xf32>
    %c0_76 = arith.constant 0 : index
    %c0_77 = arith.constant 0 : index
    %c1024 = arith.constant 1024 : index
    %44 = vector.load %arg7[%c0_76, %c0_77, %c1024] : memref<8x16x1152xf32, #tpu.memory_space<vmem>>, vector<8x16x128xf32>
    tpu.vector_store %arg7[%c0_76, %c0_77, %c1024], %43 {strides = array<i32>} : memref<8x16x1152xf32, #tpu.memory_space<vmem>>, vector<8x16x128xf32>,
    %c0_78 = arith.constant 0 : index
    %c0_79 = arith.constant 0 : index
    %c0_80 = arith.constant 0 : index
    %45 = vector.load %arg7[%c0_78, %c0_79, %c0_80] : memref<8x16x1152xf32, #tpu.memory_space<vmem>>, vector<8x16x1152xf32>
    %46 = vector.shape_cast %45 : vector<8x16x1152xf32> to vector<128x1152xf32>
    %c0_81 = arith.constant 0 : index
    %c0_82 = arith.constant 0 : index
    %47 = vector.load %arg3[%c0_81, %c0_82] : memref<1152x128xf32, #tpu.memory_space<vmem>>, vector<1152x128xf32>
    %cst_83 = arith.constant dense<0.000000e+00> : vector<128x128xf32>
    %48 = tpu.matmul %46, %47, %cst_83 {dimension_numbers = #tpu.dot_dimension_numbers<[1], [0], [0], [1], [0, 0, 1, 1], [], []>} : vector<128x1152xf32>, vector<1152x128xf32>, vector<128x128xf32> -> vector<128x128xf32>
    %c0_84 = arith.constant 0 : index
    %c0_85 = arith.constant 0 : index
    %49 = vector.load %arg4[%c0_84, %c0_85] : memref<1x128xf32, #tpu.memory_space<vmem>>, vector<1x128xf32>
    %50 = vector.broadcast %49 : vector<1x128xf32> to vector<128x128xf32>
    %51 = arith.mulf %48, %50 : vector<128x128xf32>
    %c0_86 = arith.constant 0 : index
    %c0_87 = arith.constant 0 : index
    %52 = vector.load %arg5[%c0_86, %c0_87] : memref<1x128xf32, #tpu.memory_space<vmem>>, vector<1x128xf32>
    %53 = vector.broadcast %52 : vector<1x128xf32> to vector<128x128xf32>
    %54 = arith.addf %51, %53 : vector<128x128xf32>
    %cst_88 = arith.constant 0.000000e+00 : f32
    %55 = vector.broadcast %cst_88 : f32 to vector<128x128xf32>
    %56 = arith.cmpf oge, %54, %55 : vector<128x128xf32>
    %cst_89 = arith.constant 1.000000e-01 : f32
    %57 = vector.broadcast %cst_89 : f32 to vector<128x128xf32>
    %58 = arith.mulf %54, %57 : vector<128x128xf32>
    %59 = arith.select %56, %54, %58 : vector<128x128xi1>, vector<128x128xf32>
    %60 = vector.shape_cast %59 : vector<128x128xf32> to vector<8x16x128xf32>
    %c0_90 = arith.constant 0 : index
    %c0_91 = arith.constant 0 : index
    %c0_92 = arith.constant 0 : index
    %c0_93 = arith.constant 0 : index
    %c0_94 = arith.constant 0 : index
    %61 = vector.load %arg6[%c0_90, %c0_91, %c0_92, %c0_93, %c0_94] : memref<1x1x8x16x128xf32, #tpu.memory_space<vmem>>, vector<1x1x8x16x128xf32>
    %62 = vector.shape_cast %61 : vector<1x1x8x16x128xf32> to vector<8x16x128xf32>
    %63 = vector.shape_cast %60 : vector<8x16x128xf32> to vector<1x1x8x16x128xf32>
    tpu.vector_store %arg6[%c0_90, %c0_91, %c0_92, %c0_93, %c0_94], %63 {strides = array<i32>} : memref<1x1x8x16x128xf32, #tpu.memory_space<vmem>>, vector<1x1x8x16x128xf32>,
    return
  }
  func.func @transform_0(%arg0: i32, %arg1: i32) -> (i32, i32, i32, i32, i32, i32) {
    %c0_i32 = arith.constant 0 : i32
    %c0_i32_0 = arith.constant 0 : i32
    %c0_i32_1 = arith.constant 0 : i32
    %c0_i32_2 = arith.constant 0 : i32
    %c0_i32_3 = arith.constant 0 : i32
    return %arg0, %arg1, %c0_i32, %c0_i32_0, %c0_i32_1, %c0_i32_2 : i32, i32, i32, i32, i32, i32
  }
  func.func @transform_1(%arg0: i32, %arg1: i32) -> (i32, i32) {
    %c0_i32 = arith.constant 0 : i32
    %c0_i32_0 = arith.constant 0 : i32
    %c0_i32_1 = arith.constant 0 : i32
    return %c0_i32, %c0_i32_0 : i32, i32
  }
  func.func @transform_2(%arg0: i32, %arg1: i32) -> (i32, i32) {
    %c0_i32 = arith.constant 0 : i32
    %c0_i32_0 = arith.constant 0 : i32
    %c0_i32_1 = arith.constant 0 : i32
    return %c0_i32, %c0_i32_0 : i32, i32
  }
  func.func @transform_3(%arg0: i32, %arg1: i32) -> (i32, i32) {
    %c0_i32 = arith.constant 0 : i32
    %c0_i32_0 = arith.constant 0 : i32
    %c0_i32_1 = arith.constant 0 : i32
    return %c0_i32, %c0_i32_0 : i32, i32
  }
  func.func @transform_4(%arg0: i32, %arg1: i32) -> (i32, i32, i32, i32, i32) {
    %c0_i32 = arith.constant 0 : i32
    %c0_i32_0 = arith.constant 0 : i32
    %c0_i32_1 = arith.constant 0 : i32
    %c0_i32_2 = arith.constant 0 : i32
    return %arg0, %arg1, %c0_i32, %c0_i32_0, %c0_i32_1 : i32, i32, i32, i32, i32
  }
}

module attributes {stable_mosaic.version = 11 : i64} {
  func.func @_conv_bn_lrelu_kernel(%arg0: i32, %arg1: i32, %arg2: memref<1x1x4x9x9x128xf32, #tpu.memory_space<vmem>>, %arg3: memref<1152x128xf32, #tpu.memory_space<vmem>>, %arg4: memref<1x128xf32, #tpu.memory_space<vmem>>, %arg5: memref<1x128xf32, #tpu.memory_space<vmem>>, %arg6: memref<1x1x8x8x128xf32, #tpu.memory_space<vmem>>, %arg7: memref<8x8x1152xf32, #tpu.memory_space<vmem>>) attributes {dimension_semantics = [#tpu.dimension_semantics<parallel>, #tpu.dimension_semantics<parallel>], iteration_bounds = array<i64: 2, 1>, scalar_prefetch = 0 : i64, scratch_operands = 1 : i64, tpu.core_type = #tpu.core_type<tc>, window_params = [{transform_indices = @transform_0, window_bounds = array<i64: 1, 1, 4, 9, 9, 128>}, {pipeline_mode = #tpu.pipeline_mode<synchronous>, transform_indices = @transform_1, window_bounds = array<i64: 1152, 128>}, {pipeline_mode = #tpu.pipeline_mode<synchronous>, transform_indices = @transform_2, window_bounds = array<i64: 1, 128>}, {pipeline_mode = #tpu.pipeline_mode<synchronous>, transform_indices = @transform_3, window_bounds = array<i64: 1, 128>}, {transform_indices = @transform_4, window_bounds = array<i64: 1, 1, 8, 8, 128>}]} {
    %c0 = arith.constant 0 : index
    %c0_0 = arith.constant 0 : index
    %c0_1 = arith.constant 0 : index
    %c0_2 = arith.constant 0 : index
    %c0_3 = arith.constant 0 : index
    %c0_4 = arith.constant 0 : index
    %0 = vector.load %arg2[%c0, %c0_0, %c0_1, %c0_2, %c0_3, %c0_4] : memref<1x1x4x9x9x128xf32, #tpu.memory_space<vmem>>, vector<1x1x1x8x8x128xf32>
    %1 = vector.shape_cast %0 : vector<1x1x1x8x8x128xf32> to vector<8x8x128xf32>
    %c0_5 = arith.constant 0 : index
    %c0_6 = arith.constant 0 : index
    %c0_7 = arith.constant 0 : index
    %2 = vector.load %arg7[%c0_5, %c0_6, %c0_7] : memref<8x8x1152xf32, #tpu.memory_space<vmem>>, vector<8x8x128xf32>
    tpu.vector_store %arg7[%c0_5, %c0_6, %c0_7], %1 {strides = array<i32>} : memref<8x8x1152xf32, #tpu.memory_space<vmem>>, vector<8x8x128xf32>,
    %c0_8 = arith.constant 0 : index
    %c0_9 = arith.constant 0 : index
    %c1 = arith.constant 1 : index
    %c0_10 = arith.constant 0 : index
    %c0_11 = arith.constant 0 : index
    %c0_12 = arith.constant 0 : index
    %3 = vector.load %arg2[%c0_8, %c0_9, %c1, %c0_10, %c0_11, %c0_12] : memref<1x1x4x9x9x128xf32, #tpu.memory_space<vmem>>, vector<1x1x1x8x8x128xf32>
    %4 = vector.shape_cast %3 : vector<1x1x1x8x8x128xf32> to vector<8x8x128xf32>
    %c0_13 = arith.constant 0 : index
    %c0_14 = arith.constant 0 : index
    %c128 = arith.constant 128 : index
    %5 = vector.load %arg7[%c0_13, %c0_14, %c128] : memref<8x8x1152xf32, #tpu.memory_space<vmem>>, vector<8x8x128xf32>
    tpu.vector_store %arg7[%c0_13, %c0_14, %c128], %4 {strides = array<i32>} : memref<8x8x1152xf32, #tpu.memory_space<vmem>>, vector<8x8x128xf32>,
    %c0_15 = arith.constant 0 : index
    %c0_16 = arith.constant 0 : index
    %c0_17 = arith.constant 0 : index
    %c0_18 = arith.constant 0 : index
    %c1_19 = arith.constant 1 : index
    %c0_20 = arith.constant 0 : index
    %6 = vector.load %arg2[%c0_15, %c0_16, %c0_17, %c0_18, %c1_19, %c0_20] : memref<1x1x4x9x9x128xf32, #tpu.memory_space<vmem>>, vector<1x1x1x8x8x128xf32>
    %7 = vector.shape_cast %6 : vector<1x1x1x8x8x128xf32> to vector<8x8x128xf32>
    %c0_21 = arith.constant 0 : index
    %c0_22 = arith.constant 0 : index
    %c256 = arith.constant 256 : index
    %8 = vector.load %arg7[%c0_21, %c0_22, %c256] : memref<8x8x1152xf32, #tpu.memory_space<vmem>>, vector<8x8x128xf32>
    tpu.vector_store %arg7[%c0_21, %c0_22, %c256], %7 {strides = array<i32>} : memref<8x8x1152xf32, #tpu.memory_space<vmem>>, vector<8x8x128xf32>,
    %c0_23 = arith.constant 0 : index
    %c0_24 = arith.constant 0 : index
    %c2 = arith.constant 2 : index
    %c0_25 = arith.constant 0 : index
    %c0_26 = arith.constant 0 : index
    %c0_27 = arith.constant 0 : index
    %9 = vector.load %arg2[%c0_23, %c0_24, %c2, %c0_25, %c0_26, %c0_27] : memref<1x1x4x9x9x128xf32, #tpu.memory_space<vmem>>, vector<1x1x1x8x8x128xf32>
    %10 = vector.shape_cast %9 : vector<1x1x1x8x8x128xf32> to vector<8x8x128xf32>
    %c0_28 = arith.constant 0 : index
    %c0_29 = arith.constant 0 : index
    %c384 = arith.constant 384 : index
    %11 = vector.load %arg7[%c0_28, %c0_29, %c384] : memref<8x8x1152xf32, #tpu.memory_space<vmem>>, vector<8x8x128xf32>
    tpu.vector_store %arg7[%c0_28, %c0_29, %c384], %10 {strides = array<i32>} : memref<8x8x1152xf32, #tpu.memory_space<vmem>>, vector<8x8x128xf32>,
    %c0_30 = arith.constant 0 : index
    %c0_31 = arith.constant 0 : index
    %c3 = arith.constant 3 : index
    %c0_32 = arith.constant 0 : index
    %c0_33 = arith.constant 0 : index
    %c0_34 = arith.constant 0 : index
    %12 = vector.load %arg2[%c0_30, %c0_31, %c3, %c0_32, %c0_33, %c0_34] : memref<1x1x4x9x9x128xf32, #tpu.memory_space<vmem>>, vector<1x1x1x8x8x128xf32>
    %13 = vector.shape_cast %12 : vector<1x1x1x8x8x128xf32> to vector<8x8x128xf32>
    %c0_35 = arith.constant 0 : index
    %c0_36 = arith.constant 0 : index
    %c512 = arith.constant 512 : index
    %14 = vector.load %arg7[%c0_35, %c0_36, %c512] : memref<8x8x1152xf32, #tpu.memory_space<vmem>>, vector<8x8x128xf32>
    tpu.vector_store %arg7[%c0_35, %c0_36, %c512], %13 {strides = array<i32>} : memref<8x8x1152xf32, #tpu.memory_space<vmem>>, vector<8x8x128xf32>,
    %c0_37 = arith.constant 0 : index
    %c0_38 = arith.constant 0 : index
    %c2_39 = arith.constant 2 : index
    %c0_40 = arith.constant 0 : index
    %c1_41 = arith.constant 1 : index
    %c0_42 = arith.constant 0 : index
    %15 = vector.load %arg2[%c0_37, %c0_38, %c2_39, %c0_40, %c1_41, %c0_42] : memref<1x1x4x9x9x128xf32, #tpu.memory_space<vmem>>, vector<1x1x1x8x8x128xf32>
    %16 = vector.shape_cast %15 : vector<1x1x1x8x8x128xf32> to vector<8x8x128xf32>
    %c0_43 = arith.constant 0 : index
    %c0_44 = arith.constant 0 : index
    %c640 = arith.constant 640 : index
    %17 = vector.load %arg7[%c0_43, %c0_44, %c640] : memref<8x8x1152xf32, #tpu.memory_space<vmem>>, vector<8x8x128xf32>
    tpu.vector_store %arg7[%c0_43, %c0_44, %c640], %16 {strides = array<i32>} : memref<8x8x1152xf32, #tpu.memory_space<vmem>>, vector<8x8x128xf32>,
    %c0_45 = arith.constant 0 : index
    %c0_46 = arith.constant 0 : index
    %c0_47 = arith.constant 0 : index
    %c1_48 = arith.constant 1 : index
    %c0_49 = arith.constant 0 : index
    %c0_50 = arith.constant 0 : index
    %18 = vector.load %arg2[%c0_45, %c0_46, %c0_47, %c1_48, %c0_49, %c0_50] : memref<1x1x4x9x9x128xf32, #tpu.memory_space<vmem>>, vector<1x1x1x8x8x128xf32>
    %19 = vector.shape_cast %18 : vector<1x1x1x8x8x128xf32> to vector<8x8x128xf32>
    %c0_51 = arith.constant 0 : index
    %c0_52 = arith.constant 0 : index
    %c768 = arith.constant 768 : index
    %20 = vector.load %arg7[%c0_51, %c0_52, %c768] : memref<8x8x1152xf32, #tpu.memory_space<vmem>>, vector<8x8x128xf32>
    tpu.vector_store %arg7[%c0_51, %c0_52, %c768], %19 {strides = array<i32>} : memref<8x8x1152xf32, #tpu.memory_space<vmem>>, vector<8x8x128xf32>,
    %c0_53 = arith.constant 0 : index
    %c0_54 = arith.constant 0 : index
    %c1_55 = arith.constant 1 : index
    %c1_56 = arith.constant 1 : index
    %c0_57 = arith.constant 0 : index
    %c0_58 = arith.constant 0 : index
    %21 = vector.load %arg2[%c0_53, %c0_54, %c1_55, %c1_56, %c0_57, %c0_58] : memref<1x1x4x9x9x128xf32, #tpu.memory_space<vmem>>, vector<1x1x1x8x8x128xf32>
    %22 = vector.shape_cast %21 : vector<1x1x1x8x8x128xf32> to vector<8x8x128xf32>
    %c0_59 = arith.constant 0 : index
    %c0_60 = arith.constant 0 : index
    %c896 = arith.constant 896 : index
    %23 = vector.load %arg7[%c0_59, %c0_60, %c896] : memref<8x8x1152xf32, #tpu.memory_space<vmem>>, vector<8x8x128xf32>
    tpu.vector_store %arg7[%c0_59, %c0_60, %c896], %22 {strides = array<i32>} : memref<8x8x1152xf32, #tpu.memory_space<vmem>>, vector<8x8x128xf32>,
    %c0_61 = arith.constant 0 : index
    %c0_62 = arith.constant 0 : index
    %c0_63 = arith.constant 0 : index
    %c1_64 = arith.constant 1 : index
    %c1_65 = arith.constant 1 : index
    %c0_66 = arith.constant 0 : index
    %24 = vector.load %arg2[%c0_61, %c0_62, %c0_63, %c1_64, %c1_65, %c0_66] : memref<1x1x4x9x9x128xf32, #tpu.memory_space<vmem>>, vector<1x1x1x8x8x128xf32>
    %25 = vector.shape_cast %24 : vector<1x1x1x8x8x128xf32> to vector<8x8x128xf32>
    %c0_67 = arith.constant 0 : index
    %c0_68 = arith.constant 0 : index
    %c1024 = arith.constant 1024 : index
    %26 = vector.load %arg7[%c0_67, %c0_68, %c1024] : memref<8x8x1152xf32, #tpu.memory_space<vmem>>, vector<8x8x128xf32>
    tpu.vector_store %arg7[%c0_67, %c0_68, %c1024], %25 {strides = array<i32>} : memref<8x8x1152xf32, #tpu.memory_space<vmem>>, vector<8x8x128xf32>,
    %c0_69 = arith.constant 0 : index
    %c0_70 = arith.constant 0 : index
    %c0_71 = arith.constant 0 : index
    %27 = vector.load %arg7[%c0_69, %c0_70, %c0_71] : memref<8x8x1152xf32, #tpu.memory_space<vmem>>, vector<8x8x1152xf32>
    %28 = vector.shape_cast %27 : vector<8x8x1152xf32> to vector<64x1152xf32>
    %c0_72 = arith.constant 0 : index
    %c0_73 = arith.constant 0 : index
    %29 = vector.load %arg3[%c0_72, %c0_73] : memref<1152x128xf32, #tpu.memory_space<vmem>>, vector<1152x128xf32>
    %cst = arith.constant dense<0.000000e+00> : vector<64x128xf32>
    %30 = tpu.matmul %28, %29, %cst {dimension_numbers = #tpu.dot_dimension_numbers<[1], [0], [0], [1], [0, 0, 1, 1], [], []>} : vector<64x1152xf32>, vector<1152x128xf32>, vector<64x128xf32> -> vector<64x128xf32>
    %c0_74 = arith.constant 0 : index
    %c0_75 = arith.constant 0 : index
    %31 = vector.load %arg4[%c0_74, %c0_75] : memref<1x128xf32, #tpu.memory_space<vmem>>, vector<1x128xf32>
    %32 = vector.broadcast %31 : vector<1x128xf32> to vector<64x128xf32>
    %33 = arith.mulf %30, %32 : vector<64x128xf32>
    %c0_76 = arith.constant 0 : index
    %c0_77 = arith.constant 0 : index
    %34 = vector.load %arg5[%c0_76, %c0_77] : memref<1x128xf32, #tpu.memory_space<vmem>>, vector<1x128xf32>
    %35 = vector.broadcast %34 : vector<1x128xf32> to vector<64x128xf32>
    %36 = arith.addf %33, %35 : vector<64x128xf32>
    %cst_78 = arith.constant 0.000000e+00 : f32
    %37 = vector.broadcast %cst_78 : f32 to vector<64x128xf32>
    %38 = arith.cmpf oge, %36, %37 : vector<64x128xf32>
    %cst_79 = arith.constant 1.000000e-01 : f32
    %39 = vector.broadcast %cst_79 : f32 to vector<64x128xf32>
    %40 = arith.mulf %36, %39 : vector<64x128xf32>
    %41 = arith.select %38, %36, %40 : vector<64x128xi1>, vector<64x128xf32>
    %42 = vector.shape_cast %41 : vector<64x128xf32> to vector<8x8x128xf32>
    %c0_80 = arith.constant 0 : index
    %c0_81 = arith.constant 0 : index
    %c0_82 = arith.constant 0 : index
    %c0_83 = arith.constant 0 : index
    %c0_84 = arith.constant 0 : index
    %43 = vector.load %arg6[%c0_80, %c0_81, %c0_82, %c0_83, %c0_84] : memref<1x1x8x8x128xf32, #tpu.memory_space<vmem>>, vector<1x1x8x8x128xf32>
    %44 = vector.shape_cast %43 : vector<1x1x8x8x128xf32> to vector<8x8x128xf32>
    %45 = vector.shape_cast %42 : vector<8x8x128xf32> to vector<1x1x8x8x128xf32>
    tpu.vector_store %arg6[%c0_80, %c0_81, %c0_82, %c0_83, %c0_84], %45 {strides = array<i32>} : memref<1x1x8x8x128xf32, #tpu.memory_space<vmem>>, vector<1x1x8x8x128xf32>,
    return
  }
  func.func @transform_0(%arg0: i32, %arg1: i32) -> (i32, i32, i32, i32, i32, i32) {
    %c0_i32 = arith.constant 0 : i32
    %c0_i32_0 = arith.constant 0 : i32
    %c0_i32_1 = arith.constant 0 : i32
    %c0_i32_2 = arith.constant 0 : i32
    %c0_i32_3 = arith.constant 0 : i32
    return %arg0, %arg1, %c0_i32, %c0_i32_0, %c0_i32_1, %c0_i32_2 : i32, i32, i32, i32, i32, i32
  }
  func.func @transform_1(%arg0: i32, %arg1: i32) -> (i32, i32) {
    %c0_i32 = arith.constant 0 : i32
    %c0_i32_0 = arith.constant 0 : i32
    %c0_i32_1 = arith.constant 0 : i32
    return %c0_i32, %c0_i32_0 : i32, i32
  }
  func.func @transform_2(%arg0: i32, %arg1: i32) -> (i32, i32) {
    %c0_i32 = arith.constant 0 : i32
    %c0_i32_0 = arith.constant 0 : i32
    %c0_i32_1 = arith.constant 0 : i32
    return %c0_i32, %c0_i32_0 : i32, i32
  }
  func.func @transform_3(%arg0: i32, %arg1: i32) -> (i32, i32) {
    %c0_i32 = arith.constant 0 : i32
    %c0_i32_0 = arith.constant 0 : i32
    %c0_i32_1 = arith.constant 0 : i32
    return %c0_i32, %c0_i32_0 : i32, i32
  }
  func.func @transform_4(%arg0: i32, %arg1: i32) -> (i32, i32, i32, i32, i32) {
    %c0_i32 = arith.constant 0 : i32
    %c0_i32_0 = arith.constant 0 : i32
    %c0_i32_1 = arith.constant 0 : i32
    %c0_i32_2 = arith.constant 0 : i32
    return %arg0, %arg1, %c0_i32, %c0_i32_0, %c0_i32_1 : i32, i32, i32, i32, i32
  }
}

module attributes {stable_mosaic.version = 11 : i64} {
  func.func @_conv_bn_lrelu_kernel(%arg0: i32, %arg1: i32, %arg2: memref<1x1x4x5x5x128xf32, #tpu.memory_space<vmem>>, %arg3: memref<1152x256xf32, #tpu.memory_space<vmem>>, %arg4: memref<1x256xf32, #tpu.memory_space<vmem>>, %arg5: memref<1x256xf32, #tpu.memory_space<vmem>>, %arg6: memref<1x1x4x4x256xf32, #tpu.memory_space<vmem>>, %arg7: memref<4x4x1152xf32, #tpu.memory_space<vmem>>) attributes {dimension_semantics = [#tpu.dimension_semantics<parallel>, #tpu.dimension_semantics<parallel>], iteration_bounds = array<i64: 2, 1>, scalar_prefetch = 0 : i64, scratch_operands = 1 : i64, tpu.core_type = #tpu.core_type<tc>, window_params = [{transform_indices = @transform_0, window_bounds = array<i64: 1, 1, 4, 5, 5, 128>}, {pipeline_mode = #tpu.pipeline_mode<synchronous>, transform_indices = @transform_1, window_bounds = array<i64: 1152, 256>}, {pipeline_mode = #tpu.pipeline_mode<synchronous>, transform_indices = @transform_2, window_bounds = array<i64: 1, 256>}, {pipeline_mode = #tpu.pipeline_mode<synchronous>, transform_indices = @transform_3, window_bounds = array<i64: 1, 256>}, {transform_indices = @transform_4, window_bounds = array<i64: 1, 1, 4, 4, 256>}]} {
    %c0 = arith.constant 0 : index
    %c0_0 = arith.constant 0 : index
    %c0_1 = arith.constant 0 : index
    %c0_2 = arith.constant 0 : index
    %c0_3 = arith.constant 0 : index
    %c0_4 = arith.constant 0 : index
    %0 = vector.load %arg2[%c0, %c0_0, %c0_1, %c0_2, %c0_3, %c0_4] : memref<1x1x4x5x5x128xf32, #tpu.memory_space<vmem>>, vector<1x1x1x4x4x128xf32>
    %1 = vector.shape_cast %0 : vector<1x1x1x4x4x128xf32> to vector<4x4x128xf32>
    %c0_5 = arith.constant 0 : index
    %c0_6 = arith.constant 0 : index
    %c0_7 = arith.constant 0 : index
    %2 = vector.load %arg7[%c0_5, %c0_6, %c0_7] : memref<4x4x1152xf32, #tpu.memory_space<vmem>>, vector<4x4x128xf32>
    tpu.vector_store %arg7[%c0_5, %c0_6, %c0_7], %1 {strides = array<i32>} : memref<4x4x1152xf32, #tpu.memory_space<vmem>>, vector<4x4x128xf32>,
    %c0_8 = arith.constant 0 : index
    %c0_9 = arith.constant 0 : index
    %c1 = arith.constant 1 : index
    %c0_10 = arith.constant 0 : index
    %c0_11 = arith.constant 0 : index
    %c0_12 = arith.constant 0 : index
    %3 = vector.load %arg2[%c0_8, %c0_9, %c1, %c0_10, %c0_11, %c0_12] : memref<1x1x4x5x5x128xf32, #tpu.memory_space<vmem>>, vector<1x1x1x4x4x128xf32>
    %4 = vector.shape_cast %3 : vector<1x1x1x4x4x128xf32> to vector<4x4x128xf32>
    %c0_13 = arith.constant 0 : index
    %c0_14 = arith.constant 0 : index
    %c128 = arith.constant 128 : index
    %5 = vector.load %arg7[%c0_13, %c0_14, %c128] : memref<4x4x1152xf32, #tpu.memory_space<vmem>>, vector<4x4x128xf32>
    tpu.vector_store %arg7[%c0_13, %c0_14, %c128], %4 {strides = array<i32>} : memref<4x4x1152xf32, #tpu.memory_space<vmem>>, vector<4x4x128xf32>,
    %c0_15 = arith.constant 0 : index
    %c0_16 = arith.constant 0 : index
    %c0_17 = arith.constant 0 : index
    %c0_18 = arith.constant 0 : index
    %c1_19 = arith.constant 1 : index
    %c0_20 = arith.constant 0 : index
    %6 = vector.load %arg2[%c0_15, %c0_16, %c0_17, %c0_18, %c1_19, %c0_20] : memref<1x1x4x5x5x128xf32, #tpu.memory_space<vmem>>, vector<1x1x1x4x4x128xf32>
    %7 = vector.shape_cast %6 : vector<1x1x1x4x4x128xf32> to vector<4x4x128xf32>
    %c0_21 = arith.constant 0 : index
    %c0_22 = arith.constant 0 : index
    %c256 = arith.constant 256 : index
    %8 = vector.load %arg7[%c0_21, %c0_22, %c256] : memref<4x4x1152xf32, #tpu.memory_space<vmem>>, vector<4x4x128xf32>
    tpu.vector_store %arg7[%c0_21, %c0_22, %c256], %7 {strides = array<i32>} : memref<4x4x1152xf32, #tpu.memory_space<vmem>>, vector<4x4x128xf32>,
    %c0_23 = arith.constant 0 : index
    %c0_24 = arith.constant 0 : index
    %c2 = arith.constant 2 : index
    %c0_25 = arith.constant 0 : index
    %c0_26 = arith.constant 0 : index
    %c0_27 = arith.constant 0 : index
    %9 = vector.load %arg2[%c0_23, %c0_24, %c2, %c0_25, %c0_26, %c0_27] : memref<1x1x4x5x5x128xf32, #tpu.memory_space<vmem>>, vector<1x1x1x4x4x128xf32>
    %10 = vector.shape_cast %9 : vector<1x1x1x4x4x128xf32> to vector<4x4x128xf32>
    %c0_28 = arith.constant 0 : index
    %c0_29 = arith.constant 0 : index
    %c384 = arith.constant 384 : index
    %11 = vector.load %arg7[%c0_28, %c0_29, %c384] : memref<4x4x1152xf32, #tpu.memory_space<vmem>>, vector<4x4x128xf32>
    tpu.vector_store %arg7[%c0_28, %c0_29, %c384], %10 {strides = array<i32>} : memref<4x4x1152xf32, #tpu.memory_space<vmem>>, vector<4x4x128xf32>,
    %c0_30 = arith.constant 0 : index
    %c0_31 = arith.constant 0 : index
    %c3 = arith.constant 3 : index
    %c0_32 = arith.constant 0 : index
    %c0_33 = arith.constant 0 : index
    %c0_34 = arith.constant 0 : index
    %12 = vector.load %arg2[%c0_30, %c0_31, %c3, %c0_32, %c0_33, %c0_34] : memref<1x1x4x5x5x128xf32, #tpu.memory_space<vmem>>, vector<1x1x1x4x4x128xf32>
    %13 = vector.shape_cast %12 : vector<1x1x1x4x4x128xf32> to vector<4x4x128xf32>
    %c0_35 = arith.constant 0 : index
    %c0_36 = arith.constant 0 : index
    %c512 = arith.constant 512 : index
    %14 = vector.load %arg7[%c0_35, %c0_36, %c512] : memref<4x4x1152xf32, #tpu.memory_space<vmem>>, vector<4x4x128xf32>
    tpu.vector_store %arg7[%c0_35, %c0_36, %c512], %13 {strides = array<i32>} : memref<4x4x1152xf32, #tpu.memory_space<vmem>>, vector<4x4x128xf32>,
    %c0_37 = arith.constant 0 : index
    %c0_38 = arith.constant 0 : index
    %c2_39 = arith.constant 2 : index
    %c0_40 = arith.constant 0 : index
    %c1_41 = arith.constant 1 : index
    %c0_42 = arith.constant 0 : index
    %15 = vector.load %arg2[%c0_37, %c0_38, %c2_39, %c0_40, %c1_41, %c0_42] : memref<1x1x4x5x5x128xf32, #tpu.memory_space<vmem>>, vector<1x1x1x4x4x128xf32>
    %16 = vector.shape_cast %15 : vector<1x1x1x4x4x128xf32> to vector<4x4x128xf32>
    %c0_43 = arith.constant 0 : index
    %c0_44 = arith.constant 0 : index
    %c640 = arith.constant 640 : index
    %17 = vector.load %arg7[%c0_43, %c0_44, %c640] : memref<4x4x1152xf32, #tpu.memory_space<vmem>>, vector<4x4x128xf32>
    tpu.vector_store %arg7[%c0_43, %c0_44, %c640], %16 {strides = array<i32>} : memref<4x4x1152xf32, #tpu.memory_space<vmem>>, vector<4x4x128xf32>,
    %c0_45 = arith.constant 0 : index
    %c0_46 = arith.constant 0 : index
    %c0_47 = arith.constant 0 : index
    %c1_48 = arith.constant 1 : index
    %c0_49 = arith.constant 0 : index
    %c0_50 = arith.constant 0 : index
    %18 = vector.load %arg2[%c0_45, %c0_46, %c0_47, %c1_48, %c0_49, %c0_50] : memref<1x1x4x5x5x128xf32, #tpu.memory_space<vmem>>, vector<1x1x1x4x4x128xf32>
    %19 = vector.shape_cast %18 : vector<1x1x1x4x4x128xf32> to vector<4x4x128xf32>
    %c0_51 = arith.constant 0 : index
    %c0_52 = arith.constant 0 : index
    %c768 = arith.constant 768 : index
    %20 = vector.load %arg7[%c0_51, %c0_52, %c768] : memref<4x4x1152xf32, #tpu.memory_space<vmem>>, vector<4x4x128xf32>
    tpu.vector_store %arg7[%c0_51, %c0_52, %c768], %19 {strides = array<i32>} : memref<4x4x1152xf32, #tpu.memory_space<vmem>>, vector<4x4x128xf32>,
    %c0_53 = arith.constant 0 : index
    %c0_54 = arith.constant 0 : index
    %c1_55 = arith.constant 1 : index
    %c1_56 = arith.constant 1 : index
    %c0_57 = arith.constant 0 : index
    %c0_58 = arith.constant 0 : index
    %21 = vector.load %arg2[%c0_53, %c0_54, %c1_55, %c1_56, %c0_57, %c0_58] : memref<1x1x4x5x5x128xf32, #tpu.memory_space<vmem>>, vector<1x1x1x4x4x128xf32>
    %22 = vector.shape_cast %21 : vector<1x1x1x4x4x128xf32> to vector<4x4x128xf32>
    %c0_59 = arith.constant 0 : index
    %c0_60 = arith.constant 0 : index
    %c896 = arith.constant 896 : index
    %23 = vector.load %arg7[%c0_59, %c0_60, %c896] : memref<4x4x1152xf32, #tpu.memory_space<vmem>>, vector<4x4x128xf32>
    tpu.vector_store %arg7[%c0_59, %c0_60, %c896], %22 {strides = array<i32>} : memref<4x4x1152xf32, #tpu.memory_space<vmem>>, vector<4x4x128xf32>,
    %c0_61 = arith.constant 0 : index
    %c0_62 = arith.constant 0 : index
    %c0_63 = arith.constant 0 : index
    %c1_64 = arith.constant 1 : index
    %c1_65 = arith.constant 1 : index
    %c0_66 = arith.constant 0 : index
    %24 = vector.load %arg2[%c0_61, %c0_62, %c0_63, %c1_64, %c1_65, %c0_66] : memref<1x1x4x5x5x128xf32, #tpu.memory_space<vmem>>, vector<1x1x1x4x4x128xf32>
    %25 = vector.shape_cast %24 : vector<1x1x1x4x4x128xf32> to vector<4x4x128xf32>
    %c0_67 = arith.constant 0 : index
    %c0_68 = arith.constant 0 : index
    %c1024 = arith.constant 1024 : index
    %26 = vector.load %arg7[%c0_67, %c0_68, %c1024] : memref<4x4x1152xf32, #tpu.memory_space<vmem>>, vector<4x4x128xf32>
    tpu.vector_store %arg7[%c0_67, %c0_68, %c1024], %25 {strides = array<i32>} : memref<4x4x1152xf32, #tpu.memory_space<vmem>>, vector<4x4x128xf32>,
    %c0_69 = arith.constant 0 : index
    %c0_70 = arith.constant 0 : index
    %c0_71 = arith.constant 0 : index
    %27 = vector.load %arg7[%c0_69, %c0_70, %c0_71] : memref<4x4x1152xf32, #tpu.memory_space<vmem>>, vector<4x4x1152xf32>
    %28 = vector.shape_cast %27 : vector<4x4x1152xf32> to vector<16x1152xf32>
    %c0_72 = arith.constant 0 : index
    %c0_73 = arith.constant 0 : index
    %29 = vector.load %arg3[%c0_72, %c0_73] : memref<1152x256xf32, #tpu.memory_space<vmem>>, vector<1152x256xf32>
    %cst = arith.constant dense<0.000000e+00> : vector<16x256xf32>
    %30 = tpu.matmul %28, %29, %cst {dimension_numbers = #tpu.dot_dimension_numbers<[1], [0], [0], [1], [0, 0, 1, 1], [], []>} : vector<16x1152xf32>, vector<1152x256xf32>, vector<16x256xf32> -> vector<16x256xf32>
    %c0_74 = arith.constant 0 : index
    %c0_75 = arith.constant 0 : index
    %31 = vector.load %arg4[%c0_74, %c0_75] : memref<1x256xf32, #tpu.memory_space<vmem>>, vector<1x256xf32>
    %32 = vector.broadcast %31 : vector<1x256xf32> to vector<16x256xf32>
    %33 = arith.mulf %30, %32 : vector<16x256xf32>
    %c0_76 = arith.constant 0 : index
    %c0_77 = arith.constant 0 : index
    %34 = vector.load %arg5[%c0_76, %c0_77] : memref<1x256xf32, #tpu.memory_space<vmem>>, vector<1x256xf32>
    %35 = vector.broadcast %34 : vector<1x256xf32> to vector<16x256xf32>
    %36 = arith.addf %33, %35 : vector<16x256xf32>
    %cst_78 = arith.constant 0.000000e+00 : f32
    %37 = vector.broadcast %cst_78 : f32 to vector<16x256xf32>
    %38 = arith.cmpf oge, %36, %37 : vector<16x256xf32>
    %cst_79 = arith.constant 1.000000e-01 : f32
    %39 = vector.broadcast %cst_79 : f32 to vector<16x256xf32>
    %40 = arith.mulf %36, %39 : vector<16x256xf32>
    %41 = arith.select %38, %36, %40 : vector<16x256xi1>, vector<16x256xf32>
    %42 = vector.shape_cast %41 : vector<16x256xf32> to vector<4x4x256xf32>
    %c0_80 = arith.constant 0 : index
    %c0_81 = arith.constant 0 : index
    %c0_82 = arith.constant 0 : index
    %c0_83 = arith.constant 0 : index
    %c0_84 = arith.constant 0 : index
    %43 = vector.load %arg6[%c0_80, %c0_81, %c0_82, %c0_83, %c0_84] : memref<1x1x4x4x256xf32, #tpu.memory_space<vmem>>, vector<1x1x4x4x256xf32>
    %44 = vector.shape_cast %43 : vector<1x1x4x4x256xf32> to vector<4x4x256xf32>
    %45 = vector.shape_cast %42 : vector<4x4x256xf32> to vector<1x1x4x4x256xf32>
    tpu.vector_store %arg6[%c0_80, %c0_81, %c0_82, %c0_83, %c0_84], %45 {strides = array<i32>} : memref<1x1x4x4x256xf32, #tpu.memory_space<vmem>>, vector<1x1x4x4x256xf32>,
    return
  }
  func.func @transform_0(%arg0: i32, %arg1: i32) -> (i32, i32, i32, i32, i32, i32) {
    %c0_i32 = arith.constant 0 : i32
    %c0_i32_0 = arith.constant 0 : i32
    %c0_i32_1 = arith.constant 0 : i32
    %c0_i32_2 = arith.constant 0 : i32
    %c0_i32_3 = arith.constant 0 : i32
    return %arg0, %arg1, %c0_i32, %c0_i32_0, %c0_i32_1, %c0_i32_2 : i32, i32, i32, i32, i32, i32
  }
  func.func @transform_1(%arg0: i32, %arg1: i32) -> (i32, i32) {
    %c0_i32 = arith.constant 0 : i32
    %c0_i32_0 = arith.constant 0 : i32
    %c0_i32_1 = arith.constant 0 : i32
    return %c0_i32, %c0_i32_0 : i32, i32
  }
  func.func @transform_2(%arg0: i32, %arg1: i32) -> (i32, i32) {
    %c0_i32 = arith.constant 0 : i32
    %c0_i32_0 = arith.constant 0 : i32
    %c0_i32_1 = arith.constant 0 : i32
    return %c0_i32, %c0_i32_0 : i32, i32
  }
  func.func @transform_3(%arg0: i32, %arg1: i32) -> (i32, i32) {
    %c0_i32 = arith.constant 0 : i32
    %c0_i32_0 = arith.constant 0 : i32
    %c0_i32_1 = arith.constant 0 : i32
    return %c0_i32, %c0_i32_0 : i32, i32
  }
  func.func @transform_4(%arg0: i32, %arg1: i32) -> (i32, i32, i32, i32, i32) {
    %c0_i32 = arith.constant 0 : i32
    %c0_i32_0 = arith.constant 0 : i32
    %c0_i32_1 = arith.constant 0 : i32
    %c0_i32_2 = arith.constant 0 : i32
    return %arg0, %arg1, %c0_i32, %c0_i32_0, %c0_i32_1 : i32, i32, i32, i32, i32
  }
}

module attributes {stable_mosaic.version = 11 : i64} {
  func.func @_conv_bn_lrelu_kernel(%arg0: i32, %arg1: i32, %arg2: memref<1x1x1x6x6x256xf32, #tpu.memory_space<vmem>>, %arg3: memref<2304x128xf32, #tpu.memory_space<vmem>>, %arg4: memref<1x128xf32, #tpu.memory_space<vmem>>, %arg5: memref<1x128xf32, #tpu.memory_space<vmem>>, %arg6: memref<1x1x4x4x128xf32, #tpu.memory_space<vmem>>, %arg7: memref<4x4x2304xf32, #tpu.memory_space<vmem>>) attributes {dimension_semantics = [#tpu.dimension_semantics<parallel>, #tpu.dimension_semantics<parallel>], iteration_bounds = array<i64: 2, 1>, scalar_prefetch = 0 : i64, scratch_operands = 1 : i64, tpu.core_type = #tpu.core_type<tc>, window_params = [{transform_indices = @transform_0, window_bounds = array<i64: 1, 1, 1, 6, 6, 256>}, {pipeline_mode = #tpu.pipeline_mode<synchronous>, transform_indices = @transform_1, window_bounds = array<i64: 2304, 128>}, {pipeline_mode = #tpu.pipeline_mode<synchronous>, transform_indices = @transform_2, window_bounds = array<i64: 1, 128>}, {pipeline_mode = #tpu.pipeline_mode<synchronous>, transform_indices = @transform_3, window_bounds = array<i64: 1, 128>}, {transform_indices = @transform_4, window_bounds = array<i64: 1, 1, 4, 4, 128>}]} {
    %c0 = arith.constant 0 : index
    %c0_0 = arith.constant 0 : index
    %c0_1 = arith.constant 0 : index
    %c0_2 = arith.constant 0 : index
    %c0_3 = arith.constant 0 : index
    %c0_4 = arith.constant 0 : index
    %0 = vector.load %arg2[%c0, %c0_0, %c0_1, %c0_2, %c0_3, %c0_4] : memref<1x1x1x6x6x256xf32, #tpu.memory_space<vmem>>, vector<1x1x1x4x4x256xf32>
    %1 = vector.shape_cast %0 : vector<1x1x1x4x4x256xf32> to vector<4x4x256xf32>
    %c0_5 = arith.constant 0 : index
    %c0_6 = arith.constant 0 : index
    %c0_7 = arith.constant 0 : index
    %2 = vector.load %arg7[%c0_5, %c0_6, %c0_7] : memref<4x4x2304xf32, #tpu.memory_space<vmem>>, vector<4x4x256xf32>
    tpu.vector_store %arg7[%c0_5, %c0_6, %c0_7], %1 {strides = array<i32>} : memref<4x4x2304xf32, #tpu.memory_space<vmem>>, vector<4x4x256xf32>,
    %c0_8 = arith.constant 0 : index
    %c0_9 = arith.constant 0 : index
    %c0_10 = arith.constant 0 : index
    %c0_11 = arith.constant 0 : index
    %c1 = arith.constant 1 : index
    %c0_12 = arith.constant 0 : index
    %3 = vector.load %arg2[%c0_8, %c0_9, %c0_10, %c0_11, %c1, %c0_12] : memref<1x1x1x6x6x256xf32, #tpu.memory_space<vmem>>, vector<1x1x1x4x4x256xf32>
    %4 = vector.shape_cast %3 : vector<1x1x1x4x4x256xf32> to vector<4x4x256xf32>
    %c0_13 = arith.constant 0 : index
    %c0_14 = arith.constant 0 : index
    %c256 = arith.constant 256 : index
    %5 = vector.load %arg7[%c0_13, %c0_14, %c256] : memref<4x4x2304xf32, #tpu.memory_space<vmem>>, vector<4x4x256xf32>
    tpu.vector_store %arg7[%c0_13, %c0_14, %c256], %4 {strides = array<i32>} : memref<4x4x2304xf32, #tpu.memory_space<vmem>>, vector<4x4x256xf32>,
    %c0_15 = arith.constant 0 : index
    %c0_16 = arith.constant 0 : index
    %c0_17 = arith.constant 0 : index
    %c0_18 = arith.constant 0 : index
    %c2 = arith.constant 2 : index
    %c0_19 = arith.constant 0 : index
    %6 = vector.load %arg2[%c0_15, %c0_16, %c0_17, %c0_18, %c2, %c0_19] : memref<1x1x1x6x6x256xf32, #tpu.memory_space<vmem>>, vector<1x1x1x4x4x256xf32>
    %7 = vector.shape_cast %6 : vector<1x1x1x4x4x256xf32> to vector<4x4x256xf32>
    %c0_20 = arith.constant 0 : index
    %c0_21 = arith.constant 0 : index
    %c512 = arith.constant 512 : index
    %8 = vector.load %arg7[%c0_20, %c0_21, %c512] : memref<4x4x2304xf32, #tpu.memory_space<vmem>>, vector<4x4x256xf32>
    tpu.vector_store %arg7[%c0_20, %c0_21, %c512], %7 {strides = array<i32>} : memref<4x4x2304xf32, #tpu.memory_space<vmem>>, vector<4x4x256xf32>,
    %c0_22 = arith.constant 0 : index
    %c0_23 = arith.constant 0 : index
    %c0_24 = arith.constant 0 : index
    %c1_25 = arith.constant 1 : index
    %c0_26 = arith.constant 0 : index
    %c0_27 = arith.constant 0 : index
    %9 = vector.load %arg2[%c0_22, %c0_23, %c0_24, %c1_25, %c0_26, %c0_27] : memref<1x1x1x6x6x256xf32, #tpu.memory_space<vmem>>, vector<1x1x1x4x4x256xf32>
    %10 = vector.shape_cast %9 : vector<1x1x1x4x4x256xf32> to vector<4x4x256xf32>
    %c0_28 = arith.constant 0 : index
    %c0_29 = arith.constant 0 : index
    %c768 = arith.constant 768 : index
    %11 = vector.load %arg7[%c0_28, %c0_29, %c768] : memref<4x4x2304xf32, #tpu.memory_space<vmem>>, vector<4x4x256xf32>
    tpu.vector_store %arg7[%c0_28, %c0_29, %c768], %10 {strides = array<i32>} : memref<4x4x2304xf32, #tpu.memory_space<vmem>>, vector<4x4x256xf32>,
    %c0_30 = arith.constant 0 : index
    %c0_31 = arith.constant 0 : index
    %c0_32 = arith.constant 0 : index
    %c1_33 = arith.constant 1 : index
    %c1_34 = arith.constant 1 : index
    %c0_35 = arith.constant 0 : index
    %12 = vector.load %arg2[%c0_30, %c0_31, %c0_32, %c1_33, %c1_34, %c0_35] : memref<1x1x1x6x6x256xf32, #tpu.memory_space<vmem>>, vector<1x1x1x4x4x256xf32>
    %13 = vector.shape_cast %12 : vector<1x1x1x4x4x256xf32> to vector<4x4x256xf32>
    %c0_36 = arith.constant 0 : index
    %c0_37 = arith.constant 0 : index
    %c1024 = arith.constant 1024 : index
    %14 = vector.load %arg7[%c0_36, %c0_37, %c1024] : memref<4x4x2304xf32, #tpu.memory_space<vmem>>, vector<4x4x256xf32>
    tpu.vector_store %arg7[%c0_36, %c0_37, %c1024], %13 {strides = array<i32>} : memref<4x4x2304xf32, #tpu.memory_space<vmem>>, vector<4x4x256xf32>,
    %c0_38 = arith.constant 0 : index
    %c0_39 = arith.constant 0 : index
    %c0_40 = arith.constant 0 : index
    %c1_41 = arith.constant 1 : index
    %c2_42 = arith.constant 2 : index
    %c0_43 = arith.constant 0 : index
    %15 = vector.load %arg2[%c0_38, %c0_39, %c0_40, %c1_41, %c2_42, %c0_43] : memref<1x1x1x6x6x256xf32, #tpu.memory_space<vmem>>, vector<1x1x1x4x4x256xf32>
    %16 = vector.shape_cast %15 : vector<1x1x1x4x4x256xf32> to vector<4x4x256xf32>
    %c0_44 = arith.constant 0 : index
    %c0_45 = arith.constant 0 : index
    %c1280 = arith.constant 1280 : index
    %17 = vector.load %arg7[%c0_44, %c0_45, %c1280] : memref<4x4x2304xf32, #tpu.memory_space<vmem>>, vector<4x4x256xf32>
    tpu.vector_store %arg7[%c0_44, %c0_45, %c1280], %16 {strides = array<i32>} : memref<4x4x2304xf32, #tpu.memory_space<vmem>>, vector<4x4x256xf32>,
    %c0_46 = arith.constant 0 : index
    %c0_47 = arith.constant 0 : index
    %c0_48 = arith.constant 0 : index
    %c2_49 = arith.constant 2 : index
    %c0_50 = arith.constant 0 : index
    %c0_51 = arith.constant 0 : index
    %18 = vector.load %arg2[%c0_46, %c0_47, %c0_48, %c2_49, %c0_50, %c0_51] : memref<1x1x1x6x6x256xf32, #tpu.memory_space<vmem>>, vector<1x1x1x4x4x256xf32>
    %19 = vector.shape_cast %18 : vector<1x1x1x4x4x256xf32> to vector<4x4x256xf32>
    %c0_52 = arith.constant 0 : index
    %c0_53 = arith.constant 0 : index
    %c1536 = arith.constant 1536 : index
    %20 = vector.load %arg7[%c0_52, %c0_53, %c1536] : memref<4x4x2304xf32, #tpu.memory_space<vmem>>, vector<4x4x256xf32>
    tpu.vector_store %arg7[%c0_52, %c0_53, %c1536], %19 {strides = array<i32>} : memref<4x4x2304xf32, #tpu.memory_space<vmem>>, vector<4x4x256xf32>,
    %c0_54 = arith.constant 0 : index
    %c0_55 = arith.constant 0 : index
    %c0_56 = arith.constant 0 : index
    %c2_57 = arith.constant 2 : index
    %c1_58 = arith.constant 1 : index
    %c0_59 = arith.constant 0 : index
    %21 = vector.load %arg2[%c0_54, %c0_55, %c0_56, %c2_57, %c1_58, %c0_59] : memref<1x1x1x6x6x256xf32, #tpu.memory_space<vmem>>, vector<1x1x1x4x4x256xf32>
    %22 = vector.shape_cast %21 : vector<1x1x1x4x4x256xf32> to vector<4x4x256xf32>
    %c0_60 = arith.constant 0 : index
    %c0_61 = arith.constant 0 : index
    %c1792 = arith.constant 1792 : index
    %23 = vector.load %arg7[%c0_60, %c0_61, %c1792] : memref<4x4x2304xf32, #tpu.memory_space<vmem>>, vector<4x4x256xf32>
    tpu.vector_store %arg7[%c0_60, %c0_61, %c1792], %22 {strides = array<i32>} : memref<4x4x2304xf32, #tpu.memory_space<vmem>>, vector<4x4x256xf32>,
    %c0_62 = arith.constant 0 : index
    %c0_63 = arith.constant 0 : index
    %c0_64 = arith.constant 0 : index
    %c2_65 = arith.constant 2 : index
    %c2_66 = arith.constant 2 : index
    %c0_67 = arith.constant 0 : index
    %24 = vector.load %arg2[%c0_62, %c0_63, %c0_64, %c2_65, %c2_66, %c0_67] : memref<1x1x1x6x6x256xf32, #tpu.memory_space<vmem>>, vector<1x1x1x4x4x256xf32>
    %25 = vector.shape_cast %24 : vector<1x1x1x4x4x256xf32> to vector<4x4x256xf32>
    %c0_68 = arith.constant 0 : index
    %c0_69 = arith.constant 0 : index
    %c2048 = arith.constant 2048 : index
    %26 = vector.load %arg7[%c0_68, %c0_69, %c2048] : memref<4x4x2304xf32, #tpu.memory_space<vmem>>, vector<4x4x256xf32>
    tpu.vector_store %arg7[%c0_68, %c0_69, %c2048], %25 {strides = array<i32>} : memref<4x4x2304xf32, #tpu.memory_space<vmem>>, vector<4x4x256xf32>,
    %c0_70 = arith.constant 0 : index
    %c0_71 = arith.constant 0 : index
    %c0_72 = arith.constant 0 : index
    %27 = vector.load %arg7[%c0_70, %c0_71, %c0_72] : memref<4x4x2304xf32, #tpu.memory_space<vmem>>, vector<4x4x2304xf32>
    %28 = vector.shape_cast %27 : vector<4x4x2304xf32> to vector<16x2304xf32>
    %c0_73 = arith.constant 0 : index
    %c0_74 = arith.constant 0 : index
    %29 = vector.load %arg3[%c0_73, %c0_74] : memref<2304x128xf32, #tpu.memory_space<vmem>>, vector<2304x128xf32>
    %cst = arith.constant dense<0.000000e+00> : vector<16x128xf32>
    %30 = tpu.matmul %28, %29, %cst {dimension_numbers = #tpu.dot_dimension_numbers<[1], [0], [0], [1], [0, 0, 1, 1], [], []>} : vector<16x2304xf32>, vector<2304x128xf32>, vector<16x128xf32> -> vector<16x128xf32>
    %c0_75 = arith.constant 0 : index
    %c0_76 = arith.constant 0 : index
    %31 = vector.load %arg4[%c0_75, %c0_76] : memref<1x128xf32, #tpu.memory_space<vmem>>, vector<1x128xf32>
    %32 = vector.broadcast %31 : vector<1x128xf32> to vector<16x128xf32>
    %33 = arith.mulf %30, %32 : vector<16x128xf32>
    %c0_77 = arith.constant 0 : index
    %c0_78 = arith.constant 0 : index
    %34 = vector.load %arg5[%c0_77, %c0_78] : memref<1x128xf32, #tpu.memory_space<vmem>>, vector<1x128xf32>
    %35 = vector.broadcast %34 : vector<1x128xf32> to vector<16x128xf32>
    %36 = arith.addf %33, %35 : vector<16x128xf32>
    %cst_79 = arith.constant 0.000000e+00 : f32
    %37 = vector.broadcast %cst_79 : f32 to vector<16x128xf32>
    %38 = arith.cmpf oge, %36, %37 : vector<16x128xf32>
    %cst_80 = arith.constant 1.000000e-01 : f32
    %39 = vector.broadcast %cst_80 : f32 to vector<16x128xf32>
    %40 = arith.mulf %36, %39 : vector<16x128xf32>
    %41 = arith.select %38, %36, %40 : vector<16x128xi1>, vector<16x128xf32>
    %42 = vector.shape_cast %41 : vector<16x128xf32> to vector<4x4x128xf32>
    %c0_81 = arith.constant 0 : index
    %c0_82 = arith.constant 0 : index
    %c0_83 = arith.constant 0 : index
    %c0_84 = arith.constant 0 : index
    %c0_85 = arith.constant 0 : index
    %43 = vector.load %arg6[%c0_81, %c0_82, %c0_83, %c0_84, %c0_85] : memref<1x1x4x4x128xf32, #tpu.memory_space<vmem>>, vector<1x1x4x4x128xf32>
    %44 = vector.shape_cast %43 : vector<1x1x4x4x128xf32> to vector<4x4x128xf32>
    %45 = vector.shape_cast %42 : vector<4x4x128xf32> to vector<1x1x4x4x128xf32>
    tpu.vector_store %arg6[%c0_81, %c0_82, %c0_83, %c0_84, %c0_85], %45 {strides = array<i32>} : memref<1x1x4x4x128xf32, #tpu.memory_space<vmem>>, vector<1x1x4x4x128xf32>,
    return
  }
  func.func @transform_0(%arg0: i32, %arg1: i32) -> (i32, i32, i32, i32, i32, i32) {
    %c0_i32 = arith.constant 0 : i32
    %c0_i32_0 = arith.constant 0 : i32
    %c0_i32_1 = arith.constant 0 : i32
    %c0_i32_2 = arith.constant 0 : i32
    %c0_i32_3 = arith.constant 0 : i32
    return %arg0, %arg1, %c0_i32, %c0_i32_0, %c0_i32_1, %c0_i32_2 : i32, i32, i32, i32, i32, i32
  }
  func.func @transform_1(%arg0: i32, %arg1: i32) -> (i32, i32) {
    %c0_i32 = arith.constant 0 : i32
    %c0_i32_0 = arith.constant 0 : i32
    %c0_i32_1 = arith.constant 0 : i32
    return %c0_i32, %c0_i32_0 : i32, i32
  }
  func.func @transform_2(%arg0: i32, %arg1: i32) -> (i32, i32) {
    %c0_i32 = arith.constant 0 : i32
    %c0_i32_0 = arith.constant 0 : i32
    %c0_i32_1 = arith.constant 0 : i32
    return %c0_i32, %c0_i32_0 : i32, i32
  }
  func.func @transform_3(%arg0: i32, %arg1: i32) -> (i32, i32) {
    %c0_i32 = arith.constant 0 : i32
    %c0_i32_0 = arith.constant 0 : i32
    %c0_i32_1 = arith.constant 0 : i32
    return %c0_i32, %c0_i32_0 : i32, i32
  }
  func.func @transform_4(%arg0: i32, %arg1: i32) -> (i32, i32, i32, i32, i32) {
    %c0_i32 = arith.constant 0 : i32
    %c0_i32_0 = arith.constant 0 : i32
    %c0_i32_1 = arith.constant 0 : i32
    %c0_i32_2 = arith.constant 0 : i32
    return %arg0, %arg1, %c0_i32, %c0_i32_0, %c0_i32_1 : i32, i32, i32, i32, i32
  }
}

module attributes {stable_mosaic.version = 11 : i64} {
  func.func @_conv_bn_lrelu_kernel(%arg0: i32, %arg1: i32, %arg2: memref<1x1x1x6x6x128xf32, #tpu.memory_space<vmem>>, %arg3: memref<1152x64xf32, #tpu.memory_space<vmem>>, %arg4: memref<1x64xf32, #tpu.memory_space<vmem>>, %arg5: memref<1x64xf32, #tpu.memory_space<vmem>>, %arg6: memref<1x1x4x4x64xf32, #tpu.memory_space<vmem>>, %arg7: memref<4x4x1152xf32, #tpu.memory_space<vmem>>) attributes {dimension_semantics = [#tpu.dimension_semantics<parallel>, #tpu.dimension_semantics<parallel>], iteration_bounds = array<i64: 2, 1>, scalar_prefetch = 0 : i64, scratch_operands = 1 : i64, tpu.core_type = #tpu.core_type<tc>, window_params = [{transform_indices = @transform_0, window_bounds = array<i64: 1, 1, 1, 6, 6, 128>}, {pipeline_mode = #tpu.pipeline_mode<synchronous>, transform_indices = @transform_1, window_bounds = array<i64: 1152, 64>}, {pipeline_mode = #tpu.pipeline_mode<synchronous>, transform_indices = @transform_2, window_bounds = array<i64: 1, 64>}, {pipeline_mode = #tpu.pipeline_mode<synchronous>, transform_indices = @transform_3, window_bounds = array<i64: 1, 64>}, {transform_indices = @transform_4, window_bounds = array<i64: 1, 1, 4, 4, 64>}]} {
    %c0 = arith.constant 0 : index
    %c0_0 = arith.constant 0 : index
    %c0_1 = arith.constant 0 : index
    %c0_2 = arith.constant 0 : index
    %c0_3 = arith.constant 0 : index
    %c0_4 = arith.constant 0 : index
    %0 = vector.load %arg2[%c0, %c0_0, %c0_1, %c0_2, %c0_3, %c0_4] : memref<1x1x1x6x6x128xf32, #tpu.memory_space<vmem>>, vector<1x1x1x4x4x128xf32>
    %1 = vector.shape_cast %0 : vector<1x1x1x4x4x128xf32> to vector<4x4x128xf32>
    %c0_5 = arith.constant 0 : index
    %c0_6 = arith.constant 0 : index
    %c0_7 = arith.constant 0 : index
    %2 = vector.load %arg7[%c0_5, %c0_6, %c0_7] : memref<4x4x1152xf32, #tpu.memory_space<vmem>>, vector<4x4x128xf32>
    tpu.vector_store %arg7[%c0_5, %c0_6, %c0_7], %1 {strides = array<i32>} : memref<4x4x1152xf32, #tpu.memory_space<vmem>>, vector<4x4x128xf32>,
    %c0_8 = arith.constant 0 : index
    %c0_9 = arith.constant 0 : index
    %c0_10 = arith.constant 0 : index
    %c0_11 = arith.constant 0 : index
    %c1 = arith.constant 1 : index
    %c0_12 = arith.constant 0 : index
    %3 = vector.load %arg2[%c0_8, %c0_9, %c0_10, %c0_11, %c1, %c0_12] : memref<1x1x1x6x6x128xf32, #tpu.memory_space<vmem>>, vector<1x1x1x4x4x128xf32>
    %4 = vector.shape_cast %3 : vector<1x1x1x4x4x128xf32> to vector<4x4x128xf32>
    %c0_13 = arith.constant 0 : index
    %c0_14 = arith.constant 0 : index
    %c128 = arith.constant 128 : index
    %5 = vector.load %arg7[%c0_13, %c0_14, %c128] : memref<4x4x1152xf32, #tpu.memory_space<vmem>>, vector<4x4x128xf32>
    tpu.vector_store %arg7[%c0_13, %c0_14, %c128], %4 {strides = array<i32>} : memref<4x4x1152xf32, #tpu.memory_space<vmem>>, vector<4x4x128xf32>,
    %c0_15 = arith.constant 0 : index
    %c0_16 = arith.constant 0 : index
    %c0_17 = arith.constant 0 : index
    %c0_18 = arith.constant 0 : index
    %c2 = arith.constant 2 : index
    %c0_19 = arith.constant 0 : index
    %6 = vector.load %arg2[%c0_15, %c0_16, %c0_17, %c0_18, %c2, %c0_19] : memref<1x1x1x6x6x128xf32, #tpu.memory_space<vmem>>, vector<1x1x1x4x4x128xf32>
    %7 = vector.shape_cast %6 : vector<1x1x1x4x4x128xf32> to vector<4x4x128xf32>
    %c0_20 = arith.constant 0 : index
    %c0_21 = arith.constant 0 : index
    %c256 = arith.constant 256 : index
    %8 = vector.load %arg7[%c0_20, %c0_21, %c256] : memref<4x4x1152xf32, #tpu.memory_space<vmem>>, vector<4x4x128xf32>
    tpu.vector_store %arg7[%c0_20, %c0_21, %c256], %7 {strides = array<i32>} : memref<4x4x1152xf32, #tpu.memory_space<vmem>>, vector<4x4x128xf32>,
    %c0_22 = arith.constant 0 : index
    %c0_23 = arith.constant 0 : index
    %c0_24 = arith.constant 0 : index
    %c1_25 = arith.constant 1 : index
    %c0_26 = arith.constant 0 : index
    %c0_27 = arith.constant 0 : index
    %9 = vector.load %arg2[%c0_22, %c0_23, %c0_24, %c1_25, %c0_26, %c0_27] : memref<1x1x1x6x6x128xf32, #tpu.memory_space<vmem>>, vector<1x1x1x4x4x128xf32>
    %10 = vector.shape_cast %9 : vector<1x1x1x4x4x128xf32> to vector<4x4x128xf32>
    %c0_28 = arith.constant 0 : index
    %c0_29 = arith.constant 0 : index
    %c384 = arith.constant 384 : index
    %11 = vector.load %arg7[%c0_28, %c0_29, %c384] : memref<4x4x1152xf32, #tpu.memory_space<vmem>>, vector<4x4x128xf32>
    tpu.vector_store %arg7[%c0_28, %c0_29, %c384], %10 {strides = array<i32>} : memref<4x4x1152xf32, #tpu.memory_space<vmem>>, vector<4x4x128xf32>,
    %c0_30 = arith.constant 0 : index
    %c0_31 = arith.constant 0 : index
    %c0_32 = arith.constant 0 : index
    %c1_33 = arith.constant 1 : index
    %c1_34 = arith.constant 1 : index
    %c0_35 = arith.constant 0 : index
    %12 = vector.load %arg2[%c0_30, %c0_31, %c0_32, %c1_33, %c1_34, %c0_35] : memref<1x1x1x6x6x128xf32, #tpu.memory_space<vmem>>, vector<1x1x1x4x4x128xf32>
    %13 = vector.shape_cast %12 : vector<1x1x1x4x4x128xf32> to vector<4x4x128xf32>
    %c0_36 = arith.constant 0 : index
    %c0_37 = arith.constant 0 : index
    %c512 = arith.constant 512 : index
    %14 = vector.load %arg7[%c0_36, %c0_37, %c512] : memref<4x4x1152xf32, #tpu.memory_space<vmem>>, vector<4x4x128xf32>
    tpu.vector_store %arg7[%c0_36, %c0_37, %c512], %13 {strides = array<i32>} : memref<4x4x1152xf32, #tpu.memory_space<vmem>>, vector<4x4x128xf32>,
    %c0_38 = arith.constant 0 : index
    %c0_39 = arith.constant 0 : index
    %c0_40 = arith.constant 0 : index
    %c1_41 = arith.constant 1 : index
    %c2_42 = arith.constant 2 : index
    %c0_43 = arith.constant 0 : index
    %15 = vector.load %arg2[%c0_38, %c0_39, %c0_40, %c1_41, %c2_42, %c0_43] : memref<1x1x1x6x6x128xf32, #tpu.memory_space<vmem>>, vector<1x1x1x4x4x128xf32>
    %16 = vector.shape_cast %15 : vector<1x1x1x4x4x128xf32> to vector<4x4x128xf32>
    %c0_44 = arith.constant 0 : index
    %c0_45 = arith.constant 0 : index
    %c640 = arith.constant 640 : index
    %17 = vector.load %arg7[%c0_44, %c0_45, %c640] : memref<4x4x1152xf32, #tpu.memory_space<vmem>>, vector<4x4x128xf32>
    tpu.vector_store %arg7[%c0_44, %c0_45, %c640], %16 {strides = array<i32>} : memref<4x4x1152xf32, #tpu.memory_space<vmem>>, vector<4x4x128xf32>,
    %c0_46 = arith.constant 0 : index
    %c0_47 = arith.constant 0 : index
    %c0_48 = arith.constant 0 : index
    %c2_49 = arith.constant 2 : index
    %c0_50 = arith.constant 0 : index
    %c0_51 = arith.constant 0 : index
    %18 = vector.load %arg2[%c0_46, %c0_47, %c0_48, %c2_49, %c0_50, %c0_51] : memref<1x1x1x6x6x128xf32, #tpu.memory_space<vmem>>, vector<1x1x1x4x4x128xf32>
    %19 = vector.shape_cast %18 : vector<1x1x1x4x4x128xf32> to vector<4x4x128xf32>
    %c0_52 = arith.constant 0 : index
    %c0_53 = arith.constant 0 : index
    %c768 = arith.constant 768 : index
    %20 = vector.load %arg7[%c0_52, %c0_53, %c768] : memref<4x4x1152xf32, #tpu.memory_space<vmem>>, vector<4x4x128xf32>
    tpu.vector_store %arg7[%c0_52, %c0_53, %c768], %19 {strides = array<i32>} : memref<4x4x1152xf32, #tpu.memory_space<vmem>>, vector<4x4x128xf32>,
    %c0_54 = arith.constant 0 : index
    %c0_55 = arith.constant 0 : index
    %c0_56 = arith.constant 0 : index
    %c2_57 = arith.constant 2 : index
    %c1_58 = arith.constant 1 : index
    %c0_59 = arith.constant 0 : index
    %21 = vector.load %arg2[%c0_54, %c0_55, %c0_56, %c2_57, %c1_58, %c0_59] : memref<1x1x1x6x6x128xf32, #tpu.memory_space<vmem>>, vector<1x1x1x4x4x128xf32>
    %22 = vector.shape_cast %21 : vector<1x1x1x4x4x128xf32> to vector<4x4x128xf32>
    %c0_60 = arith.constant 0 : index
    %c0_61 = arith.constant 0 : index
    %c896 = arith.constant 896 : index
    %23 = vector.load %arg7[%c0_60, %c0_61, %c896] : memref<4x4x1152xf32, #tpu.memory_space<vmem>>, vector<4x4x128xf32>
    tpu.vector_store %arg7[%c0_60, %c0_61, %c896], %22 {strides = array<i32>} : memref<4x4x1152xf32, #tpu.memory_space<vmem>>, vector<4x4x128xf32>,
    %c0_62 = arith.constant 0 : index
    %c0_63 = arith.constant 0 : index
    %c0_64 = arith.constant 0 : index
    %c2_65 = arith.constant 2 : index
    %c2_66 = arith.constant 2 : index
    %c0_67 = arith.constant 0 : index
    %24 = vector.load %arg2[%c0_62, %c0_63, %c0_64, %c2_65, %c2_66, %c0_67] : memref<1x1x1x6x6x128xf32, #tpu.memory_space<vmem>>, vector<1x1x1x4x4x128xf32>
    %25 = vector.shape_cast %24 : vector<1x1x1x4x4x128xf32> to vector<4x4x128xf32>
    %c0_68 = arith.constant 0 : index
    %c0_69 = arith.constant 0 : index
    %c1024 = arith.constant 1024 : index
    %26 = vector.load %arg7[%c0_68, %c0_69, %c1024] : memref<4x4x1152xf32, #tpu.memory_space<vmem>>, vector<4x4x128xf32>
    tpu.vector_store %arg7[%c0_68, %c0_69, %c1024], %25 {strides = array<i32>} : memref<4x4x1152xf32, #tpu.memory_space<vmem>>, vector<4x4x128xf32>,
    %c0_70 = arith.constant 0 : index
    %c0_71 = arith.constant 0 : index
    %c0_72 = arith.constant 0 : index
    %27 = vector.load %arg7[%c0_70, %c0_71, %c0_72] : memref<4x4x1152xf32, #tpu.memory_space<vmem>>, vector<4x4x1152xf32>
    %28 = vector.shape_cast %27 : vector<4x4x1152xf32> to vector<16x1152xf32>
    %c0_73 = arith.constant 0 : index
    %c0_74 = arith.constant 0 : index
    %29 = vector.load %arg3[%c0_73, %c0_74] : memref<1152x64xf32, #tpu.memory_space<vmem>>, vector<1152x64xf32>
    %cst = arith.constant dense<0.000000e+00> : vector<16x64xf32>
    %30 = tpu.matmul %28, %29, %cst {dimension_numbers = #tpu.dot_dimension_numbers<[1], [0], [0], [1], [0, 0, 1, 1], [], []>} : vector<16x1152xf32>, vector<1152x64xf32>, vector<16x64xf32> -> vector<16x64xf32>
    %c0_75 = arith.constant 0 : index
    %c0_76 = arith.constant 0 : index
    %31 = vector.load %arg4[%c0_75, %c0_76] : memref<1x64xf32, #tpu.memory_space<vmem>>, vector<1x64xf32>
    %32 = vector.broadcast %31 : vector<1x64xf32> to vector<16x64xf32>
    %33 = arith.mulf %30, %32 : vector<16x64xf32>
    %c0_77 = arith.constant 0 : index
    %c0_78 = arith.constant 0 : index
    %34 = vector.load %arg5[%c0_77, %c0_78] : memref<1x64xf32, #tpu.memory_space<vmem>>, vector<1x64xf32>
    %35 = vector.broadcast %34 : vector<1x64xf32> to vector<16x64xf32>
    %36 = arith.addf %33, %35 : vector<16x64xf32>
    %cst_79 = arith.constant 0.000000e+00 : f32
    %37 = vector.broadcast %cst_79 : f32 to vector<16x64xf32>
    %38 = arith.cmpf oge, %36, %37 : vector<16x64xf32>
    %cst_80 = arith.constant 1.000000e-01 : f32
    %39 = vector.broadcast %cst_80 : f32 to vector<16x64xf32>
    %40 = arith.mulf %36, %39 : vector<16x64xf32>
    %41 = arith.select %38, %36, %40 : vector<16x64xi1>, vector<16x64xf32>
    %42 = vector.shape_cast %41 : vector<16x64xf32> to vector<4x4x64xf32>
    %c0_81 = arith.constant 0 : index
    %c0_82 = arith.constant 0 : index
    %c0_83 = arith.constant 0 : index
    %c0_84 = arith.constant 0 : index
    %c0_85 = arith.constant 0 : index
    %43 = vector.load %arg6[%c0_81, %c0_82, %c0_83, %c0_84, %c0_85] : memref<1x1x4x4x64xf32, #tpu.memory_space<vmem>>, vector<1x1x4x4x64xf32>
    %44 = vector.shape_cast %43 : vector<1x1x4x4x64xf32> to vector<4x4x64xf32>
    %45 = vector.shape_cast %42 : vector<4x4x64xf32> to vector<1x1x4x4x64xf32>
    tpu.vector_store %arg6[%c0_81, %c0_82, %c0_83, %c0_84, %c0_85], %45 {strides = array<i32>} : memref<1x1x4x4x64xf32, #tpu.memory_space<vmem>>, vector<1x1x4x4x64xf32>,
    return
  }
  func.func @transform_0(%arg0: i32, %arg1: i32) -> (i32, i32, i32, i32, i32, i32) {
    %c0_i32 = arith.constant 0 : i32
    %c0_i32_0 = arith.constant 0 : i32
    %c0_i32_1 = arith.constant 0 : i32
    %c0_i32_2 = arith.constant 0 : i32
    %c0_i32_3 = arith.constant 0 : i32
    return %arg0, %arg1, %c0_i32, %c0_i32_0, %c0_i32_1, %c0_i32_2 : i32, i32, i32, i32, i32, i32
  }
  func.func @transform_1(%arg0: i32, %arg1: i32) -> (i32, i32) {
    %c0_i32 = arith.constant 0 : i32
    %c0_i32_0 = arith.constant 0 : i32
    %c0_i32_1 = arith.constant 0 : i32
    return %c0_i32, %c0_i32_0 : i32, i32
  }
  func.func @transform_2(%arg0: i32, %arg1: i32) -> (i32, i32) {
    %c0_i32 = arith.constant 0 : i32
    %c0_i32_0 = arith.constant 0 : i32
    %c0_i32_1 = arith.constant 0 : i32
    return %c0_i32, %c0_i32_0 : i32, i32
  }
  func.func @transform_3(%arg0: i32, %arg1: i32) -> (i32, i32) {
    %c0_i32 = arith.constant 0 : i32
    %c0_i32_0 = arith.constant 0 : i32
    %c0_i32_1 = arith.constant 0 : i32
    return %c0_i32, %c0_i32_0 : i32, i32
  }
  func.func @transform_4(%arg0: i32, %arg1: i32) -> (i32, i32, i32, i32, i32) {
    %c0_i32 = arith.constant 0 : i32
    %c0_i32_0 = arith.constant 0 : i32
    %c0_i32_1 = arith.constant 0 : i32
    %c0_i32_2 = arith.constant 0 : i32
    return %arg0, %arg1, %c0_i32, %c0_i32_0, %c0_i32_1 : i32, i32, i32, i32, i32
  }
}

</mosaic_0001>

<bundles_post_ra>
// kernel: decoder_forward.6
= control target key start
LH: loop header
LB: loop body
LE: loop exit
PB: predicated region body
PF: predicated region fallthrough
CT: control target
= control target key end

     0   :  { %s2831_s15 = smov 0   ;;  %s2833_s16 = smov 0   ;;  %s3927_s0 = inlined_call_operand.vmem [shape: f32[2,2,1,10,18,64], index: 0, kind: input, shape index: {}]   ;;  %s3928_s1 = inlined_call_operand.vmem [shape: f32[1152,64], index: 1, kind: input, shape index: {}]   ;;  %s3929_s2 = inlined_call_operand.vmem [shape: f32[1,64], index: 2, kind: input, shape index: {}]   ;;  %s3930_s3 = inlined_call_operand.vmem [shape: f32[1,64], index: 3, kind: input, shape index: {}]   ;;  %s3931_s4 = inlined_call_operand.vmem [shape: f32[2,2,8,16,64], index: 4, kind: output, shape index: {}]  }
   0x1   :  { %s2835_s17 = smov 0   ;;  %s2837_s18 = smov 0  }
   0x2   :  { %s2839_s19 = smov 0  }
   0x3 LB: > { %s23_s20 = sadd.s32 1, %s2796_s17  ;;  %s26_s21 = sadd.s32 1, %s2800_s18  ;;  %s2804_s19 = sphi %s2839_s19, %s14_s19   ;;  %s2800_s18 = sphi %s2837_s18, %s3935_s18   ;;  %s2796_s17 = sphi %s2835_s17, %s3934_s17   ;;  %s2792_s16 = sphi %s2833_s16, %s3933_s16   ;;  %s2788_s15 = sphi %s2831_s15, %s3932_s15  }
   0x4   : > { %p24_p0 = scmp.ge.s32.totalorder %s23_s20, 2  ;;  %p1891_p1 = scmp.ge.s32.totalorder %s2804_s19, 1 }
   0x5   : > { %p182_p2 = scmp.lt.s32.totalorder %s2804_s19, 5 }
   0x6   : > { %s3937_s20 = smov (%p24_p0, %s23_s20), 0  ;;  %s3939_s21 = smov (!%p24_p0, %s26_s21), %s2800_s18 }
   0x7   : > { %p183_p3 = pnand %p1891_p1, %p182_p2  ;;  %p28_p4 = scmp.ge.s32.totalorder %s3939_s21, 2 }
   0x8   : > { %v829_v0 = vld [vmem:[%s3928_s1 + $0x80] sm:$0xff] (!%p183_p3)  ;;  %v830_v1 = vld [vmem:[%s3928_s1 + $0x88] sm:$0xff] (!%p183_p3)  ;;  %p216_p5 = scmp.lt.s32.totalorder (!%p183_p3), %s2792_s16, 1  ;;  %p218_p6 = scmp.lt.s32.totalorder (!%p183_p3), %s2788_s15, 1  ;;  %v831_v11 = vld [vmem:[%s3928_s1 + $0x90] sm:$0xff] (!%p183_p3)  ;;  %vm250_vm0 = vcmask (!%p183_p3), 523264  }
   0x9   : > { %s3941_s21 = smov (%p28_p4, %s3939_s21), 0  ;;  %186 = sbr.rel (%p183_p3) target bundleno = 417 (0x1a1), region = 36 }
   0xa   : > { %v861_v2 = vld [vmem:[%s3928_s1 + $0x180] sm:$0xff] (!%p183_p3)  ;;  %v2548_v3 = vpack.c.bf16 (!%p183_p3), %v830_v1, %v829_v0  ;;  %v862_v4 = vld [vmem:[%s3928_s1 + $0x188] sm:$0xff] (!%p183_p3)  ;;  %v832_v13 = vld [vmem:[%s3928_s1 + $0x98] sm:$0xff] (!%p183_p3) }
   0xb   : > { %v813_v5 = vld [vmem:[%s3928_s1] sm:$0xff] (!%p183_p3)  ;;  %v814_v6 = vld [vmem:[%s3928_s1 + $0x8] sm:$0xff] (!%p183_p3)  ;;  %v2580_v7 = vpack.c.bf16 (!%p183_p3), %v862_v4, %v861_v2  ;;  %v863_v14 = vld [vmem:[%s3928_s1 + $0x190] sm:$0xff] (!%p183_p3)  ;;  %v2552_v16 = vpack.c.bf16 (!%p183_p3), %v832_v13, %v831_v11 }
   0xc   : > { %v2550_v8 = vpack.c.bf16 (!%p183_p3), %v814_v6, %v813_v5  ;;  %v845_v9 = vld [vmem:[%s3928_s1 + $0x100] sm:$0xff] (!%p183_p3)  ;;  %v846_v10 = vld [vmem:[%s3928_s1 + $0x108] sm:$0xff] (!%p183_p3)  ;;  %2549 = vmatprep.subr.bf16.mxu0 (!%p183_p3), %v2548_v3  ;;  %v864_v15 = vld [vmem:[%s3928_s1 + $0x198] sm:$0xff] (!%p183_p3) }
   0xd   : > { %v2582_v12 = vpack.c.bf16 (!%p183_p3), %v846_v10, %v845_v9  ;;  %2581 = vmatprep.subr.bf16.mxu1 (!%p183_p3), %v2580_v7  ;;  %v2584_v17 = vpack.c.bf16 (!%p183_p3), %v864_v15, %v863_v14  ;;  %v815_v18 = vld [vmem:[%s3928_s1 + $0x10] sm:$0xff] (!%p183_p3)  ;;  %v816_v19 = vld [vmem:[%s3928_s1 + $0x18] sm:$0xff] (!%p183_p3)  ;;  %v833_v23 = vld [vmem:[%s3928_s1 + $0xa0] sm:$0xff] (!%p183_p3) }
   0xe   : > { %2551 = vmatpush3.bf16.msra.mxu0 (!%p183_p3), %v2550_v8  ;;  %v847_v20 = vld [vmem:[%s3928_s1 + $0x110] sm:$0xff] (!%p183_p3)  ;;  %v2554_v21 = vpack.c.bf16 (!%p183_p3), %v816_v19, %v815_v18  ;;  %v848_v22 = vld [vmem:[%s3928_s1 + $0x118] sm:$0xff] (!%p183_p3)  ;;  %v834_v24 = vld [vmem:[%s3928_s1 + $0xa8] sm:$0xff] (!%p183_p3) }
   0xf   : > { %2583 = vmatpush3.bf16.msra.mxu1 (!%p183_p3), %v2582_v12  ;;  %2553 = vmatprep.subr.bf16.mxu0 (!%p183_p3), %v2552_v16  ;;  %v2586_v25 = vpack.c.bf16 (!%p183_p3), %v848_v22, %v847_v20  ;;  %v2556_v26 = vpack.c.bf16 (!%p183_p3), %v834_v24, %v833_v23  ;;  %v865_v27 = vld [vmem:[%s3928_s1 + $0x1a0] sm:$0xff] (!%p183_p3)  ;;  %v866_v28 = vld [vmem:[%s3928_s1 + $0x1a8] sm:$0xff] (!%p183_p3)  ;;  %v835_v35 = vld [vmem:[%s3928_s1 + $0xb0] sm:$0xff] (!%p183_p3) }
  0x10   : > { %s3943_s16 = smov (!%p216_p5, %s2792_s16), 1  ;;  %s3945_s15 = smov (!%p218_p6, %s2788_s15), 1  ;;  %2585 = vmatprep.subr.bf16.mxu1 %v2584_v17  ;;  %v817_v29 = vld [vmem:[%s3928_s1 + $0x20] sm:$0xff]  ;;  %v2588_v30 = vpack.c.bf16 %v866_v28, %v865_v27  ;;  %v818_v31 = vld [vmem:[%s3928_s1 + $0x28] sm:$0xff]  ;;  %v836_v36 = vld [vmem:[%s3928_s1 + $0xb8] sm:$0xff] }
  0x11   : > { %v849_v32 = vld [vmem:[%s3928_s1 + $0x120] sm:$0xff]  ;;  %v850_v33 = vld [vmem:[%s3928_s1 + $0x128] sm:$0xff]  ;;  %s2725_s6 = smul.u32 60, %s3943_s16  ;;  %v2558_v34 = vpack.c.bf16 %v818_v31, %v817_v29  ;;  %v867_v37 = vld [vmem:[%s3928_s1 + $0x1b0] sm:$0xff]  ;;  %v2560_v39 = vpack.c.bf16 %v836_v36, %v835_v35  ;;  %s1894_s26 = sshll.u32 %s3943_s16, 5 }
  0x12   : > { %2555 = vmatpush3.bf16.msra.mxu0 %v2554_v21  ;;  %s2724_s13 = smul.u32 30, %s3945_s15  ;;  %v2590_v38 = vpack.c.bf16 %v850_v33, %v849_v32  ;;  %v868_v40 = vld [vmem:[%s3928_s1 + $0x1b8] sm:$0xff]  ;;  %v819_v41 = vld [vmem:[%s3928_s1 + $0x30] sm:$0xff]  ;;  %v837_v46 = vld [vmem:[%s3928_s1 + $0xc0] sm:$0xff] }
  0x13   : > { %2587 = vmatpush3.bf16.msra.mxu1 %v2586_v25  ;;  %2557 = vmatprep.subr.bf16.mxu0 %v2556_v26  ;;  %v820_v42 = vld [vmem:[%s3928_s1 + $0x38] sm:$0xff]  ;;  %v2592_v43 = vpack.c.bf16 %v868_v40, %v867_v37  ;;  %v851_v44 = vld [vmem:[%s3928_s1 + $0x130] sm:$0xff]  ;;  %v838_v47 = vld [vmem:[%s3928_s1 + $0xc8] sm:$0xff] }
  0x14   : > { %2589 = vmatprep.subr.bf16.mxu1 %v2588_v30  ;;  %v852_v45 = vld [vmem:[%s3928_s1 + $0x138] sm:$0xff]  ;;  %v869_v48 = vld [vmem:[%s3928_s1 + $0x1c0] sm:$0xff]  ;;  %v870_v49 = vld [vmem:[%s3928_s1 + $0x1c8] sm:$0xff]  ;;  %v2562_v50 = vpack.c.bf16 %v820_v42, %v819_v41  ;;  %s2987_s22 = sadd.s32 %s2725_s6, %s2724_s13  ;;  %v2564_v52 = vpack.c.bf16 %v838_v47, %v837_v46 }
  0x15   : > { %v2594_v51 = vpack.c.bf16 %v852_v45, %v851_v44  ;;  %v821_v53 = vld [vmem:[%s3928_s1 + $0x40] sm:$0xff]  ;;  %v822_v54 = vld [vmem:[%s3928_s1 + $0x48] sm:$0xff]  ;;  %v2596_v56 = vpack.c.bf16 %v870_v49, %v869_v48  ;;  %v839_v58 = vld [vmem:[%s3928_s1 + $0xd0] sm:$0xff]  ;;  %s1892_s12 = sshll.u32 %s2987_s22, 3 }
  0x16   : > { %2559 = vmatpush3.bf16.msra.mxu0 %v2558_v34  ;;  %v853_v55 = vld [vmem:[%s3928_s1 + $0x140] sm:$0xff]  ;;  %v854_v57 = vld [vmem:[%s3928_s1 + $0x148] sm:$0xff]  ;;  %v840_v59 = vld [vmem:[%s3928_s1 + $0xd8] sm:$0xff]  ;;  %v2566_v62 = vpack.c.bf16 %v822_v54, %v821_v53  ;;  %s3035_s8 = scalar_lea.vmem %s3927_s0, %s1892_s12 }
  0x17   : > { %2591 = vmatpush3.bf16.msra.mxu1 %v2590_v38  ;;  %2561 = vmatprep.subr.bf16.mxu0 %v2560_v39  ;;  %v871_v60 = vld [vmem:[%s3928_s1 + $0x1d0] sm:$0xff]  ;;  %v872_v61 = vld [vmem:[%s3928_s1 + $0x1d8] sm:$0xff]  ;;  %v2598_v63 = vpack.c.bf16 %v854_v57, %v853_v55  ;;  %v2568_v0 = vpack.c.bf16 %v840_v59, %v839_v58  ;;  %v841_v6 = vld [vmem:[%s3928_s1 + $0xe0] sm:$0xff] }
  0x18   : > { %2593 = vmatprep.subr.bf16.mxu1 %v2592_v43  ;;  %v823_v1 = vld [vmem:[%s3928_s1 + $0x50] sm:$0xff]  ;;  %v824_v2 = vld [vmem:[%s3928_s1 + $0x58] sm:$0xff]  ;;  %v2600_v4 = vpack.c.bf16 %v872_v61, %v871_v60  ;;  %v842_v7 = vld [vmem:[%s3928_s1 + $0xe8] sm:$0xff] }
  0x19   : > { %v855_v3 = vld [vmem:[%s3928_s1 + $0x150] sm:$0xff]  ;;  %v856_v5 = vld [vmem:[%s3928_s1 + $0x158] sm:$0xff]  ;;  %v873_v8 = vld [vmem:[%s3928_s1 + $0x1e0] sm:$0xff]  ;;  %v2570_v10 = vpack.c.bf16 %v824_v2, %v823_v1  ;;  %v2572_v14 = vpack.c.bf16 %v842_v7, %v841_v6 }
  0x1a   : > { %2563 = vmatpush3.bf16.msra.mxu0 %v2562_v50  ;;  %v874_v9 = vld [vmem:[%s3928_s1 + $0x1e8] sm:$0xff]  ;;  %v825_v11 = vld [vmem:[%s3928_s1 + $0x60] sm:$0xff]  ;;  %v2602_v13 = vpack.c.bf16 %v856_v5, %v855_v3  ;;  %v3054_v17 = vld [vmem:[%s3035_s8 + $0x18] sm:$0xff] }
  0x1b   : > { %2595 = vmatpush3.bf16.msra.mxu1 %v2594_v51  ;;  %2565 = vmatprep.subr.bf16.mxu0 %v2564_v52  ;;  %v826_v12 = vld [vmem:[%s3928_s1 + $0x68] sm:$0xff]  ;;  %v857_v15 = vld [vmem:[%s3928_s1 + $0x160] sm:$0xff]  ;;  %v2604_v18 = vpack.c.bf16 %v874_v9, %v873_v8  ;;  %v843_v20 = vld [vmem:[%s3928_s1 + $0xf0] sm:$0xff] }
  0x1c   : > { %2597 = vmatprep.subr.bf16.mxu1 %v2596_v56  ;;  %v283_v16 = vld [vmem:[%s3035_s8 + $0x1] sm:$0xff]  ;;  %v844_v21 = vld [vmem:[%s3928_s1 + $0xf8] sm:$0xff]  ;;  %v875_v22 = vld [vmem:[%s3928_s1 + $0x1f0] sm:$0xff]  ;;  %2028 = vmatprep.mubr.msk.f32.mxu1 %vm250_vm0, %v3054_v17  ;;  %v2574_v24 = vpack.c.bf16 %v826_v12, %v825_v11 }
  0x1d   : > { %v858_v19 = vld [vmem:[%s3928_s1 + $0x168] sm:$0xff]  ;;  %1996 = vmatprep.mubr.msk.f32.mxu0 %vm250_vm0, %v283_v16  ;;  %v876_v23 = vld [vmem:[%s3928_s1 + $0x1f8] sm:$0xff]  ;;  %v2576_v26 = vpack.c.bf16 %v844_v21, %v843_v20  ;;  %v827_v27 = vld [vmem:[%s3928_s1 + $0x70] sm:$0xff] }
  0x1e   : > { %2567 = vmatpush3.bf16.msra.mxu0 %v2566_v62  ;;  %v2606_v25 = vpack.c.bf16 %v858_v19, %v857_v15  ;;  %v828_v28 = vld [vmem:[%s3928_s1 + $0x78] sm:$0xff]  ;;  %v859_v29 = vld [vmem:[%s3928_s1 + $0x170] sm:$0xff]  ;;  %v2608_v30 = vpack.c.bf16 %v876_v23, %v875_v22  ;;  %v893_v32 = vld [vmem:[%s3928_s1 + $0x280] sm:$0xff] }
  0x1f   : > { %2599 = vmatpush3.bf16.msra.mxu1 %v2598_v63  ;;  %2569 = vmatprep.subr.bf16.mxu0 %v2568_v0  ;;  %v860_v31 = vld [vmem:[%s3928_s1 + $0x178] sm:$0xff]  ;;  %v894_v33 = vld [vmem:[%s3928_s1 + $0x288] sm:$0xff]  ;;  %v925_v34 = vld [vmem:[%s3928_s1 + $0x380] sm:$0xff]  ;;  %v2578_v36 = vpack.c.bf16 %v828_v28, %v827_v27 }
  0x20   : > { %2601 = vmatprep.subr.bf16.mxu1 %v2600_v4  ;;  %v926_v35 = vld [vmem:[%s3928_s1 + $0x388] sm:$0xff]  ;;  %v2610_v37 = vpack.c.bf16 %v860_v31, %v859_v29  ;;  %v2612_v38 = vpack.c.bf16 %v894_v33, %v893_v32  ;;  %v877_v39 = vld [vmem:[%s3928_s1 + $0x200] sm:$0xff]  ;;  %v895_v44 = vld [vmem:[%s3928_s1 + $0x290] sm:$0xff] }
  0x21   : > { %v878_v40 = vld [vmem:[%s3928_s1 + $0x208] sm:$0xff]  ;;  %v2644_v41 = vpack.c.bf16 %v926_v35, %v925_v34  ;;  %v909_v42 = vld [vmem:[%s3928_s1 + $0x300] sm:$0xff]  ;;  %v896_v45 = vld [vmem:[%s3928_s1 + $0x298] sm:$0xff] }
  0x22   : > { %2571 = vmatpush3.bf16.msra.mxu0 %v2570_v10  ;;  %v910_v43 = vld [vmem:[%s3928_s1 + $0x308] sm:$0xff]  ;;  %v234_v46 = vld [vmem:[%s3035_s8] sm:$0xff]  ;;  %v2614_v47 = vpack.c.bf16 %v878_v40, %v877_v39  ;;  %v927_v48 = vld [vmem:[%s3928_s1 + $0x390] sm:$0xff]  ;;  %v2616_v54 = vpack.c.bf16 %v896_v45, %v895_v44 }
  0x23   : > { %2603 = vmatpush3.bf16.msra.mxu1 %v2602_v13  ;;  %2573 = vmatprep.subr.bf16.mxu0 %v2572_v14  ;;  %v928_v49 = vld [vmem:[%s3928_s1 + $0x398] sm:$0xff]  ;;  %v331_v50 = vld [vmem:[%s3035_s8 + $0x2] sm:$0xff]  ;;  %v2646_v51 = vpack.c.bf16 %v910_v43, %v909_v42  ;;  %v879_v55 = vld [vmem:[%s3928_s1 + $0x210] sm:$0xff] }
  0x24   : > { %2605 = vmatprep.subr.bf16.mxu1 %v2604_v18  ;;  %v284_v52 = vld [vmem:[%s3035_s8 + $0x9] sm:$0xff]  ;;  %v3126_v53 = vld [vmem:[%s3035_s8 + $0x20] sm:$0xff]  ;;  %v880_v56 = vld [vmem:[%s3928_s1 + $0x218] sm:$0xff]  ;;  %v2648_v58 = vpack.c.bf16 %v928_v49, %v927_v48 }
  0x25   : > { %v911_v57 = vld [vmem:[%s3928_s1 + $0x310] sm:$0xff]  ;;  %v912_v59 = vld [vmem:[%s3928_s1 + $0x318] sm:$0xff]  ;;  %v897_v60 = vld [vmem:[%s3928_s1 + $0x2a0] sm:$0xff]  ;;  %v2618_v4 = vpack.c.bf16 %v880_v56, %v879_v55 }
  0x26   : > { %2575 = vmatpush3.bf16.msra.mxu0 %v2574_v24  ;;  %v898_v61 = vld [vmem:[%s3928_s1 + $0x2a8] sm:$0xff]  ;;  %v929_v63 = vld [vmem:[%s3928_s1 + $0x3a0] sm:$0xff]  ;;  %v3161_v3 = vld [vmem:[%s3035_s8 + $0x30] sm:$0xff]  ;;  %v2650_v5 = vpack.c.bf16 %v912_v59, %v911_v57 }
  0x27   : > { %2607 = vmatpush3.bf16.msra.mxu1 %v2606_v25  ;;  %2577 = vmatprep.subr.bf16.mxu0 %v2576_v26  ;;  %v235_v62 = vld [vmem:[%s3035_s8 + $0x8] sm:$0xff]  ;;  %v3158_v2 = vld [vmem:[%s3035_s8 + $0x19] sm:$0xff]  ;;  %v2620_v6 = vpack.c.bf16 %v898_v61, %v897_v60  ;;  %v899_v12 = vld [vmem:[%s3928_s1 + $0x2b0] sm:$0xff] }
  0x28   : > { %2609 = vmatprep.subr.bf16.mxu1 %v2608_v30  ;;  %v930_v0 = vld [vmem:[%s3928_s1 + $0x3a8] sm:$0xff]  ;;  %v881_v7 = vld [vmem:[%s3928_s1 + $0x220] sm:$0xff]  ;;  %v900_v13 = vld [vmem:[%s3928_s1 + $0x2b8] sm:$0xff] }
  0x29   : > { %v332_v1 = vld [vmem:[%s3035_s8 + $0xa] sm:$0xff]  ;;  %v913_v9 = vld [vmem:[%s3928_s1 + $0x320] sm:$0xff]  ;;  %v2652_v10 = vpack.c.bf16 %v930_v0, %v929_v63  ;;  %v932_v15 = vld [vmem:[%s3928_s1 + $0x3b8] sm:$0xff]  ;;  %v2624_v22 = vpack.c.bf16 %v900_v13, %v899_v12 }
  0x2a   : > { %2579 = vmatpush3.bf16.msra.mxu0 %v2578_v36  ;;  %v882_v8 = vld [vmem:[%s3928_s1 + $0x228] sm:$0xff]  ;;  %v931_v14 = vld [vmem:[%s3928_s1 + $0x3b0] sm:$0xff]  ;;  %v3196_v16 = vld [vmem:[%s3035_s8 + $0x1a] sm:$0xff] }
  0x2b   : > { %2611 = vmatpush3.bf16.msra.mxu1 %v2610_v37  ;;  %2613 = vmatprep.subr.bf16.mxu0 %v2612_v38  ;;  %v914_v11 = vld [vmem:[%s3928_s1 + $0x328] sm:$0xff]  ;;  %v3202_v19 = vld [vmem:[%s3035_s8 + $0x38] sm:$0xff]  ;;  %v2622_v20 = vpack.c.bf16 %v882_v8, %v881_v7  ;;  %v883_v23 = vld [vmem:[%s3928_s1 + $0x230] sm:$0xff]  ;;  %v2656_v26 = vpack.c.bf16 %v932_v15, %v931_v14 }
  0x2c   : > { %2645 = vmatprep.subr.bf16.mxu1 %v2644_v41  ;;  %v3199_v18 = vld [vmem:[%s3035_s8 + $0x21] sm:$0xff]  ;;  %v2654_v21 = vpack.c.bf16 %v914_v11, %v913_v9  ;;  %v884_v24 = vld [vmem:[%s3928_s1 + $0x238] sm:$0xff]  ;;  %v915_v25 = vld [vmem:[%s3928_s1 + $0x330] sm:$0xff] }
  0x2d   : > { %1997 = vmatmul.mubr.msk.f32.vlgmr.msra.gmra.mrb[0].mxu0 %vm250_vm0, %v234_v46  ;;  %v916_v27 = vld [vmem:[%s3928_s1 + $0x338] sm:$0xff]  ;;  %v901_v28 = vld [vmem:[%s3928_s1 + $0x2c0] sm:$0xff]  ;;  %v902_v29 = vld [vmem:[%s3928_s1 + $0x2c8] sm:$0xff]  ;;  %v2626_v34 = vpack.c.bf16 %v884_v24, %v883_v23 }
  0x2e   : > { %2029 = vmatmul.mubr.msk.f32.vlgmr.msra.gmra.mrb[0].mxu1 %vm250_vm0, %v331_v50  ;;  %2615 = vmatpush3.bf16.msra.mxu0 %v2614_v47  ;;  %v934_v30 = vld [vmem:[%s3928_s1 + $0x3c8] sm:$0xff]  ;;  %v3240_v32 = vld [vmem:[%s3035_s8 + $0x31] sm:$0xff]  ;;  %v2658_v35 = vpack.c.bf16 %v916_v27, %v915_v25  ;;  %v2628_v36 = vpack.c.bf16 %v902_v29, %v901_v28  ;;  %v885_v37 = vld [vmem:[%s3928_s1 + $0x240] sm:$0xff] }
  0x2f   : > { %2647 = vmatpush3.bf16.msra.mxu1 %v2646_v51  ;;  %1998 = vmatprep.mubr.msk.f32.mxu0 %vm250_vm0, %v284_v52  ;;  %v3237_v31 = vld [vmem:[%s3035_s8 + $0x22] sm:$0xff]  ;;  %v903_v42 = vld [vmem:[%s3928_s1 + $0x2d0] sm:$0xff]  ;;  %v904_v43 = vld [vmem:[%s3928_s1 + $0x2d8] sm:$0xff] }
  0x30   : > { %2030 = vmatprep.mubr.msk.f32.mxu1 %vm250_vm0, %v3126_v53  ;;  %2617 = vmatprep.subr.bf16.mxu0 %v2616_v54  ;;  %v3243_v33 = vld [vmem:[%s3035_s8 + $0x48] sm:$0xff]  ;;  %v917_v39 = vld [vmem:[%s3928_s1 + $0x340] sm:$0xff]  ;;  %v935_v44 = vld [vmem:[%s3928_s1 + $0x3d0] sm:$0xff]  ;;  %v2632_v51 = vpack.c.bf16 %v904_v43, %v903_v42 }
  0x31   : > { %1999 = vmatmul.mubr.msk.f32.gmra.mrb[2].mxu0 %vm250_vm0, %v235_v62  ;;  %2649 = vmatprep.subr.bf16.mxu1 %v2648_v58  ;;  %v886_v38 = vld [vmem:[%s3928_s1 + $0x248] sm:$0xff]  ;;  %v936_v45 = vld [vmem:[%s3928_s1 + $0x3d8] sm:$0xff]  ;;  %v3284_v48 = vld [vmem:[%s3035_s8 + $0x50] sm:$0xff] }
  0x32   : > { %2031 = vmatmul.mubr.msk.f32.gmra.mrb[2].mxu1 %vm250_vm0, %v332_v1  ;;  %2000 = vmatprep.mubr.msk.f32.mxu0 %vm250_vm0, %v3158_v2  ;;  %v918_v41 = vld [vmem:[%s3928_s1 + $0x348] sm:$0xff]  ;;  %v3278_v46 = vld [vmem:[%s3035_s8 + $0x32] sm:$0xff]  ;;  %v2630_v49 = vpack.c.bf16 %v886_v38, %v885_v37  ;;  %v2664_v55 = vpack.c.bf16 %v936_v45, %v935_v44  ;;  %v905_v57 = vld [vmem:[%s3928_s1 + $0x2e0] sm:$0xff] }
  0x33   : > { %2032 = vmatprep.mubr.msk.f32.mxu1 %vm250_vm0, %v3161_v3  ;;  %2619 = vmatpush3.bf16.msra.mxu0 %v2618_v4  ;;  %v3281_v47 = vld [vmem:[%s3035_s8 + $0x39] sm:$0xff]  ;;  %v2662_v50 = vpack.c.bf16 %v918_v41, %v917_v39  ;;  %v887_v52 = vld [vmem:[%s3928_s1 + $0x250] sm:$0xff]  ;;  %v906_v58 = vld [vmem:[%s3928_s1 + $0x2e8] sm:$0xff] }
  0x34   : > { %2651 = vmatpush3.bf16.msra.mxu1 %v2650_v5  ;;  %2621 = vmatprep.subr.bf16.mxu0 %v2620_v6  ;;  %v919_v54 = vld [vmem:[%s3928_s1 + $0x350] sm:$0xff]  ;;  %v920_v56 = vld [vmem:[%s3928_s1 + $0x358] sm:$0xff]  ;;  %v937_v59 = vld [vmem:[%s3928_s1 + $0x3e0] sm:$0xff]  ;;  %v2636_v4 = vpack.c.bf16 %v906_v58, %v905_v57 }
  0x35   : > { %2001 = vmatmul.mubr.msk.f32.gmra.mrb[4].mxu0 %vm250_vm0, %v3054_v17  ;;  %2653 = vmatprep.subr.bf16.mxu1 %v2652_v10  ;;  %v933_v17 = vld [vmem:[%s3928_s1 + $0x3c0] sm:$0xff]  ;;  %v938_v60 = vld [vmem:[%s3928_s1 + $0x3e8] sm:$0xff]  ;;  %v2666_v1 = vpack.c.bf16 %v920_v56, %v919_v54  ;;  %v907_v10 = vld [vmem:[%s3928_s1 + $0x2f0] sm:$0xff] }
  0x36   : > { %2033 = vmatmul.mubr.msk.f32.gmra.mrb[4].mxu1 %vm250_vm0, %v3196_v16  ;;  %2002 = vmatprep.mubr.msk.f32.mxu0 %vm250_vm0, %v3199_v18  ;;  %v2660_v40 = vpack.c.bf16 %v934_v30, %v933_v17  ;;  %v3319_v61 = vld [vmem:[%s3035_s8 + $0x3a] sm:$0xff]  ;;  %v3322_v62 = vld [vmem:[%s3035_s8 + $0x49] sm:$0xff]  ;;  %v2668_v7 = vpack.c.bf16 %v938_v60, %v937_v59  ;;  %v3363_v15 = vld [vmem:[%s3035_s8 + $0x51] sm:$0xff] }
  0x37   : > { %2034 = vmatprep.mubr.msk.f32.mxu1 %vm250_vm0, %v3202_v19  ;;  %2623 = vmatpush3.bf16.msra.mxu0 %v2622_v20  ;;  %v3325_v0 = vld [vmem:[%s3035_s8 + $0x60] sm:$0xff]  ;;  %v890_v6 = vld [vmem:[%s3928_s1 + $0x268] sm:$0xff]  ;;  %v908_v11 = vld [vmem:[%s3928_s1 + $0x2f8] sm:$0xff] }
  0x38   : > { %2655 = vmatpush3.bf16.msra.mxu1 %v2654_v21  ;;  %2625 = vmatprep.subr.bf16.mxu0 %v2624_v22  ;;  %v889_v5 = vld [vmem:[%s3928_s1 + $0x260] sm:$0xff]  ;;  %v922_v9 = vld [vmem:[%s3928_s1 + $0x368] sm:$0xff]  ;;  %v939_v12 = vld [vmem:[%s3928_s1 + $0x3f0] sm:$0xff]  ;;  %v2640_v23 = vpack.c.bf16 %v908_v11, %v907_v10 }
  0x39   : > { %2003 = vmatmul.mubr.msk.f32.gmra.mrb[6].mxu0 %vm250_vm0, %v3126_v53  ;;  %2657 = vmatprep.subr.bf16.mxu1 %v2656_v26  ;;  %v888_v53 = vld [vmem:[%s3928_s1 + $0x258] sm:$0xff]  ;;  %v921_v8 = vld [vmem:[%s3928_s1 + $0x360] sm:$0xff]  ;;  %v3360_v14 = vld [vmem:[%s3035_s8 + $0x4a] sm:$0xff]  ;;  %v2638_v21 = vpack.c.bf16 %v890_v6, %v889_v5 }
  0x3a   : > { %2035 = vmatmul.mubr.msk.f32.gmra.mrb[6].mxu1 %vm250_vm0, %v3237_v31  ;;  %2004 = vmatprep.mubr.msk.f32.mxu0 %vm250_vm0, %v3240_v32  ;;  %v2634_v63 = vpack.c.bf16 %v888_v53, %v887_v52  ;;  %v940_v13 = vld [vmem:[%s3928_s1 + $0x3f8] sm:$0xff]  ;;  %v3366_v20 = vld [vmem:[%s3035_s8 + $0x68] sm:$0xff]  ;;  %v2670_v22 = vpack.c.bf16 %v922_v9, %v921_v8  ;;  %v891_v24 = vld [vmem:[%s3928_s1 + $0x270] sm:$0xff] }
  0x3b   : > { %2036 = vmatprep.mubr.msk.f32.mxu1 %vm250_vm0, %v3243_v33  ;;  %2627 = vmatpush3.bf16.msra.mxu0 %v2626_v34  ;;  %v892_v25 = vld [vmem:[%s3928_s1 + $0x278] sm:$0xff]  ;;  %v923_v26 = vld [vmem:[%s3928_s1 + $0x370] sm:$0xff]  ;;  %v2672_v27 = vpack.c.bf16 %v940_v13, %v939_v12  ;;  %v941_v29 = vld [vmem:[%s3928_s1 + $0x400] sm:$0xff] }
  0x3c   : > { %2659 = vmatpush3.bf16.msra.mxu1 %v2658_v35  ;;  %2629 = vmatprep.subr.bf16.mxu0 %v2628_v36  ;;  %v924_v28 = vld [vmem:[%s3928_s1 + $0x378] sm:$0xff]  ;;  %v942_v17 = vld [vmem:[%s3928_s1 + $0x408] sm:$0xff]  ;;  %v2642_v35 = vpack.c.bf16 %v892_v25, %v891_v24  ;;  %v3420_v41 = vld [vmem:[%s3035_s8 + $0x80] sm:$0xff] }
  0x3d   : > { %2005 = vmatmul.mubr.msk.f32.gmra.mrb[8].mxu0 %vm250_vm0, %v3161_v3  ;;  %2661 = vmatprep.subr.bf16.mxu1 %v2660_v40  ;;  %v3395_v30 = vld [vmem:[%s3035_s8 + $0x52] sm:$0xff]  ;;  %v3398_v34 = vld [vmem:[%s3035_s8 + $0x61] sm:$0xff]  ;;  %v2674_v37 = vpack.c.bf16 %v924_v28, %v923_v26  ;;  %v3403_v38 = vpack.c.bf16 %v942_v17, %v941_v29  ;;  %v3417_v40 = vld [vmem:[%s3035_s8 + $0x69] sm:$0xff] }
  0x3e   : > { %2037 = vmatmul.mubr.msk.f32.gmra.mrb[8].mxu1 %vm250_vm0, %v3278_v46  ;;  %2006 = vmatprep.mubr.msk.f32.mxu0 %vm250_vm0, %v3281_v47  ;;  %v3401_v36 = vld [vmem:[%s3035_s8 + $0x78] sm:$0xff]  ;;  %v3414_v39 = vld [vmem:[%s3035_s8 + $0x62] sm:$0xff]  ;;  %v3433_v42 = vld [vmem:[%s3035_s8 + $0x6a] sm:$0xff] }
  0x3f   : > { %2038 = vmatprep.mubr.msk.f32.mxu1 %vm250_vm0, %v3284_v48  ;;  %2631 = vmatpush3.bf16.msra.mxu0 %v2630_v49  ;;  %v3436_v43 = vld [vmem:[%s3035_s8 + $0x79] sm:$0xff]  ;;  %v3439_v44 = vld [vmem:[%s3035_s8 + $0x90] sm:$0xff]  ;;  %v3453_v49 = vld [vmem:[%s3035_s8 + $0x81] sm:$0xff] }
  0x40   : > { %2663 = vmatpush3.bf16.msra.mxu1 %v2662_v50  ;;  %2633 = vmatprep.subr.bf16.mxu0 %v2632_v51  ;;  %v3450_v45 = vld [vmem:[%s3035_s8 + $0x7a] sm:$0xff]  ;;  %v3467_v51 = vld [vmem:[%s3035_s8 + $0x82] sm:$0xff]  ;;  %v3470_v52 = vld [vmem:[%s3035_s8 + $0x91] sm:$0xff] }
  0x41   : > { %2007 = vmatmul.mubr.msk.f32.gmra.mrb[10].mxu0 %vm250_vm0, %v3202_v19  ;;  %2665 = vmatprep.subr.bf16.mxu1 %v2664_v55  ;;  %v3456_v50 = vld [vmem:[%s3035_s8 + $0x98] sm:$0xff]  ;;  %v3473_v53 = vld [vmem:[%s3035_s8 + $0xa8] sm:$0xff]  ;;  %v3490_v56 = vld [vmem:[%s3035_s8 + $0xb0] sm:$0xff] }
  0x42   : > { %2039 = vmatmul.mubr.msk.f32.gmra.mrb[10].mxu1 %vm250_vm0, %v3319_v61  ;;  %2008 = vmatprep.mubr.msk.f32.mxu0 %vm250_vm0, %v3322_v62  ;;  %v3484_v54 = vld [vmem:[%s3035_s8 + $0x92] sm:$0xff]  ;;  %v3501_v57 = vld [vmem:[%s3035_s8 + $0x9a] sm:$0xff]  ;;  %v3504_v58 = vld [vmem:[%s3035_s8 + $0xa9] sm:$0xff] }
  0x43   : > { %2040 = vmatprep.mubr.msk.f32.mxu1 %vm250_vm0, %v3325_v0  ;;  %2635 = vmatpush3.bf16.msra.mxu0 %v2634_v63  ;;  %v3487_v55 = vld [vmem:[%s3035_s8 + $0x99] sm:$0xff]  ;;  %v3518_v60 = vld [vmem:[%s3035_s8 + $0xaa] sm:$0xff]  ;;  %v1975_v25 = vld [vmem:[%s3035_s8 + $0xe1] sm:$0xff] }
  0x44   : > { %2667 = vmatpush3.bf16.msra.mxu1 %v2666_v1  ;;  %2637 = vmatprep.subr.bf16.mxu0 %v2636_v4  ;;  %v3507_v59 = vld [vmem:[%s3035_s8 + $0xc0] sm:$0xff]  ;;  %v3521_v63 = vld [vmem:[%s3035_s8 + $0xb1] sm:$0xff]  ;;  %v3524_v1 = vld [vmem:[%s3035_s8 + $0xc8] sm:$0xff] }
  0x45   : > { %2009 = vmatmul.mubr.msk.f32.gmra.mrb[12].mxu0 %vm250_vm0, %v3243_v33  ;;  %2669 = vmatprep.subr.bf16.mxu1 %v2668_v7  ;;  %v3535_v4 = vld [vmem:[%s3035_s8 + $0xb2] sm:$0xff]  ;;  %v945_v8 = vld [vmem:[%s3928_s1 + $0x420] sm:$0xff]  ;;  %v946_v9 = vld [vmem:[%s3928_s1 + $0x428] sm:$0xff] }
  0x46   : > { %2041 = vmatmul.mubr.msk.f32.gmra.mrb[12].mxu1 %vm250_vm0, %v3360_v14  ;;  %2010 = vmatprep.mubr.msk.f32.mxu0 %vm250_vm0, %v3363_v15  ;;  %v943_v5 = vld [vmem:[%s3928_s1 + $0x410] sm:$0xff]  ;;  %v944_v6 = vld [vmem:[%s3928_s1 + $0x418] sm:$0xff]  ;;  %v953_v11 = vld [vmem:[%s3928_s1 + $0x460] sm:$0xff] }
  0x47   : > { %2042 = vmatprep.mubr.msk.f32.mxu1 %vm250_vm0, %v3366_v20  ;;  %2639 = vmatpush3.bf16.msra.mxu0 %v2638_v21  ;;  %v2680_v7 = vpack.c.bf16 %v944_v6, %v943_v5  ;;  %v951_v10 = vld [vmem:[%s3928_s1 + $0x450] sm:$0xff]  ;;  %v1942_v21 = vld [vmem:[%s3035_s8 + $0xc2] sm:$0xff] }
  0x48   : > { %2671 = vmatpush3.bf16.msra.mxu1 %v2670_v22  ;;  %2641 = vmatprep.subr.bf16.mxu0 %v2640_v23  ;;  %v955_v12 = vld [vmem:[%s3928_s1 + $0x470] sm:$0xff]  ;;  %v1974_v22 = vld [vmem:[%s3035_s8 + $0xd9] sm:$0xff] }
  0x49   : > { %2011 = vmatmul.mubr.msk.f32.gmra.mrb[14].mxu0 %vm250_vm0, %v3284_v48  ;;  %2673 = vmatprep.subr.bf16.mxu1 %v2672_v27  ;;  %v1958_v23 = vld [vmem:[%s3035_s8 + $0xd8] sm:$0xff]  ;;  %v1943_v24 = vld [vmem:[%s3035_s8 + $0xca] sm:$0xff]  ;;  %v1959_v26 = vld [vmem:[%s3035_s8 + $0xe0] sm:$0xff] }
  0x4a   : > { %2043 = vmatmul.mubr.msk.f32.gmra.mrb[14].mxu1 %vm250_vm0, %v3395_v30  ;;  %2012 = vmatprep.mubr.msk.f32.mxu0 %vm250_vm0, %v3398_v34 }
  0x4b   : > { %2044 = vmatprep.mubr.msk.f32.mxu1 %vm250_vm0, %v3401_v36  ;;  %2643 = vmatpush3.bf16.msra.mxu0 %v2642_v35 }
  0x4c   : > { %2675 = vmatpush3.bf16.msra.mxu1 %v2674_v37  ;;  %2677 = vmatprep.subr.bf16.mxu0 %v3403_v38 }
  0x4d   : > { %2013 = vmatmul.mubr.msk.f32.gmra.mrb[16].mxu0 %vm250_vm0, %v3325_v0  ;;  %2708 = vmatprep.subr.bf16.mxu1 %v3403_v38 }
  0x4e   : > { %2045 = vmatmul.mubr.msk.f32.gmra.mrb[16].mxu1 %vm250_vm0, %v3414_v39  ;;  %2014 = vmatprep.mubr.msk.f32.mxu0 %vm250_vm0, %v3417_v40 }
  0x4f   : > { %2046 = vmatprep.mubr.msk.f32.mxu1 %vm250_vm0, %v3420_v41 }
  0x51   : > { %2015 = vmatmul.mubr.msk.f32.gmra.mrb[18].mxu0 %vm250_vm0, %v3366_v20 }
  0x52   : > { %2047 = vmatmul.mubr.msk.f32.gmra.mrb[18].mxu1 %vm250_vm0, %v3433_v42  ;;  %2016 = vmatprep.mubr.msk.f32.mxu0 %vm250_vm0, %v3436_v43 }
  0x53   : > { %2048 = vmatprep.mubr.msk.f32.mxu1 %vm250_vm0, %v3439_v44 }
  0x55   : > { %2017 = vmatmul.mubr.msk.f32.gmra.mrb[20].mxu0 %vm250_vm0, %v3401_v36 }
  0x56   : > { %2049 = vmatmul.mubr.msk.f32.gmra.mrb[20].mxu1 %vm250_vm0, %v3450_v45  ;;  %2018 = vmatprep.mubr.msk.f32.mxu0 %vm250_vm0, %v3453_v49 }
  0x57   : > { %2050 = vmatprep.mubr.msk.f32.mxu1 %vm250_vm0, %v3456_v50 }
  0x59   : > { %2019 = vmatmul.mubr.msk.f32.gmra.mrb[22].mxu0 %vm250_vm0, %v3420_v41 }
  0x5a   : > { %2051 = vmatmul.mubr.msk.f32.gmra.mrb[22].mxu1 %vm250_vm0, %v3467_v51  ;;  %2020 = vmatprep.mubr.msk.f32.mxu0 %vm250_vm0, %v3470_v52 }
  0x5b   : > { %2052 = vmatprep.mubr.msk.f32.mxu1 %vm250_vm0, %v3473_v53 }
  0x5d   : > { %2021 = vmatmul.mubr.msk.f32.gmra.mrb[24].mxu0 %vm250_vm0, %v3439_v44 }
  0x5e   : > { %2053 = vmatmul.mubr.msk.f32.gmra.mrb[24].mxu1 %vm250_vm0, %v3484_v54  ;;  %2022 = vmatprep.mubr.msk.f32.mxu0 %vm250_vm0, %v3487_v55 }
  0x5f   : > { %2054 = vmatprep.mubr.msk.f32.mxu1 %vm250_vm0, %v3490_v56 }
  0x61   : > { %2023 = vmatmul.mubr.msk.f32.gmra.mrb[26].mxu0 %vm250_vm0, %v3456_v50 }
  0x62   : > { %2055 = vmatmul.mubr.msk.f32.gmra.mrb[26].mxu1 %vm250_vm0, %v3501_v57  ;;  %2024 = vmatprep.mubr.msk.f32.mxu0 %vm250_vm0, %v3504_v58 }
  0x63   : > { %2056 = vmatprep.mubr.msk.f32.mxu1 %vm250_vm0, %v3507_v59 }
  0x65   : > { %2025 = vmatmul.mubr.msk.f32.gmra.mrb[28].mxu0 %vm250_vm0, %v3473_v53 }
  0x66   : > { %2057 = vmatmul.mubr.msk.f32.gmra.mrb[28].mxu1 %vm250_vm0, %v3518_v60  ;;  %2026 = vmatprep.mubr.msk.f32.mxu0 %vm250_vm0, %v3521_v63 }
  0x67   : > { %2058 = vmatprep.mubr.msk.f32.mxu1 %vm250_vm0, %v3524_v1 }
  0x69   : > { %2027 = vmatmul.mubr.msk.f32.gmra.mrb[30].mxu0 %vm250_vm0, %v3490_v56 }
  0x6a   : > { %2059 = vmatmul.mubr.msk.f32.gmra.mrb[30].mxu1 %vm250_vm0, %v3535_v4  ;;  %2060 = vmatprep.mubr.msk.f32.mxu0 %vm250_vm0, %v3196_v16  ;;  %v948_v16 = vld [vmem:[%s3928_s1 + $0x438] sm:$0xff] }
  0x6b   : > { %2092 = vmatprep.mubr.msk.f32.mxu1 %vm250_vm0, %v3240_v32 }
  0x6d   : > { %2061 = vmatmul.mubr.msk.f32.vlgmr.msra.gmra.mrb[32].mxu0 %vm250_vm0, %v3158_v2  ;;  %v2684_v2 = vpack.c.bf16 %v946_v9, %v945_v8 }
  0x6e   : > { %2093 = vmatmul.mubr.msk.f32.vlgmr.msra.gmra.mrb[32].mxu1 %vm250_vm0, %v3161_v3  ;;  %2679 = vmatpush3.bf16.msra.mxu0 %v3403_v38  ;;  %v947_v3 = vld [vmem:[%s3928_s1 + $0x430] sm:$0xff] }
  0x6f   : > { %2716 = vmatpush3.bf16.msra.mxu1 %v3403_v38  ;;  %2062 = vmatprep.mubr.msk.f32.mxu0 %vm250_vm0, %v3237_v31  ;;  %v949_v31 = vld [vmem:[%s3928_s1 + $0x440] sm:$0xff] }
  0x70   : > { %2094 = vmatprep.mubr.msk.f32.mxu1 %vm250_vm0, %v3281_v47  ;;  %2681 = vmatprep.subr.bf16.mxu0 %v2680_v7 }
  0x71   : > { %2063 = vmatmul.mubr.msk.f32.gmra.mrb[34].mxu0 %vm250_vm0, %v3199_v18  ;;  %2709 = vmatprep.subr.bf16.mxu1 %v2680_v7  ;;  %v2688_v18 = vpack.c.bf16 %v948_v16, %v947_v3 }
  0x72   : > { %2095 = vmatmul.mubr.msk.f32.gmra.mrb[34].mxu1 %vm250_vm0, %v3202_v19  ;;  %2064 = vmatprep.mubr.msk.f32.mxu0 %vm250_vm0, %v3278_v46  ;;  %v950_v19 = vld [vmem:[%s3928_s1 + $0x448] sm:$0xff] }
  0x73   : > { %2096 = vmatprep.mubr.msk.f32.mxu1 %vm250_vm0, %v3322_v62  ;;  %2683 = vmatpush3.bf16.msra.mxu0 %v2680_v7 }
  0x74   : > { %2717 = vmatpush3.bf16.msra.mxu1 %v2680_v7  ;;  %2685 = vmatprep.subr.bf16.mxu0 %v2684_v2 }
  0x75   : > { %2065 = vmatmul.mubr.msk.f32.gmra.mrb[36].mxu0 %vm250_vm0, %v3240_v32  ;;  %2710 = vmatprep.subr.bf16.mxu1 %v2684_v2  ;;  %v2692_v32 = vpack.c.bf16 %v950_v19, %v949_v31 }
  0x76   : > { %2097 = vmatmul.mubr.msk.f32.gmra.mrb[36].mxu1 %vm250_vm0, %v3243_v33  ;;  %2066 = vmatprep.mubr.msk.f32.mxu0 %vm250_vm0, %v3319_v61  ;;  %v952_v33 = vld [vmem:[%s3928_s1 + $0x458] sm:$0xff] }
  0x77   : > { %2098 = vmatprep.mubr.msk.f32.mxu1 %vm250_vm0, %v3363_v15  ;;  %2687 = vmatpush3.bf16.msra.mxu0 %v2684_v2 }
  0x78   : > { %2718 = vmatpush3.bf16.msra.mxu1 %v2684_v2  ;;  %2689 = vmatprep.subr.bf16.mxu0 %v2688_v18 }
  0x79   : > { %2067 = vmatmul.mubr.msk.f32.gmra.mrb[38].mxu0 %vm250_vm0, %v3281_v47  ;;  %2711 = vmatprep.subr.bf16.mxu1 %v2688_v18  ;;  %v2696_v47 = vpack.c.bf16 %v952_v33, %v951_v10 }
  0x7a   : > { %2099 = vmatmul.mubr.msk.f32.gmra.mrb[38].mxu1 %vm250_vm0, %v3284_v48  ;;  %2068 = vmatprep.mubr.msk.f32.mxu0 %vm250_vm0, %v3360_v14  ;;  %v954_v48 = vld [vmem:[%s3928_s1 + $0x468] sm:$0xff] }
  0x7b   : > { %2100 = vmatprep.mubr.msk.f32.mxu1 %vm250_vm0, %v3398_v34  ;;  %2691 = vmatpush3.bf16.msra.mxu0 %v2688_v18 }
  0x7c   : > { %2719 = vmatpush3.bf16.msra.mxu1 %v2688_v18  ;;  %2693 = vmatprep.subr.bf16.mxu0 %v2692_v32 }
  0x7d   : > { %2069 = vmatmul.mubr.msk.f32.gmra.mrb[40].mxu0 %vm250_vm0, %v3322_v62  ;;  %2712 = vmatprep.subr.bf16.mxu1 %v2692_v32  ;;  %v2700_v62 = vpack.c.bf16 %v954_v48, %v953_v11 }
  0x7e   : > { %2101 = vmatmul.mubr.msk.f32.gmra.mrb[40].mxu1 %vm250_vm0, %v3325_v0  ;;  %2070 = vmatprep.mubr.msk.f32.mxu0 %vm250_vm0, %v3395_v30  ;;  %v956_v0 = vld [vmem:[%s3928_s1 + $0x478] sm:$0xff] }
  0x7f   : > { %2102 = vmatprep.mubr.msk.f32.mxu1 %vm250_vm0, %v3417_v40  ;;  %2695 = vmatpush3.bf16.msra.mxu0 %v2692_v32  ;;  %v2704_v13 = vpack.c.bf16 %v956_v0, %v955_v12 }
  0x80   : > { %2720 = vmatpush3.bf16.msra.mxu1 %v2692_v32  ;;  %2697 = vmatprep.subr.bf16.mxu0 %v2696_v47 }
  0x81   : > { %2071 = vmatmul.mubr.msk.f32.gmra.mrb[42].mxu0 %vm250_vm0, %v3363_v15  ;;  %2713 = vmatprep.subr.bf16.mxu1 %v2696_v47  ;;  %v1972_v15 = vld [vmem:[%s3035_s8 + $0xc1] sm:$0xff] }
  0x82   : > { %2103 = vmatmul.mubr.msk.f32.gmra.mrb[42].mxu1 %vm250_vm0, %v3366_v20  ;;  %2072 = vmatprep.mubr.msk.f32.mxu0 %vm250_vm0, %v3414_v39  ;;  %v1973_v20 = vld [vmem:[%s3035_s8 + $0xc9] sm:$0xff] }
  0x83   : > { %2104 = vmatprep.mubr.msk.f32.mxu1 %vm250_vm0, %v3436_v43  ;;  %2699 = vmatpush3.bf16.msra.mxu0 %v2696_v47 }
  0x84   : > { %2721 = vmatpush3.bf16.msra.mxu1 %v2696_v47  ;;  %2701 = vmatprep.subr.bf16.mxu0 %v2700_v62 }
  0x85   : > { %2073 = vmatmul.mubr.msk.f32.gmra.mrb[44].mxu0 %vm250_vm0, %v3398_v34  ;;  %2714 = vmatprep.subr.bf16.mxu1 %v2700_v62 }
  0x86   : > { %2105 = vmatmul.mubr.msk.f32.gmra.mrb[44].mxu1 %vm250_vm0, %v3401_v36  ;;  %2074 = vmatprep.mubr.msk.f32.mxu0 %vm250_vm0, %v3433_v42 }
  0x87   : > { %2106 = vmatprep.mubr.msk.f32.mxu1 %vm250_vm0, %v3453_v49  ;;  %2703 = vmatpush3.bf16.msra.mxu0 %v2700_v62 }
  0x88   : > { %2722 = vmatpush3.bf16.msra.mxu1 %v2700_v62  ;;  %2705 = vmatprep.subr.bf16.mxu0 %v2704_v13 }
  0x89   : > { %2075 = vmatmul.mubr.msk.f32.gmra.mrb[46].mxu0 %vm250_vm0, %v3417_v40  ;;  %2715 = vmatprep.subr.bf16.mxu1 %v2704_v13 }
  0x8a   : > { %2107 = vmatmul.mubr.msk.f32.gmra.mrb[46].mxu1 %vm250_vm0, %v3420_v41  ;;  %2076 = vmatprep.mubr.msk.f32.mxu0 %vm250_vm0, %v3450_v45 }
  0x8b   : > { %2108 = vmatprep.mubr.msk.f32.mxu1 %vm250_vm0, %v3470_v52  ;;  %2707 = vmatpush3.bf16.msra.mxu0 %v2704_v13 }
  0x8c   : > { %2723 = vmatpush3.bf16.msra.mxu1 %v2704_v13 }
  0x8d   : > { %2077 = vmatmul.mubr.msk.f32.gmra.mrb[48].mxu0 %vm250_vm0, %v3436_v43 }
  0x8e   : > { %2109 = vmatmul.mubr.msk.f32.gmra.mrb[48].mxu1 %vm250_vm0, %v3439_v44  ;;  %2078 = vmatprep.mubr.msk.f32.mxu0 %vm250_vm0, %v3467_v51 }
  0x8f   : > { %2110 = vmatprep.mubr.msk.f32.mxu1 %vm250_vm0, %v3487_v55 }
  0x91   : > { %2079 = vmatmul.mubr.msk.f32.gmra.mrb[50].mxu0 %vm250_vm0, %v3453_v49 }
  0x92   : > { %2111 = vmatmul.mubr.msk.f32.gmra.mrb[50].mxu1 %vm250_vm0, %v3456_v50  ;;  %2080 = vmatprep.mubr.msk.f32.mxu0 %vm250_vm0, %v3484_v54 }
  0x93   : > { %2112 = vmatprep.mubr.msk.f32.mxu1 %vm250_vm0, %v3504_v58 }
  0x95   : > { %2081 = vmatmul.mubr.msk.f32.gmra.mrb[52].mxu0 %vm250_vm0, %v3470_v52 }
  0x96   : > { %2113 = vmatmul.mubr.msk.f32.gmra.mrb[52].mxu1 %vm250_vm0, %v3473_v53  ;;  %2082 = vmatprep.mubr.msk.f32.mxu0 %vm250_vm0, %v3501_v57 }
  0x97   : > { %2114 = vmatprep.mubr.msk.f32.mxu1 %vm250_vm0, %v3521_v63 }
  0x99   : > { %2083 = vmatmul.mubr.msk.f32.gmra.mrb[54].mxu0 %vm250_vm0, %v3487_v55 }
  0x9a   : > { %2115 = vmatmul.mubr.msk.f32.gmra.mrb[54].mxu1 %vm250_vm0, %v3490_v56  ;;  %2084 = vmatprep.mubr.msk.f32.mxu0 %vm250_vm0, %v3518_v60 }
  0x9b   : > { %2116 = vmatprep.mubr.msk.f32.mxu1 %vm250_vm0, %v1972_v15 }
  0x9d   : > { %2085 = vmatmul.mubr.msk.f32.gmra.mrb[56].mxu0 %vm250_vm0, %v3504_v58 }
  0x9e   : > { %2117 = vmatmul.mubr.msk.f32.gmra.mrb[56].mxu1 %vm250_vm0, %v3507_v59  ;;  %2086 = vmatprep.mubr.msk.f32.mxu0 %vm250_vm0, %v3535_v4 }
  0x9f   : > { %2118 = vmatprep.mubr.msk.f32.mxu1 %vm250_vm0, %v1973_v20 }
  0xa1   : > { %2087 = vmatmul.mubr.msk.f32.gmra.mrb[58].mxu0 %vm250_vm0, %v3521_v63 }
  0xa2   : > { %2119 = vmatmul.mubr.msk.f32.gmra.mrb[58].mxu1 %vm250_vm0, %v3524_v1  ;;  %2088 = vmatprep.mubr.msk.f32.mxu0 %vm250_vm0, %v1942_v21 }
  0xa3   : > { %2120 = vmatprep.mubr.msk.f32.mxu1 %vm250_vm0, %v1974_v22 }
  0xa5   : > { %2089 = vmatmul.mubr.msk.f32.gmra.mrb[60].mxu0 %vm250_vm0, %v1972_v15 }
  0xa6   : > { %2121 = vmatmul.mubr.msk.f32.gmra.mrb[60].mxu1 %vm250_vm0, %v1958_v23  ;;  %2090 = vmatprep.mubr.msk.f32.mxu0 %vm250_vm0, %v1943_v24 }
  0xa7   : > { %2122 = vmatprep.mubr.msk.f32.mxu1 %vm250_vm0, %v1975_v25 }
  0xa9   : > { %2091 = vmatmul.mubr.msk.f32.gmra.mrb[62].mxu0 %vm250_vm0, %v1973_v20 }
  0xaa   : > { %2123 = vmatmul.mubr.msk.f32.gmra.mrb[62].mxu1 %vm250_vm0, %v1959_v26  ;;  %2524 = vmatprep.mubr.msk.f32.mxu0 %vm250_vm0, %v3278_v46  ;;  %v1990_v46 = vld [vmem:[%s3035_s8 + $0xda] sm:$0xff] }
  0xab   : > { %2536 = vmatprep.mubr.msk.f32.mxu1 %vm250_vm0, %v3484_v54 }
  0xad   : > { %2525 = vmatmul.mubr.msk.f32.vlgmr.msra.gmra.mrb[64].mxu0 %vm250_vm0, %v3319_v61  ;;  %v1991_v61 = vld [vmem:[%s3035_s8 + $0xe2] sm:$0xff]  ;;  %s1893_s8 = sshll.u32 %s3945_s15, 4 }
  0xae   : > { %2537 = vmatmul.mubr.msk.f32.vlgmr.msra.gmra.mrb[64].mxu1 %vm250_vm0, %v3501_v57  ;;  %2527 = vmatprep.mubr.msk.f32.mxu0 %vm250_vm0, %v3360_v14  ;;  %s231_s28 = sadd.s32 %s1894_s26, %s1893_s8 }
  0xaf   : > { %2539 = vmatprep.mubr.msk.f32.mxu1 %vm250_vm0, %v3518_v60  ;;  %s1895_s15 = sshll.u32 %s231_s28, 3 }
  0xb0   : > { %s3844_s30 = scalar_lea.vmem %s3931_s4, %s1895_s15 }
  0xb1   : > { %2528 = vmatmul.mubr.msk.f32.gmra.mrb[66].mxu0 %vm250_vm0, %v3395_v30 }
  0xb2   : > { %2540 = vmatmul.mubr.msk.f32.gmra.mrb[66].mxu1 %vm250_vm0, %v3535_v4  ;;  %2530 = vmatprep.mubr.msk.f32.mxu0 %vm250_vm0, %v3414_v39 }
  0xb3   : > { %2542 = vmatprep.mubr.msk.f32.mxu1 %vm250_vm0, %v1942_v21 }
  0xb5   : > { %2531 = vmatmul.mubr.msk.f32.gmra.mrb[68].mxu0 %vm250_vm0, %v3433_v42 }
  0xb6   : > { %2543 = vmatmul.mubr.msk.f32.gmra.mrb[68].mxu1 %vm250_vm0, %v1943_v24  ;;  %2533 = vmatprep.mubr.msk.f32.mxu0 %vm250_vm0, %v3450_v45 }
  0xb7   : > { %2545 = vmatprep.mubr.msk.f32.mxu1 %vm250_vm0, %v1990_v46 }
  0xb9   : > { %2534 = vmatmul.mubr.msk.f32.gmra.mrb[70].mxu0 %vm250_vm0, %v3467_v51 }
  0xba   : > { %2546 = vmatmul.mubr.msk.f32.gmra.mrb[70].mxu1 %vm250_vm0, %v1991_v61 }
 0x100   : > { %v2172_v14 = vpop.f32.mrb[0].mxu0 }
 0x101   : > { %v2252_v27 = vpop.f32.mrb[0].mxu1  ;;  %v2173_v28 = vpop.f32.mrb[1].mxu0 }
 0x102   : > { %v2174_v29 = vadd.f32 %v2173_v28, %v2172_v14  ;;  %v2253_v17 = vpop.f32.mrb[1].mxu1 }
 0x103   : > { %v2254_v30 = vadd.f32 %v2253_v17, %v2252_v27 }
 0x104   : > { %v2175_v34 = vpop.f32.mrb[2].mxu0 }
 0x105   : > { %v3741_v35 = vadd.f32 %v2254_v30, %v2174_v29  ;;  %v2255_v36 = vpop.f32.mrb[2].mxu1  ;;  %v2176_v37 = vpop.f32.mrb[3].mxu0 }
 0x106   : > { %v2177_v38 = vadd.f32 %v2176_v37, %v2175_v34  ;;  %v2256_v39 = vpop.f32.mrb[3].mxu1 }
 0x107   : > { %v2257_v40 = vadd.f32 %v2256_v39, %v2255_v36 }
 0x108   : > { %v2178_v41 = vpop.f32.mrb[4].mxu0 }
 0x109   : > { %v3743_v42 = vadd.f32 %v2257_v40, %v2177_v38  ;;  %v2258_v43 = vpop.f32.mrb[4].mxu1  ;;  %v2179_v44 = vpop.f32.mrb[5].mxu0 }
 0x10a   : > { %v2180_v45 = vadd.f32 %v2179_v44, %v2178_v41  ;;  %v2259_v49 = vpop.f32.mrb[5].mxu1 }
 0x10b   : > { %v2260_v50 = vadd.f32 %v2259_v49, %v2258_v43 }
 0x10c   : > { %v2181_v51 = vpop.f32.mrb[6].mxu0 }
 0x10d   : > { %v3745_v52 = vadd.f32 %v2260_v50, %v2180_v45  ;;  %v2261_v53 = vpop.f32.mrb[6].mxu1  ;;  %v2182_v54 = vpop.f32.mrb[7].mxu0 }
 0x10e   : > { %v2183_v55 = vadd.f32 %v2182_v54, %v2181_v51  ;;  %v2262_v56 = vpop.f32.mrb[7].mxu1 }
 0x10f   : > { %v2263_v57 = vadd.f32 %v2262_v56, %v2261_v53 }
 0x110   : > { %v2184_v58 = vpop.f32.mrb[8].mxu0 }
 0x111   : > { %v3747_v59 = vadd.f32 %v2263_v57, %v2183_v55  ;;  %v2264_v60 = vpop.f32.mrb[8].mxu1  ;;  %v2185_v63 = vpop.f32.mrb[9].mxu0 }
 0x112   : > { %v2186_v1 = vadd.f32 %v2185_v63, %v2184_v58  ;;  %v2265_v4 = vpop.f32.mrb[9].mxu1 }
 0x113   : > { %v2266_v5 = vadd.f32 %v2265_v4, %v2264_v60 }
 0x114   : > { %v2187_v6 = vpop.f32.mrb[10].mxu0 }
 0x115   : > { %v3749_v7 = vadd.f32 %v2266_v5, %v2186_v1  ;;  %v2267_v8 = vpop.f32.mrb[10].mxu1  ;;  %v2188_v9 = vpop.f32.mrb[11].mxu0 }
 0x116   : > { %v2189_v2 = vadd.f32 %v2188_v9, %v2187_v6  ;;  %v2268_v3 = vpop.f32.mrb[11].mxu1 }
 0x117   : > { %v2269_v16 = vadd.f32 %v2268_v3, %v2267_v8 }
 0x118   : > { %v2190_v18 = vpop.f32.mrb[12].mxu0 }
 0x119   : > { %v3751_v31 = vadd.f32 %v2269_v16, %v2189_v2  ;;  %v2270_v19 = vpop.f32.mrb[12].mxu1  ;;  %v2191_v32 = vpop.f32.mrb[13].mxu0 }
 0x11a   : > { %v2192_v10 = vadd.f32 %v2191_v32, %v2190_v18  ;;  %v2271_v33 = vpop.f32.mrb[13].mxu1 }
 0x11b   : > { %v2272_v47 = vadd.f32 %v2271_v33, %v2270_v19 }
 0x11c   : > { %v2193_v11 = vpop.f32.mrb[14].mxu0 }
 0x11d   : > { %v3753_v48 = vadd.f32 %v2272_v47, %v2192_v10  ;;  %v2273_v62 = vpop.f32.mrb[14].mxu1  ;;  %v2194_v12 = vpop.f32.mrb[15].mxu0 }
 0x11e   : > { %v2195_v0 = vadd.f32 %v2194_v12, %v2193_v11  ;;  %v2274_v13 = vpop.f32.mrb[15].mxu1 }
 0x11f   : > { %v2275_v15 = vadd.f32 %v2274_v13, %v2273_v62 }
 0x120   : > { %v2196_v20 = vpop.f32.mrb[16].mxu0 }
 0x121   : > { %v3755_v21 = vadd.f32 %v2275_v15, %v2195_v0  ;;  %v2276_v22 = vpop.f32.mrb[16].mxu1  ;;  %v2197_v23 = vpop.f32.mrb[17].mxu0 }
 0x122   : > { %v2198_v24 = vadd.f32 %v2197_v23, %v2196_v20  ;;  %v2277_v25 = vpop.f32.mrb[17].mxu1 }
 0x123   : > { %v2278_v26 = vadd.f32 %v2277_v25, %v2276_v22 }
 0x124   : > { %v2199_v46 = vpop.f32.mrb[18].mxu0 }
 0x125   : > { %v3757_v61 = vadd.f32 %v2278_v26, %v2198_v24  ;;  %v2279_v14 = vpop.f32.mrb[18].mxu1  ;;  %v2200_v27 = vpop.f32.mrb[19].mxu0 }
 0x126   : > { %v2201_v28 = vadd.f32 %v2200_v27, %v2199_v46  ;;  %v2280_v29 = vpop.f32.mrb[19].mxu1 }
 0x127   : > { %v2281_v17 = vadd.f32 %v2280_v29, %v2279_v14 }
 0x128   : > { %v2202_v30 = vpop.f32.mrb[20].mxu0 }
 0x129   : > { %v3759_v34 = vadd.f32 %v2281_v17, %v2201_v28  ;;  %v2282_v36 = vpop.f32.mrb[20].mxu1  ;;  %v2203_v37 = vpop.f32.mrb[21].mxu0 }
 0x12a   : > { %v2204_v38 = vadd.f32 %v2203_v37, %v2202_v30  ;;  %v2283_v39 = vpop.f32.mrb[21].mxu1 }
 0x12b   : > { %v2284_v40 = vadd.f32 %v2283_v39, %v2282_v36 }
 0x12c   : > { %v2205_v41 = vpop.f32.mrb[22].mxu0 }
 0x12d   : > { %v3761_v43 = vadd.f32 %v2284_v40, %v2204_v38  ;;  %v2285_v44 = vpop.f32.mrb[22].mxu1  ;;  %v2206_v45 = vpop.f32.mrb[23].mxu0 }
 0x12e   : > { %v2207_v49 = vadd.f32 %v2206_v45, %v2205_v41  ;;  %v2286_v50 = vpop.f32.mrb[23].mxu1 }
 0x12f   : > { %v2287_v51 = vadd.f32 %v2286_v50, %v2285_v44 }
 0x130   : > { %v2208_v53 = vpop.f32.mrb[24].mxu0 }
 0x131   : > { %v3763_v54 = vadd.f32 %v2287_v51, %v2207_v49  ;;  %v2288_v55 = vpop.f32.mrb[24].mxu1  ;;  %v2209_v56 = vpop.f32.mrb[25].mxu0 }
 0x132   : > { %v2210_v57 = vadd.f32 %v2209_v56, %v2208_v53  ;;  %v2289_v58 = vpop.f32.mrb[25].mxu1 }
 0x133   : > { %v2290_v60 = vadd.f32 %v2289_v58, %v2288_v55 }
 0x134   : > { %v2211_v63 = vpop.f32.mrb[26].mxu0 }
 0x135   : > { %v3765_v1 = vadd.f32 %v2290_v60, %v2210_v57  ;;  %v2291_v4 = vpop.f32.mrb[26].mxu1  ;;  %v2212_v5 = vpop.f32.mrb[27].mxu0 }
 0x136   : > { %v2213_v6 = vadd.f32 %v2212_v5, %v2211_v63  ;;  %v2292_v8 = vpop.f32.mrb[27].mxu1 }
 0x137   : > { %v2293_v9 = vadd.f32 %v2292_v8, %v2291_v4 }
 0x138   : > { %v2214_v2 = vpop.f32.mrb[28].mxu0 }
 0x139   : > { %v3767_v3 = vadd.f32 %v2293_v9, %v2213_v6  ;;  %v2294_v16 = vpop.f32.mrb[28].mxu1  ;;  %v2215_v18 = vpop.f32.mrb[29].mxu0 }
 0x13a   : > { %v2216_v19 = vadd.f32 %v2215_v18, %v2214_v2  ;;  %v2295_v32 = vpop.f32.mrb[29].mxu1 }
 0x13b   : > { %v2296_v10 = vadd.f32 %v2295_v32, %v2294_v16 }
 0x13c   : > { %v2217_v33 = vpop.f32.mrb[30].mxu0 }
 0x13d   : > { %v3769_v47 = vadd.f32 %v2296_v10, %v2216_v19  ;;  %v2297_v11 = vpop.f32.mrb[30].mxu1  ;;  %v2218_v62 = vpop.f32.mrb[31].mxu0 }
 0x13e   : > { %v2219_v12 = vadd.f32 %v2218_v62, %v2217_v33  ;;  %v2298_v0 = vpop.f32.mrb[31].mxu1 }
 0x13f   : > { %v2299_v13 = vadd.f32 %v2298_v0, %v2297_v11 }
 0x140   : > { %v2332_v15 = vpop.f32.mrb[32].mxu0 }
 0x141   : > { %v3771_v20 = vadd.f32 %v2299_v13, %v2219_v12  ;;  %v2412_v22 = vpop.f32.mrb[32].mxu1  ;;  %v2333_v23 = vpop.f32.mrb[33].mxu0 }
 0x142   : > { %v2334_v24 = vadd.f32 %v2333_v23, %v2332_v15  ;;  %v2413_v25 = vpop.f32.mrb[33].mxu1 }
 0x143   : > { %v2414_v26 = vadd.f32 %v2413_v25, %v2412_v22 }
 0x144   : > { %v1314_v46 = vadd.f32 %v2334_v24, %v3741_v35  ;;  %v2335_v14 = vpop.f32.mrb[34].mxu0 }
 0x145   : > { %v2415_v27 = vpop.f32.mrb[34].mxu1  ;;  %v2336_v28 = vpop.f32.mrb[35].mxu0 }
 0x146   : > { %v2337_v29 = vadd.f32 %v2336_v28, %v2335_v14  ;;  %v2416_v17 = vpop.f32.mrb[35].mxu1  ;;  %v3774_v30 = vadd.f32 %v2414_v26, %v1314_v46 }
 0x147   : > { %v2417_v36 = vadd.f32 %v2416_v17, %v2415_v27 }
 0x148   : > { %v1319_v37 = vadd.f32 %v2337_v29, %v3743_v42  ;;  %v2338_v38 = vpop.f32.mrb[36].mxu0 }
 0x149   : > { %v2418_v39 = vpop.f32.mrb[36].mxu1  ;;  %v2339_v40 = vpop.f32.mrb[37].mxu0 }
 0x14a   : > { %v2340_v41 = vadd.f32 %v2339_v40, %v2338_v38  ;;  %v2419_v44 = vpop.f32.mrb[37].mxu1  ;;  %v3777_v45 = vadd.f32 %v2417_v36, %v1319_v37 }
 0x14b   : > { %v2420_v49 = vadd.f32 %v2419_v44, %v2418_v39 }
 0x14c   : > { %v1324_v35 = vadd.f32 %v2340_v41, %v3745_v52  ;;  %v2341_v50 = vpop.f32.mrb[38].mxu0 }
 0x14d   : > { %v2421_v51 = vpop.f32.mrb[38].mxu1  ;;  %v2342_v53 = vpop.f32.mrb[39].mxu0 }
 0x14e   : > { %v2343_v55 = vadd.f32 %v2342_v53, %v2341_v50  ;;  %v2422_v56 = vpop.f32.mrb[39].mxu1  ;;  %v3780_v57 = vadd.f32 %v2420_v49, %v1324_v35 }
 0x14f   : > { %v2423_v58 = vadd.f32 %v2422_v56, %v2421_v51 }
 0x150   : > { %v1329_v42 = vadd.f32 %v2343_v55, %v3747_v59  ;;  %v2344_v60 = vpop.f32.mrb[40].mxu0 }
 0x151   : > { %v2424_v63 = vpop.f32.mrb[40].mxu1  ;;  %v2345_v4 = vpop.f32.mrb[41].mxu0 }
 0x152   : > { %v2346_v5 = vadd.f32 %v2345_v4, %v2344_v60  ;;  %v2425_v6 = vpop.f32.mrb[41].mxu1  ;;  %v3783_v8 = vadd.f32 %v2423_v58, %v1329_v42 }
 0x153   : > { %v2426_v9 = vadd.f32 %v2425_v6, %v2424_v63 }
 0x154   : > { %v1334_v52 = vadd.f32 %v2346_v5, %v3749_v7  ;;  %v2347_v2 = vpop.f32.mrb[42].mxu0 }
 0x155   : > { %v2427_v16 = vpop.f32.mrb[42].mxu1  ;;  %v2348_v18 = vpop.f32.mrb[43].mxu0 }
 0x156   : > { %v2349_v19 = vadd.f32 %v2348_v18, %v2347_v2  ;;  %v2428_v32 = vpop.f32.mrb[43].mxu1  ;;  %v3786_v10 = vadd.f32 %v2426_v9, %v1334_v52 }
 0x157   : > { %v2429_v33 = vadd.f32 %v2428_v32, %v2427_v16 }
 0x158   : > { %v1339_v59 = vadd.f32 %v2349_v19, %v3751_v31  ;;  %v2350_v11 = vpop.f32.mrb[44].mxu0 }
 0x159   : > { %v2430_v62 = vpop.f32.mrb[44].mxu1  ;;  %v2351_v12 = vpop.f32.mrb[45].mxu0 }
 0x15a   : > { %v2352_v0 = vadd.f32 %v2351_v12, %v2350_v11  ;;  %v2431_v13 = vpop.f32.mrb[45].mxu1  ;;  %v3789_v15 = vadd.f32 %v2429_v33, %v1339_v59 }
 0x15b   : > { %v2432_v22 = vadd.f32 %v2431_v13, %v2430_v62 }
 0x15c   : > { %v1344_v7 = vadd.f32 %v2352_v0, %v3753_v48  ;;  %v2353_v23 = vpop.f32.mrb[46].mxu0 }
 0x15d   : > { %v2433_v24 = vpop.f32.mrb[46].mxu1  ;;  %v2354_v25 = vpop.f32.mrb[47].mxu0 }
 0x15e   : > { %v2355_v26 = vadd.f32 %v2354_v25, %v2353_v23  ;;  %v2434_v46 = vpop.f32.mrb[47].mxu1  ;;  %v3792_v14 = vadd.f32 %v2432_v22, %v1344_v7 }
 0x15f   : > { %v2435_v27 = vadd.f32 %v2434_v46, %v2433_v24 }
 0x160   : > { %v1349_v31 = vadd.f32 %v2355_v26, %v3755_v21  ;;  %v2356_v28 = vpop.f32.mrb[48].mxu0 }
 0x161   : > { %v2436_v29 = vpop.f32.mrb[48].mxu1  ;;  %v2357_v17 = vpop.f32.mrb[49].mxu0 }
 0x162   : > { %v2358_v36 = vadd.f32 %v2357_v17, %v2356_v28  ;;  %v2437_v37 = vpop.f32.mrb[49].mxu1  ;;  %v3795_v38 = vadd.f32 %v2435_v27, %v1349_v31 }
 0x163   : > { %v2438_v39 = vadd.f32 %v2437_v37, %v2436_v29 }
 0x164   : > { %v1354_v48 = vadd.f32 %v2358_v36, %v3757_v61  ;;  %v2359_v40 = vpop.f32.mrb[50].mxu0 }
 0x165   : > { %v2439_v41 = vpop.f32.mrb[50].mxu1  ;;  %v2360_v44 = vpop.f32.mrb[51].mxu0 }
 0x166   : > { %v2361_v49 = vadd.f32 %v2360_v44, %v2359_v40  ;;  %v2440_v35 = vpop.f32.mrb[51].mxu1  ;;  %v3798_v50 = vadd.f32 %v2438_v39, %v1354_v48 }
 0x167   : > { %v2441_v51 = vadd.f32 %v2440_v35, %v2439_v41 }
 0x168   : > { %v1359_v21 = vadd.f32 %v2361_v49, %v3759_v34  ;;  %v2362_v53 = vpop.f32.mrb[52].mxu0  ;;  %v3820_v49 = vld [vmem:[%s3929_s2] ss:$0 sm:$0xff] }
 0x169   : > { %v2442_v55 = vpop.f32.mrb[52].mxu1  ;;  %v2363_v56 = vpop.f32.mrb[53].mxu0 }
 0x16a   : > { %v2364_v58 = vadd.f32 %v2363_v56, %v2362_v53  ;;  %v2443_v42 = vpop.f32.mrb[53].mxu1  ;;  %v1504_v60 = vadd.f32 %v2441_v51, %v1359_v21  ;;  %v3826_v21 = vld [vmem:[%s3930_s3] ss:$0 sm:$0xff] }
 0x16b   : > { %v2444_v63 = vadd.f32 %v2443_v42, %v2442_v55 }
 0x16c   : > { %v1364_v4 = vadd.f32 %v2364_v58, %v3761_v43  ;;  %v2365_v61 = vpop.f32.mrb[54].mxu0 }
 0x16d   : > { %v2445_v5 = vpop.f32.mrb[54].mxu1  ;;  %v2366_v6 = vpop.f32.mrb[55].mxu0 }
 0x16e   : > { %v2367_v9 = vadd.f32 %v2366_v6, %v2365_v61  ;;  %v2446_v52 = vpop.f32.mrb[55].mxu1  ;;  %v3802_v2 = vadd.f32 %v2444_v63, %v1364_v4 }
 0x16f   : > { %v2447_v16 = vadd.f32 %v2446_v52, %v2445_v5 }
 0x170   : > { %v1369_v18 = vadd.f32 %v2367_v9, %v3763_v54  ;;  %v2368_v34 = vpop.f32.mrb[56].mxu0 }
 0x171   : > { %v2448_v19 = vpop.f32.mrb[56].mxu1  ;;  %v2369_v32 = vpop.f32.mrb[57].mxu0 }
 0x172   : > { %v2370_v33 = vadd.f32 %v2369_v32, %v2368_v34  ;;  %v2449_v59 = vpop.f32.mrb[57].mxu1  ;;  %v1514_v11 = vadd.f32 %v2447_v16, %v1369_v18 }
 0x173   : > { %v2450_v62 = vadd.f32 %v2449_v59, %v2448_v19 }
 0x174   : > { %v1374_v12 = vadd.f32 %v2370_v33, %v3765_v1  ;;  %v2371_v43 = vpop.f32.mrb[58].mxu0 }
 0x175   : > { %v2451_v0 = vpop.f32.mrb[58].mxu1  ;;  %v2372_v13 = vpop.f32.mrb[59].mxu0 }
 0x176   : > { %v2373_v22 = vadd.f32 %v2372_v13, %v2371_v43  ;;  %v2452_v7 = vpop.f32.mrb[59].mxu1  ;;  %v3806_v23 = vadd.f32 %v2450_v62, %v1374_v12 }
 0x177   : > { %v2453_v24 = vadd.f32 %v2452_v7, %v2451_v0 }
 0x178   : > { %v1379_v54 = vadd.f32 %v2373_v22, %v3767_v3  ;;  %v2374_v25 = vpop.f32.mrb[60].mxu0 }
 0x179   : > { %v2454_v26 = vpop.f32.mrb[60].mxu1  ;;  %v2375_v46 = vpop.f32.mrb[61].mxu0 }
 0x17a   : > { %v2376_v27 = vadd.f32 %v2375_v46, %v2374_v25  ;;  %v2455_v31 = vpop.f32.mrb[61].mxu1  ;;  %v3809_v28 = vadd.f32 %v2453_v24, %v1379_v54 }
 0x17b   : > { %v2456_v1 = vadd.f32 %v2455_v31, %v2454_v26 }
 0x17c   : > { %v1384_v29 = vadd.f32 %v2376_v27, %v3769_v47  ;;  %v2377_v17 = vpop.f32.mrb[62].mxu0 }
 0x17d   : > { %v2457_v36 = vpop.f32.mrb[62].mxu1  ;;  %v2378_v37 = vpop.f32.mrb[63].mxu0 }
 0x17e   : > { %v2379_v39 = vadd.f32 %v2378_v37, %v2377_v17  ;;  %v2458_v48 = vpop.f32.mrb[63].mxu1  ;;  %v3814_v40 = vadd.f32 %v2456_v1, %v1384_v29 }
 0x17f   : > { %v2459_v3 = vadd.f32 %v2458_v48, %v2457_v36 }
 0x180   : > { %v1389_v41 = vadd.f32 %v2379_v39, %v3771_v20  ;;  %v2526_v44 = vpop.f32.mrb[64].mxu0 }
 0x181   : > { %v1609_v47 = vadd.f32 %v2526_v44, %v3777_v45  ;;  %v2538_v35 = vpop.f32.mrb[64].mxu1  ;;  %v1603_v51 = vpop.f32.mrb[65].mxu0 }
 0x182   : > { %v1649_v53 = vadd.f32 %v2538_v35, %v1504_v60  ;;  %v1604_v55 = vadd.f32 %v1603_v51, %v3774_v30  ;;  %v1643_v20 = vpop.f32.mrb[65].mxu1  ;;  %v3829_v56 = vadd.f32 %v2459_v3, %v1389_v41 }
 0x183   : > { %v1690_v58 = vmul.f32 %v3820_v49, %v1609_v47  ;;  %v1644_v42 = vadd.f32 %v1643_v20, %v3798_v50 }
 0x184   : > { %v1698_v45 = vmul.f32 %v3820_v49, %v1649_v53  ;;  %v1689_v63 = vmul.f32 %v3820_v49, %v1604_v55  ;;  %v2529_v4 = vpop.f32.mrb[66].mxu0 }
 0x185   : > { %v1713_v61 = vadd.f32 %v3826_v21, %v1690_v58  ;;  %v1697_v5 = vmul.f32 %v3820_v49, %v1644_v42  ;;  %v1619_v60 = vadd.f32 %v2529_v4, %v3783_v8  ;;  %v2541_v30 = vpop.f32.mrb[66].mxu1  ;;  %v1613_v6 = vpop.f32.mrb[67].mxu0 }
 0x186   : > { %v1721_v9 = vadd.f32 %v3826_v21, %v1698_v45  ;;  %v1712_v52 = vadd.f32 %v3826_v21, %v1689_v63  ;;  %v1659_v16 = vadd.f32 %v2541_v30, %v1514_v11  ;;  %v1614_v50 = vadd.f32 %v1613_v6, %v3780_v57  ;;  %v1653_v18 = vpop.f32.mrb[67].mxu1 }
 0x187   : > { %vm1729_vm1 = vcmp.ge.f32.partialorder %v1713_v61, 0.0  ;;  %v1745_v34 = vmul.f32 0.1, %v1713_v61  ;;  %v1720_v8 = vadd.f32 %v3826_v21, %v1697_v5  ;;  %v1692_v19 = vmul.f32 %v3820_v49, %v1619_v60 }
 0x188   : > { %vm1737_vm2 = vcmp.ge.f32.partialorder %v1721_v9, 0.0  ;;  %v1753_v32 = vmul.f32 0.1, %v1721_v9  ;;  %vm1728_vm3 = vcmp.ge.f32.partialorder %v1712_v52, 0.0  ;;  %v1744_v33 = vmul.f32 0.1, %v1712_v52 }
 0x189   : > { %v1761_v57 = vsel %vm1729_vm1, %v1713_v61, %v1745_v34  ;;  %vm1736_vm4 = vcmp.ge.f32.partialorder %v1720_v8, 0.0  ;;  %v1752_v59 = vmul.f32 0.1, %v1720_v8  ;;  %v1715_v11 = vadd.f32 %v3826_v21, %v1692_v19  ;;  %v2532_v62 = vpop.f32.mrb[68].mxu0  ;;  %v2544_v12 = vpop.f32.mrb[68].mxu1 }
 0x18a   : > { %1777 = vst.msk [vmem:[%s3844_s30 + $0x8] sm:$0xff] %vm250_vm0, %v1761_v57  ;;  %v1769_v43 = vsel %vm1737_vm2, %v1721_v9, %v1753_v32  ;;  %v1760_v0 = vsel %vm1728_vm3, %v1712_v52, %v1744_v33  ;;  %v1700_v13 = vmul.f32 %v3820_v49, %v1659_v16  ;;  %v1691_v22 = vmul.f32 %v3820_v49, %v1614_v50  ;;  %v1623_v7 = vpop.f32.mrb[69].mxu0  ;;  %v1663_v24 = vpop.f32.mrb[69].mxu1 }
 0x18b   : > { %1785 = vst.msk [vmem:[%s3844_s30 + $0x48] sm:$0xff] %vm250_vm0, %v1769_v43  ;;  %1776 = vst.msk [vmem:[%s3844_s30] sm:$0xff] %vm250_vm0, %v1760_v0  ;;  %v1768_v54 = vsel %vm1736_vm4, %v1720_v8, %v1752_v59  ;;  %vm1731_vm5 = vcmp.ge.f32.partialorder %v1715_v11, 0.0  ;;  %v1747_v25 = vmul.f32 0.1, %v1715_v11  ;;  %v1654_v26 = vadd.f32 %v1653_v18, %v3802_v2 }
 0x18c   : > { %1784 = vst.msk [vmem:[%s3844_s30 + $0x40] sm:$0xff] %vm250_vm0, %v1768_v54  ;;  %v1723_v46 = vadd.f32 %v3826_v21, %v1700_v13  ;;  %v1714_v27 = vadd.f32 %v3826_v21, %v1691_v22  ;;  %v1629_v31 = vadd.f32 %v2532_v62, %v3789_v15  ;;  %v1669_v1 = vadd.f32 %v2544_v12, %v3809_v28  ;;  %v2535_v29 = vpop.f32.mrb[70].mxu0 }
 0x18d   : > { %v1763_v17 = vsel %vm1731_vm5, %v1715_v11, %v1747_v25  ;;  %v1699_v36 = vmul.f32 %v3820_v49, %v1654_v26  ;;  %v1624_v37 = vadd.f32 %v1623_v7, %v3786_v10  ;;  %v1664_v39 = vadd.f32 %v1663_v24, %v3806_v23  ;;  %v2547_v48 = vpop.f32.mrb[70].mxu1  ;;  %v1633_v2 = vpop.f32.mrb[71].mxu0 }
 0x18e   : > { %1779 = vst.msk [vmem:[%s3844_s30 + $0x18] sm:$0xff] %vm250_vm0, %v1763_v17  ;;  %vm1739_vm6 = vcmp.ge.f32.partialorder %v1723_v46, 0.0  ;;  %v1755_v3 = vmul.f32 0.1, %v1723_v46  ;;  %vm1730_vm7 = vcmp.ge.f32.partialorder %v1714_v27, 0.0  ;;  %v1694_v41 = vmul.f32 %v3820_v49, %v1629_v31  ;;  %v1673_v47 = vpop.f32.mrb[71].mxu1 }
 0x18f   : > { %v1746_v15 = vmul.f32 0.1, %v1714_v27  ;;  %v1722_v28 = vadd.f32 %v3826_v21, %v1699_v36  ;;  %v1702_v44 = vmul.f32 %v3820_v49, %v1669_v1  ;;  %v1693_v10 = vmul.f32 %v3820_v49, %v1624_v37 }
 0x190   : > { %v1771_v23 = vsel %vm1739_vm6, %v1723_v46, %v1755_v3  ;;  %v1701_v51 = vmul.f32 %v3820_v49, %v1664_v39  ;;  %v1639_v53 = vadd.f32 %v2535_v29, %v3795_v38  ;;  %v1717_v20 = vadd.f32 %v3826_v21, %v1694_v41 }
 0x191   : > { %v1762_v35 = vsel %vm1730_vm7, %v1714_v27, %v1746_v15  ;;  %1787 = vst.msk [vmem:[%s3844_s30 + $0x58] sm:$0xff] %vm250_vm0, %v1771_v23  ;;  %vm1738_vm8 = vcmp.ge.f32.partialorder %v1722_v28, 0.0  ;;  %v1754_v55 = vmul.f32 0.1, %v1722_v28  ;;  %v1725_v58 = vadd.f32 %v3826_v21, %v1702_v44 }
 0x192   : > { %1778 = vst.msk [vmem:[%s3844_s30 + $0x10] sm:$0xff] %vm250_vm0, %v1762_v35  ;;  %v1716_v42 = vadd.f32 %v3826_v21, %v1693_v10  ;;  %v1724_v45 = vadd.f32 %v3826_v21, %v1701_v51  ;;  %v1696_v63 = vmul.f32 %v3820_v49, %v1639_v53  ;;  %v1679_v4 = vadd.f32 %v2547_v48, %v3829_v56 }
 0x193   : > { %v1770_v38 = vsel %vm1738_vm8, %v1722_v28, %v1754_v55  ;;  %vm1733_vm9 = vcmp.ge.f32.partialorder %v1717_v20, 0.0  ;;  %v1749_v61 = vmul.f32 0.1, %v1717_v20  ;;  %vm1741_vm10 = vcmp.ge.f32.partialorder %v1725_v58, 0.0 }
 0x194   : > { %1786 = vst.msk [vmem:[%s3844_s30 + $0x50] sm:$0xff] %vm250_vm0, %v1770_v38  ;;  %v1757_v5 = vmul.f32 0.1, %v1725_v58  ;;  %vm1732_vm11 = vcmp.ge.f32.partialorder %v1716_v42, 0.0  ;;  %v1748_v60 = vmul.f32 0.1, %v1716_v42  ;;  %v1719_v9 = vadd.f32 %v3826_v21, %v1696_v63 }
 0x195   : > { %vm1740_vm12 = vcmp.ge.f32.partialorder %v1724_v45, 0.0  ;;  %v1765_v30 = vsel %vm1733_vm9, %v1717_v20, %v1749_v61  ;;  %v1756_v6 = vmul.f32 0.1, %v1724_v45  ;;  %v1704_v52 = vmul.f32 %v3820_v49, %v1679_v4 }
 0x196   : > { %1781 = vst.msk [vmem:[%s3844_s30 + $0x28] sm:$0xff] %vm250_vm0, %v1765_v30  ;;  %v1773_v56 = vsel %vm1741_vm10, %v1725_v58, %v1757_v5  ;;  %v1764_v16 = vsel %vm1732_vm11, %v1716_v42, %v1748_v60  ;;  %v1634_v50 = vadd.f32 %v1633_v2, %v3792_v14  ;;  %v1674_v18 = vadd.f32 %v1673_v47, %v3814_v40 }
 0x197   : > { %1789 = vst.msk [vmem:[%s3844_s30 + $0x68] sm:$0xff] %vm250_vm0, %v1773_v56  ;;  %1780 = vst.msk [vmem:[%s3844_s30 + $0x20] sm:$0xff] %vm250_vm0, %v1764_v16  ;;  %v1772_v34 = vsel %vm1740_vm12, %v1724_v45, %v1756_v6  ;;  %vm1735_vm13 = vcmp.ge.f32.partialorder %v1719_v9, 0.0  ;;  %v1751_v8 = vmul.f32 0.1, %v1719_v9  ;;  %v1727_v19 = vadd.f32 %v3826_v21, %v1704_v52 }
 0x198   : > { %1788 = vst.msk [vmem:[%s3844_s30 + $0x60] sm:$0xff] %vm250_vm0, %v1772_v34  ;;  %v1695_v32 = vmul.f32 %v3820_v49, %v1634_v50  ;;  %v1703_v33 = vmul.f32 %v3820_v49, %v1674_v18 }
 0x199   : > { %v1767_v14 = vsel %vm1735_vm13, %v1719_v9, %v1751_v8  ;;  %vm1743_vm14 = vcmp.ge.f32.partialorder %v1727_v19, 0.0  ;;  %v1759_v40 = vmul.f32 0.1, %v1727_v19 }
 0x19a   : > { %1783 = vst.msk [vmem:[%s3844_s30 + $0x38] sm:$0xff] %vm250_vm0, %v1767_v14  ;;  %v1718_v57 = vadd.f32 %v3826_v21, %v1695_v32  ;;  %v1726_v59 = vadd.f32 %v3826_v21, %v1703_v33 }
 0x19b   : > { %v1775_v11 = vsel %vm1743_vm14, %v1727_v19, %v1759_v40 }
 0x19c   : > { %1791 = vst.msk [vmem:[%s3844_s30 + $0x78] sm:$0xff] %vm250_vm0, %v1775_v11  ;;  %vm1734_vm15 = vcmp.ge.f32.partialorder %v1718_v57, 0.0  ;;  %v1750_v62 = vmul.f32 0.1, %v1718_v57  ;;  %vm1742_vm1 = vcmp.ge.f32.partialorder %v1726_v59, 0.0 }
 0x19d   : > { %v1758_v12 = vmul.f32 0.1, %v1726_v59 }
 0x19e   : > { %v1766_v43 = vsel %vm1734_vm15, %v1718_v57, %v1750_v62 }
 0x19f   : > { %v1774_v0 = vsel %vm1742_vm1, %v1726_v59, %v1758_v12  ;;  %1782 = vst.msk [vmem:[%s3844_s30 + $0x30] sm:$0xff] %vm250_vm0, %v1766_v43 }
 0x1a0   : > { %1790 = vst.msk [vmem:[%s3844_s30 + $0x70] sm:$0xff] %vm250_vm0, %v1774_v0 }
 0x1a1 PF: > { %s14_s19 = sadd.s32 1, %s2804_s19   ;;  %s3932_s15 = smov %s2796_s17 }
 0x1a2   : > { %p11_p7 = scmp.ge.s32.totalorder %s14_s19, 6   ;;  %s3933_s16 = smov %s2800_s18 }
 0x1a3   : > { %s3934_s17 = smov %s3937_s20  ;;  %s3935_s18 = smov %s3941_s21 }
 0x1a4   :  { %13 = sbr.rel (!%p11_p7) target bundleno = 3 (0x3), region = 68 }

// kernel: decoder_forward.7
= control target key start
LH: loop header
LB: loop body
LE: loop exit
PB: predicated region body
PF: predicated region fallthrough
CT: control target
= control target key end

     0   :  { %s2831_s15 = smov 0   ;;  %s2833_s16 = smov 0   ;;  %s3911_s0 = inlined_call_operand.vmem [shape: f32[2,2,1,10,18,64], index: 0, kind: input, shape index: {}]   ;;  %s3912_s1 = inlined_call_operand.vmem [shape: f32[1152,128], index: 1, kind: input, shape index: {}]   ;;  %s3913_s2 = inlined_call_operand.vmem [shape: f32[1,128], index: 2, kind: input, shape index: {}]   ;;  %s3914_s3 = inlined_call_operand.vmem [shape: f32[1,128], index: 3, kind: input, shape index: {}]   ;;  %s3915_s4 = inlined_call_operand.vmem [shape: f32[2,2,8,16,128], index: 4, kind: output, shape index: {}]  }
   0x1   :  { %s2835_s17 = smov 0   ;;  %s2837_s18 = smov 0  }
   0x2   :  { %s2839_s19 = smov 0  }
   0x3 LB: > { %s23_s20 = sadd.s32 1, %s2796_s17  ;;  %s26_s21 = sadd.s32 1, %s2800_s18  ;;  %s2804_s19 = sphi %s2839_s19, %s14_s19   ;;  %s2800_s18 = sphi %s2837_s18, %s3919_s18   ;;  %s2796_s17 = sphi %s2835_s17, %s3918_s17   ;;  %s2792_s16 = sphi %s2833_s16, %s3917_s16   ;;  %s2788_s15 = sphi %s2831_s15, %s3916_s15  }
   0x4   : > { %p24_p0 = scmp.ge.s32.totalorder %s23_s20, 2  ;;  %p1891_p1 = scmp.ge.s32.totalorder %s2804_s19, 1 }
   0x5   : > { %p182_p2 = scmp.lt.s32.totalorder %s2804_s19, 5 }
   0x6   : > { %s3921_s20 = smov (%p24_p0, %s23_s20), 0  ;;  %s3923_s21 = smov (!%p24_p0, %s26_s21), %s2800_s18 }
   0x7   : > { %p183_p3 = pnand %p1891_p1, %p182_p2  ;;  %p28_p4 = scmp.ge.s32.totalorder %s3923_s21, 2 }
   0x8   : > { %v829_v0 = vld [vmem:[%s3912_s1 + $0x80] sm:$0xff] (!%p183_p3)  ;;  %v830_v1 = vld [vmem:[%s3912_s1 + $0x88] sm:$0xff] (!%p183_p3)  ;;  %p216_p5 = scmp.lt.s32.totalorder (!%p183_p3), %s2792_s16, 1  ;;  %p218_p6 = scmp.lt.s32.totalorder (!%p183_p3), %s2788_s15, 1  ;;  %v831_v11 = vld [vmem:[%s3912_s1 + $0x90] sm:$0xff] (!%p183_p3)  ;;  %vm250_vm0 = vcmask (!%p183_p3), 523264  }
   0x9   : > { %s3925_s21 = smov (%p28_p4, %s3923_s21), 0  ;;  %186 = sbr.rel (%p183_p3) target bundleno = 417 (0x1a1), region = 36 }
   0xa   : > { %v861_v2 = vld [vmem:[%s3912_s1 + $0x180] sm:$0xff] (!%p183_p3)  ;;  %v2548_v3 = vpack.c.bf16 (!%p183_p3), %v830_v1, %v829_v0  ;;  %v862_v4 = vld [vmem:[%s3912_s1 + $0x188] sm:$0xff] (!%p183_p3)  ;;  %v832_v13 = vld [vmem:[%s3912_s1 + $0x98] sm:$0xff] (!%p183_p3) }
   0xb   : > { %v813_v5 = vld [vmem:[%s3912_s1] sm:$0xff] (!%p183_p3)  ;;  %v814_v6 = vld [vmem:[%s3912_s1 + $0x8] sm:$0xff] (!%p183_p3)  ;;  %v2580_v7 = vpack.c.bf16 (!%p183_p3), %v862_v4, %v861_v2  ;;  %v863_v14 = vld [vmem:[%s3912_s1 + $0x190] sm:$0xff] (!%p183_p3)  ;;  %v2552_v16 = vpack.c.bf16 (!%p183_p3), %v832_v13, %v831_v11 }
   0xc   : > { %v2550_v8 = vpack.c.bf16 (!%p183_p3), %v814_v6, %v813_v5  ;;  %v845_v9 = vld [vmem:[%s3912_s1 + $0x100] sm:$0xff] (!%p183_p3)  ;;  %v846_v10 = vld [vmem:[%s3912_s1 + $0x108] sm:$0xff] (!%p183_p3)  ;;  %2549 = vmatprep.subr.bf16.mxu0 (!%p183_p3), %v2548_v3  ;;  %v864_v15 = vld [vmem:[%s3912_s1 + $0x198] sm:$0xff] (!%p183_p3) }
   0xd   : > { %v2582_v12 = vpack.c.bf16 (!%p183_p3), %v846_v10, %v845_v9  ;;  %2581 = vmatprep.subr.bf16.mxu1 (!%p183_p3), %v2580_v7  ;;  %v2584_v17 = vpack.c.bf16 (!%p183_p3), %v864_v15, %v863_v14  ;;  %v815_v18 = vld [vmem:[%s3912_s1 + $0x10] sm:$0xff] (!%p183_p3)  ;;  %v816_v19 = vld [vmem:[%s3912_s1 + $0x18] sm:$0xff] (!%p183_p3)  ;;  %v833_v23 = vld [vmem:[%s3912_s1 + $0xa0] sm:$0xff] (!%p183_p3) }
   0xe   : > { %2551 = vmatpush3.bf16.msra.mxu0 (!%p183_p3), %v2550_v8  ;;  %v847_v20 = vld [vmem:[%s3912_s1 + $0x110] sm:$0xff] (!%p183_p3)  ;;  %v2554_v21 = vpack.c.bf16 (!%p183_p3), %v816_v19, %v815_v18  ;;  %v848_v22 = vld [vmem:[%s3912_s1 + $0x118] sm:$0xff] (!%p183_p3)  ;;  %v834_v24 = vld [vmem:[%s3912_s1 + $0xa8] sm:$0xff] (!%p183_p3) }
   0xf   : > { %2583 = vmatpush3.bf16.msra.mxu1 (!%p183_p3), %v2582_v12  ;;  %2553 = vmatprep.subr.bf16.mxu0 (!%p183_p3), %v2552_v16  ;;  %v2586_v25 = vpack.c.bf16 (!%p183_p3), %v848_v22, %v847_v20  ;;  %v2556_v26 = vpack.c.bf16 (!%p183_p3), %v834_v24, %v833_v23  ;;  %v865_v27 = vld [vmem:[%s3912_s1 + $0x1a0] sm:$0xff] (!%p183_p3)  ;;  %v866_v28 = vld [vmem:[%s3912_s1 + $0x1a8] sm:$0xff] (!%p183_p3)  ;;  %v835_v35 = vld [vmem:[%s3912_s1 + $0xb0] sm:$0xff] (!%p183_p3) }
  0x10   : > { %s3927_s16 = smov (!%p216_p5, %s2792_s16), 1  ;;  %s3929_s15 = smov (!%p218_p6, %s2788_s15), 1  ;;  %2585 = vmatprep.subr.bf16.mxu1 %v2584_v17  ;;  %v817_v29 = vld [vmem:[%s3912_s1 + $0x20] sm:$0xff]  ;;  %v2588_v30 = vpack.c.bf16 %v866_v28, %v865_v27  ;;  %v818_v31 = vld [vmem:[%s3912_s1 + $0x28] sm:$0xff]  ;;  %v836_v36 = vld [vmem:[%s3912_s1 + $0xb8] sm:$0xff] }
  0x11   : > { %v849_v32 = vld [vmem:[%s3912_s1 + $0x120] sm:$0xff]  ;;  %v850_v33 = vld [vmem:[%s3912_s1 + $0x128] sm:$0xff]  ;;  %s2725_s6 = smul.u32 60, %s3927_s16  ;;  %v2558_v34 = vpack.c.bf16 %v818_v31, %v817_v29  ;;  %v867_v37 = vld [vmem:[%s3912_s1 + $0x1b0] sm:$0xff]  ;;  %v2560_v39 = vpack.c.bf16 %v836_v36, %v835_v35  ;;  %s1894_s26 = sshll.u32 %s3927_s16, 5 }
  0x12   : > { %2555 = vmatpush3.bf16.msra.mxu0 %v2554_v21  ;;  %s2724_s13 = smul.u32 30, %s3929_s15  ;;  %v2590_v38 = vpack.c.bf16 %v850_v33, %v849_v32  ;;  %v868_v40 = vld [vmem:[%s3912_s1 + $0x1b8] sm:$0xff]  ;;  %v819_v41 = vld [vmem:[%s3912_s1 + $0x30] sm:$0xff]  ;;  %v837_v46 = vld [vmem:[%s3912_s1 + $0xc0] sm:$0xff] }
  0x13   : > { %2587 = vmatpush3.bf16.msra.mxu1 %v2586_v25  ;;  %2557 = vmatprep.subr.bf16.mxu0 %v2556_v26  ;;  %v820_v42 = vld [vmem:[%s3912_s1 + $0x38] sm:$0xff]  ;;  %v2592_v43 = vpack.c.bf16 %v868_v40, %v867_v37  ;;  %v851_v44 = vld [vmem:[%s3912_s1 + $0x130] sm:$0xff]  ;;  %v838_v47 = vld [vmem:[%s3912_s1 + $0xc8] sm:$0xff] }
  0x14   : > { %2589 = vmatprep.subr.bf16.mxu1 %v2588_v30  ;;  %v852_v45 = vld [vmem:[%s3912_s1 + $0x138] sm:$0xff]  ;;  %v869_v48 = vld [vmem:[%s3912_s1 + $0x1c0] sm:$0xff]  ;;  %v870_v49 = vld [vmem:[%s3912_s1 + $0x1c8] sm:$0xff]  ;;  %v2562_v50 = vpack.c.bf16 %v820_v42, %v819_v41  ;;  %s2987_s22 = sadd.s32 %s2725_s6, %s2724_s13  ;;  %v2564_v52 = vpack.c.bf16 %v838_v47, %v837_v46 }
  0x15   : > { %v2594_v51 = vpack.c.bf16 %v852_v45, %v851_v44  ;;  %v821_v53 = vld [vmem:[%s3912_s1 + $0x40] sm:$0xff]  ;;  %v822_v54 = vld [vmem:[%s3912_s1 + $0x48] sm:$0xff]  ;;  %v2596_v56 = vpack.c.bf16 %v870_v49, %v869_v48  ;;  %v839_v58 = vld [vmem:[%s3912_s1 + $0xd0] sm:$0xff]  ;;  %s1892_s12 = sshll.u32 %s2987_s22, 3 }
  0x16   : > { %2559 = vmatpush3.bf16.msra.mxu0 %v2558_v34  ;;  %v853_v55 = vld [vmem:[%s3912_s1 + $0x140] sm:$0xff]  ;;  %v854_v57 = vld [vmem:[%s3912_s1 + $0x148] sm:$0xff]  ;;  %v840_v59 = vld [vmem:[%s3912_s1 + $0xd8] sm:$0xff]  ;;  %v2566_v62 = vpack.c.bf16 %v822_v54, %v821_v53  ;;  %s3035_s8 = scalar_lea.vmem %s3911_s0, %s1892_s12 }
  0x17   : > { %2591 = vmatpush3.bf16.msra.mxu1 %v2590_v38  ;;  %2561 = vmatprep.subr.bf16.mxu0 %v2560_v39  ;;  %v871_v60 = vld [vmem:[%s3912_s1 + $0x1d0] sm:$0xff]  ;;  %v872_v61 = vld [vmem:[%s3912_s1 + $0x1d8] sm:$0xff]  ;;  %v2598_v63 = vpack.c.bf16 %v854_v57, %v853_v55  ;;  %v2568_v0 = vpack.c.bf16 %v840_v59, %v839_v58  ;;  %v841_v6 = vld [vmem:[%s3912_s1 + $0xe0] sm:$0xff] }
  0x18   : > { %2593 = vmatprep.subr.bf16.mxu1 %v2592_v43  ;;  %v823_v1 = vld [vmem:[%s3912_s1 + $0x50] sm:$0xff]  ;;  %v824_v2 = vld [vmem:[%s3912_s1 + $0x58] sm:$0xff]  ;;  %v2600_v4 = vpack.c.bf16 %v872_v61, %v871_v60  ;;  %v842_v7 = vld [vmem:[%s3912_s1 + $0xe8] sm:$0xff] }
  0x19   : > { %v855_v3 = vld [vmem:[%s3912_s1 + $0x150] sm:$0xff]  ;;  %v856_v5 = vld [vmem:[%s3912_s1 + $0x158] sm:$0xff]  ;;  %v873_v8 = vld [vmem:[%s3912_s1 + $0x1e0] sm:$0xff]  ;;  %v2570_v10 = vpack.c.bf16 %v824_v2, %v823_v1  ;;  %v2572_v14 = vpack.c.bf16 %v842_v7, %v841_v6 }
  0x1a   : > { %2563 = vmatpush3.bf16.msra.mxu0 %v2562_v50  ;;  %v874_v9 = vld [vmem:[%s3912_s1 + $0x1e8] sm:$0xff]  ;;  %v825_v11 = vld [vmem:[%s3912_s1 + $0x60] sm:$0xff]  ;;  %v2602_v13 = vpack.c.bf16 %v856_v5, %v855_v3  ;;  %v3054_v17 = vld [vmem:[%s3035_s8 + $0x18] sm:$0xff] }
  0x1b   : > { %2595 = vmatpush3.bf16.msra.mxu1 %v2594_v51  ;;  %2565 = vmatprep.subr.bf16.mxu0 %v2564_v52  ;;  %v826_v12 = vld [vmem:[%s3912_s1 + $0x68] sm:$0xff]  ;;  %v857_v15 = vld [vmem:[%s3912_s1 + $0x160] sm:$0xff]  ;;  %v2604_v18 = vpack.c.bf16 %v874_v9, %v873_v8  ;;  %v843_v20 = vld [vmem:[%s3912_s1 + $0xf0] sm:$0xff] }
  0x1c   : > { %2597 = vmatprep.subr.bf16.mxu1 %v2596_v56  ;;  %v283_v16 = vld [vmem:[%s3035_s8 + $0x1] sm:$0xff]  ;;  %v844_v21 = vld [vmem:[%s3912_s1 + $0xf8] sm:$0xff]  ;;  %v875_v22 = vld [vmem:[%s3912_s1 + $0x1f0] sm:$0xff]  ;;  %2028 = vmatprep.mubr.msk.f32.mxu1 %vm250_vm0, %v3054_v17  ;;  %v2574_v24 = vpack.c.bf16 %v826_v12, %v825_v11 }
  0x1d   : > { %v858_v19 = vld [vmem:[%s3912_s1 + $0x168] sm:$0xff]  ;;  %1996 = vmatprep.mubr.msk.f32.mxu0 %vm250_vm0, %v283_v16  ;;  %v876_v23 = vld [vmem:[%s3912_s1 + $0x1f8] sm:$0xff]  ;;  %v2576_v26 = vpack.c.bf16 %v844_v21, %v843_v20  ;;  %v827_v27 = vld [vmem:[%s3912_s1 + $0x70] sm:$0xff] }
  0x1e   : > { %2567 = vmatpush3.bf16.msra.mxu0 %v2566_v62  ;;  %v2606_v25 = vpack.c.bf16 %v858_v19, %v857_v15  ;;  %v828_v28 = vld [vmem:[%s3912_s1 + $0x78] sm:$0xff]  ;;  %v859_v29 = vld [vmem:[%s3912_s1 + $0x170] sm:$0xff]  ;;  %v2608_v30 = vpack.c.bf16 %v876_v23, %v875_v22  ;;  %v893_v32 = vld [vmem:[%s3912_s1 + $0x280] sm:$0xff] }
  0x1f   : > { %2599 = vmatpush3.bf16.msra.mxu1 %v2598_v63  ;;  %2569 = vmatprep.subr.bf16.mxu0 %v2568_v0  ;;  %v860_v31 = vld [vmem:[%s3912_s1 + $0x178] sm:$0xff]  ;;  %v894_v33 = vld [vmem:[%s3912_s1 + $0x288] sm:$0xff]  ;;  %v925_v34 = vld [vmem:[%s3912_s1 + $0x380] sm:$0xff]  ;;  %v2578_v36 = vpack.c.bf16 %v828_v28, %v827_v27 }
  0x20   : > { %2601 = vmatprep.subr.bf16.mxu1 %v2600_v4  ;;  %v926_v35 = vld [vmem:[%s3912_s1 + $0x388] sm:$0xff]  ;;  %v2610_v37 = vpack.c.bf16 %v860_v31, %v859_v29  ;;  %v2612_v38 = vpack.c.bf16 %v894_v33, %v893_v32  ;;  %v877_v39 = vld [vmem:[%s3912_s1 + $0x200] sm:$0xff]  ;;  %v895_v44 = vld [vmem:[%s3912_s1 + $0x290] sm:$0xff] }
  0x21   : > { %v878_v40 = vld [vmem:[%s3912_s1 + $0x208] sm:$0xff]  ;;  %v2644_v41 = vpack.c.bf16 %v926_v35, %v925_v34  ;;  %v909_v42 = vld [vmem:[%s3912_s1 + $0x300] sm:$0xff]  ;;  %v896_v45 = vld [vmem:[%s3912_s1 + $0x298] sm:$0xff] }
  0x22   : > { %2571 = vmatpush3.bf16.msra.mxu0 %v2570_v10  ;;  %v910_v43 = vld [vmem:[%s3912_s1 + $0x308] sm:$0xff]  ;;  %v234_v46 = vld [vmem:[%s3035_s8] sm:$0xff]  ;;  %v2614_v47 = vpack.c.bf16 %v878_v40, %v877_v39  ;;  %v927_v48 = vld [vmem:[%s3912_s1 + $0x390] sm:$0xff]  ;;  %v2616_v54 = vpack.c.bf16 %v896_v45, %v895_v44 }
  0x23   : > { %2603 = vmatpush3.bf16.msra.mxu1 %v2602_v13  ;;  %2573 = vmatprep.subr.bf16.mxu0 %v2572_v14  ;;  %v928_v49 = vld [vmem:[%s3912_s1 + $0x398] sm:$0xff]  ;;  %v331_v50 = vld [vmem:[%s3035_s8 + $0x2] sm:$0xff]  ;;  %v2646_v51 = vpack.c.bf16 %v910_v43, %v909_v42  ;;  %v879_v55 = vld [vmem:[%s3912_s1 + $0x210] sm:$0xff] }
  0x24   : > { %2605 = vmatprep.subr.bf16.mxu1 %v2604_v18  ;;  %v284_v52 = vld [vmem:[%s3035_s8 + $0x9] sm:$0xff]  ;;  %v3126_v53 = vld [vmem:[%s3035_s8 + $0x20] sm:$0xff]  ;;  %v880_v56 = vld [vmem:[%s3912_s1 + $0x218] sm:$0xff]  ;;  %v2648_v58 = vpack.c.bf16 %v928_v49, %v927_v48 }
  0x25   : > { %v911_v57 = vld [vmem:[%s3912_s1 + $0x310] sm:$0xff]  ;;  %v912_v59 = vld [vmem:[%s3912_s1 + $0x318] sm:$0xff]  ;;  %v897_v60 = vld [vmem:[%s3912_s1 + $0x2a0] sm:$0xff]  ;;  %v2618_v4 = vpack.c.bf16 %v880_v56, %v879_v55 }
  0x26   : > { %2575 = vmatpush3.bf16.msra.mxu0 %v2574_v24  ;;  %v898_v61 = vld [vmem:[%s3912_s1 + $0x2a8] sm:$0xff]  ;;  %v929_v63 = vld [vmem:[%s3912_s1 + $0x3a0] sm:$0xff]  ;;  %v3161_v3 = vld [vmem:[%s3035_s8 + $0x30] sm:$0xff]  ;;  %v2650_v5 = vpack.c.bf16 %v912_v59, %v911_v57 }
  0x27   : > { %2607 = vmatpush3.bf16.msra.mxu1 %v2606_v25  ;;  %2577 = vmatprep.subr.bf16.mxu0 %v2576_v26  ;;  %v235_v62 = vld [vmem:[%s3035_s8 + $0x8] sm:$0xff]  ;;  %v3158_v2 = vld [vmem:[%s3035_s8 + $0x19] sm:$0xff]  ;;  %v2620_v6 = vpack.c.bf16 %v898_v61, %v897_v60  ;;  %v899_v12 = vld [vmem:[%s3912_s1 + $0x2b0] sm:$0xff] }
  0x28   : > { %2609 = vmatprep.subr.bf16.mxu1 %v2608_v30  ;;  %v930_v0 = vld [vmem:[%s3912_s1 + $0x3a8] sm:$0xff]  ;;  %v881_v7 = vld [vmem:[%s3912_s1 + $0x220] sm:$0xff]  ;;  %v900_v13 = vld [vmem:[%s3912_s1 + $0x2b8] sm:$0xff] }
  0x29   : > { %v332_v1 = vld [vmem:[%s3035_s8 + $0xa] sm:$0xff]  ;;  %v913_v9 = vld [vmem:[%s3912_s1 + $0x320] sm:$0xff]  ;;  %v2652_v10 = vpack.c.bf16 %v930_v0, %v929_v63  ;;  %v932_v15 = vld [vmem:[%s3912_s1 + $0x3b8] sm:$0xff]  ;;  %v2624_v22 = vpack.c.bf16 %v900_v13, %v899_v12 }
  0x2a   : > { %2579 = vmatpush3.bf16.msra.mxu0 %v2578_v36  ;;  %v882_v8 = vld [vmem:[%s3912_s1 + $0x228] sm:$0xff]  ;;  %v931_v14 = vld [vmem:[%s3912_s1 + $0x3b0] sm:$0xff]  ;;  %v3196_v16 = vld [vmem:[%s3035_s8 + $0x1a] sm:$0xff] }
  0x2b   : > { %2611 = vmatpush3.bf16.msra.mxu1 %v2610_v37  ;;  %2613 = vmatprep.subr.bf16.mxu0 %v2612_v38  ;;  %v914_v11 = vld [vmem:[%s3912_s1 + $0x328] sm:$0xff]  ;;  %v3202_v19 = vld [vmem:[%s3035_s8 + $0x38] sm:$0xff]  ;;  %v2622_v20 = vpack.c.bf16 %v882_v8, %v881_v7  ;;  %v883_v23 = vld [vmem:[%s3912_s1 + $0x230] sm:$0xff]  ;;  %v2656_v26 = vpack.c.bf16 %v932_v15, %v931_v14 }
  0x2c   : > { %2645 = vmatprep.subr.bf16.mxu1 %v2644_v41  ;;  %v3199_v18 = vld [vmem:[%s3035_s8 + $0x21] sm:$0xff]  ;;  %v2654_v21 = vpack.c.bf16 %v914_v11, %v913_v9  ;;  %v884_v24 = vld [vmem:[%s3912_s1 + $0x238] sm:$0xff]  ;;  %v915_v25 = vld [vmem:[%s3912_s1 + $0x330] sm:$0xff] }
  0x2d   : > { %1997 = vmatmul.mubr.msk.f32.vlgmr.msra.gmra.mrb[0].mxu0 %vm250_vm0, %v234_v46  ;;  %v916_v27 = vld [vmem:[%s3912_s1 + $0x338] sm:$0xff]  ;;  %v901_v28 = vld [vmem:[%s3912_s1 + $0x2c0] sm:$0xff]  ;;  %v902_v29 = vld [vmem:[%s3912_s1 + $0x2c8] sm:$0xff]  ;;  %v2626_v34 = vpack.c.bf16 %v884_v24, %v883_v23 }
  0x2e   : > { %2029 = vmatmul.mubr.msk.f32.vlgmr.msra.gmra.mrb[0].mxu1 %vm250_vm0, %v331_v50  ;;  %2615 = vmatpush3.bf16.msra.mxu0 %v2614_v47  ;;  %v934_v30 = vld [vmem:[%s3912_s1 + $0x3c8] sm:$0xff]  ;;  %v3240_v32 = vld [vmem:[%s3035_s8 + $0x31] sm:$0xff]  ;;  %v2658_v35 = vpack.c.bf16 %v916_v27, %v915_v25  ;;  %v2628_v36 = vpack.c.bf16 %v902_v29, %v901_v28  ;;  %v885_v37 = vld [vmem:[%s3912_s1 + $0x240] sm:$0xff] }
  0x2f   : > { %2647 = vmatpush3.bf16.msra.mxu1 %v2646_v51  ;;  %1998 = vmatprep.mubr.msk.f32.mxu0 %vm250_vm0, %v284_v52  ;;  %v3237_v31 = vld [vmem:[%s3035_s8 + $0x22] sm:$0xff]  ;;  %v903_v42 = vld [vmem:[%s3912_s1 + $0x2d0] sm:$0xff]  ;;  %v904_v43 = vld [vmem:[%s3912_s1 + $0x2d8] sm:$0xff] }
  0x30   : > { %2030 = vmatprep.mubr.msk.f32.mxu1 %vm250_vm0, %v3126_v53  ;;  %2617 = vmatprep.subr.bf16.mxu0 %v2616_v54  ;;  %v3243_v33 = vld [vmem:[%s3035_s8 + $0x48] sm:$0xff]  ;;  %v917_v39 = vld [vmem:[%s3912_s1 + $0x340] sm:$0xff]  ;;  %v935_v44 = vld [vmem:[%s3912_s1 + $0x3d0] sm:$0xff]  ;;  %v2632_v51 = vpack.c.bf16 %v904_v43, %v903_v42 }
  0x31   : > { %1999 = vmatmul.mubr.msk.f32.gmra.mrb[2].mxu0 %vm250_vm0, %v235_v62  ;;  %2649 = vmatprep.subr.bf16.mxu1 %v2648_v58  ;;  %v886_v38 = vld [vmem:[%s3912_s1 + $0x248] sm:$0xff]  ;;  %v936_v45 = vld [vmem:[%s3912_s1 + $0x3d8] sm:$0xff]  ;;  %v3284_v48 = vld [vmem:[%s3035_s8 + $0x50] sm:$0xff] }
  0x32   : > { %2031 = vmatmul.mubr.msk.f32.gmra.mrb[2].mxu1 %vm250_vm0, %v332_v1  ;;  %2000 = vmatprep.mubr.msk.f32.mxu0 %vm250_vm0, %v3158_v2  ;;  %v918_v41 = vld [vmem:[%s3912_s1 + $0x348] sm:$0xff]  ;;  %v3278_v46 = vld [vmem:[%s3035_s8 + $0x32] sm:$0xff]  ;;  %v2630_v49 = vpack.c.bf16 %v886_v38, %v885_v37  ;;  %v2664_v55 = vpack.c.bf16 %v936_v45, %v935_v44  ;;  %v905_v57 = vld [vmem:[%s3912_s1 + $0x2e0] sm:$0xff] }
  0x33   : > { %2032 = vmatprep.mubr.msk.f32.mxu1 %vm250_vm0, %v3161_v3  ;;  %2619 = vmatpush3.bf16.msra.mxu0 %v2618_v4  ;;  %v3281_v47 = vld [vmem:[%s3035_s8 + $0x39] sm:$0xff]  ;;  %v2662_v50 = vpack.c.bf16 %v918_v41, %v917_v39  ;;  %v887_v52 = vld [vmem:[%s3912_s1 + $0x250] sm:$0xff]  ;;  %v906_v58 = vld [vmem:[%s3912_s1 + $0x2e8] sm:$0xff] }
  0x34   : > { %2651 = vmatpush3.bf16.msra.mxu1 %v2650_v5  ;;  %2621 = vmatprep.subr.bf16.mxu0 %v2620_v6  ;;  %v919_v54 = vld [vmem:[%s3912_s1 + $0x350] sm:$0xff]  ;;  %v920_v56 = vld [vmem:[%s3912_s1 + $0x358] sm:$0xff]  ;;  %v937_v59 = vld [vmem:[%s3912_s1 + $0x3e0] sm:$0xff]  ;;  %v2636_v4 = vpack.c.bf16 %v906_v58, %v905_v57 }
  0x35   : > { %2001 = vmatmul.mubr.msk.f32.gmra.mrb[4].mxu0 %vm250_vm0, %v3054_v17  ;;  %2653 = vmatprep.subr.bf16.mxu1 %v2652_v10  ;;  %v933_v17 = vld [vmem:[%s3912_s1 + $0x3c0] sm:$0xff]  ;;  %v938_v60 = vld [vmem:[%s3912_s1 + $0x3e8] sm:$0xff]  ;;  %v2666_v1 = vpack.c.bf16 %v920_v56, %v919_v54  ;;  %v907_v10 = vld [vmem:[%s3912_s1 + $0x2f0] sm:$0xff] }
  0x36   : > { %2033 = vmatmul.mubr.msk.f32.gmra.mrb[4].mxu1 %vm250_vm0, %v3196_v16  ;;  %2002 = vmatprep.mubr.msk.f32.mxu0 %vm250_vm0, %v3199_v18  ;;  %v2660_v40 = vpack.c.bf16 %v934_v30, %v933_v17  ;;  %v3319_v61 = vld [vmem:[%s3035_s8 + $0x3a] sm:$0xff]  ;;  %v3322_v62 = vld [vmem:[%s3035_s8 + $0x49] sm:$0xff]  ;;  %v2668_v7 = vpack.c.bf16 %v938_v60, %v937_v59  ;;  %v3363_v15 = vld [vmem:[%s3035_s8 + $0x51] sm:$0xff] }
  0x37   : > { %2034 = vmatprep.mubr.msk.f32.mxu1 %vm250_vm0, %v3202_v19  ;;  %2623 = vmatpush3.bf16.msra.mxu0 %v2622_v20  ;;  %v3325_v0 = vld [vmem:[%s3035_s8 + $0x60] sm:$0xff]  ;;  %v890_v6 = vld [vmem:[%s3912_s1 + $0x268] sm:$0xff]  ;;  %v908_v11 = vld [vmem:[%s3912_s1 + $0x2f8] sm:$0xff] }
  0x38   : > { %2655 = vmatpush3.bf16.msra.mxu1 %v2654_v21  ;;  %2625 = vmatprep.subr.bf16.mxu0 %v2624_v22  ;;  %v889_v5 = vld [vmem:[%s3912_s1 + $0x260] sm:$0xff]  ;;  %v922_v9 = vld [vmem:[%s3912_s1 + $0x368] sm:$0xff]  ;;  %v939_v12 = vld [vmem:[%s3912_s1 + $0x3f0] sm:$0xff]  ;;  %v2640_v23 = vpack.c.bf16 %v908_v11, %v907_v10 }
  0x39   : > { %2003 = vmatmul.mubr.msk.f32.gmra.mrb[6].mxu0 %vm250_vm0, %v3126_v53  ;;  %2657 = vmatprep.subr.bf16.mxu1 %v2656_v26  ;;  %v888_v53 = vld [vmem:[%s3912_s1 + $0x258] sm:$0xff]  ;;  %v921_v8 = vld [vmem:[%s3912_s1 + $0x360] sm:$0xff]  ;;  %v3360_v14 = vld [vmem:[%s3035_s8 + $0x4a] sm:$0xff]  ;;  %v2638_v21 = vpack.c.bf16 %v890_v6, %v889_v5 }
  0x3a   : > { %2035 = vmatmul.mubr.msk.f32.gmra.mrb[6].mxu1 %vm250_vm0, %v3237_v31  ;;  %2004 = vmatprep.mubr.msk.f32.mxu0 %vm250_vm0, %v3240_v32  ;;  %v2634_v63 = vpack.c.bf16 %v888_v53, %v887_v52  ;;  %v940_v13 = vld [vmem:[%s3912_s1 + $0x3f8] sm:$0xff]  ;;  %v3366_v20 = vld [vmem:[%s3035_s8 + $0x68] sm:$0xff]  ;;  %v2670_v22 = vpack.c.bf16 %v922_v9, %v921_v8  ;;  %v891_v24 = vld [vmem:[%s3912_s1 + $0x270] sm:$0xff] }
  0x3b   : > { %2036 = vmatprep.mubr.msk.f32.mxu1 %vm250_vm0, %v3243_v33  ;;  %2627 = vmatpush3.bf16.msra.mxu0 %v2626_v34  ;;  %v892_v25 = vld [vmem:[%s3912_s1 + $0x278] sm:$0xff]  ;;  %v923_v26 = vld [vmem:[%s3912_s1 + $0x370] sm:$0xff]  ;;  %v2672_v27 = vpack.c.bf16 %v940_v13, %v939_v12  ;;  %v941_v29 = vld [vmem:[%s3912_s1 + $0x400] sm:$0xff] }
  0x3c   : > { %2659 = vmatpush3.bf16.msra.mxu1 %v2658_v35  ;;  %2629 = vmatprep.subr.bf16.mxu0 %v2628_v36  ;;  %v924_v28 = vld [vmem:[%s3912_s1 + $0x378] sm:$0xff]  ;;  %v942_v17 = vld [vmem:[%s3912_s1 + $0x408] sm:$0xff]  ;;  %v2642_v35 = vpack.c.bf16 %v892_v25, %v891_v24  ;;  %v3420_v41 = vld [vmem:[%s3035_s8 + $0x80] sm:$0xff] }
  0x3d   : > { %2005 = vmatmul.mubr.msk.f32.gmra.mrb[8].mxu0 %vm250_vm0, %v3161_v3  ;;  %2661 = vmatprep.subr.bf16.mxu1 %v2660_v40  ;;  %v3395_v30 = vld [vmem:[%s3035_s8 + $0x52] sm:$0xff]  ;;  %v3398_v34 = vld [vmem:[%s3035_s8 + $0x61] sm:$0xff]  ;;  %v2674_v37 = vpack.c.bf16 %v924_v28, %v923_v26  ;;  %v3403_v38 = vpack.c.bf16 %v942_v17, %v941_v29  ;;  %v3417_v40 = vld [vmem:[%s3035_s8 + $0x69] sm:$0xff] }
  0x3e   : > { %2037 = vmatmul.mubr.msk.f32.gmra.mrb[8].mxu1 %vm250_vm0, %v3278_v46  ;;  %2006 = vmatprep.mubr.msk.f32.mxu0 %vm250_vm0, %v3281_v47  ;;  %v3401_v36 = vld [vmem:[%s3035_s8 + $0x78] sm:$0xff]  ;;  %v3414_v39 = vld [vmem:[%s3035_s8 + $0x62] sm:$0xff]  ;;  %v3433_v42 = vld [vmem:[%s3035_s8 + $0x6a] sm:$0xff] }
  0x3f   : > { %2038 = vmatprep.mubr.msk.f32.mxu1 %vm250_vm0, %v3284_v48  ;;  %2631 = vmatpush3.bf16.msra.mxu0 %v2630_v49  ;;  %v3436_v43 = vld [vmem:[%s3035_s8 + $0x79] sm:$0xff]  ;;  %v3439_v44 = vld [vmem:[%s3035_s8 + $0x90] sm:$0xff]  ;;  %v3453_v49 = vld [vmem:[%s3035_s8 + $0x81] sm:$0xff] }
  0x40   : > { %2663 = vmatpush3.bf16.msra.mxu1 %v2662_v50  ;;  %2633 = vmatprep.subr.bf16.mxu0 %v2632_v51  ;;  %v3450_v45 = vld [vmem:[%s3035_s8 + $0x7a] sm:$0xff]  ;;  %v3467_v51 = vld [vmem:[%s3035_s8 + $0x82] sm:$0xff]  ;;  %v3470_v52 = vld [vmem:[%s3035_s8 + $0x91] sm:$0xff] }
  0x41   : > { %2007 = vmatmul.mubr.msk.f32.gmra.mrb[10].mxu0 %vm250_vm0, %v3202_v19  ;;  %2665 = vmatprep.subr.bf16.mxu1 %v2664_v55  ;;  %v3456_v50 = vld [vmem:[%s3035_s8 + $0x98] sm:$0xff]  ;;  %v3473_v53 = vld [vmem:[%s3035_s8 + $0xa8] sm:$0xff]  ;;  %v3490_v56 = vld [vmem:[%s3035_s8 + $0xb0] sm:$0xff] }
  0x42   : > { %2039 = vmatmul.mubr.msk.f32.gmra.mrb[10].mxu1 %vm250_vm0, %v3319_v61  ;;  %2008 = vmatprep.mubr.msk.f32.mxu0 %vm250_vm0, %v3322_v62  ;;  %v3484_v54 = vld [vmem:[%s3035_s8 + $0x92] sm:$0xff]  ;;  %v3501_v57 = vld [vmem:[%s3035_s8 + $0x9a] sm:$0xff]  ;;  %v3504_v58 = vld [vmem:[%s3035_s8 + $0xa9] sm:$0xff] }
  0x43   : > { %2040 = vmatprep.mubr.msk.f32.mxu1 %vm250_vm0, %v3325_v0  ;;  %2635 = vmatpush3.bf16.msra.mxu0 %v2634_v63  ;;  %v3487_v55 = vld [vmem:[%s3035_s8 + $0x99] sm:$0xff]  ;;  %v3518_v60 = vld [vmem:[%s3035_s8 + $0xaa] sm:$0xff]  ;;  %v1975_v25 = vld [vmem:[%s3035_s8 + $0xe1] sm:$0xff] }
  0x44   : > { %2667 = vmatpush3.bf16.msra.mxu1 %v2666_v1  ;;  %2637 = vmatprep.subr.bf16.mxu0 %v2636_v4  ;;  %v3507_v59 = vld [vmem:[%s3035_s8 + $0xc0] sm:$0xff]  ;;  %v3521_v63 = vld [vmem:[%s3035_s8 + $0xb1] sm:$0xff]  ;;  %v3524_v1 = vld [vmem:[%s3035_s8 + $0xc8] sm:$0xff] }
  0x45   : > { %2009 = vmatmul.mubr.msk.f32.gmra.mrb[12].mxu0 %vm250_vm0, %v3243_v33  ;;  %2669 = vmatprep.subr.bf16.mxu1 %v2668_v7  ;;  %v3535_v4 = vld [vmem:[%s3035_s8 + $0xb2] sm:$0xff]  ;;  %v945_v8 = vld [vmem:[%s3912_s1 + $0x420] sm:$0xff]  ;;  %v946_v9 = vld [vmem:[%s3912_s1 + $0x428] sm:$0xff] }
  0x46   : > { %2041 = vmatmul.mubr.msk.f32.gmra.mrb[12].mxu1 %vm250_vm0, %v3360_v14  ;;  %2010 = vmatprep.mubr.msk.f32.mxu0 %vm250_vm0, %v3363_v15  ;;  %v943_v5 = vld [vmem:[%s3912_s1 + $0x410] sm:$0xff]  ;;  %v944_v6 = vld [vmem:[%s3912_s1 + $0x418] sm:$0xff]  ;;  %v953_v11 = vld [vmem:[%s3912_s1 + $0x460] sm:$0xff] }
  0x47   : > { %2042 = vmatprep.mubr.msk.f32.mxu1 %vm250_vm0, %v3366_v20  ;;  %2639 = vmatpush3.bf16.msra.mxu0 %v2638_v21  ;;  %v2680_v7 = vpack.c.bf16 %v944_v6, %v943_v5  ;;  %v951_v10 = vld [vmem:[%s3912_s1 + $0x450] sm:$0xff]  ;;  %v1942_v21 = vld [vmem:[%s3035_s8 + $0xc2] sm:$0xff] }
  0x48   : > { %2671 = vmatpush3.bf16.msra.mxu1 %v2670_v22  ;;  %2641 = vmatprep.subr.bf16.mxu0 %v2640_v23  ;;  %v955_v12 = vld [vmem:[%s3912_s1 + $0x470] sm:$0xff]  ;;  %v1974_v22 = vld [vmem:[%s3035_s8 + $0xd9] sm:$0xff] }
  0x49   : > { %2011 = vmatmul.mubr.msk.f32.gmra.mrb[14].mxu0 %vm250_vm0, %v3284_v48  ;;  %2673 = vmatprep.subr.bf16.mxu1 %v2672_v27  ;;  %v1958_v23 = vld [vmem:[%s3035_s8 + $0xd8] sm:$0xff]  ;;  %v1943_v24 = vld [vmem:[%s3035_s8 + $0xca] sm:$0xff]  ;;  %v1959_v26 = vld [vmem:[%s3035_s8 + $0xe0] sm:$0xff] }
  0x4a   : > { %2043 = vmatmul.mubr.msk.f32.gmra.mrb[14].mxu1 %vm250_vm0, %v3395_v30  ;;  %2012 = vmatprep.mubr.msk.f32.mxu0 %vm250_vm0, %v3398_v34 }
  0x4b   : > { %2044 = vmatprep.mubr.msk.f32.mxu1 %vm250_vm0, %v3401_v36  ;;  %2643 = vmatpush3.bf16.msra.mxu0 %v2642_v35 }
  0x4c   : > { %2675 = vmatpush3.bf16.msra.mxu1 %v2674_v37  ;;  %2677 = vmatprep.subr.bf16.mxu0 %v3403_v38 }
  0x4d   : > { %2013 = vmatmul.mubr.msk.f32.gmra.mrb[16].mxu0 %vm250_vm0, %v3325_v0  ;;  %2708 = vmatprep.subr.bf16.mxu1 %v3403_v38 }
  0x4e   : > { %2045 = vmatmul.mubr.msk.f32.gmra.mrb[16].mxu1 %vm250_vm0, %v3414_v39  ;;  %2014 = vmatprep.mubr.msk.f32.mxu0 %vm250_vm0, %v3417_v40 }
  0x4f   : > { %2046 = vmatprep.mubr.msk.f32.mxu1 %vm250_vm0, %v3420_v41 }
  0x51   : > { %2015 = vmatmul.mubr.msk.f32.gmra.mrb[18].mxu0 %vm250_vm0, %v3366_v20 }
  0x52   : > { %2047 = vmatmul.mubr.msk.f32.gmra.mrb[18].mxu1 %vm250_vm0, %v3433_v42  ;;  %2016 = vmatprep.mubr.msk.f32.mxu0 %vm250_vm0, %v3436_v43 }
  0x53   : > { %2048 = vmatprep.mubr.msk.f32.mxu1 %vm250_vm0, %v3439_v44 }
  0x55   : > { %2017 = vmatmul.mubr.msk.f32.gmra.mrb[20].mxu0 %vm250_vm0, %v3401_v36 }
  0x56   : > { %2049 = vmatmul.mubr.msk.f32.gmra.mrb[20].mxu1 %vm250_vm0, %v3450_v45  ;;  %2018 = vmatprep.mubr.msk.f32.mxu0 %vm250_vm0, %v3453_v49 }
  0x57   : > { %2050 = vmatprep.mubr.msk.f32.mxu1 %vm250_vm0, %v3456_v50 }
  0x59   : > { %2019 = vmatmul.mubr.msk.f32.gmra.mrb[22].mxu0 %vm250_vm0, %v3420_v41 }
  0x5a   : > { %2051 = vmatmul.mubr.msk.f32.gmra.mrb[22].mxu1 %vm250_vm0, %v3467_v51  ;;  %2020 = vmatprep.mubr.msk.f32.mxu0 %vm250_vm0, %v3470_v52 }
  0x5b   : > { %2052 = vmatprep.mubr.msk.f32.mxu1 %vm250_vm0, %v3473_v53 }
  0x5d   : > { %2021 = vmatmul.mubr.msk.f32.gmra.mrb[24].mxu0 %vm250_vm0, %v3439_v44 }
  0x5e   : > { %2053 = vmatmul.mubr.msk.f32.gmra.mrb[24].mxu1 %vm250_vm0, %v3484_v54  ;;  %2022 = vmatprep.mubr.msk.f32.mxu0 %vm250_vm0, %v3487_v55 }
  0x5f   : > { %2054 = vmatprep.mubr.msk.f32.mxu1 %vm250_vm0, %v3490_v56 }
  0x61   : > { %2023 = vmatmul.mubr.msk.f32.gmra.mrb[26].mxu0 %vm250_vm0, %v3456_v50 }
  0x62   : > { %2055 = vmatmul.mubr.msk.f32.gmra.mrb[26].mxu1 %vm250_vm0, %v3501_v57  ;;  %2024 = vmatprep.mubr.msk.f32.mxu0 %vm250_vm0, %v3504_v58 }
  0x63   : > { %2056 = vmatprep.mubr.msk.f32.mxu1 %vm250_vm0, %v3507_v59 }
  0x65   : > { %2025 = vmatmul.mubr.msk.f32.gmra.mrb[28].mxu0 %vm250_vm0, %v3473_v53 }
  0x66   : > { %2057 = vmatmul.mubr.msk.f32.gmra.mrb[28].mxu1 %vm250_vm0, %v3518_v60  ;;  %2026 = vmatprep.mubr.msk.f32.mxu0 %vm250_vm0, %v3521_v63 }
  0x67   : > { %2058 = vmatprep.mubr.msk.f32.mxu1 %vm250_vm0, %v3524_v1 }
  0x69   : > { %2027 = vmatmul.mubr.msk.f32.gmra.mrb[30].mxu0 %vm250_vm0, %v3490_v56 }
  0x6a   : > { %2059 = vmatmul.mubr.msk.f32.gmra.mrb[30].mxu1 %vm250_vm0, %v3535_v4  ;;  %2060 = vmatprep.mubr.msk.f32.mxu0 %vm250_vm0, %v3196_v16  ;;  %v948_v16 = vld [vmem:[%s3912_s1 + $0x438] sm:$0xff] }
  0x6b   : > { %2092 = vmatprep.mubr.msk.f32.mxu1 %vm250_vm0, %v3240_v32 }
  0x6d   : > { %2061 = vmatmul.mubr.msk.f32.vlgmr.msra.gmra.mrb[32].mxu0 %vm250_vm0, %v3158_v2  ;;  %v2684_v2 = vpack.c.bf16 %v946_v9, %v945_v8 }
  0x6e   : > { %2093 = vmatmul.mubr.msk.f32.vlgmr.msra.gmra.mrb[32].mxu1 %vm250_vm0, %v3161_v3  ;;  %2679 = vmatpush3.bf16.msra.mxu0 %v3403_v38  ;;  %v947_v3 = vld [vmem:[%s3912_s1 + $0x430] sm:$0xff] }
  0x6f   : > { %2716 = vmatpush3.bf16.msra.mxu1 %v3403_v38  ;;  %2062 = vmatprep.mubr.msk.f32.mxu0 %vm250_vm0, %v3237_v31  ;;  %v949_v31 = vld [vmem:[%s3912_s1 + $0x440] sm:$0xff] }
  0x70   : > { %2094 = vmatprep.mubr.msk.f32.mxu1 %vm250_vm0, %v3281_v47  ;;  %2681 = vmatprep.subr.bf16.mxu0 %v2680_v7 }
  0x71   : > { %2063 = vmatmul.mubr.msk.f32.gmra.mrb[34].mxu0 %vm250_vm0, %v3199_v18  ;;  %2709 = vmatprep.subr.bf16.mxu1 %v2680_v7  ;;  %v2688_v18 = vpack.c.bf16 %v948_v16, %v947_v3 }
  0x72   : > { %2095 = vmatmul.mubr.msk.f32.gmra.mrb[34].mxu1 %vm250_vm0, %v3202_v19  ;;  %2064 = vmatprep.mubr.msk.f32.mxu0 %vm250_vm0, %v3278_v46  ;;  %v950_v19 = vld [vmem:[%s3912_s1 + $0x448] sm:$0xff] }
  0x73   : > { %2096 = vmatprep.mubr.msk.f32.mxu1 %vm250_vm0, %v3322_v62  ;;  %2683 = vmatpush3.bf16.msra.mxu0 %v2680_v7 }
  0x74   : > { %2717 = vmatpush3.bf16.msra.mxu1 %v2680_v7  ;;  %2685 = vmatprep.subr.bf16.mxu0 %v2684_v2 }
  0x75   : > { %2065 = vmatmul.mubr.msk.f32.gmra.mrb[36].mxu0 %vm250_vm0, %v3240_v32  ;;  %2710 = vmatprep.subr.bf16.mxu1 %v2684_v2  ;;  %v2692_v32 = vpack.c.bf16 %v950_v19, %v949_v31 }
  0x76   : > { %2097 = vmatmul.mubr.msk.f32.gmra.mrb[36].mxu1 %vm250_vm0, %v3243_v33  ;;  %2066 = vmatprep.mubr.msk.f32.mxu0 %vm250_vm0, %v3319_v61  ;;  %v952_v33 = vld [vmem:[%s3912_s1 + $0x458] sm:$0xff] }
  0x77   : > { %2098 = vmatprep.mubr.msk.f32.mxu1 %vm250_vm0, %v3363_v15  ;;  %2687 = vmatpush3.bf16.msra.mxu0 %v2684_v2 }
  0x78   : > { %2718 = vmatpush3.bf16.msra.mxu1 %v2684_v2  ;;  %2689 = vmatprep.subr.bf16.mxu0 %v2688_v18 }
  0x79   : > { %2067 = vmatmul.mubr.msk.f32.gmra.mrb[38].mxu0 %vm250_vm0, %v3281_v47  ;;  %2711 = vmatprep.subr.bf16.mxu1 %v2688_v18  ;;  %v2696_v47 = vpack.c.bf16 %v952_v33, %v951_v10 }
  0x7a   : > { %2099 = vmatmul.mubr.msk.f32.gmra.mrb[38].mxu1 %vm250_vm0, %v3284_v48  ;;  %2068 = vmatprep.mubr.msk.f32.mxu0 %vm250_vm0, %v3360_v14  ;;  %v954_v48 = vld [vmem:[%s3912_s1 + $0x468] sm:$0xff] }
  0x7b   : > { %2100 = vmatprep.mubr.msk.f32.mxu1 %vm250_vm0, %v3398_v34  ;;  %2691 = vmatpush3.bf16.msra.mxu0 %v2688_v18 }
  0x7c   : > { %2719 = vmatpush3.bf16.msra.mxu1 %v2688_v18  ;;  %2693 = vmatprep.subr.bf16.mxu0 %v2692_v32 }
  0x7d   : > { %2069 = vmatmul.mubr.msk.f32.gmra.mrb[40].mxu0 %vm250_vm0, %v3322_v62  ;;  %2712 = vmatprep.subr.bf16.mxu1 %v2692_v32  ;;  %v2700_v62 = vpack.c.bf16 %v954_v48, %v953_v11 }
  0x7e   : > { %2101 = vmatmul.mubr.msk.f32.gmra.mrb[40].mxu1 %vm250_vm0, %v3325_v0  ;;  %2070 = vmatprep.mubr.msk.f32.mxu0 %vm250_vm0, %v3395_v30  ;;  %v956_v0 = vld [vmem:[%s3912_s1 + $0x478] sm:$0xff] }
  0x7f   : > { %2102 = vmatprep.mubr.msk.f32.mxu1 %vm250_vm0, %v3417_v40  ;;  %2695 = vmatpush3.bf16.msra.mxu0 %v2692_v32  ;;  %v2704_v13 = vpack.c.bf16 %v956_v0, %v955_v12 }
  0x80   : > { %2720 = vmatpush3.bf16.msra.mxu1 %v2692_v32  ;;  %2697 = vmatprep.subr.bf16.mxu0 %v2696_v47 }
  0x81   : > { %2071 = vmatmul.mubr.msk.f32.gmra.mrb[42].mxu0 %vm250_vm0, %v3363_v15  ;;  %2713 = vmatprep.subr.bf16.mxu1 %v2696_v47  ;;  %v1972_v15 = vld [vmem:[%s3035_s8 + $0xc1] sm:$0xff] }
  0x82   : > { %2103 = vmatmul.mubr.msk.f32.gmra.mrb[42].mxu1 %vm250_vm0, %v3366_v20  ;;  %2072 = vmatprep.mubr.msk.f32.mxu0 %vm250_vm0, %v3414_v39  ;;  %v1973_v20 = vld [vmem:[%s3035_s8 + $0xc9] sm:$0xff] }
  0x83   : > { %2104 = vmatprep.mubr.msk.f32.mxu1 %vm250_vm0, %v3436_v43  ;;  %2699 = vmatpush3.bf16.msra.mxu0 %v2696_v47 }
  0x84   : > { %2721 = vmatpush3.bf16.msra.mxu1 %v2696_v47  ;;  %2701 = vmatprep.subr.bf16.mxu0 %v2700_v62 }
  0x85   : > { %2073 = vmatmul.mubr.msk.f32.gmra.mrb[44].mxu0 %vm250_vm0, %v3398_v34  ;;  %2714 = vmatprep.subr.bf16.mxu1 %v2700_v62 }
  0x86   : > { %2105 = vmatmul.mubr.msk.f32.gmra.mrb[44].mxu1 %vm250_vm0, %v3401_v36  ;;  %2074 = vmatprep.mubr.msk.f32.mxu0 %vm250_vm0, %v3433_v42 }
  0x87   : > { %2106 = vmatprep.mubr.msk.f32.mxu1 %vm250_vm0, %v3453_v49  ;;  %2703 = vmatpush3.bf16.msra.mxu0 %v2700_v62 }
  0x88   : > { %2722 = vmatpush3.bf16.msra.mxu1 %v2700_v62  ;;  %2705 = vmatprep.subr.bf16.mxu0 %v2704_v13 }
  0x89   : > { %2075 = vmatmul.mubr.msk.f32.gmra.mrb[46].mxu0 %vm250_vm0, %v3417_v40  ;;  %2715 = vmatprep.subr.bf16.mxu1 %v2704_v13 }
  0x8a   : > { %2107 = vmatmul.mubr.msk.f32.gmra.mrb[46].mxu1 %vm250_vm0, %v3420_v41  ;;  %2076 = vmatprep.mubr.msk.f32.mxu0 %vm250_vm0, %v3450_v45 }
  0x8b   : > { %2108 = vmatprep.mubr.msk.f32.mxu1 %vm250_vm0, %v3470_v52  ;;  %2707 = vmatpush3.bf16.msra.mxu0 %v2704_v13 }
  0x8c   : > { %2723 = vmatpush3.bf16.msra.mxu1 %v2704_v13 }
  0x8d   : > { %2077 = vmatmul.mubr.msk.f32.gmra.mrb[48].mxu0 %vm250_vm0, %v3436_v43 }
  0x8e   : > { %2109 = vmatmul.mubr.msk.f32.gmra.mrb[48].mxu1 %vm250_vm0, %v3439_v44  ;;  %2078 = vmatprep.mubr.msk.f32.mxu0 %vm250_vm0, %v3467_v51 }
  0x8f   : > { %2110 = vmatprep.mubr.msk.f32.mxu1 %vm250_vm0, %v3487_v55 }
  0x91   : > { %2079 = vmatmul.mubr.msk.f32.gmra.mrb[50].mxu0 %vm250_vm0, %v3453_v49 }
  0x92   : > { %2111 = vmatmul.mubr.msk.f32.gmra.mrb[50].mxu1 %vm250_vm0, %v3456_v50  ;;  %2080 = vmatprep.mubr.msk.f32.mxu0 %vm250_vm0, %v3484_v54 }
  0x93   : > { %2112 = vmatprep.mubr.msk.f32.mxu1 %vm250_vm0, %v3504_v58 }
  0x95   : > { %2081 = vmatmul.mubr.msk.f32.gmra.mrb[52].mxu0 %vm250_vm0, %v3470_v52 }
  0x96   : > { %2113 = vmatmul.mubr.msk.f32.gmra.mrb[52].mxu1 %vm250_vm0, %v3473_v53  ;;  %2082 = vmatprep.mubr.msk.f32.mxu0 %vm250_vm0, %v3501_v57 }
  0x97   : > { %2114 = vmatprep.mubr.msk.f32.mxu1 %vm250_vm0, %v3521_v63 }
  0x99   : > { %2083 = vmatmul.mubr.msk.f32.gmra.mrb[54].mxu0 %vm250_vm0, %v3487_v55 }
  0x9a   : > { %2115 = vmatmul.mubr.msk.f32.gmra.mrb[54].mxu1 %vm250_vm0, %v3490_v56  ;;  %2084 = vmatprep.mubr.msk.f32.mxu0 %vm250_vm0, %v3518_v60 }
  0x9b   : > { %2116 = vmatprep.mubr.msk.f32.mxu1 %vm250_vm0, %v1972_v15 }
  0x9d   : > { %2085 = vmatmul.mubr.msk.f32.gmra.mrb[56].mxu0 %vm250_vm0, %v3504_v58 }
  0x9e   : > { %2117 = vmatmul.mubr.msk.f32.gmra.mrb[56].mxu1 %vm250_vm0, %v3507_v59  ;;  %2086 = vmatprep.mubr.msk.f32.mxu0 %vm250_vm0, %v3535_v4 }
  0x9f   : > { %2118 = vmatprep.mubr.msk.f32.mxu1 %vm250_vm0, %v1973_v20 }
  0xa1   : > { %2087 = vmatmul.mubr.msk.f32.gmra.mrb[58].mxu0 %vm250_vm0, %v3521_v63 }
  0xa2   : > { %2119 = vmatmul.mubr.msk.f32.gmra.mrb[58].mxu1 %vm250_vm0, %v3524_v1  ;;  %2088 = vmatprep.mubr.msk.f32.mxu0 %vm250_vm0, %v1942_v21 }
  0xa3   : > { %2120 = vmatprep.mubr.msk.f32.mxu1 %vm250_vm0, %v1974_v22 }
  0xa5   : > { %2089 = vmatmul.mubr.msk.f32.gmra.mrb[60].mxu0 %vm250_vm0, %v1972_v15 }
  0xa6   : > { %2121 = vmatmul.mubr.msk.f32.gmra.mrb[60].mxu1 %vm250_vm0, %v1958_v23  ;;  %2090 = vmatprep.mubr.msk.f32.mxu0 %vm250_vm0, %v1943_v24 }
  0xa7   : > { %2122 = vmatprep.mubr.msk.f32.mxu1 %vm250_vm0, %v1975_v25 }
  0xa9   : > { %2091 = vmatmul.mubr.msk.f32.gmra.mrb[62].mxu0 %vm250_vm0, %v1973_v20 }
  0xaa   : > { %2123 = vmatmul.mubr.msk.f32.gmra.mrb[62].mxu1 %vm250_vm0, %v1959_v26  ;;  %2524 = vmatprep.mubr.msk.f32.mxu0 %vm250_vm0, %v3278_v46  ;;  %v1990_v46 = vld [vmem:[%s3035_s8 + $0xda] sm:$0xff] }
  0xab   : > { %2536 = vmatprep.mubr.msk.f32.mxu1 %vm250_vm0, %v3484_v54 }
  0xad   : > { %2525 = vmatmul.mubr.msk.f32.vlgmr.msra.gmra.mrb[64].mxu0 %vm250_vm0, %v3319_v61  ;;  %v1991_v61 = vld [vmem:[%s3035_s8 + $0xe2] sm:$0xff]  ;;  %s1893_s8 = sshll.u32 %s3929_s15, 4 }
  0xae   : > { %2537 = vmatmul.mubr.msk.f32.vlgmr.msra.gmra.mrb[64].mxu1 %vm250_vm0, %v3501_v57  ;;  %2527 = vmatprep.mubr.msk.f32.mxu0 %vm250_vm0, %v3360_v14  ;;  %s231_s28 = sadd.s32 %s1894_s26, %s1893_s8 }
  0xaf   : > { %2539 = vmatprep.mubr.msk.f32.mxu1 %vm250_vm0, %v3518_v60  ;;  %s1895_s15 = sshll.u32 %s231_s28, 3 }
  0xb0   : > { %s3844_s30 = scalar_lea.vmem %s3915_s4, %s1895_s15 }
  0xb1   : > { %2528 = vmatmul.mubr.msk.f32.gmra.mrb[66].mxu0 %vm250_vm0, %v3395_v30 }
  0xb2   : > { %2540 = vmatmul.mubr.msk.f32.gmra.mrb[66].mxu1 %vm250_vm0, %v3535_v4  ;;  %2530 = vmatprep.mubr.msk.f32.mxu0 %vm250_vm0, %v3414_v39 }
  0xb3   : > { %2542 = vmatprep.mubr.msk.f32.mxu1 %vm250_vm0, %v1942_v21 }
  0xb5   : > { %2531 = vmatmul.mubr.msk.f32.gmra.mrb[68].mxu0 %vm250_vm0, %v3433_v42 }
  0xb6   : > { %2543 = vmatmul.mubr.msk.f32.gmra.mrb[68].mxu1 %vm250_vm0, %v1943_v24  ;;  %2533 = vmatprep.mubr.msk.f32.mxu0 %vm250_vm0, %v3450_v45 }
  0xb7   : > { %2545 = vmatprep.mubr.msk.f32.mxu1 %vm250_vm0, %v1990_v46 }
  0xb9   : > { %2534 = vmatmul.mubr.msk.f32.gmra.mrb[70].mxu0 %vm250_vm0, %v3467_v51 }
  0xba   : > { %2546 = vmatmul.mubr.msk.f32.gmra.mrb[70].mxu1 %vm250_vm0, %v1991_v61 }
 0x100   : > { %v2172_v14 = vpop.f32.mrb[0].mxu0 }
 0x101   : > { %v2252_v27 = vpop.f32.mrb[0].mxu1  ;;  %v2173_v28 = vpop.f32.mrb[1].mxu0 }
 0x102   : > { %v2174_v29 = vadd.f32 %v2173_v28, %v2172_v14  ;;  %v2253_v17 = vpop.f32.mrb[1].mxu1 }
 0x103   : > { %v2254_v30 = vadd.f32 %v2253_v17, %v2252_v27 }
 0x104   : > { %v2175_v34 = vpop.f32.mrb[2].mxu0 }
 0x105   : > { %v3741_v35 = vadd.f32 %v2254_v30, %v2174_v29  ;;  %v2255_v36 = vpop.f32.mrb[2].mxu1  ;;  %v2176_v37 = vpop.f32.mrb[3].mxu0 }
 0x106   : > { %v2177_v38 = vadd.f32 %v2176_v37, %v2175_v34  ;;  %v2256_v39 = vpop.f32.mrb[3].mxu1 }
 0x107   : > { %v2257_v40 = vadd.f32 %v2256_v39, %v2255_v36 }
 0x108   : > { %v2178_v41 = vpop.f32.mrb[4].mxu0 }
 0x109   : > { %v3743_v42 = vadd.f32 %v2257_v40, %v2177_v38  ;;  %v2258_v43 = vpop.f32.mrb[4].mxu1  ;;  %v2179_v44 = vpop.f32.mrb[5].mxu0 }
 0x10a   : > { %v2180_v45 = vadd.f32 %v2179_v44, %v2178_v41  ;;  %v2259_v49 = vpop.f32.mrb[5].mxu1 }
 0x10b   : > { %v2260_v50 = vadd.f32 %v2259_v49, %v2258_v43 }
 0x10c   : > { %v2181_v51 = vpop.f32.mrb[6].mxu0 }
 0x10d   : > { %v3745_v52 = vadd.f32 %v2260_v50, %v2180_v45  ;;  %v2261_v53 = vpop.f32.mrb[6].mxu1  ;;  %v2182_v54 = vpop.f32.mrb[7].mxu0 }
 0x10e   : > { %v2183_v55 = vadd.f32 %v2182_v54, %v2181_v51  ;;  %v2262_v56 = vpop.f32.mrb[7].mxu1 }
 0x10f   : > { %v2263_v57 = vadd.f32 %v2262_v56, %v2261_v53 }
 0x110   : > { %v2184_v58 = vpop.f32.mrb[8].mxu0 }
 0x111   : > { %v3747_v59 = vadd.f32 %v2263_v57, %v2183_v55  ;;  %v2264_v60 = vpop.f32.mrb[8].mxu1  ;;  %v2185_v63 = vpop.f32.mrb[9].mxu0 }
 0x112   : > { %v2186_v1 = vadd.f32 %v2185_v63, %v2184_v58  ;;  %v2265_v4 = vpop.f32.mrb[9].mxu1 }
 0x113   : > { %v2266_v5 = vadd.f32 %v2265_v4, %v2264_v60 }
 0x114   : > { %v2187_v6 = vpop.f32.mrb[10].mxu0 }
 0x115   : > { %v3749_v7 = vadd.f32 %v2266_v5, %v2186_v1  ;;  %v2267_v8 = vpop.f32.mrb[10].mxu1  ;;  %v2188_v9 = vpop.f32.mrb[11].mxu0 }
 0x116   : > { %v2189_v2 = vadd.f32 %v2188_v9, %v2187_v6  ;;  %v2268_v3 = vpop.f32.mrb[11].mxu1 }
 0x117   : > { %v2269_v16 = vadd.f32 %v2268_v3, %v2267_v8 }
 0x118   : > { %v2190_v18 = vpop.f32.mrb[12].mxu0 }
 0x119   : > { %v3751_v31 = vadd.f32 %v2269_v16, %v2189_v2  ;;  %v2270_v19 = vpop.f32.mrb[12].mxu1  ;;  %v2191_v32 = vpop.f32.mrb[13].mxu0 }
 0x11a   : > { %v2192_v10 = vadd.f32 %v2191_v32, %v2190_v18  ;;  %v2271_v33 = vpop.f32.mrb[13].mxu1 }
 0x11b   : > { %v2272_v47 = vadd.f32 %v2271_v33, %v2270_v19 }
 0x11c   : > { %v2193_v11 = vpop.f32.mrb[14].mxu0 }
 0x11d   : > { %v3753_v48 = vadd.f32 %v2272_v47, %v2192_v10  ;;  %v2273_v62 = vpop.f32.mrb[14].mxu1  ;;  %v2194_v12 = vpop.f32.mrb[15].mxu0 }
 0x11e   : > { %v2195_v0 = vadd.f32 %v2194_v12, %v2193_v11  ;;  %v2274_v13 = vpop.f32.mrb[15].mxu1 }
 0x11f   : > { %v2275_v15 = vadd.f32 %v2274_v13, %v2273_v62 }
 0x120   : > { %v2196_v20 = vpop.f32.mrb[16].mxu0 }
 0x121   : > { %v3755_v21 = vadd.f32 %v2275_v15, %v2195_v0  ;;  %v2276_v22 = vpop.f32.mrb[16].mxu1  ;;  %v2197_v23 = vpop.f32.mrb[17].mxu0 }
 0x122   : > { %v2198_v24 = vadd.f32 %v2197_v23, %v2196_v20  ;;  %v2277_v25 = vpop.f32.mrb[17].mxu1 }
 0x123   : > { %v2278_v26 = vadd.f32 %v2277_v25, %v2276_v22 }
 0x124   : > { %v2199_v46 = vpop.f32.mrb[18].mxu0 }
 0x125   : > { %v3757_v61 = vadd.f32 %v2278_v26, %v2198_v24  ;;  %v2279_v14 = vpop.f32.mrb[18].mxu1  ;;  %v2200_v27 = vpop.f32.mrb[19].mxu0 }
 0x126   : > { %v2201_v28 = vadd.f32 %v2200_v27, %v2199_v46  ;;  %v2280_v29 = vpop.f32.mrb[19].mxu1 }
 0x127   : > { %v2281_v17 = vadd.f32 %v2280_v29, %v2279_v14 }
 0x128   : > { %v2202_v30 = vpop.f32.mrb[20].mxu0 }
 0x129   : > { %v3759_v34 = vadd.f32 %v2281_v17, %v2201_v28  ;;  %v2282_v36 = vpop.f32.mrb[20].mxu1  ;;  %v2203_v37 = vpop.f32.mrb[21].mxu0 }
 0x12a   : > { %v2204_v38 = vadd.f32 %v2203_v37, %v2202_v30  ;;  %v2283_v39 = vpop.f32.mrb[21].mxu1 }
 0x12b   : > { %v2284_v40 = vadd.f32 %v2283_v39, %v2282_v36 }
 0x12c   : > { %v2205_v41 = vpop.f32.mrb[22].mxu0 }
 0x12d   : > { %v3761_v43 = vadd.f32 %v2284_v40, %v2204_v38  ;;  %v2285_v44 = vpop.f32.mrb[22].mxu1  ;;  %v2206_v45 = vpop.f32.mrb[23].mxu0 }
 0x12e   : > { %v2207_v49 = vadd.f32 %v2206_v45, %v2205_v41  ;;  %v2286_v50 = vpop.f32.mrb[23].mxu1 }
 0x12f   : > { %v2287_v51 = vadd.f32 %v2286_v50, %v2285_v44 }
 0x130   : > { %v2208_v53 = vpop.f32.mrb[24].mxu0 }
 0x131   : > { %v3763_v54 = vadd.f32 %v2287_v51, %v2207_v49  ;;  %v2288_v55 = vpop.f32.mrb[24].mxu1  ;;  %v2209_v56 = vpop.f32.mrb[25].mxu0 }
 0x132   : > { %v2210_v57 = vadd.f32 %v2209_v56, %v2208_v53  ;;  %v2289_v58 = vpop.f32.mrb[25].mxu1 }
 0x133   : > { %v2290_v60 = vadd.f32 %v2289_v58, %v2288_v55 }
 0x134   : > { %v2211_v63 = vpop.f32.mrb[26].mxu0 }
 0x135   : > { %v3765_v1 = vadd.f32 %v2290_v60, %v2210_v57  ;;  %v2291_v4 = vpop.f32.mrb[26].mxu1  ;;  %v2212_v5 = vpop.f32.mrb[27].mxu0 }
 0x136   : > { %v2213_v6 = vadd.f32 %v2212_v5, %v2211_v63  ;;  %v2292_v8 = vpop.f32.mrb[27].mxu1 }
 0x137   : > { %v2293_v9 = vadd.f32 %v2292_v8, %v2291_v4 }
 0x138   : > { %v2214_v2 = vpop.f32.mrb[28].mxu0 }
 0x139   : > { %v3767_v3 = vadd.f32 %v2293_v9, %v2213_v6  ;;  %v2294_v16 = vpop.f32.mrb[28].mxu1  ;;  %v2215_v18 = vpop.f32.mrb[29].mxu0 }
 0x13a   : > { %v2216_v19 = vadd.f32 %v2215_v18, %v2214_v2  ;;  %v2295_v32 = vpop.f32.mrb[29].mxu1 }
 0x13b   : > { %v2296_v10 = vadd.f32 %v2295_v32, %v2294_v16 }
 0x13c   : > { %v2217_v33 = vpop.f32.mrb[30].mxu0 }
 0x13d   : > { %v3769_v47 = vadd.f32 %v2296_v10, %v2216_v19  ;;  %v2297_v11 = vpop.f32.mrb[30].mxu1  ;;  %v2218_v62 = vpop.f32.mrb[31].mxu0 }
 0x13e   : > { %v2219_v12 = vadd.f32 %v2218_v62, %v2217_v33  ;;  %v2298_v0 = vpop.f32.mrb[31].mxu1 }
 0x13f   : > { %v2299_v13 = vadd.f32 %v2298_v0, %v2297_v11 }
 0x140   : > { %v2332_v15 = vpop.f32.mrb[32].mxu0 }
 0x141   : > { %v3771_v20 = vadd.f32 %v2299_v13, %v2219_v12  ;;  %v2412_v22 = vpop.f32.mrb[32].mxu1  ;;  %v2333_v23 = vpop.f32.mrb[33].mxu0 }
 0x142   : > { %v2334_v24 = vadd.f32 %v2333_v23, %v2332_v15  ;;  %v2413_v25 = vpop.f32.mrb[33].mxu1 }
 0x143   : > { %v2414_v26 = vadd.f32 %v2413_v25, %v2412_v22 }
 0x144   : > { %v1314_v46 = vadd.f32 %v2334_v24, %v3741_v35  ;;  %v2335_v14 = vpop.f32.mrb[34].mxu0 }
 0x145   : > { %v2415_v27 = vpop.f32.mrb[34].mxu1  ;;  %v2336_v28 = vpop.f32.mrb[35].mxu0 }
 0x146   : > { %v2337_v29 = vadd.f32 %v2336_v28, %v2335_v14  ;;  %v2416_v17 = vpop.f32.mrb[35].mxu1  ;;  %v3774_v30 = vadd.f32 %v2414_v26, %v1314_v46 }
 0x147   : > { %v2417_v36 = vadd.f32 %v2416_v17, %v2415_v27 }
 0x148   : > { %v1319_v37 = vadd.f32 %v2337_v29, %v3743_v42  ;;  %v2338_v38 = vpop.f32.mrb[36].mxu0 }
 0x149   : > { %v2418_v39 = vpop.f32.mrb[36].mxu1  ;;  %v2339_v40 = vpop.f32.mrb[37].mxu0 }
 0x14a   : > { %v2340_v41 = vadd.f32 %v2339_v40, %v2338_v38  ;;  %v2419_v44 = vpop.f32.mrb[37].mxu1  ;;  %v3777_v45 = vadd.f32 %v2417_v36, %v1319_v37 }
 0x14b   : > { %v2420_v49 = vadd.f32 %v2419_v44, %v2418_v39 }
 0x14c   : > { %v1324_v35 = vadd.f32 %v2340_v41, %v3745_v52  ;;  %v2341_v50 = vpop.f32.mrb[38].mxu0 }
 0x14d   : > { %v2421_v51 = vpop.f32.mrb[38].mxu1  ;;  %v2342_v53 = vpop.f32.mrb[39].mxu0 }
 0x14e   : > { %v2343_v55 = vadd.f32 %v2342_v53, %v2341_v50  ;;  %v2422_v56 = vpop.f32.mrb[39].mxu1  ;;  %v3780_v57 = vadd.f32 %v2420_v49, %v1324_v35 }
 0x14f   : > { %v2423_v58 = vadd.f32 %v2422_v56, %v2421_v51 }
 0x150   : > { %v1329_v42 = vadd.f32 %v2343_v55, %v3747_v59  ;;  %v2344_v60 = vpop.f32.mrb[40].mxu0 }
 0x151   : > { %v2424_v63 = vpop.f32.mrb[40].mxu1  ;;  %v2345_v4 = vpop.f32.mrb[41].mxu0 }
 0x152   : > { %v2346_v5 = vadd.f32 %v2345_v4, %v2344_v60  ;;  %v2425_v6 = vpop.f32.mrb[41].mxu1  ;;  %v3783_v8 = vadd.f32 %v2423_v58, %v1329_v42 }
 0x153   : > { %v2426_v9 = vadd.f32 %v2425_v6, %v2424_v63 }
 0x154   : > { %v1334_v52 = vadd.f32 %v2346_v5, %v3749_v7  ;;  %v2347_v2 = vpop.f32.mrb[42].mxu0 }
 0x155   : > { %v2427_v16 = vpop.f32.mrb[42].mxu1  ;;  %v2348_v18 = vpop.f32.mrb[43].mxu0 }
 0x156   : > { %v2349_v19 = vadd.f32 %v2348_v18, %v2347_v2  ;;  %v2428_v32 = vpop.f32.mrb[43].mxu1  ;;  %v3786_v10 = vadd.f32 %v2426_v9, %v1334_v52 }
 0x157   : > { %v2429_v33 = vadd.f32 %v2428_v32, %v2427_v16 }
 0x158   : > { %v1339_v59 = vadd.f32 %v2349_v19, %v3751_v31  ;;  %v2350_v11 = vpop.f32.mrb[44].mxu0 }
 0x159   : > { %v2430_v62 = vpop.f32.mrb[44].mxu1  ;;  %v2351_v12 = vpop.f32.mrb[45].mxu0 }
 0x15a   : > { %v2352_v0 = vadd.f32 %v2351_v12, %v2350_v11  ;;  %v2431_v13 = vpop.f32.mrb[45].mxu1  ;;  %v3789_v15 = vadd.f32 %v2429_v33, %v1339_v59 }
 0x15b   : > { %v2432_v22 = vadd.f32 %v2431_v13, %v2430_v62 }
 0x15c   : > { %v1344_v7 = vadd.f32 %v2352_v0, %v3753_v48  ;;  %v2353_v23 = vpop.f32.mrb[46].mxu0 }
 0x15d   : > { %v2433_v24 = vpop.f32.mrb[46].mxu1  ;;  %v2354_v25 = vpop.f32.mrb[47].mxu0 }
 0x15e   : > { %v2355_v26 = vadd.f32 %v2354_v25, %v2353_v23  ;;  %v2434_v46 = vpop.f32.mrb[47].mxu1  ;;  %v3792_v14 = vadd.f32 %v2432_v22, %v1344_v7 }
 0x15f   : > { %v2435_v27 = vadd.f32 %v2434_v46, %v2433_v24 }
 0x160   : > { %v1349_v31 = vadd.f32 %v2355_v26, %v3755_v21  ;;  %v2356_v28 = vpop.f32.mrb[48].mxu0 }
 0x161   : > { %v2436_v29 = vpop.f32.mrb[48].mxu1  ;;  %v2357_v17 = vpop.f32.mrb[49].mxu0 }
 0x162   : > { %v2358_v36 = vadd.f32 %v2357_v17, %v2356_v28  ;;  %v2437_v37 = vpop.f32.mrb[49].mxu1  ;;  %v3795_v38 = vadd.f32 %v2435_v27, %v1349_v31 }
 0x163   : > { %v2438_v39 = vadd.f32 %v2437_v37, %v2436_v29 }
 0x164   : > { %v1354_v48 = vadd.f32 %v2358_v36, %v3757_v61  ;;  %v2359_v40 = vpop.f32.mrb[50].mxu0 }
 0x165   : > { %v2439_v41 = vpop.f32.mrb[50].mxu1  ;;  %v2360_v44 = vpop.f32.mrb[51].mxu0 }
 0x166   : > { %v2361_v49 = vadd.f32 %v2360_v44, %v2359_v40  ;;  %v2440_v35 = vpop.f32.mrb[51].mxu1  ;;  %v3798_v50 = vadd.f32 %v2438_v39, %v1354_v48 }
 0x167   : > { %v2441_v51 = vadd.f32 %v2440_v35, %v2439_v41 }
 0x168   : > { %v1359_v21 = vadd.f32 %v2361_v49, %v3759_v34  ;;  %v2362_v53 = vpop.f32.mrb[52].mxu0  ;;  %v3820_v49 = vld [vmem:[%s3913_s2] ss:$0 sm:$0xff] }
 0x169   : > { %v2442_v55 = vpop.f32.mrb[52].mxu1  ;;  %v2363_v56 = vpop.f32.mrb[53].mxu0 }
 0x16a   : > { %v2364_v58 = vadd.f32 %v2363_v56, %v2362_v53  ;;  %v2443_v42 = vpop.f32.mrb[53].mxu1  ;;  %v1504_v60 = vadd.f32 %v2441_v51, %v1359_v21  ;;  %v3826_v21 = vld [vmem:[%s3914_s3] ss:$0 sm:$0xff] }
 0x16b   : > { %v2444_v63 = vadd.f32 %v2443_v42, %v2442_v55 }
 0x16c   : > { %v1364_v4 = vadd.f32 %v2364_v58, %v3761_v43  ;;  %v2365_v61 = vpop.f32.mrb[54].mxu0 }
 0x16d   : > { %v2445_v5 = vpop.f32.mrb[54].mxu1  ;;  %v2366_v6 = vpop.f32.mrb[55].mxu0 }
 0x16e   : > { %v2367_v9 = vadd.f32 %v2366_v6, %v2365_v61  ;;  %v2446_v52 = vpop.f32.mrb[55].mxu1  ;;  %v3802_v2 = vadd.f32 %v2444_v63, %v1364_v4 }
 0x16f   : > { %v2447_v16 = vadd.f32 %v2446_v52, %v2445_v5 }
 0x170   : > { %v1369_v18 = vadd.f32 %v2367_v9, %v3763_v54  ;;  %v2368_v34 = vpop.f32.mrb[56].mxu0 }
 0x171   : > { %v2448_v19 = vpop.f32.mrb[56].mxu1  ;;  %v2369_v32 = vpop.f32.mrb[57].mxu0 }
 0x172   : > { %v2370_v33 = vadd.f32 %v2369_v32, %v2368_v34  ;;  %v2449_v59 = vpop.f32.mrb[57].mxu1  ;;  %v1514_v11 = vadd.f32 %v2447_v16, %v1369_v18 }
 0x173   : > { %v2450_v62 = vadd.f32 %v2449_v59, %v2448_v19 }
 0x174   : > { %v1374_v12 = vadd.f32 %v2370_v33, %v3765_v1  ;;  %v2371_v43 = vpop.f32.mrb[58].mxu0 }
 0x175   : > { %v2451_v0 = vpop.f32.mrb[58].mxu1  ;;  %v2372_v13 = vpop.f32.mrb[59].mxu0 }
 0x176   : > { %v2373_v22 = vadd.f32 %v2372_v13, %v2371_v43  ;;  %v2452_v7 = vpop.f32.mrb[59].mxu1  ;;  %v3806_v23 = vadd.f32 %v2450_v62, %v1374_v12 }
 0x177   : > { %v2453_v24 = vadd.f32 %v2452_v7, %v2451_v0 }
 0x178   : > { %v1379_v54 = vadd.f32 %v2373_v22, %v3767_v3  ;;  %v2374_v25 = vpop.f32.mrb[60].mxu0 }
 0x179   : > { %v2454_v26 = vpop.f32.mrb[60].mxu1  ;;  %v2375_v46 = vpop.f32.mrb[61].mxu0 }
 0x17a   : > { %v2376_v27 = vadd.f32 %v2375_v46, %v2374_v25  ;;  %v2455_v31 = vpop.f32.mrb[61].mxu1  ;;  %v3809_v28 = vadd.f32 %v2453_v24, %v1379_v54 }
 0x17b   : > { %v2456_v1 = vadd.f32 %v2455_v31, %v2454_v26 }
 0x17c   : > { %v1384_v29 = vadd.f32 %v2376_v27, %v3769_v47  ;;  %v2377_v17 = vpop.f32.mrb[62].mxu0 }
 0x17d   : > { %v2457_v36 = vpop.f32.mrb[62].mxu1  ;;  %v2378_v37 = vpop.f32.mrb[63].mxu0 }
 0x17e   : > { %v2379_v39 = vadd.f32 %v2378_v37, %v2377_v17  ;;  %v2458_v48 = vpop.f32.mrb[63].mxu1  ;;  %v3814_v40 = vadd.f32 %v2456_v1, %v1384_v29 }
 0x17f   : > { %v2459_v3 = vadd.f32 %v2458_v48, %v2457_v36 }
 0x180   : > { %v1389_v41 = vadd.f32 %v2379_v39, %v3771_v20  ;;  %v2526_v44 = vpop.f32.mrb[64].mxu0 }
 0x181   : > { %v1609_v47 = vadd.f32 %v2526_v44, %v3777_v45  ;;  %v2538_v35 = vpop.f32.mrb[64].mxu1  ;;  %v1603_v51 = vpop.f32.mrb[65].mxu0 }
 0x182   : > { %v1649_v53 = vadd.f32 %v2538_v35, %v1504_v60  ;;  %v1604_v55 = vadd.f32 %v1603_v51, %v3774_v30  ;;  %v1643_v20 = vpop.f32.mrb[65].mxu1  ;;  %v3829_v56 = vadd.f32 %v2459_v3, %v1389_v41 }
 0x183   : > { %v1690_v58 = vmul.f32 %v3820_v49, %v1609_v47  ;;  %v1644_v42 = vadd.f32 %v1643_v20, %v3798_v50 }
 0x184   : > { %v1698_v45 = vmul.f32 %v3820_v49, %v1649_v53  ;;  %v1689_v63 = vmul.f32 %v3820_v49, %v1604_v55  ;;  %v2529_v4 = vpop.f32.mrb[66].mxu0 }
 0x185   : > { %v1713_v61 = vadd.f32 %v3826_v21, %v1690_v58  ;;  %v1697_v5 = vmul.f32 %v3820_v49, %v1644_v42  ;;  %v1619_v60 = vadd.f32 %v2529_v4, %v3783_v8  ;;  %v2541_v30 = vpop.f32.mrb[66].mxu1  ;;  %v1613_v6 = vpop.f32.mrb[67].mxu0 }
 0x186   : > { %v1721_v9 = vadd.f32 %v3826_v21, %v1698_v45  ;;  %v1712_v52 = vadd.f32 %v3826_v21, %v1689_v63  ;;  %v1659_v16 = vadd.f32 %v2541_v30, %v1514_v11  ;;  %v1614_v50 = vadd.f32 %v1613_v6, %v3780_v57  ;;  %v1653_v18 = vpop.f32.mrb[67].mxu1 }
 0x187   : > { %vm1729_vm1 = vcmp.ge.f32.partialorder %v1713_v61, 0.0  ;;  %v1745_v34 = vmul.f32 0.1, %v1713_v61  ;;  %v1720_v8 = vadd.f32 %v3826_v21, %v1697_v5  ;;  %v1692_v19 = vmul.f32 %v3820_v49, %v1619_v60 }
 0x188   : > { %vm1737_vm2 = vcmp.ge.f32.partialorder %v1721_v9, 0.0  ;;  %v1753_v32 = vmul.f32 0.1, %v1721_v9  ;;  %vm1728_vm3 = vcmp.ge.f32.partialorder %v1712_v52, 0.0  ;;  %v1744_v33 = vmul.f32 0.1, %v1712_v52 }
 0x189   : > { %v1761_v57 = vsel %vm1729_vm1, %v1713_v61, %v1745_v34  ;;  %vm1736_vm4 = vcmp.ge.f32.partialorder %v1720_v8, 0.0  ;;  %v1752_v59 = vmul.f32 0.1, %v1720_v8  ;;  %v1715_v11 = vadd.f32 %v3826_v21, %v1692_v19  ;;  %v2532_v62 = vpop.f32.mrb[68].mxu0  ;;  %v2544_v12 = vpop.f32.mrb[68].mxu1 }
 0x18a   : > { %1777 = vst [vmem:[%s3844_s30 + $0x8] sm:$0xff] %v1761_v57  ;;  %v1769_v43 = vsel %vm1737_vm2, %v1721_v9, %v1753_v32  ;;  %v1760_v0 = vsel %vm1728_vm3, %v1712_v52, %v1744_v33  ;;  %v1700_v13 = vmul.f32 %v3820_v49, %v1659_v16  ;;  %v1691_v22 = vmul.f32 %v3820_v49, %v1614_v50  ;;  %v1623_v7 = vpop.f32.mrb[69].mxu0  ;;  %v1663_v24 = vpop.f32.mrb[69].mxu1 }
 0x18b   : > { %1785 = vst [vmem:[%s3844_s30 + $0x48] sm:$0xff] %v1769_v43  ;;  %1776 = vst [vmem:[%s3844_s30] sm:$0xff] %v1760_v0  ;;  %v1768_v54 = vsel %vm1736_vm4, %v1720_v8, %v1752_v59  ;;  %vm1731_vm5 = vcmp.ge.f32.partialorder %v1715_v11, 0.0  ;;  %v1747_v25 = vmul.f32 0.1, %v1715_v11  ;;  %v1654_v26 = vadd.f32 %v1653_v18, %v3802_v2 }
 0x18c   : > { %1784 = vst [vmem:[%s3844_s30 + $0x40] sm:$0xff] %v1768_v54  ;;  %v1723_v46 = vadd.f32 %v3826_v21, %v1700_v13  ;;  %v1714_v27 = vadd.f32 %v3826_v21, %v1691_v22  ;;  %v1629_v31 = vadd.f32 %v2532_v62, %v3789_v15  ;;  %v1669_v1 = vadd.f32 %v2544_v12, %v3809_v28  ;;  %v2535_v29 = vpop.f32.mrb[70].mxu0 }
 0x18d   : > { %v1763_v17 = vsel %vm1731_vm5, %v1715_v11, %v1747_v25  ;;  %v1699_v36 = vmul.f32 %v3820_v49, %v1654_v26  ;;  %v1624_v37 = vadd.f32 %v1623_v7, %v3786_v10  ;;  %v1664_v39 = vadd.f32 %v1663_v24, %v3806_v23  ;;  %v2547_v48 = vpop.f32.mrb[70].mxu1  ;;  %v1633_v2 = vpop.f32.mrb[71].mxu0 }
 0x18e   : > { %1779 = vst [vmem:[%s3844_s30 + $0x18] sm:$0xff] %v1763_v17  ;;  %vm1739_vm6 = vcmp.ge.f32.partialorder %v1723_v46, 0.0  ;;  %v1755_v3 = vmul.f32 0.1, %v1723_v46  ;;  %vm1730_vm7 = vcmp.ge.f32.partialorder %v1714_v27, 0.0  ;;  %v1694_v28 = vmul.f32 %v3820_v49, %v1629_v31  ;;  %v1673_v10 = vpop.f32.mrb[71].mxu1 }
 0x18f   : > { %v1746_v41 = vmul.f32 0.1, %v1714_v27  ;;  %v1722_v15 = vadd.f32 %v3826_v21, %v1699_v36  ;;  %v1702_v44 = vmul.f32 %v3820_v49, %v1669_v1  ;;  %v1693_v47 = vmul.f32 %v3820_v49, %v1624_v37 }
 0x190   : > { %v1771_v35 = vsel %vm1739_vm6, %v1723_v46, %v1755_v3  ;;  %v1701_v51 = vmul.f32 %v3820_v49, %v1664_v39  ;;  %v1639_v53 = vadd.f32 %v2535_v29, %v3795_v38  ;;  %v1717_v20 = vadd.f32 %v3826_v21, %v1694_v28 }
 0x191   : > { %v1762_v23 = vsel %vm1730_vm7, %v1714_v27, %v1746_v41  ;;  %1787 = vst [vmem:[%s3844_s30 + $0x58] sm:$0xff] %v1771_v35  ;;  %vm1738_vm8 = vcmp.ge.f32.partialorder %v1722_v15, 0.0  ;;  %v1754_v55 = vmul.f32 0.1, %v1722_v15  ;;  %v1725_v58 = vadd.f32 %v3826_v21, %v1702_v44 }
 0x192   : > { %1778 = vst [vmem:[%s3844_s30 + $0x10] sm:$0xff] %v1762_v23  ;;  %v1716_v42 = vadd.f32 %v3826_v21, %v1693_v47  ;;  %v1724_v45 = vadd.f32 %v3826_v21, %v1701_v51  ;;  %v1696_v63 = vmul.f32 %v3820_v49, %v1639_v53  ;;  %v1679_v4 = vadd.f32 %v2547_v48, %v3829_v56 }
 0x193   : > { %v1770_v61 = vsel %vm1738_vm8, %v1722_v15, %v1754_v55  ;;  %vm1733_vm9 = vcmp.ge.f32.partialorder %v1717_v20, 0.0  ;;  %v1749_v38 = vmul.f32 0.1, %v1717_v20  ;;  %vm1741_vm10 = vcmp.ge.f32.partialorder %v1725_v58, 0.0 }
 0x194   : > { %1786 = vst [vmem:[%s3844_s30 + $0x50] sm:$0xff] %v1770_v61  ;;  %v1757_v5 = vmul.f32 0.1, %v1725_v58  ;;  %vm1732_vm11 = vcmp.ge.f32.partialorder %v1716_v42, 0.0  ;;  %v1748_v60 = vmul.f32 0.1, %v1716_v42  ;;  %v1719_v9 = vadd.f32 %v3826_v21, %v1696_v63 }
 0x195   : > { %vm1740_vm12 = vcmp.ge.f32.partialorder %v1724_v45, 0.0  ;;  %v1765_v30 = vsel %vm1733_vm9, %v1717_v20, %v1749_v38  ;;  %v1756_v6 = vmul.f32 0.1, %v1724_v45  ;;  %v1704_v52 = vmul.f32 %v3820_v49, %v1679_v4 }
 0x196   : > { %1781 = vst [vmem:[%s3844_s30 + $0x28] sm:$0xff] %v1765_v30  ;;  %v1773_v56 = vsel %vm1741_vm10, %v1725_v58, %v1757_v5  ;;  %v1764_v16 = vsel %vm1732_vm11, %v1716_v42, %v1748_v60  ;;  %v1634_v50 = vadd.f32 %v1633_v2, %v3792_v14  ;;  %v1674_v18 = vadd.f32 %v1673_v10, %v3814_v40 }
 0x197   : > { %1789 = vst [vmem:[%s3844_s30 + $0x68] sm:$0xff] %v1773_v56  ;;  %1780 = vst [vmem:[%s3844_s30 + $0x20] sm:$0xff] %v1764_v16  ;;  %v1772_v34 = vsel %vm1740_vm12, %v1724_v45, %v1756_v6  ;;  %vm1735_vm13 = vcmp.ge.f32.partialorder %v1719_v9, 0.0  ;;  %v1751_v8 = vmul.f32 0.1, %v1719_v9  ;;  %v1727_v19 = vadd.f32 %v3826_v21, %v1704_v52 }
 0x198   : > { %1788 = vst [vmem:[%s3844_s30 + $0x60] sm:$0xff] %v1772_v34  ;;  %v1695_v32 = vmul.f32 %v3820_v49, %v1634_v50  ;;  %v1703_v33 = vmul.f32 %v3820_v49, %v1674_v18 }
 0x199   : > { %v1767_v57 = vsel %vm1735_vm13, %v1719_v9, %v1751_v8  ;;  %vm1743_vm14 = vcmp.ge.f32.partialorder %v1727_v19, 0.0  ;;  %v1759_v14 = vmul.f32 0.1, %v1727_v19 }
 0x19a   : > { %1783 = vst [vmem:[%s3844_s30 + $0x38] sm:$0xff] %v1767_v57  ;;  %v1718_v40 = vadd.f32 %v3826_v21, %v1695_v32  ;;  %v1726_v59 = vadd.f32 %v3826_v21, %v1703_v33 }
 0x19b   : > { %v1775_v11 = vsel %vm1743_vm14, %v1727_v19, %v1759_v14 }
 0x19c   : > { %1791 = vst [vmem:[%s3844_s30 + $0x78] sm:$0xff] %v1775_v11  ;;  %vm1734_vm15 = vcmp.ge.f32.partialorder %v1718_v40, 0.0  ;;  %v1750_v62 = vmul.f32 0.1, %v1718_v40  ;;  %vm1742_vm0 = vcmp.ge.f32.partialorder %v1726_v59, 0.0 }
 0x19d   : > { %v1758_v12 = vmul.f32 0.1, %v1726_v59 }
 0x19e   : > { %v1766_v43 = vsel %vm1734_vm15, %v1718_v40, %v1750_v62 }
 0x19f   : > { %v1774_v0 = vsel %vm1742_vm0, %v1726_v59, %v1758_v12  ;;  %1782 = vst [vmem:[%s3844_s30 + $0x30] sm:$0xff] %v1766_v43 }
 0x1a0   : > { %1790 = vst [vmem:[%s3844_s30 + $0x70] sm:$0xff] %v1774_v0 }
 0x1a1 PF: > { %s14_s19 = sadd.s32 1, %s2804_s19   ;;  %s3916_s15 = smov %s2796_s17 }
 0x1a2   : > { %p11_p7 = scmp.ge.s32.totalorder %s14_s19, 6   ;;  %s3917_s16 = smov %s2800_s18 }
 0x1a3   : > { %s3918_s17 = smov %s3921_s20  ;;  %s3919_s18 = smov %s3925_s21 }
 0x1a4   :  { %13 = sbr.rel (!%p11_p7) target bundleno = 3 (0x3), region = 68 }

// kernel: decoder_forward.8
= control target key start
LH: loop header
LB: loop body
LE: loop exit
PB: predicated region body
PF: predicated region fallthrough
CT: control target
= control target key end

     0   :  { %s1889_s15 = smov 0   ;;  %s1891_s16 = smov 0   ;;  %s2517_s0 = inlined_call_operand.vmem [shape: f32[2,1,4,9,9,128], index: 0, kind: input, shape index: {}]   ;;  %s2518_s1 = inlined_call_operand.vmem [shape: f32[1152,128], index: 1, kind: input, shape index: {}]   ;;  %s2519_s2 = inlined_call_operand.vmem [shape: f32[1,128], index: 2, kind: input, shape index: {}]   ;;  %s2520_s3 = inlined_call_operand.vmem [shape: f32[1,128], index: 3, kind: input, shape index: {}]   ;;  %s2521_s4 = inlined_call_operand.vmem [shape: f32[2,1,8,8,128], index: 4, kind: output, shape index: {}]  }
   0x1   :  { %s1893_s17 = smov 0  }
   0x2 LB: > { %s26_s18 = sadd.s32 1, %s1858_s16  ;;  %p1282_p0 = scmp.ge.s32.totalorder %s1862_s17, 1  ;;  %s1862_s17 = sphi %s1893_s17, %s14_s17   ;;  %s1858_s16 = sphi %s1891_s16, %s2523_s16   ;;  %s1854_s15 = sphi %s1889_s15, %s2522_s15  }
   0x3   : > { %p28_p1 = scmp.ge.s32.totalorder %s26_s18, 2  ;;  %p182_p2 = scmp.lt.s32.totalorder %s1862_s17, 3 }
   0x5   : > { %s2525_s18 = smov (%p28_p1, %s26_s18), 0  ;;  %p183_p3 = pnand %p1282_p0, %p182_p2 }
   0x6   : > { %v471_v0 = vld [vmem:[%s2518_s1 + $0x80] sm:$0xff] (!%p183_p3)  ;;  %v472_v1 = vld [vmem:[%s2518_s1 + $0x88] sm:$0xff] (!%p183_p3)  ;;  %v473_v11 = vld [vmem:[%s2518_s1 + $0x90] sm:$0xff] (!%p183_p3)  ;;  %p216_p4 = scmp.lt.s32.totalorder (!%p183_p3), %s1854_s15, 1 }
   0x7   : > { %186 = sbr.rel (%p183_p3) target bundleno = 338 (0x152), region = 36  ;;  %v503_v2 = vld [vmem:[%s2518_s1 + $0x180] sm:$0xff] (!%p183_p3)  ;;  %v1639_v3 = vpack.c.bf16 (!%p183_p3), %v472_v1, %v471_v0  ;;  %v504_v4 = vld [vmem:[%s2518_s1 + $0x188] sm:$0xff] (!%p183_p3)  ;;  %v474_v13 = vld [vmem:[%s2518_s1 + $0x98] sm:$0xff] (!%p183_p3) }
   0x8   : > { %v455_v5 = vld [vmem:[%s2518_s1] sm:$0xff] (!%p183_p3)  ;;  %v456_v6 = vld [vmem:[%s2518_s1 + $0x8] sm:$0xff] (!%p183_p3)  ;;  %v1671_v7 = vpack.c.bf16 (!%p183_p3), %v504_v4, %v503_v2  ;;  %v505_v14 = vld [vmem:[%s2518_s1 + $0x190] sm:$0xff] (!%p183_p3)  ;;  %v1643_v16 = vpack.c.bf16 (!%p183_p3), %v474_v13, %v473_v11 }
   0x9   : > { %v1641_v8 = vpack.c.bf16 (!%p183_p3), %v456_v6, %v455_v5  ;;  %v487_v9 = vld [vmem:[%s2518_s1 + $0x100] sm:$0xff] (!%p183_p3)  ;;  %v488_v10 = vld [vmem:[%s2518_s1 + $0x108] sm:$0xff] (!%p183_p3)  ;;  %1640 = vmatprep.subr.bf16.mxu0 (!%p183_p3), %v1639_v3  ;;  %v506_v15 = vld [vmem:[%s2518_s1 + $0x198] sm:$0xff] (!%p183_p3) }
   0xa   : > { %v1673_v12 = vpack.c.bf16 (!%p183_p3), %v488_v10, %v487_v9  ;;  %1672 = vmatprep.subr.bf16.mxu1 (!%p183_p3), %v1671_v7  ;;  %v1675_v17 = vpack.c.bf16 (!%p183_p3), %v506_v15, %v505_v14  ;;  %v457_v18 = vld [vmem:[%s2518_s1 + $0x10] sm:$0xff] (!%p183_p3)  ;;  %v458_v19 = vld [vmem:[%s2518_s1 + $0x18] sm:$0xff] (!%p183_p3)  ;;  %v475_v23 = vld [vmem:[%s2518_s1 + $0xa0] sm:$0xff] (!%p183_p3) }
   0xb   : > { %1642 = vmatpush3.bf16.msra.mxu0 (!%p183_p3), %v1641_v8  ;;  %v489_v20 = vld [vmem:[%s2518_s1 + $0x110] sm:$0xff] (!%p183_p3)  ;;  %v1645_v21 = vpack.c.bf16 (!%p183_p3), %v458_v19, %v457_v18  ;;  %v490_v22 = vld [vmem:[%s2518_s1 + $0x118] sm:$0xff] (!%p183_p3)  ;;  %v476_v24 = vld [vmem:[%s2518_s1 + $0xa8] sm:$0xff] (!%p183_p3) }
   0xc   : > { %1674 = vmatpush3.bf16.msra.mxu1 (!%p183_p3), %v1673_v12  ;;  %1644 = vmatprep.subr.bf16.mxu0 (!%p183_p3), %v1643_v16  ;;  %v1677_v25 = vpack.c.bf16 (!%p183_p3), %v490_v22, %v489_v20  ;;  %v1647_v26 = vpack.c.bf16 (!%p183_p3), %v476_v24, %v475_v23  ;;  %v507_v27 = vld [vmem:[%s2518_s1 + $0x1a0] sm:$0xff] (!%p183_p3)  ;;  %v508_v28 = vld [vmem:[%s2518_s1 + $0x1a8] sm:$0xff] (!%p183_p3)  ;;  %v477_v35 = vld [vmem:[%s2518_s1 + $0xb0] sm:$0xff] (!%p183_p3) }
   0xd   : > { %1676 = vmatprep.subr.bf16.mxu1 (!%p183_p3), %v1675_v17  ;;  %v459_v29 = vld [vmem:[%s2518_s1 + $0x20] sm:$0xff] (!%p183_p3)  ;;  %v1679_v30 = vpack.c.bf16 (!%p183_p3), %v508_v28, %v507_v27  ;;  %v460_v31 = vld [vmem:[%s2518_s1 + $0x28] sm:$0xff] (!%p183_p3)  ;;  %v478_v36 = vld [vmem:[%s2518_s1 + $0xb8] sm:$0xff] (!%p183_p3) }
   0xe   : > { %v491_v32 = vld [vmem:[%s2518_s1 + $0x120] sm:$0xff]  ;;  %v492_v33 = vld [vmem:[%s2518_s1 + $0x128] sm:$0xff]  ;;  %v1649_v34 = vpack.c.bf16 %v460_v31, %v459_v29  ;;  %v509_v37 = vld [vmem:[%s2518_s1 + $0x1b0] sm:$0xff]  ;;  %v1651_v39 = vpack.c.bf16 %v478_v36, %v477_v35  ;;  %s2527_s15 = smov (!%p216_p4, %s1854_s15), 1 }
   0xf   : > { %1646 = vmatpush3.bf16.msra.mxu0 %v1645_v21  ;;  %v1681_v38 = vpack.c.bf16 %v492_v33, %v491_v32  ;;  %v510_v40 = vld [vmem:[%s2518_s1 + $0x1b8] sm:$0xff]  ;;  %v461_v41 = vld [vmem:[%s2518_s1 + $0x30] sm:$0xff]  ;;  %v479_v46 = vld [vmem:[%s2518_s1 + $0xc0] sm:$0xff]  ;;  %s1815_s11 = smul.u32 576, %s2527_s15  ;;  %s1346_s12 = sshll.u32 %s2527_s15, 6 }
  0x10   : > { %1678 = vmatpush3.bf16.msra.mxu1 %v1677_v25  ;;  %1648 = vmatprep.subr.bf16.mxu0 %v1647_v26  ;;  %v462_v42 = vld [vmem:[%s2518_s1 + $0x38] sm:$0xff]  ;;  %v1683_v43 = vpack.c.bf16 %v510_v40, %v509_v37  ;;  %v493_v44 = vld [vmem:[%s2518_s1 + $0x130] sm:$0xff]  ;;  %v480_v47 = vld [vmem:[%s2518_s1 + $0xc8] sm:$0xff]  ;;  %s2498_s19 = scalar_lea.vmem %s2521_s4, %s1346_s12 }
  0x11   : > { %1680 = vmatprep.subr.bf16.mxu1 %v1679_v30  ;;  %v494_v45 = vld [vmem:[%s2518_s1 + $0x138] sm:$0xff]  ;;  %v511_v48 = vld [vmem:[%s2518_s1 + $0x1c0] sm:$0xff]  ;;  %v512_v49 = vld [vmem:[%s2518_s1 + $0x1c8] sm:$0xff]  ;;  %v1653_v50 = vpack.c.bf16 %v462_v42, %v461_v41  ;;  %v1655_v52 = vpack.c.bf16 %v480_v47, %v479_v46  ;;  %s2069_s8 = scalar_lea.vmem %s2517_s0, %s1815_s11 }
  0x12   : > { %v1685_v51 = vpack.c.bf16 %v494_v45, %v493_v44  ;;  %v463_v53 = vld [vmem:[%s2518_s1 + $0x40] sm:$0xff]  ;;  %v464_v54 = vld [vmem:[%s2518_s1 + $0x48] sm:$0xff]  ;;  %v1687_v56 = vpack.c.bf16 %v512_v49, %v511_v48  ;;  %v481_v58 = vld [vmem:[%s2518_s1 + $0xd0] sm:$0xff] }
  0x13   : > { %1650 = vmatpush3.bf16.msra.mxu0 %v1649_v34  ;;  %v495_v55 = vld [vmem:[%s2518_s1 + $0x140] sm:$0xff]  ;;  %v496_v57 = vld [vmem:[%s2518_s1 + $0x148] sm:$0xff]  ;;  %v482_v59 = vld [vmem:[%s2518_s1 + $0xd8] sm:$0xff]  ;;  %v1657_v62 = vpack.c.bf16 %v464_v54, %v463_v53 }
  0x14   : > { %1682 = vmatpush3.bf16.msra.mxu1 %v1681_v38  ;;  %1652 = vmatprep.subr.bf16.mxu0 %v1651_v39  ;;  %v513_v60 = vld [vmem:[%s2518_s1 + $0x1d0] sm:$0xff]  ;;  %v514_v61 = vld [vmem:[%s2518_s1 + $0x1d8] sm:$0xff]  ;;  %v1689_v63 = vpack.c.bf16 %v496_v57, %v495_v55  ;;  %v1659_v0 = vpack.c.bf16 %v482_v59, %v481_v58  ;;  %v483_v6 = vld [vmem:[%s2518_s1 + $0xe0] sm:$0xff] }
  0x15   : > { %1684 = vmatprep.subr.bf16.mxu1 %v1683_v43  ;;  %v465_v1 = vld [vmem:[%s2518_s1 + $0x50] sm:$0xff]  ;;  %v466_v2 = vld [vmem:[%s2518_s1 + $0x58] sm:$0xff]  ;;  %v1691_v4 = vpack.c.bf16 %v514_v61, %v513_v60  ;;  %v484_v7 = vld [vmem:[%s2518_s1 + $0xe8] sm:$0xff] }
  0x16   : > { %v497_v3 = vld [vmem:[%s2518_s1 + $0x150] sm:$0xff]  ;;  %v498_v5 = vld [vmem:[%s2518_s1 + $0x158] sm:$0xff]  ;;  %v515_v8 = vld [vmem:[%s2518_s1 + $0x1e0] sm:$0xff]  ;;  %v1661_v10 = vpack.c.bf16 %v466_v2, %v465_v1  ;;  %v1663_v14 = vpack.c.bf16 %v484_v7, %v483_v6 }
  0x17   : > { %1654 = vmatpush3.bf16.msra.mxu0 %v1653_v50  ;;  %v516_v9 = vld [vmem:[%s2518_s1 + $0x1e8] sm:$0xff]  ;;  %v467_v11 = vld [vmem:[%s2518_s1 + $0x60] sm:$0xff]  ;;  %v1693_v13 = vpack.c.bf16 %v498_v5, %v497_v3  ;;  %v1286_v16 = vld [vmem:[%s2069_s8 + $0x90] sm:$0xff] }
  0x18   : > { %1686 = vmatpush3.bf16.msra.mxu1 %v1685_v51  ;;  %1656 = vmatprep.subr.bf16.mxu0 %v1655_v52  ;;  %v468_v12 = vld [vmem:[%s2518_s1 + $0x68] sm:$0xff]  ;;  %v499_v15 = vld [vmem:[%s2518_s1 + $0x160] sm:$0xff]  ;;  %v1695_v18 = vpack.c.bf16 %v516_v9, %v515_v8  ;;  %v485_v20 = vld [vmem:[%s2518_s1 + $0xf0] sm:$0xff] }
  0x19   : > { %1688 = vmatprep.subr.bf16.mxu1 %v1687_v56  ;;  %v1294_v17 = vld [vmem:[%s2069_s8 + $0x120] sm:$0xff]  ;;  %v500_v19 = vld [vmem:[%s2518_s1 + $0x168] sm:$0xff]  ;;  %v486_v21 = vld [vmem:[%s2518_s1 + $0xf8] sm:$0xff]  ;;  %663 = vmatprep.mubr.f32.mxu0 %v1286_v16  ;;  %v1665_v24 = vpack.c.bf16 %v468_v12, %v467_v11 }
  0x1a   : > { %v517_v22 = vld [vmem:[%s2518_s1 + $0x1f0] sm:$0xff]  ;;  %v518_v23 = vld [vmem:[%s2518_s1 + $0x1f8] sm:$0xff]  ;;  %768 = vmatprep.mubr.f32.mxu1 %v1294_v17  ;;  %v1697_v25 = vpack.c.bf16 %v500_v19, %v499_v15  ;;  %v1667_v26 = vpack.c.bf16 %v486_v21, %v485_v20  ;;  %v535_v32 = vld [vmem:[%s2518_s1 + $0x280] sm:$0xff] }
  0x1b   : > { %1658 = vmatpush3.bf16.msra.mxu0 %v1657_v62  ;;  %v469_v27 = vld [vmem:[%s2518_s1 + $0x70] sm:$0xff]  ;;  %v470_v28 = vld [vmem:[%s2518_s1 + $0x78] sm:$0xff]  ;;  %v1699_v30 = vpack.c.bf16 %v518_v23, %v517_v22  ;;  %v536_v33 = vld [vmem:[%s2518_s1 + $0x288] sm:$0xff] }
  0x1c   : > { %1690 = vmatpush3.bf16.msra.mxu1 %v1689_v63  ;;  %1660 = vmatprep.subr.bf16.mxu0 %v1659_v0  ;;  %v501_v29 = vld [vmem:[%s2518_s1 + $0x170] sm:$0xff]  ;;  %v502_v31 = vld [vmem:[%s2518_s1 + $0x178] sm:$0xff]  ;;  %v567_v34 = vld [vmem:[%s2518_s1 + $0x380] sm:$0xff]  ;;  %v1669_v36 = vpack.c.bf16 %v470_v28, %v469_v27  ;;  %v1703_v38 = vpack.c.bf16 %v536_v33, %v535_v32 }
  0x1d   : > { %1692 = vmatprep.subr.bf16.mxu1 %v1691_v4  ;;  %v568_v35 = vld [vmem:[%s2518_s1 + $0x388] sm:$0xff]  ;;  %v1701_v37 = vpack.c.bf16 %v502_v31, %v501_v29  ;;  %v519_v39 = vld [vmem:[%s2518_s1 + $0x200] sm:$0xff]  ;;  %v537_v44 = vld [vmem:[%s2518_s1 + $0x290] sm:$0xff] }
  0x1e   : > { %v520_v40 = vld [vmem:[%s2518_s1 + $0x208] sm:$0xff]  ;;  %v1735_v41 = vpack.c.bf16 %v568_v35, %v567_v34  ;;  %v551_v42 = vld [vmem:[%s2518_s1 + $0x300] sm:$0xff]  ;;  %v538_v45 = vld [vmem:[%s2518_s1 + $0x298] sm:$0xff] }
  0x1f   : > { %1662 = vmatpush3.bf16.msra.mxu0 %v1661_v10  ;;  %v552_v43 = vld [vmem:[%s2518_s1 + $0x308] sm:$0xff]  ;;  %v234_v46 = vld [vmem:[%s2069_s8] sm:$0xff]  ;;  %v1705_v47 = vpack.c.bf16 %v520_v40, %v519_v39  ;;  %v569_v48 = vld [vmem:[%s2518_s1 + $0x390] sm:$0xff]  ;;  %v1707_v55 = vpack.c.bf16 %v538_v45, %v537_v44 }
  0x20   : > { %1694 = vmatpush3.bf16.msra.mxu1 %v1693_v13  ;;  %1664 = vmatprep.subr.bf16.mxu0 %v1663_v14  ;;  %v570_v49 = vld [vmem:[%s2518_s1 + $0x398] sm:$0xff]  ;;  %v267_v50 = vld [vmem:[%s2069_s8 + $0x1] sm:$0xff]  ;;  %v1737_v51 = vpack.c.bf16 %v552_v43, %v551_v42  ;;  %v521_v52 = vld [vmem:[%s2518_s1 + $0x210] sm:$0xff] }
  0x21   : > { %1696 = vmatprep.subr.bf16.mxu1 %v1695_v18  ;;  %v522_v53 = vld [vmem:[%s2518_s1 + $0x218] sm:$0xff]  ;;  %v2160_v54 = vld [vmem:[%s2069_s8 + $0xa0] sm:$0xff]  ;;  %v553_v56 = vld [vmem:[%s2518_s1 + $0x310] sm:$0xff]  ;;  %v1739_v59 = vpack.c.bf16 %v570_v49, %v569_v48 }
  0x22   : > { %v554_v57 = vld [vmem:[%s2518_s1 + $0x318] sm:$0xff]  ;;  %v1295_v58 = vld [vmem:[%s2069_s8 + $0x130] sm:$0xff]  ;;  %v539_v60 = vld [vmem:[%s2518_s1 + $0x2a0] sm:$0xff]  ;;  %v1709_v63 = vpack.c.bf16 %v522_v53, %v521_v52 }
  0x23   : > { %1666 = vmatpush3.bf16.msra.mxu0 %v1665_v24  ;;  %v540_v61 = vld [vmem:[%s2518_s1 + $0x2a8] sm:$0xff]  ;;  %v2176_v62 = vld [vmem:[%s2069_s8 + $0x10] sm:$0xff]  ;;  %v571_v0 = vld [vmem:[%s2518_s1 + $0x3a0] sm:$0xff]  ;;  %v1741_v3 = vpack.c.bf16 %v554_v57, %v553_v56 }
  0x24   : > { %1698 = vmatpush3.bf16.msra.mxu1 %v1697_v25  ;;  %1668 = vmatprep.subr.bf16.mxu0 %v1667_v26  ;;  %v572_v1 = vld [vmem:[%s2518_s1 + $0x3a8] sm:$0xff]  ;;  %v2186_v2 = vld [vmem:[%s2069_s8 + $0x11] sm:$0xff]  ;;  %v523_v4 = vld [vmem:[%s2518_s1 + $0x220] sm:$0xff]  ;;  %v1711_v7 = vpack.c.bf16 %v540_v61, %v539_v60 }
  0x25   : > { %1700 = vmatprep.subr.bf16.mxu1 %v1699_v30  ;;  %v524_v5 = vld [vmem:[%s2518_s1 + $0x228] sm:$0xff]  ;;  %v2195_v6 = vld [vmem:[%s2069_s8 + $0xb0] sm:$0xff]  ;;  %v555_v8 = vld [vmem:[%s2518_s1 + $0x320] sm:$0xff]  ;;  %v1743_v11 = vpack.c.bf16 %v572_v1, %v571_v0 }
  0x26   : > { %v556_v9 = vld [vmem:[%s2518_s1 + $0x328] sm:$0xff]  ;;  %v1296_v10 = vld [vmem:[%s2069_s8 + $0x140] sm:$0xff]  ;;  %v541_v12 = vld [vmem:[%s2518_s1 + $0x2b0] sm:$0xff]  ;;  %v1713_v15 = vpack.c.bf16 %v524_v5, %v523_v4 }
  0x27   : > { %1670 = vmatpush3.bf16.msra.mxu0 %v1669_v36  ;;  %v542_v13 = vld [vmem:[%s2518_s1 + $0x2b8] sm:$0xff]  ;;  %v2213_v14 = vld [vmem:[%s2069_s8 + $0x20] sm:$0xff]  ;;  %v573_v16 = vld [vmem:[%s2518_s1 + $0x3b0] sm:$0xff]  ;;  %v1745_v19 = vpack.c.bf16 %v556_v9, %v555_v8 }
  0x28   : > { %1702 = vmatpush3.bf16.msra.mxu1 %v1701_v37  ;;  %1704 = vmatprep.subr.bf16.mxu0 %v1703_v38  ;;  %v574_v17 = vld [vmem:[%s2518_s1 + $0x3b8] sm:$0xff]  ;;  %v2223_v18 = vld [vmem:[%s2069_s8 + $0x21] sm:$0xff]  ;;  %v525_v20 = vld [vmem:[%s2518_s1 + $0x230] sm:$0xff]  ;;  %v1715_v23 = vpack.c.bf16 %v542_v13, %v541_v12 }
  0x29   : > { %1736 = vmatprep.subr.bf16.mxu1 %v1735_v41  ;;  %v526_v21 = vld [vmem:[%s2518_s1 + $0x238] sm:$0xff]  ;;  %v2232_v22 = vld [vmem:[%s2069_s8 + $0xc0] sm:$0xff]  ;;  %v557_v24 = vld [vmem:[%s2518_s1 + $0x330] sm:$0xff]  ;;  %v1747_v27 = vpack.c.bf16 %v574_v17, %v573_v16 }
  0x2a   : > { %664 = vmatmul.mubr.f32.vlgmr.msra.gmra.mrb[0].mxu0 %v234_v46  ;;  %v558_v25 = vld [vmem:[%s2518_s1 + $0x338] sm:$0xff]  ;;  %v1297_v26 = vld [vmem:[%s2069_s8 + $0x150] sm:$0xff]  ;;  %v543_v28 = vld [vmem:[%s2518_s1 + $0x2c0] sm:$0xff]  ;;  %v1717_v31 = vpack.c.bf16 %v526_v21, %v525_v20 }
  0x2b   : > { %769 = vmatmul.mubr.f32.vlgmr.msra.gmra.mrb[0].mxu1 %v267_v50  ;;  %1706 = vmatpush3.bf16.msra.mxu0 %v1705_v47  ;;  %v544_v29 = vld [vmem:[%s2518_s1 + $0x2c8] sm:$0xff]  ;;  %v2250_v30 = vld [vmem:[%s2069_s8 + $0x30] sm:$0xff]  ;;  %v575_v32 = vld [vmem:[%s2518_s1 + $0x3c0] sm:$0xff]  ;;  %v1749_v35 = vpack.c.bf16 %v558_v25, %v557_v24 }
  0x2c   : > { %1738 = vmatpush3.bf16.msra.mxu1 %v1737_v51  ;;  %668 = vmatprep.mubr.f32.mxu0 %v2160_v54  ;;  %v576_v33 = vld [vmem:[%s2518_s1 + $0x3c8] sm:$0xff]  ;;  %v2260_v34 = vld [vmem:[%s2069_s8 + $0x31] sm:$0xff]  ;;  %v527_v36 = vld [vmem:[%s2518_s1 + $0x240] sm:$0xff]  ;;  %v1719_v39 = vpack.c.bf16 %v544_v29, %v543_v28 }
  0x2d   : > { %773 = vmatprep.mubr.f32.mxu1 %v1295_v58  ;;  %1708 = vmatprep.subr.bf16.mxu0 %v1707_v55  ;;  %v528_v37 = vld [vmem:[%s2518_s1 + $0x248] sm:$0xff]  ;;  %v2269_v38 = vld [vmem:[%s2069_s8 + $0xd0] sm:$0xff]  ;;  %v559_v40 = vld [vmem:[%s2518_s1 + $0x340] sm:$0xff]  ;;  %v1751_v43 = vpack.c.bf16 %v576_v33, %v575_v32 }
  0x2e   : > { %669 = vmatmul.mubr.f32.gmra.mrb[2].mxu0 %v2176_v62  ;;  %1740 = vmatprep.subr.bf16.mxu1 %v1739_v59  ;;  %v560_v41 = vld [vmem:[%s2518_s1 + $0x348] sm:$0xff]  ;;  %v1298_v42 = vld [vmem:[%s2069_s8 + $0x160] sm:$0xff]  ;;  %v545_v44 = vld [vmem:[%s2518_s1 + $0x2d0] sm:$0xff]  ;;  %v1721_v47 = vpack.c.bf16 %v528_v37, %v527_v36 }
  0x2f   : > { %774 = vmatmul.mubr.f32.gmra.mrb[2].mxu1 %v2186_v2  ;;  %1710 = vmatpush3.bf16.msra.mxu0 %v1709_v63  ;;  %v546_v45 = vld [vmem:[%s2518_s1 + $0x2d8] sm:$0xff]  ;;  %v2287_v46 = vld [vmem:[%s2069_s8 + $0x40] sm:$0xff]  ;;  %v577_v48 = vld [vmem:[%s2518_s1 + $0x3d0] sm:$0xff]  ;;  %v1753_v51 = vpack.c.bf16 %v560_v41, %v559_v40 }
  0x30   : > { %1742 = vmatpush3.bf16.msra.mxu1 %v1741_v3  ;;  %673 = vmatprep.mubr.f32.mxu0 %v2195_v6  ;;  %v578_v49 = vld [vmem:[%s2518_s1 + $0x3d8] sm:$0xff]  ;;  %v2297_v50 = vld [vmem:[%s2069_s8 + $0x41] sm:$0xff]  ;;  %v529_v52 = vld [vmem:[%s2518_s1 + $0x250] sm:$0xff]  ;;  %v1723_v56 = vpack.c.bf16 %v546_v45, %v545_v44 }
  0x31   : > { %778 = vmatprep.mubr.f32.mxu1 %v1296_v10  ;;  %1712 = vmatprep.subr.bf16.mxu0 %v1711_v7  ;;  %v530_v53 = vld [vmem:[%s2518_s1 + $0x258] sm:$0xff]  ;;  %v2306_v55 = vld [vmem:[%s2069_s8 + $0xe0] sm:$0xff]  ;;  %v561_v57 = vld [vmem:[%s2518_s1 + $0x350] sm:$0xff]  ;;  %v1755_v60 = vpack.c.bf16 %v578_v49, %v577_v48 }
  0x32   : > { %674 = vmatmul.mubr.f32.gmra.mrb[4].mxu0 %v2213_v14  ;;  %1744 = vmatprep.subr.bf16.mxu1 %v1743_v11  ;;  %v562_v58 = vld [vmem:[%s2518_s1 + $0x358] sm:$0xff]  ;;  %v1299_v59 = vld [vmem:[%s2069_s8 + $0x170] sm:$0xff]  ;;  %v547_v61 = vld [vmem:[%s2518_s1 + $0x2e0] sm:$0xff]  ;;  %v1725_v1 = vpack.c.bf16 %v530_v53, %v529_v52 }
  0x33   : > { %779 = vmatmul.mubr.f32.gmra.mrb[4].mxu1 %v2223_v18  ;;  %1714 = vmatpush3.bf16.msra.mxu0 %v1713_v15  ;;  %v548_v63 = vld [vmem:[%s2518_s1 + $0x2e8] sm:$0xff]  ;;  %v2324_v0 = vld [vmem:[%s2069_s8 + $0x50] sm:$0xff]  ;;  %v579_v3 = vld [vmem:[%s2518_s1 + $0x3e0] sm:$0xff]  ;;  %v1757_v7 = vpack.c.bf16 %v562_v58, %v561_v57 }
  0x34   : > { %1746 = vmatpush3.bf16.msra.mxu1 %v1745_v19  ;;  %678 = vmatprep.mubr.f32.mxu0 %v2232_v22  ;;  %v580_v4 = vld [vmem:[%s2518_s1 + $0x3e8] sm:$0xff]  ;;  %v2334_v5 = vld [vmem:[%s2069_s8 + $0x51] sm:$0xff]  ;;  %v531_v8 = vld [vmem:[%s2518_s1 + $0x260] sm:$0xff]  ;;  %v1727_v11 = vpack.c.bf16 %v548_v63, %v547_v61 }
  0x35   : > { %783 = vmatprep.mubr.f32.mxu1 %v1297_v26  ;;  %1716 = vmatprep.subr.bf16.mxu0 %v1715_v23  ;;  %v532_v9 = vld [vmem:[%s2518_s1 + $0x268] sm:$0xff]  ;;  %v2343_v10 = vld [vmem:[%s2069_s8 + $0xf0] sm:$0xff]  ;;  %v563_v12 = vld [vmem:[%s2518_s1 + $0x360] sm:$0xff]  ;;  %v1759_v16 = vpack.c.bf16 %v580_v4, %v579_v3 }
  0x36   : > { %679 = vmatmul.mubr.f32.gmra.mrb[6].mxu0 %v2250_v30  ;;  %1748 = vmatprep.subr.bf16.mxu1 %v1747_v27  ;;  %v564_v13 = vld [vmem:[%s2518_s1 + $0x368] sm:$0xff]  ;;  %v1300_v15 = vld [vmem:[%s2069_s8 + $0x180] sm:$0xff]  ;;  %v549_v17 = vld [vmem:[%s2518_s1 + $0x2f0] sm:$0xff]  ;;  %v1729_v21 = vpack.c.bf16 %v532_v9, %v531_v8 }
  0x37   : > { %784 = vmatmul.mubr.f32.gmra.mrb[6].mxu1 %v2260_v34  ;;  %1718 = vmatpush3.bf16.msra.mxu0 %v1717_v31  ;;  %v550_v19 = vld [vmem:[%s2518_s1 + $0x2f8] sm:$0xff]  ;;  %v2361_v20 = vld [vmem:[%s2069_s8 + $0x60] sm:$0xff]  ;;  %v581_v23 = vld [vmem:[%s2518_s1 + $0x3f0] sm:$0xff]  ;;  %v1761_v26 = vpack.c.bf16 %v564_v13, %v563_v12 }
  0x38   : > { %1750 = vmatpush3.bf16.msra.mxu1 %v1749_v35  ;;  %683 = vmatprep.mubr.f32.mxu0 %v2269_v38  ;;  %v582_v24 = vld [vmem:[%s2518_s1 + $0x3f8] sm:$0xff]  ;;  %v2371_v25 = vld [vmem:[%s2069_s8 + $0x61] sm:$0xff]  ;;  %v533_v27 = vld [vmem:[%s2518_s1 + $0x270] sm:$0xff]  ;;  %v1731_v31 = vpack.c.bf16 %v550_v19, %v549_v17 }
  0x39   : > { %788 = vmatprep.mubr.f32.mxu1 %v1298_v42  ;;  %1720 = vmatprep.subr.bf16.mxu0 %v1719_v39  ;;  %v534_v28 = vld [vmem:[%s2518_s1 + $0x278] sm:$0xff]  ;;  %v2380_v29 = vld [vmem:[%s2069_s8 + $0x100] sm:$0xff]  ;;  %v565_v32 = vld [vmem:[%s2518_s1 + $0x370] sm:$0xff]  ;;  %v1763_v36 = vpack.c.bf16 %v582_v24, %v581_v23 }
  0x3a   : > { %684 = vmatmul.mubr.f32.gmra.mrb[8].mxu0 %v2287_v46  ;;  %1752 = vmatprep.subr.bf16.mxu1 %v1751_v43  ;;  %v566_v33 = vld [vmem:[%s2518_s1 + $0x378] sm:$0xff]  ;;  %v1301_v35 = vld [vmem:[%s2069_s8 + $0x190] sm:$0xff]  ;;  %v583_v37 = vld [vmem:[%s2518_s1 + $0x400] sm:$0xff]  ;;  %v1733_v41 = vpack.c.bf16 %v534_v28, %v533_v27 }
  0x3b   : > { %789 = vmatmul.mubr.f32.gmra.mrb[8].mxu1 %v2297_v50  ;;  %1722 = vmatpush3.bf16.msra.mxu0 %v1721_v47  ;;  %v584_v39 = vld [vmem:[%s2518_s1 + $0x408] sm:$0xff]  ;;  %v2398_v40 = vld [vmem:[%s2069_s8 + $0x70] sm:$0xff]  ;;  %v1765_v43 = vpack.c.bf16 %v566_v33, %v565_v32  ;;  %v586_v48 = vld [vmem:[%s2518_s1 + $0x418] sm:$0xff] }
  0x3c   : > { %1754 = vmatpush3.bf16.msra.mxu1 %v1753_v51  ;;  %688 = vmatprep.mubr.f32.mxu0 %v2306_v55  ;;  %v2402_v42 = vld [vmem:[%s2069_s8 + $0x71] sm:$0xff]  ;;  %v1310_v44 = vld [vmem:[%s2069_s8 + $0x121] sm:$0xff]  ;;  %v1767_v45 = vpack.c.bf16 %v584_v39, %v583_v37 }
  0x3d   : > { %793 = vmatprep.mubr.f32.mxu1 %v1299_v59  ;;  %1724 = vmatprep.subr.bf16.mxu0 %v1723_v56  ;;  %v585_v47 = vld [vmem:[%s2518_s1 + $0x410] sm:$0xff]  ;;  %v587_v53 = vld [vmem:[%s2518_s1 + $0x420] sm:$0xff]  ;;  %v588_v56 = vld [vmem:[%s2518_s1 + $0x428] sm:$0xff] }
  0x3e   : > { %689 = vmatmul.mubr.f32.gmra.mrb[10].mxu0 %v2324_v0  ;;  %1756 = vmatprep.subr.bf16.mxu1 %v1755_v60  ;;  %v1302_v49 = vld [vmem:[%s2069_s8 + $0x1b0] sm:$0xff]  ;;  %v1771_v52 = vpack.c.bf16 %v586_v48, %v585_v47  ;;  %v1303_v57 = vld [vmem:[%s2069_s8 + $0x1c0] sm:$0xff]  ;;  %v1775_v58 = vpack.c.bf16 %v588_v56, %v587_v53 }
  0x3f   : > { %794 = vmatmul.mubr.f32.gmra.mrb[10].mxu1 %v2334_v5  ;;  %1726 = vmatpush3.bf16.msra.mxu0 %v1725_v1  ;;  %v1311_v51 = vld [vmem:[%s2069_s8 + $0x131] sm:$0xff]  ;;  %v591_v63 = vld [vmem:[%s2518_s1 + $0x440] sm:$0xff] }
  0x40   : > { %1758 = vmatpush3.bf16.msra.mxu1 %v1757_v7  ;;  %693 = vmatprep.mubr.f32.mxu0 %v2343_v10  ;;  %v589_v59 = vld [vmem:[%s2518_s1 + $0x430] sm:$0xff]  ;;  %v1305_v1 = vld [vmem:[%s2069_s8 + $0x1e0] sm:$0xff] }
  0x41   : > { %798 = vmatprep.mubr.f32.mxu1 %v1300_v15  ;;  %1728 = vmatprep.subr.bf16.mxu0 %v1727_v11  ;;  %v1304_v60 = vld [vmem:[%s2069_s8 + $0x1d0] sm:$0xff]  ;;  %v595_v9 = vld [vmem:[%s2518_s1 + $0x460] sm:$0xff] }
  0x42   : > { %694 = vmatmul.mubr.f32.gmra.mrb[12].mxu0 %v2361_v20  ;;  %1760 = vmatprep.subr.bf16.mxu1 %v1759_v16  ;;  %v593_v4 = vld [vmem:[%s2518_s1 + $0x450] sm:$0xff]  ;;  %v1307_v11 = vld [vmem:[%s2069_s8 + $0x200] sm:$0xff] }
  0x43   : > { %799 = vmatmul.mubr.f32.gmra.mrb[12].mxu1 %v2371_v25  ;;  %1730 = vmatpush3.bf16.msra.mxu0 %v1729_v21  ;;  %v1306_v7 = vld [vmem:[%s2069_s8 + $0x1f0] sm:$0xff]  ;;  %v1309_v19 = vld [vmem:[%s2069_s8 + $0x220] sm:$0xff] }
  0x44   : > { %1762 = vmatpush3.bf16.msra.mxu1 %v1761_v26  ;;  %698 = vmatprep.mubr.f32.mxu0 %v2380_v29  ;;  %v597_v13 = vld [vmem:[%s2518_s1 + $0x470] sm:$0xff]  ;;  %v1341_v21 = vld [vmem:[%s2069_s8 + $0x81] sm:$0xff] }
  0x45   : > { %803 = vmatprep.mubr.f32.mxu1 %v1301_v35  ;;  %1732 = vmatprep.subr.bf16.mxu0 %v1731_v31  ;;  %v1317_v15 = vld [vmem:[%s2069_s8 + $0x191] sm:$0xff] }
  0x46   : > { %699 = vmatmul.mubr.f32.gmra.mrb[14].mxu0 %v2398_v40  ;;  %1764 = vmatprep.subr.bf16.mxu1 %v1763_v36  ;;  %v1333_v17 = vld [vmem:[%s2069_s8 + $0x110] sm:$0xff] }
  0x47   : > { %804 = vmatmul.mubr.f32.gmra.mrb[14].mxu1 %v2402_v42  ;;  %1734 = vmatpush3.bf16.msra.mxu0 %v1733_v41 }
  0x48   : > { %1766 = vmatpush3.bf16.msra.mxu1 %v1765_v43  ;;  %873 = vmatprep.mubr.f32.mxu0 %v1310_v44 }
  0x49   : > { %978 = vmatprep.mubr.f32.mxu1 %v2160_v54  ;;  %1768 = vmatprep.subr.bf16.mxu0 %v1767_v45  ;;  %v1312_v54 = vld [vmem:[%s2069_s8 + $0x141] sm:$0xff] }
  0x4a   : > { %874 = vmatmul.mubr.f32.vlgmr.msra.gmra.mrb[16].mxu0 %v1302_v49  ;;  %1799 = vmatprep.subr.bf16.mxu1 %v1767_v45 }
  0x4b   : > { %979 = vmatmul.mubr.f32.vlgmr.msra.gmra.mrb[16].mxu1 %v2176_v62  ;;  %1770 = vmatpush3.bf16.msra.mxu0 %v1767_v45  ;;  %v590_v62 = vld [vmem:[%s2518_s1 + $0x438] sm:$0xff] }
  0x4c   : > { %1807 = vmatpush3.bf16.msra.mxu1 %v1767_v45  ;;  %878 = vmatprep.mubr.f32.mxu0 %v1311_v51  ;;  %v1779_v61 = vpack.c.bf16 %v590_v62, %v589_v59 }
  0x4d   : > { %983 = vmatprep.mubr.f32.mxu1 %v2195_v6  ;;  %1772 = vmatprep.subr.bf16.mxu0 %v1771_v52  ;;  %v1313_v6 = vld [vmem:[%s2069_s8 + $0x151] sm:$0xff] }
  0x4e   : > { %879 = vmatmul.mubr.f32.gmra.mrb[18].mxu0 %v1303_v57  ;;  %1800 = vmatprep.subr.bf16.mxu1 %v1771_v52 }
  0x4f   : > { %984 = vmatmul.mubr.f32.gmra.mrb[18].mxu1 %v2213_v14  ;;  %1774 = vmatpush3.bf16.msra.mxu0 %v1771_v52  ;;  %v592_v14 = vld [vmem:[%s2518_s1 + $0x448] sm:$0xff] }
  0x50   : > { %1808 = vmatpush3.bf16.msra.mxu1 %v1771_v52  ;;  %883 = vmatprep.mubr.f32.mxu0 %v1312_v54  ;;  %v1783_v3 = vpack.c.bf16 %v592_v14, %v591_v63 }
  0x51   : > { %988 = vmatprep.mubr.f32.mxu1 %v2232_v22  ;;  %1776 = vmatprep.subr.bf16.mxu0 %v1775_v58  ;;  %v1314_v22 = vld [vmem:[%s2069_s8 + $0x161] sm:$0xff] }
  0x52   : > { %884 = vmatmul.mubr.f32.gmra.mrb[20].mxu0 %v1304_v60  ;;  %1801 = vmatprep.subr.bf16.mxu1 %v1775_v58 }
  0x53   : > { %989 = vmatmul.mubr.f32.gmra.mrb[20].mxu1 %v2250_v30  ;;  %1778 = vmatpush3.bf16.msra.mxu0 %v1775_v58  ;;  %v594_v30 = vld [vmem:[%s2518_s1 + $0x458] sm:$0xff] }
  0x54   : > { %1809 = vmatpush3.bf16.msra.mxu1 %v1775_v58  ;;  %888 = vmatprep.mubr.f32.mxu0 %v1313_v6  ;;  %v1787_v8 = vpack.c.bf16 %v594_v30, %v593_v4 }
  0x55   : > { %993 = vmatprep.mubr.f32.mxu1 %v2269_v38  ;;  %1780 = vmatprep.subr.bf16.mxu0 %v1779_v61  ;;  %v1315_v38 = vld [vmem:[%s2069_s8 + $0x171] sm:$0xff] }
  0x56   : > { %889 = vmatmul.mubr.f32.gmra.mrb[22].mxu0 %v1305_v1  ;;  %1802 = vmatprep.subr.bf16.mxu1 %v1779_v61 }
  0x57   : > { %994 = vmatmul.mubr.f32.gmra.mrb[22].mxu1 %v2287_v46  ;;  %1782 = vmatpush3.bf16.msra.mxu0 %v1779_v61  ;;  %v596_v46 = vld [vmem:[%s2518_s1 + $0x468] sm:$0xff] }
  0x58   : > { %1810 = vmatpush3.bf16.msra.mxu1 %v1779_v61  ;;  %893 = vmatprep.mubr.f32.mxu0 %v1314_v22  ;;  %v1791_v12 = vpack.c.bf16 %v596_v46, %v595_v9 }
  0x59   : > { %998 = vmatprep.mubr.f32.mxu1 %v2306_v55  ;;  %1784 = vmatprep.subr.bf16.mxu0 %v1783_v3  ;;  %v1316_v55 = vld [vmem:[%s2069_s8 + $0x181] sm:$0xff] }
  0x5a   : > { %894 = vmatmul.mubr.f32.gmra.mrb[24].mxu0 %v1306_v7  ;;  %1803 = vmatprep.subr.bf16.mxu1 %v1783_v3 }
  0x5b   : > { %999 = vmatmul.mubr.f32.gmra.mrb[24].mxu1 %v2324_v0  ;;  %1786 = vmatpush3.bf16.msra.mxu0 %v1783_v3  ;;  %v598_v0 = vld [vmem:[%s2518_s1 + $0x478] sm:$0xff] }
  0x5c   : > { %1811 = vmatpush3.bf16.msra.mxu1 %v1783_v3  ;;  %898 = vmatprep.mubr.f32.mxu0 %v1315_v38  ;;  %v1795_v16 = vpack.c.bf16 %v598_v0, %v597_v13 }
  0x5d   : > { %1003 = vmatprep.mubr.f32.mxu1 %v2343_v10  ;;  %1788 = vmatprep.subr.bf16.mxu0 %v1787_v8  ;;  %v1308_v10 = vld [vmem:[%s2069_s8 + $0x210] sm:$0xff] }
  0x5e   : > { %899 = vmatmul.mubr.f32.gmra.mrb[26].mxu0 %v1307_v11  ;;  %1804 = vmatprep.subr.bf16.mxu1 %v1787_v8 }
  0x5f   : > { %1004 = vmatmul.mubr.f32.gmra.mrb[26].mxu1 %v2361_v20  ;;  %1790 = vmatpush3.bf16.msra.mxu0 %v1787_v8  ;;  %v1325_v20 = vld [vmem:[%s2069_s8 + $0x80] sm:$0xff] }
  0x60   : > { %1812 = vmatpush3.bf16.msra.mxu1 %v1787_v8  ;;  %903 = vmatprep.mubr.f32.mxu0 %v1316_v55 }
  0x61   : > { %1008 = vmatprep.mubr.f32.mxu1 %v2380_v29  ;;  %1792 = vmatprep.subr.bf16.mxu0 %v1791_v12 }
  0x62   : > { %904 = vmatmul.mubr.f32.gmra.mrb[28].mxu0 %v1308_v10  ;;  %1805 = vmatprep.subr.bf16.mxu1 %v1791_v12 }
  0x63   : > { %1009 = vmatmul.mubr.f32.gmra.mrb[28].mxu1 %v2398_v40  ;;  %1794 = vmatpush3.bf16.msra.mxu0 %v1791_v12 }
  0x64   : > { %1813 = vmatpush3.bf16.msra.mxu1 %v1791_v12  ;;  %908 = vmatprep.mubr.f32.mxu0 %v1317_v15 }
  0x65   : > { %1013 = vmatprep.mubr.f32.mxu1 %v1333_v17  ;;  %1796 = vmatprep.subr.bf16.mxu0 %v1795_v16 }
  0x66   : > { %909 = vmatmul.mubr.f32.gmra.mrb[30].mxu0 %v1309_v19  ;;  %1806 = vmatprep.subr.bf16.mxu1 %v1795_v16 }
  0x67   : > { %1014 = vmatmul.mubr.f32.gmra.mrb[30].mxu1 %v1325_v20  ;;  %1798 = vmatpush3.bf16.msra.mxu0 %v1795_v16 }
  0x68   : > { %1814 = vmatpush3.bf16.msra.mxu1 %v1795_v16  ;;  %1627 = vmatprep.mubr.f32.mxu0 %v2186_v2 }
  0x69   : > { %1633 = vmatprep.mubr.f32.mxu1 %v2334_v5 }
  0x6a   : > { %1628 = vmatmul.mubr.f32.vlgmr.msra.gmra.mrb[32].mxu0 %v2223_v18 }
  0x6b   : > { %1634 = vmatmul.mubr.f32.vlgmr.msra.gmra.mrb[32].mxu1 %v2371_v25  ;;  %1630 = vmatprep.mubr.f32.mxu0 %v2260_v34 }
  0x6c   : > { %1636 = vmatprep.mubr.f32.mxu1 %v2402_v42 }
  0x6e   : > { %1631 = vmatmul.mubr.f32.gmra.mrb[34].mxu0 %v2297_v50 }
  0x6f   : > { %1637 = vmatmul.mubr.f32.gmra.mrb[34].mxu1 %v1341_v21 }
  0xfd   : > { %v1379_v23 = vpop.f32.mrb[0].mxu0 }
  0xfe   : > { %v1435_v24 = vpop.f32.mrb[0].mxu1  ;;  %v1380_v26 = vpop.f32.mrb[1].mxu0 }
  0xff   : > { %v1381_v27 = vadd.f32 %v1380_v26, %v1379_v23  ;;  %v1436_v28 = vpop.f32.mrb[1].mxu1 }
 0x100   : > { %v1437_v2 = vadd.f32 %v1436_v28, %v1435_v24 }
 0x101   : > { %v1382_v29 = vpop.f32.mrb[2].mxu0 }
 0x102   : > { %v771_v5 = vadd.f32 %v1437_v2, %v1381_v27  ;;  %v1438_v31 = vpop.f32.mrb[2].mxu1  ;;  %v1383_v18 = vpop.f32.mrb[3].mxu0 }
 0x103   : > { %v1384_v32 = vadd.f32 %v1383_v18, %v1382_v29  ;;  %v1439_v25 = vpop.f32.mrb[3].mxu1 }
 0x104   : > { %v1440_v33 = vadd.f32 %v1439_v25, %v1438_v31 }
 0x105   : > { %v1385_v34 = vpop.f32.mrb[4].mxu0 }
 0x106   : > { %v776_v35 = vadd.f32 %v1440_v33, %v1384_v32  ;;  %v1441_v36 = vpop.f32.mrb[4].mxu1  ;;  %v1386_v37 = vpop.f32.mrb[5].mxu0 }
 0x107   : > { %v1387_v39 = vadd.f32 %v1386_v37, %v1385_v34  ;;  %v1442_v50 = vpop.f32.mrb[5].mxu1 }
 0x108   : > { %v1443_v40 = vadd.f32 %v1442_v50, %v1441_v36 }
 0x109   : > { %v1388_v41 = vpop.f32.mrb[6].mxu0 }
 0x10a   : > { %v781_v42 = vadd.f32 %v1443_v40, %v1387_v39  ;;  %v1444_v43 = vpop.f32.mrb[6].mxu1  ;;  %v1389_v44 = vpop.f32.mrb[7].mxu0 }
 0x10b   : > { %v1390_v45 = vadd.f32 %v1389_v44, %v1388_v41  ;;  %v1445_v47 = vpop.f32.mrb[7].mxu1 }
 0x10c   : > { %v1446_v48 = vadd.f32 %v1445_v47, %v1444_v43 }
 0x10d   : > { %v1391_v49 = vpop.f32.mrb[8].mxu0 }
 0x10e   : > { %v786_v51 = vadd.f32 %v1446_v48, %v1390_v45  ;;  %v1447_v52 = vpop.f32.mrb[8].mxu1  ;;  %v1392_v53 = vpop.f32.mrb[9].mxu0 }
 0x10f   : > { %v1393_v56 = vadd.f32 %v1392_v53, %v1391_v49  ;;  %v1448_v57 = vpop.f32.mrb[9].mxu1 }
 0x110   : > { %v1449_v54 = vadd.f32 %v1448_v57, %v1447_v52 }
 0x111   : > { %v1394_v58 = vpop.f32.mrb[10].mxu0 }
 0x112   : > { %v791_v59 = vadd.f32 %v1449_v54, %v1393_v56  ;;  %v1450_v62 = vpop.f32.mrb[10].mxu1  ;;  %v1395_v60 = vpop.f32.mrb[11].mxu0 }
 0x113   : > { %v1396_v6 = vadd.f32 %v1395_v60, %v1394_v58  ;;  %v1451_v61 = vpop.f32.mrb[11].mxu1 }
 0x114   : > { %v1452_v63 = vadd.f32 %v1451_v61, %v1450_v62 }
 0x115   : > { %v1397_v14 = vpop.f32.mrb[12].mxu0 }
 0x116   : > { %v796_v1 = vadd.f32 %v1452_v63, %v1396_v6  ;;  %v1453_v22 = vpop.f32.mrb[12].mxu1  ;;  %v1398_v3 = vpop.f32.mrb[13].mxu0 }
 0x117   : > { %v1399_v4 = vadd.f32 %v1398_v3, %v1397_v14  ;;  %v1454_v30 = vpop.f32.mrb[13].mxu1 }
 0x118   : > { %v1455_v7 = vadd.f32 %v1454_v30, %v1453_v22 }
 0x119   : > { %v1400_v38 = vpop.f32.mrb[14].mxu0 }
 0x11a   : > { %v801_v8 = vadd.f32 %v1455_v7, %v1399_v4  ;;  %v1456_v9 = vpop.f32.mrb[14].mxu1  ;;  %v1401_v46 = vpop.f32.mrb[15].mxu0 }
 0x11b   : > { %v1402_v11 = vadd.f32 %v1401_v46, %v1400_v38  ;;  %v1457_v55 = vpop.f32.mrb[15].mxu1 }
 0x11c   : > { %v1458_v12 = vadd.f32 %v1457_v55, %v1456_v9 }
 0x11d   : > { %v1491_v13 = vpop.f32.mrb[16].mxu0 }
 0x11e   : > { %v806_v0 = vadd.f32 %v1458_v12, %v1402_v11  ;;  %v1547_v10 = vpop.f32.mrb[16].mxu1  ;;  %v1492_v15 = vpop.f32.mrb[17].mxu0 }
 0x11f   : > { %v1493_v16 = vadd.f32 %v1492_v15, %v1491_v13  ;;  %v1548_v17 = vpop.f32.mrb[17].mxu1 }
 0x120   : > { %v1549_v19 = vadd.f32 %v1548_v17, %v1547_v10 }
 0x121   : > { %v876_v20 = vadd.f32 %v1493_v16, %v771_v5  ;;  %v1494_v21 = vpop.f32.mrb[18].mxu0 }
 0x122   : > { %v1550_v23 = vpop.f32.mrb[18].mxu1  ;;  %v1495_v24 = vpop.f32.mrb[19].mxu0 }
 0x123   : > { %v1496_v26 = vadd.f32 %v1495_v24, %v1494_v21  ;;  %v1551_v27 = vpop.f32.mrb[19].mxu1  ;;  %v981_v28 = vadd.f32 %v1549_v19, %v876_v20 }
 0x124   : > { %v1552_v2 = vadd.f32 %v1551_v27, %v1550_v23 }
 0x125   : > { %v881_v29 = vadd.f32 %v1496_v26, %v776_v35  ;;  %v1497_v31 = vpop.f32.mrb[20].mxu0 }
 0x126   : > { %v1553_v18 = vpop.f32.mrb[20].mxu1  ;;  %v1498_v32 = vpop.f32.mrb[21].mxu0 }
 0x127   : > { %v1499_v25 = vadd.f32 %v1498_v32, %v1497_v31  ;;  %v1554_v33 = vpop.f32.mrb[21].mxu1  ;;  %v986_v34 = vadd.f32 %v1552_v2, %v881_v29 }
 0x128   : > { %v1555_v36 = vadd.f32 %v1554_v33, %v1553_v18 }
 0x129   : > { %v886_v37 = vadd.f32 %v1499_v25, %v781_v42  ;;  %v1500_v39 = vpop.f32.mrb[22].mxu0 }
 0x12a   : > { %v1556_v50 = vpop.f32.mrb[22].mxu1  ;;  %v1501_v40 = vpop.f32.mrb[23].mxu0 }
 0x12b   : > { %v1502_v5 = vadd.f32 %v1501_v40, %v1500_v39  ;;  %v1557_v41 = vpop.f32.mrb[23].mxu1  ;;  %v991_v43 = vadd.f32 %v1555_v36, %v886_v37 }
 0x12c   : > { %v1558_v44 = vadd.f32 %v1557_v41, %v1556_v50 }
 0x12d   : > { %v891_v45 = vadd.f32 %v1502_v5, %v786_v51  ;;  %v1503_v47 = vpop.f32.mrb[24].mxu0 }
 0x12e   : > { %v1559_v48 = vpop.f32.mrb[24].mxu1  ;;  %v1504_v49 = vpop.f32.mrb[25].mxu0 }
 0x12f   : > { %v1505_v35 = vadd.f32 %v1504_v49, %v1503_v47  ;;  %v1560_v52 = vpop.f32.mrb[25].mxu1  ;;  %v996_v53 = vadd.f32 %v1558_v44, %v891_v45 }
 0x130   : > { %v1561_v56 = vadd.f32 %v1560_v52, %v1559_v48 }
 0x131   : > { %v896_v57 = vadd.f32 %v1505_v35, %v791_v59  ;;  %v1506_v54 = vpop.f32.mrb[26].mxu0 }
 0x132   : > { %v1562_v58 = vpop.f32.mrb[26].mxu1  ;;  %v1507_v62 = vpop.f32.mrb[27].mxu0 }
 0x133   : > { %v1508_v42 = vadd.f32 %v1507_v62, %v1506_v54  ;;  %v1563_v60 = vpop.f32.mrb[27].mxu1  ;;  %v1001_v6 = vadd.f32 %v1561_v56, %v896_v57 }
 0x134   : > { %v1564_v61 = vadd.f32 %v1563_v60, %v1562_v58 }
 0x135   : > { %v901_v63 = vadd.f32 %v1508_v42, %v796_v1  ;;  %v1509_v14 = vpop.f32.mrb[28].mxu0  ;;  %v1342_v1 = vld [vmem:[%s2519_s2] ss:$0 sm:$0xff] }
 0x136   : > { %v1565_v22 = vpop.f32.mrb[28].mxu1  ;;  %v1510_v3 = vpop.f32.mrb[29].mxu0 }
 0x137   : > { %v1511_v51 = vadd.f32 %v1510_v3, %v1509_v14  ;;  %v1566_v4 = vpop.f32.mrb[29].mxu1  ;;  %v1006_v30 = vadd.f32 %v1564_v61, %v901_v63 }
 0x138   : > { %v1567_v7 = vadd.f32 %v1566_v4, %v1565_v22 }
 0x139   : > { %v906_v38 = vadd.f32 %v1511_v51, %v801_v8  ;;  %v1512_v9 = vpop.f32.mrb[30].mxu0  ;;  %v1343_v8 = vld [vmem:[%s2520_s3] ss:$0 sm:$0xff] }
 0x13a   : > { %v1568_v46 = vpop.f32.mrb[30].mxu1  ;;  %v1513_v11 = vpop.f32.mrb[31].mxu0 }
 0x13b   : > { %v1514_v59 = vadd.f32 %v1513_v11, %v1512_v9  ;;  %v1569_v55 = vpop.f32.mrb[31].mxu1  ;;  %v1011_v12 = vadd.f32 %v1567_v7, %v906_v38 }
 0x13c   : > { %v1570_v13 = vadd.f32 %v1569_v55, %v1568_v46 }
 0x13d   : > { %v911_v10 = vadd.f32 %v1514_v59, %v806_v0  ;;  %v1629_v15 = vpop.f32.mrb[32].mxu0 }
 0x13e   : > { %v1091_v16 = vadd.f32 %v1629_v15, %v986_v34  ;;  %v1635_v17 = vpop.f32.mrb[32].mxu1  ;;  %v1085_v19 = vpop.f32.mrb[33].mxu0 }
 0x13f   : > { %v1111_v20 = vadd.f32 %v1635_v17, %v1006_v30  ;;  %v1086_v21 = vadd.f32 %v1085_v19, %v981_v28  ;;  %v1105_v23 = vpop.f32.mrb[33].mxu1  ;;  %v1016_v24 = vadd.f32 %v1570_v13, %v911_v10 }
 0x140   : > { %v1132_v26 = vmul.f32 %v1342_v1, %v1091_v16  ;;  %v1106_v27 = vadd.f32 %v1105_v23, %v1001_v6 }
 0x141   : > { %v1136_v0 = vmul.f32 %v1342_v1, %v1111_v20  ;;  %v1131_v2 = vmul.f32 %v1342_v1, %v1086_v21  ;;  %v1632_v29 = vpop.f32.mrb[34].mxu0 }
 0x142   : > { %v1147_v31 = vadd.f32 %v1343_v8, %v1132_v26  ;;  %v1135_v18 = vmul.f32 %v1342_v1, %v1106_v27  ;;  %v1101_v32 = vadd.f32 %v1632_v29, %v996_v53  ;;  %v1638_v25 = vpop.f32.mrb[34].mxu1  ;;  %v1095_v33 = vpop.f32.mrb[35].mxu0 }
 0x143   : > { %v1151_v34 = vadd.f32 %v1343_v8, %v1136_v0  ;;  %v1146_v36 = vadd.f32 %v1343_v8, %v1131_v2  ;;  %v1121_v37 = vadd.f32 %v1638_v25, %v1016_v24  ;;  %v1096_v39 = vadd.f32 %v1095_v33, %v991_v43  ;;  %v1115_v50 = vpop.f32.mrb[35].mxu1 }
 0x144   : > { %vm1155_vm0 = vcmp.ge.f32.partialorder %v1147_v31, 0.0  ;;  %v1163_v28 = vmul.f32 0.1, %v1147_v31  ;;  %v1150_v40 = vadd.f32 %v1343_v8, %v1135_v18  ;;  %v1134_v5 = vmul.f32 %v1342_v1, %v1101_v32 }
 0x145   : > { %vm1159_vm1 = vcmp.ge.f32.partialorder %v1151_v34, 0.0  ;;  %v1167_v41 = vmul.f32 0.1, %v1151_v34  ;;  %vm1154_vm2 = vcmp.ge.f32.partialorder %v1146_v36, 0.0  ;;  %v1162_v44 = vmul.f32 0.1, %v1146_v36 }
 0x146   : > { %v1171_v45 = vsel %vm1155_vm0, %v1147_v31, %v1163_v28  ;;  %vm1158_vm3 = vcmp.ge.f32.partialorder %v1150_v40, 0.0  ;;  %v1166_v43 = vmul.f32 0.1, %v1150_v40  ;;  %v1149_v47 = vadd.f32 %v1343_v8, %v1134_v5 }
 0x147   : > { %1179 = vst [vmem:[%s2498_s19 + $0x8] sm:$0xff] %v1171_v45  ;;  %v1175_v48 = vsel %vm1159_vm1, %v1151_v34, %v1167_v41  ;;  %v1170_v49 = vsel %vm1154_vm2, %v1146_v36, %v1162_v44  ;;  %v1138_v35 = vmul.f32 %v1342_v1, %v1121_v37  ;;  %v1133_v52 = vmul.f32 %v1342_v1, %v1096_v39 }
 0x148   : > { %1183 = vst [vmem:[%s2498_s19 + $0x28] sm:$0xff] %v1175_v48  ;;  %1178 = vst [vmem:[%s2498_s19] sm:$0xff] %v1170_v49  ;;  %v1174_v53 = vsel %vm1158_vm3, %v1150_v40, %v1166_v43  ;;  %vm1157_vm4 = vcmp.ge.f32.partialorder %v1149_v47, 0.0  ;;  %v1165_v56 = vmul.f32 0.1, %v1149_v47  ;;  %v1116_v57 = vadd.f32 %v1115_v50, %v1011_v12 }
 0x149   : > { %1182 = vst [vmem:[%s2498_s19 + $0x20] sm:$0xff] %v1174_v53  ;;  %v1153_v54 = vadd.f32 %v1343_v8, %v1138_v35  ;;  %v1148_v58 = vadd.f32 %v1343_v8, %v1133_v52 }
 0x14a   : > { %v1173_v62 = vsel %vm1157_vm4, %v1149_v47, %v1165_v56  ;;  %v1137_v42 = vmul.f32 %v1342_v1, %v1116_v57 }
 0x14b   : > { %1181 = vst [vmem:[%s2498_s19 + $0x18] sm:$0xff] %v1173_v62  ;;  %vm1161_vm5 = vcmp.ge.f32.partialorder %v1153_v54, 0.0  ;;  %v1169_v60 = vmul.f32 0.1, %v1153_v54  ;;  %vm1156_vm6 = vcmp.ge.f32.partialorder %v1148_v58, 0.0 }
 0x14c   : > { %v1164_v6 = vmul.f32 0.1, %v1148_v58  ;;  %v1152_v61 = vadd.f32 %v1343_v8, %v1137_v42 }
 0x14d   : > { %v1177_v63 = vsel %vm1161_vm5, %v1153_v54, %v1169_v60 }
 0x14e   : > { %v1172_v14 = vsel %vm1156_vm6, %v1148_v58, %v1164_v6  ;;  %1185 = vst [vmem:[%s2498_s19 + $0x38] sm:$0xff] %v1177_v63  ;;  %vm1160_vm7 = vcmp.ge.f32.partialorder %v1152_v61, 0.0  ;;  %v1168_v22 = vmul.f32 0.1, %v1152_v61 }
 0x14f   : > { %1180 = vst [vmem:[%s2498_s19 + $0x10] sm:$0xff] %v1172_v14 }
 0x150   : > { %v1176_v3 = vsel %vm1160_vm7, %v1152_v61, %v1168_v22 }
 0x151   : > { %1184 = vst [vmem:[%s2498_s19 + $0x30] sm:$0xff] %v1176_v3 }
 0x152 PF: > { %s14_s17 = sadd.s32 1, %s1862_s17   ;;  %s2522_s15 = smov %s1858_s16 }
 0x153   : > { %p11_p5 = scmp.ge.s32.totalorder %s14_s17, 4   ;;  %s2523_s16 = smov %s2525_s18 }
 0x155   :  { %13 = sbr.rel (!%p11_p5) target bundleno = 2 (0x2), region = 71 }

// kernel: decoder_forward.9
= control target key start
LH: loop header
LB: loop body
LE: loop exit
PB: predicated region body
PF: predicated region fallthrough
CT: control target
= control target key end

     0   :  { %s1673_s15 = smov 0   ;;  %s1675_s16 = smov 0   ;;  %s2645_s0 = inlined_call_operand.vmem [shape: f32[2,1,4,5,5,128], index: 0, kind: input, shape index: {}]   ;;  %s2646_s1 = inlined_call_operand.vmem [shape: f32[1152,256], index: 1, kind: input, shape index: {}]   ;;  %s2647_s2 = inlined_call_operand.vmem [shape: f32[1,256], index: 2, kind: input, shape index: {}]   ;;  %s2648_s3 = inlined_call_operand.vmem [shape: f32[1,256], index: 3, kind: input, shape index: {}]   ;;  %s2649_s4 = inlined_call_operand.vmem [shape: f32[2,1,4,4,256], index: 4, kind: output, shape index: {}]  }
   0x1   :  { %s1677_s17 = smov 0  }
   0x2 LB: > { %s26_s18 = sadd.s32 1, %s1641_s16  ;;  %p1216_p0 = scmp.ge.s32.totalorder %s1645_s17, 1  ;;  %s1645_s17 = sphi %s1677_s17, %s14_s17   ;;  %s1641_s16 = sphi %s1675_s16, %s2651_s16   ;;  %s1637_s15 = sphi %s1673_s15, %s2650_s15  }
   0x3   : > { %p28_p1 = scmp.ge.s32.totalorder %s26_s18, 2  ;;  %p182_p2 = scmp.lt.s32.totalorder %s1645_s17, 3 }
   0x5   : > { %s2653_s18 = smov (%p28_p1, %s26_s18), 0  ;;  %p183_p3 = pnand %p1216_p0, %p182_p2 }
   0x6   : > { %v332_v0 = vld [vmem:[%s2646_s1 + $0x8] sm:$0xff] (!%p183_p3)  ;;  %v334_v1 = vld [vmem:[%s2646_s1 + $0x18] sm:$0xff] (!%p183_p3)  ;;  %v331_v5 = vld [vmem:[%s2646_s1] sm:$0xff] (!%p183_p3)  ;;  %p216_p4 = scmp.lt.s32.totalorder (!%p183_p3), %s1637_s15, 1 }
   0x7   : > { %186 = sbr.rel (%p183_p3) target bundleno = 395 (0x18b), region = 36  ;;  %v460_v2 = vld [vmem:[%s2646_s1 + $0x408] sm:$0xff] (!%p183_p3)  ;;  %v1251_v3 = vpack.c.bf16 (!%p183_p3), %v334_v1, %v332_v0  ;;  %v462_v4 = vld [vmem:[%s2646_s1 + $0x418] sm:$0xff] (!%p183_p3)  ;;  %v333_v6 = vld [vmem:[%s2646_s1 + $0x10] sm:$0xff] (!%p183_p3) }
   0x8   : > { %v1379_v7 = vpack.c.bf16 (!%p183_p3), %v462_v4, %v460_v2  ;;  %v1253_v8 = vpack.c.bf16 (!%p183_p3), %v333_v6, %v331_v5  ;;  %v459_v9 = vld [vmem:[%s2646_s1 + $0x400] sm:$0xff] (!%p183_p3)  ;;  %v461_v10 = vld [vmem:[%s2646_s1 + $0x410] sm:$0xff] (!%p183_p3)  ;;  %v336_v11 = vld [vmem:[%s2646_s1 + $0x28] sm:$0xff] (!%p183_p3) }
   0x9   : > { %1252 = vmatprep.subr.bf16.mxu1 (!%p183_p3), %v1251_v3  ;;  %v1381_v12 = vpack.c.bf16 (!%p183_p3), %v461_v10, %v459_v9  ;;  %v338_v13 = vld [vmem:[%s2646_s1 + $0x38] sm:$0xff] (!%p183_p3)  ;;  %v464_v14 = vld [vmem:[%s2646_s1 + $0x428] sm:$0xff] (!%p183_p3)  ;;  %v335_v18 = vld [vmem:[%s2646_s1 + $0x20] sm:$0xff] (!%p183_p3) }
   0xa   : > { %v466_v15 = vld [vmem:[%s2646_s1 + $0x438] sm:$0xff] (!%p183_p3)  ;;  %1380 = vmatprep.subr.bf16.mxu0 (!%p183_p3), %v1379_v7  ;;  %1254 = vmatpush1.bf16.msra.mxu1 (!%p183_p3), %v1253_v8  ;;  %v1255_v16 = vpack.c.bf16 (!%p183_p3), %v338_v13, %v336_v11  ;;  %v337_v19 = vld [vmem:[%s2646_s1 + $0x30] sm:$0xff] (!%p183_p3)  ;;  %v463_v20 = vld [vmem:[%s2646_s1 + $0x420] sm:$0xff] (!%p183_p3) }
   0xb   : > { %v1383_v17 = vpack.c.bf16 (!%p183_p3), %v466_v15, %v464_v14  ;;  %1382 = vmatpush1.bf16.msra.mxu0 (!%p183_p3), %v1381_v12  ;;  %v1257_v21 = vpack.c.bf16 (!%p183_p3), %v337_v19, %v335_v18  ;;  %v465_v22 = vld [vmem:[%s2646_s1 + $0x430] sm:$0xff] (!%p183_p3)  ;;  %v340_v23 = vld [vmem:[%s2646_s1 + $0x48] sm:$0xff] (!%p183_p3)  ;;  %v342_v24 = vld [vmem:[%s2646_s1 + $0x58] sm:$0xff] (!%p183_p3) }
   0xc   : > { %1256 = vmatprep.subr.bf16.mxu1 (!%p183_p3), %v1255_v16  ;;  %v1385_v25 = vpack.c.bf16 (!%p183_p3), %v465_v22, %v463_v20  ;;  %v1259_v26 = vpack.c.bf16 (!%p183_p3), %v342_v24, %v340_v23  ;;  %v468_v27 = vld [vmem:[%s2646_s1 + $0x448] sm:$0xff] (!%p183_p3)  ;;  %v470_v28 = vld [vmem:[%s2646_s1 + $0x458] sm:$0xff] (!%p183_p3)  ;;  %v339_v29 = vld [vmem:[%s2646_s1 + $0x40] sm:$0xff] (!%p183_p3) }
   0xd   : > { %1384 = vmatprep.subr.bf16.mxu0 (!%p183_p3), %v1383_v17  ;;  %v1387_v30 = vpack.c.bf16 (!%p183_p3), %v470_v28, %v468_v27  ;;  %v341_v31 = vld [vmem:[%s2646_s1 + $0x50] sm:$0xff] (!%p183_p3)  ;;  %v467_v32 = vld [vmem:[%s2646_s1 + $0x440] sm:$0xff] (!%p183_p3)  ;;  %v344_v35 = vld [vmem:[%s2646_s1 + $0x68] sm:$0xff] (!%p183_p3) }
   0xe   : > { %v469_v33 = vld [vmem:[%s2646_s1 + $0x450] sm:$0xff]  ;;  %1258 = vmatpush1.bf16.msra.mxu1 %v1257_v21  ;;  %v1261_v34 = vpack.c.bf16 %v341_v31, %v339_v29  ;;  %v346_v36 = vld [vmem:[%s2646_s1 + $0x78] sm:$0xff]  ;;  %v472_v37 = vld [vmem:[%s2646_s1 + $0x468] sm:$0xff]  ;;  %s2655_s15 = smov (!%p216_p4, %s1637_s15), 1 }
   0xf   : > { %1386 = vmatpush1.bf16.msra.mxu0 %v1385_v25  ;;  %1260 = vmatprep.subr.bf16.mxu1 %v1259_v26  ;;  %v1389_v38 = vpack.c.bf16 %v469_v33, %v467_v32  ;;  %v1263_v39 = vpack.c.bf16 %v346_v36, %v344_v35  ;;  %v474_v40 = vld [vmem:[%s2646_s1 + $0x478] sm:$0xff]  ;;  %v343_v41 = vld [vmem:[%s2646_s1 + $0x60] sm:$0xff]  ;;  %v345_v42 = vld [vmem:[%s2646_s1 + $0x70] sm:$0xff]  ;;  %s1571_s7 = smul.u32 160, %s2655_s15  ;;  %s1250_s23 = sshll.u32 %s2655_s15, 5 }
  0x10   : > { %1388 = vmatprep.subr.bf16.mxu0 %v1387_v30  ;;  %v1391_v43 = vpack.c.bf16 %v474_v40, %v472_v37  ;;  %v471_v44 = vld [vmem:[%s2646_s1 + $0x460] sm:$0xff]  ;;  %v473_v45 = vld [vmem:[%s2646_s1 + $0x470] sm:$0xff]  ;;  %v348_v46 = vld [vmem:[%s2646_s1 + $0x88] sm:$0xff]  ;;  %v1265_v50 = vpack.c.bf16 %v345_v42, %v343_v41  ;;  %s233_s26 = scalar_lea.vmem %s2649_s4, %s1250_s23 }
  0x11   : > { %v350_v47 = vld [vmem:[%s2646_s1 + $0x98] sm:$0xff]  ;;  %v476_v48 = vld [vmem:[%s2646_s1 + $0x488] sm:$0xff]  ;;  %v1393_v51 = vpack.c.bf16 %v473_v45, %v471_v44  ;;  %v347_v53 = vld [vmem:[%s2646_s1 + $0x80] sm:$0xff]  ;;  %s1979_s30 = scalar_lea.vmem %s2645_s0, %s1571_s7 }
  0x12   : > { %v478_v49 = vld [vmem:[%s2646_s1 + $0x498] sm:$0xff]  ;;  %1262 = vmatpush1.bf16.msra.mxu1 %v1261_v34  ;;  %v1267_v52 = vpack.c.bf16 %v350_v47, %v348_v46  ;;  %v349_v54 = vld [vmem:[%s2646_s1 + $0x90] sm:$0xff]  ;;  %v475_v55 = vld [vmem:[%s2646_s1 + $0x480] sm:$0xff] }
  0x13   : > { %1390 = vmatpush1.bf16.msra.mxu0 %v1389_v38  ;;  %1264 = vmatprep.subr.bf16.mxu1 %v1263_v39  ;;  %v1395_v56 = vpack.c.bf16 %v478_v49, %v476_v48  ;;  %v477_v57 = vld [vmem:[%s2646_s1 + $0x490] sm:$0xff]  ;;  %v352_v58 = vld [vmem:[%s2646_s1 + $0xa8] sm:$0xff]  ;;  %v354_v59 = vld [vmem:[%s2646_s1 + $0xb8] sm:$0xff]  ;;  %v1269_v62 = vpack.c.bf16 %v349_v54, %v347_v53 }
  0x14   : > { %1392 = vmatprep.subr.bf16.mxu0 %v1391_v43  ;;  %v480_v60 = vld [vmem:[%s2646_s1 + $0x4a8] sm:$0xff]  ;;  %v482_v61 = vld [vmem:[%s2646_s1 + $0x4b8] sm:$0xff]  ;;  %v1397_v63 = vpack.c.bf16 %v477_v57, %v475_v55  ;;  %v1271_v0 = vpack.c.bf16 %v354_v59, %v352_v58  ;;  %v351_v1 = vld [vmem:[%s2646_s1 + $0xa0] sm:$0xff] }
  0x15   : > { %v353_v2 = vld [vmem:[%s2646_s1 + $0xb0] sm:$0xff]  ;;  %v479_v3 = vld [vmem:[%s2646_s1 + $0x4a0] sm:$0xff]  ;;  %v1399_v4 = vpack.c.bf16 %v482_v61, %v480_v60  ;;  %v356_v6 = vld [vmem:[%s2646_s1 + $0xc8] sm:$0xff] }
  0x16   : > { %1266 = vmatpush1.bf16.msra.mxu1 %v1265_v50  ;;  %v481_v5 = vld [vmem:[%s2646_s1 + $0x4b0] sm:$0xff]  ;;  %v358_v7 = vld [vmem:[%s2646_s1 + $0xd8] sm:$0xff]  ;;  %v484_v8 = vld [vmem:[%s2646_s1 + $0x4c8] sm:$0xff]  ;;  %v1273_v10 = vpack.c.bf16 %v353_v2, %v351_v1 }
  0x17   : > { %1394 = vmatpush1.bf16.msra.mxu0 %v1393_v51  ;;  %1268 = vmatprep.subr.bf16.mxu1 %v1267_v52  ;;  %v486_v9 = vld [vmem:[%s2646_s1 + $0x4d8] sm:$0xff]  ;;  %v1401_v11 = vpack.c.bf16 %v481_v5, %v479_v3  ;;  %v1275_v12 = vpack.c.bf16 %v358_v7, %v356_v6  ;;  %v355_v13 = vld [vmem:[%s2646_s1 + $0xc0] sm:$0xff]  ;;  %v357_v14 = vld [vmem:[%s2646_s1 + $0xd0] sm:$0xff] }
  0x18   : > { %1396 = vmatprep.subr.bf16.mxu0 %v1395_v56  ;;  %v483_v15 = vld [vmem:[%s2646_s1 + $0x4c0] sm:$0xff]  ;;  %v1403_v16 = vpack.c.bf16 %v486_v9, %v484_v8  ;;  %v485_v17 = vld [vmem:[%s2646_s1 + $0x4d0] sm:$0xff]  ;;  %v360_v18 = vld [vmem:[%s2646_s1 + $0xe8] sm:$0xff]  ;;  %v1277_v22 = vpack.c.bf16 %v357_v14, %v355_v13 }
  0x19   : > { %v362_v19 = vld [vmem:[%s2646_s1 + $0xf8] sm:$0xff]  ;;  %v488_v20 = vld [vmem:[%s2646_s1 + $0x4e8] sm:$0xff]  ;;  %v1405_v23 = vpack.c.bf16 %v485_v17, %v483_v15  ;;  %v359_v25 = vld [vmem:[%s2646_s1 + $0xe0] sm:$0xff] }
  0x1a   : > { %1270 = vmatpush1.bf16.msra.mxu1 %v1269_v62  ;;  %v490_v21 = vld [vmem:[%s2646_s1 + $0x4f8] sm:$0xff]  ;;  %v1279_v24 = vpack.c.bf16 %v362_v19, %v360_v18  ;;  %v361_v26 = vld [vmem:[%s2646_s1 + $0xf0] sm:$0xff]  ;;  %v487_v27 = vld [vmem:[%s2646_s1 + $0x4e0] sm:$0xff] }
  0x1b   : > { %1398 = vmatpush1.bf16.msra.mxu0 %v1397_v63  ;;  %1272 = vmatprep.subr.bf16.mxu1 %v1271_v0  ;;  %v1407_v28 = vpack.c.bf16 %v490_v21, %v488_v20  ;;  %v489_v29 = vld [vmem:[%s2646_s1 + $0x4f0] sm:$0xff]  ;;  %v364_v30 = vld [vmem:[%s2646_s1 + $0x108] sm:$0xff]  ;;  %v366_v31 = vld [vmem:[%s2646_s1 + $0x118] sm:$0xff]  ;;  %v1281_v34 = vpack.c.bf16 %v361_v26, %v359_v25 }
  0x1c   : > { %1400 = vmatprep.subr.bf16.mxu0 %v1399_v4  ;;  %v492_v32 = vld [vmem:[%s2646_s1 + $0x508] sm:$0xff]  ;;  %v494_v33 = vld [vmem:[%s2646_s1 + $0x518] sm:$0xff]  ;;  %v1409_v35 = vpack.c.bf16 %v489_v29, %v487_v27  ;;  %v1283_v36 = vpack.c.bf16 %v366_v31, %v364_v30  ;;  %v363_v37 = vld [vmem:[%s2646_s1 + $0x100] sm:$0xff] }
  0x1d   : > { %v365_v38 = vld [vmem:[%s2646_s1 + $0x110] sm:$0xff]  ;;  %v491_v39 = vld [vmem:[%s2646_s1 + $0x500] sm:$0xff]  ;;  %v1411_v40 = vpack.c.bf16 %v494_v33, %v492_v32  ;;  %v368_v42 = vld [vmem:[%s2646_s1 + $0x128] sm:$0xff] }
  0x1e   : > { %1274 = vmatpush1.bf16.msra.mxu1 %v1273_v10  ;;  %v493_v41 = vld [vmem:[%s2646_s1 + $0x510] sm:$0xff]  ;;  %v370_v43 = vld [vmem:[%s2646_s1 + $0x138] sm:$0xff]  ;;  %v496_v44 = vld [vmem:[%s2646_s1 + $0x528] sm:$0xff]  ;;  %v1285_v46 = vpack.c.bf16 %v365_v38, %v363_v37 }
  0x1f   : > { %1402 = vmatpush1.bf16.msra.mxu0 %v1401_v11  ;;  %1276 = vmatprep.subr.bf16.mxu1 %v1275_v12  ;;  %v498_v45 = vld [vmem:[%s2646_s1 + $0x538] sm:$0xff]  ;;  %v1413_v47 = vpack.c.bf16 %v493_v41, %v491_v39  ;;  %v1287_v48 = vpack.c.bf16 %v370_v43, %v368_v42  ;;  %v367_v49 = vld [vmem:[%s2646_s1 + $0x120] sm:$0xff]  ;;  %v369_v50 = vld [vmem:[%s2646_s1 + $0x130] sm:$0xff] }
  0x20   : > { %1404 = vmatprep.subr.bf16.mxu0 %v1403_v16  ;;  %v495_v51 = vld [vmem:[%s2646_s1 + $0x520] sm:$0xff]  ;;  %v1415_v52 = vpack.c.bf16 %v498_v45, %v496_v44  ;;  %v497_v53 = vld [vmem:[%s2646_s1 + $0x530] sm:$0xff]  ;;  %v372_v54 = vld [vmem:[%s2646_s1 + $0x148] sm:$0xff]  ;;  %v1289_v58 = vpack.c.bf16 %v369_v50, %v367_v49 }
  0x21   : > { %v374_v55 = vld [vmem:[%s2646_s1 + $0x158] sm:$0xff]  ;;  %v500_v56 = vld [vmem:[%s2646_s1 + $0x548] sm:$0xff]  ;;  %v1417_v59 = vpack.c.bf16 %v497_v53, %v495_v51  ;;  %v371_v61 = vld [vmem:[%s2646_s1 + $0x140] sm:$0xff] }
  0x22   : > { %1278 = vmatpush1.bf16.msra.mxu1 %v1277_v22  ;;  %v502_v57 = vld [vmem:[%s2646_s1 + $0x558] sm:$0xff]  ;;  %v1291_v60 = vpack.c.bf16 %v374_v55, %v372_v54  ;;  %v373_v62 = vld [vmem:[%s2646_s1 + $0x150] sm:$0xff]  ;;  %v499_v63 = vld [vmem:[%s2646_s1 + $0x540] sm:$0xff] }
  0x23   : > { %1406 = vmatpush1.bf16.msra.mxu0 %v1405_v23  ;;  %1280 = vmatprep.subr.bf16.mxu1 %v1279_v24  ;;  %v1419_v0 = vpack.c.bf16 %v502_v57, %v500_v56  ;;  %v501_v1 = vld [vmem:[%s2646_s1 + $0x550] sm:$0xff]  ;;  %v376_v2 = vld [vmem:[%s2646_s1 + $0x168] sm:$0xff]  ;;  %v378_v3 = vld [vmem:[%s2646_s1 + $0x178] sm:$0xff]  ;;  %v1293_v6 = vpack.c.bf16 %v373_v62, %v371_v61 }
  0x24   : > { %1408 = vmatprep.subr.bf16.mxu0 %v1407_v28  ;;  %v504_v4 = vld [vmem:[%s2646_s1 + $0x568] sm:$0xff]  ;;  %v506_v5 = vld [vmem:[%s2646_s1 + $0x578] sm:$0xff]  ;;  %v375_v7 = vld [vmem:[%s2646_s1 + $0x160] sm:$0xff]  ;;  %v1421_v10 = vpack.c.bf16 %v501_v1, %v499_v63  ;;  %v1295_v11 = vpack.c.bf16 %v378_v3, %v376_v2 }
  0x25   : > { %v377_v8 = vld [vmem:[%s2646_s1 + $0x170] sm:$0xff]  ;;  %v503_v9 = vld [vmem:[%s2646_s1 + $0x560] sm:$0xff]  ;;  %v380_v13 = vld [vmem:[%s2646_s1 + $0x188] sm:$0xff]  ;;  %v1423_v15 = vpack.c.bf16 %v506_v5, %v504_v4 }
  0x26   : > { %1282 = vmatpush1.bf16.msra.mxu1 %v1281_v34  ;;  %v505_v12 = vld [vmem:[%s2646_s1 + $0x570] sm:$0xff]  ;;  %v382_v14 = vld [vmem:[%s2646_s1 + $0x198] sm:$0xff]  ;;  %v508_v16 = vld [vmem:[%s2646_s1 + $0x588] sm:$0xff]  ;;  %v1297_v23 = vpack.c.bf16 %v377_v8, %v375_v7 }
  0x27   : > { %1410 = vmatpush1.bf16.msra.mxu0 %v1409_v35  ;;  %1284 = vmatprep.subr.bf16.mxu1 %v1283_v36  ;;  %v510_v17 = vld [vmem:[%s2646_s1 + $0x598] sm:$0xff]  ;;  %v234_v18 = vld [vmem:[%s1979_s30] sm:$0xf]  ;;  %v235_v20 = vld [vmem:[%s1979_s30 + $0x8] sm:$0xf]  ;;  %v1425_v27 = vpack.c.bf16 %v505_v12, %v503_v9  ;;  %v1299_v28 = vpack.c.bf16 %v382_v14, %v380_v13 }
  0x28   : > { %1412 = vmatprep.subr.bf16.mxu0 %v1411_v40  ;;  %v379_v19 = vld [vmem:[%s2646_s1 + $0x180] sm:$0xff]  ;;  %238 = vst [vmem:[#allocation2] sm:$0xf] %v234_v18  ;;  %v1220_v21 = vld [vmem:[%s1979_s30 + $0x28] sm:$0xf]  ;;  %v381_v24 = vld [vmem:[%s2646_s1 + $0x190] sm:$0xff]  ;;  %v1427_v32 = vpack.c.bf16 %v510_v17, %v508_v16 }
  0x29   : > { %v1221_v22 = vld [vmem:[%s1979_s30 + $0x30] sm:$0xf]  ;;  %v507_v25 = vld [vmem:[%s2646_s1 + $0x580] sm:$0xff]  ;;  %239 = vst [vmem:[#allocation2 + $0x24] sm:$0xf] %v235_v20  ;;  %v384_v34 = vld [vmem:[%s2646_s1 + $0x1a8] sm:$0xff]  ;;  %v1301_v38 = vpack.c.bf16 %v381_v24, %v379_v19 }
  0x2a   : > { %1286 = vmatpush1.bf16.msra.mxu1 %v1285_v46  ;;  %247 = vst [vmem:[#allocation2 + $0x4] sm:$0xf] %v1220_v21  ;;  %248 = vst [vmem:[#allocation2 + $0x28] sm:$0xf] %v1221_v22  ;;  %v1228_v26 = vld [vmem:[%s1979_s30 + $0x78] sm:$0xf] }
  0x2b   : > { %1414 = vmatpush1.bf16.msra.mxu0 %v1413_v47  ;;  %1288 = vmatprep.subr.bf16.mxu1 %v1287_v48  ;;  %v1229_v29 = vld [vmem:[%s1979_s30 + $0x80] sm:$0xf]  ;;  %273 = vst [vmem:[#allocation2 + $0x10] sm:$0xf] %v1228_v26  ;;  %v1232_v30 = vld [vmem:[%s1979_s30 + $0x51] sm:$0xf] }
  0x2c   : > { %1416 = vmatprep.subr.bf16.mxu0 %v1415_v52  ;;  %v1233_v31 = vld [vmem:[%s1979_s30 + $0x59] sm:$0xf]  ;;  %v509_v33 = vld [vmem:[%s2646_s1 + $0x590] sm:$0xff]  ;;  %274 = vst [vmem:[#allocation2 + $0x34] sm:$0xf] %v1229_v29  ;;  %v512_v36 = vld [vmem:[%s2646_s1 + $0x5a8] sm:$0xff] }
  0x2d   : > { %v386_v35 = vld [vmem:[%s2646_s1 + $0x1b8] sm:$0xff]  ;;  %281 = vst [vmem:[#allocation2 + $0x14] sm:$0xf] %v1232_v30  ;;  %282 = vst [vmem:[#allocation2 + $0x38] sm:$0xf] %v1233_v31  ;;  %v383_v39 = vld [vmem:[%s2646_s1 + $0x1a0] sm:$0xff]  ;;  %v1429_v41 = vpack.c.bf16 %v509_v33, %v507_v25 }
  0x2e   : > { %1290 = vmatpush1.bf16.msra.mxu1 %v1289_v58  ;;  %v514_v37 = vld [vmem:[%s2646_s1 + $0x5b8] sm:$0xff]  ;;  %v385_v40 = vld [vmem:[%s2646_s1 + $0x1b0] sm:$0xff]  ;;  %v1303_v42 = vpack.c.bf16 %v386_v35, %v384_v34  ;;  %v511_v43 = vld [vmem:[%s2646_s1 + $0x5a0] sm:$0xff] }
  0x2f   : > { %1418 = vmatpush1.bf16.msra.mxu0 %v1417_v59  ;;  %1292 = vmatprep.subr.bf16.mxu1 %v1291_v60  ;;  %v513_v44 = vld [vmem:[%s2646_s1 + $0x5b0] sm:$0xff]  ;;  %v388_v45 = vld [vmem:[%s2646_s1 + $0x1c8] sm:$0xff]  ;;  %v1431_v46 = vpack.c.bf16 %v514_v37, %v512_v36  ;;  %v390_v47 = vld [vmem:[%s2646_s1 + $0x1d8] sm:$0xff]  ;;  %v1305_v51 = vpack.c.bf16 %v385_v40, %v383_v39 }
  0x30   : > { %1420 = vmatprep.subr.bf16.mxu0 %v1419_v0  ;;  %v516_v48 = vld [vmem:[%s2646_s1 + $0x5c8] sm:$0xff]  ;;  %v518_v49 = vld [vmem:[%s2646_s1 + $0x5d8] sm:$0xff]  ;;  %v387_v50 = vld [vmem:[%s2646_s1 + $0x1c0] sm:$0xff]  ;;  %v1433_v55 = vpack.c.bf16 %v513_v44, %v511_v43  ;;  %v1307_v56 = vpack.c.bf16 %v390_v47, %v388_v45 }
  0x31   : > { %v389_v52 = vld [vmem:[%s2646_s1 + $0x1d0] sm:$0xff]  ;;  %v515_v53 = vld [vmem:[%s2646_s1 + $0x5c0] sm:$0xff]  ;;  %v1435_v58 = vpack.c.bf16 %v518_v49, %v516_v48  ;;  %v392_v59 = vld [vmem:[%s2646_s1 + $0x1e8] sm:$0xff] }
  0x32   : > { %1294 = vmatpush1.bf16.msra.mxu1 %v1293_v6  ;;  %v1599_v54 = vld [vmem:[#allocation2 + $0x4] ss:$36 sps:$4 sm:$0xff]   ;;  %v517_v57 = vld [vmem:[%s2646_s1 + $0x5d0] sm:$0xff]  ;;  %v394_v60 = vld [vmem:[%s2646_s1 + $0x1f8] sm:$0xff]  ;;  %v1309_v0 = vpack.c.bf16 %v389_v52, %v387_v50 }
  0x33   : > { %1422 = vmatpush1.bf16.msra.mxu0 %v1421_v10  ;;  %1296 = vmatprep.subr.bf16.mxu1 %v1295_v11  ;;  %v520_v62 = vld [vmem:[%s2646_s1 + $0x5e8] sm:$0xff]  ;;  %v522_v63 = vld [vmem:[%s2646_s1 + $0x5f8] sm:$0xff]  ;;  %v1437_v1 = vpack.c.bf16 %v517_v57, %v515_v53  ;;  %v1311_v2 = vpack.c.bf16 %v394_v60, %v392_v59  ;;  %v391_v3 = vld [vmem:[%s2646_s1 + $0x1e0] sm:$0xff] }
  0x34   : > { %1424 = vmatprep.subr.bf16.mxu0 %v1423_v15  ;;  %739 = vmatprep.mubr.f32.mxu1 %v1599_v54  ;;  %v1602_v61 = vld [vmem:[#allocation2 + $0x14] ss:$36 sps:$4 sm:$0xff]   ;;  %v519_v5 = vld [vmem:[%s2646_s1 + $0x5e0] sm:$0xff]  ;;  %v1439_v6 = vpack.c.bf16 %v522_v63, %v520_v62  ;;  %v396_v8 = vld [vmem:[%s2646_s1 + $0x208] sm:$0xff] }
  0x35   : > { %893 = vmatprep.mubr.f32.mxu0 %v1602_v61  ;;  %v393_v4 = vld [vmem:[%s2646_s1 + $0x1f0] sm:$0xff]  ;;  %v398_v9 = vld [vmem:[%s2646_s1 + $0x218] sm:$0xff]  ;;  %v524_v10 = vld [vmem:[%s2646_s1 + $0x608] sm:$0xff] }
  0x36   : > { %1298 = vmatpush1.bf16.msra.mxu1 %v1297_v23  ;;  %v521_v7 = vld [vmem:[%s2646_s1 + $0x5f0] sm:$0xff]  ;;  %v526_v11 = vld [vmem:[%s2646_s1 + $0x618] sm:$0xff]  ;;  %v1313_v12 = vpack.c.bf16 %v393_v4, %v391_v3  ;;  %v1315_v14 = vpack.c.bf16 %v398_v9, %v396_v8  ;;  %v395_v15 = vld [vmem:[%s2646_s1 + $0x200] sm:$0xff] }
  0x37   : > { %1426 = vmatpush1.bf16.msra.mxu0 %v1425_v27  ;;  %1300 = vmatprep.subr.bf16.mxu1 %v1299_v28  ;;  %v1441_v13 = vpack.c.bf16 %v521_v7, %v519_v5  ;;  %v397_v16 = vld [vmem:[%s2646_s1 + $0x210] sm:$0xff]  ;;  %v523_v17 = vld [vmem:[%s2646_s1 + $0x600] sm:$0xff]  ;;  %v1443_v18 = vpack.c.bf16 %v526_v11, %v524_v10  ;;  %v400_v20 = vld [vmem:[%s2646_s1 + $0x228] sm:$0xff] }
  0x38   : > { %1428 = vmatprep.subr.bf16.mxu0 %v1427_v32  ;;  %v525_v19 = vld [vmem:[%s2646_s1 + $0x610] sm:$0xff]  ;;  %v402_v21 = vld [vmem:[%s2646_s1 + $0x238] sm:$0xff]  ;;  %v1597_v22 = vld [vmem:[#allocation2] ss:$36 sps:$4 sm:$0xff]   ;;  %v1317_v26 = vpack.c.bf16 %v397_v16, %v395_v15 }
  0x39   : > { %v528_v23 = vld [vmem:[%s2646_s1 + $0x628] sm:$0xff]  ;;  %v530_v24 = vld [vmem:[%s2646_s1 + $0x638] sm:$0xff]  ;;  %v1600_v25 = vld [vmem:[#allocation2 + $0x10] ss:$36 sps:$4 sm:$0xff]   ;;  %v1445_v27 = vpack.c.bf16 %v525_v19, %v523_v17  ;;  %v1319_v28 = vpack.c.bf16 %v402_v21, %v400_v20 }
  0x3a   : > { %1302 = vmatpush1.bf16.msra.mxu1 %v1301_v38  ;;  %v399_v29 = vld [vmem:[%s2646_s1 + $0x220] sm:$0xff]  ;;  %v401_v30 = vld [vmem:[%s2646_s1 + $0x230] sm:$0xff]  ;;  %v1447_v32 = vpack.c.bf16 %v530_v24, %v528_v23  ;;  %v404_v34 = vld [vmem:[%s2646_s1 + $0x248] sm:$0xff] }
  0x3b   : > { %1430 = vmatpush1.bf16.msra.mxu0 %v1429_v41  ;;  %1304 = vmatprep.subr.bf16.mxu1 %v1303_v42  ;;  %v527_v31 = vld [vmem:[%s2646_s1 + $0x620] sm:$0xff]  ;;  %v529_v33 = vld [vmem:[%s2646_s1 + $0x630] sm:$0xff]  ;;  %v406_v35 = vld [vmem:[%s2646_s1 + $0x258] sm:$0xff]  ;;  %v1321_v38 = vpack.c.bf16 %v401_v30, %v399_v29 }
  0x3c   : > { %1432 = vmatprep.subr.bf16.mxu0 %v1431_v46  ;;  %v532_v36 = vld [vmem:[%s2646_s1 + $0x648] sm:$0xff]  ;;  %v534_v37 = vld [vmem:[%s2646_s1 + $0x658] sm:$0xff]  ;;  %v1449_v39 = vpack.c.bf16 %v529_v33, %v527_v31  ;;  %v1323_v40 = vpack.c.bf16 %v406_v35, %v404_v34  ;;  %v403_v41 = vld [vmem:[%s2646_s1 + $0x240] sm:$0xff] }
  0x3d   : > { %v405_v42 = vld [vmem:[%s2646_s1 + $0x250] sm:$0xff]  ;;  %v531_v43 = vld [vmem:[%s2646_s1 + $0x640] sm:$0xff]  ;;  %v1451_v44 = vpack.c.bf16 %v534_v37, %v532_v36  ;;  %v408_v46 = vld [vmem:[%s2646_s1 + $0x268] sm:$0xff] }
  0x3e   : > { %1306 = vmatpush1.bf16.msra.mxu1 %v1305_v51  ;;  %v533_v45 = vld [vmem:[%s2646_s1 + $0x650] sm:$0xff]  ;;  %v410_v47 = vld [vmem:[%s2646_s1 + $0x278] sm:$0xff]  ;;  %v536_v48 = vld [vmem:[%s2646_s1 + $0x668] sm:$0xff]  ;;  %v1325_v50 = vpack.c.bf16 %v405_v42, %v403_v41 }
  0x3f   : > { %1434 = vmatpush1.bf16.msra.mxu0 %v1433_v55  ;;  %1308 = vmatprep.subr.bf16.mxu1 %v1307_v56  ;;  %v538_v49 = vld [vmem:[%s2646_s1 + $0x678] sm:$0xff]  ;;  %v1453_v51 = vpack.c.bf16 %v533_v45, %v531_v43  ;;  %v1327_v52 = vpack.c.bf16 %v410_v47, %v408_v46  ;;  %v407_v53 = vld [vmem:[%s2646_s1 + $0x260] sm:$0xff]  ;;  %v409_v54 = vld [vmem:[%s2646_s1 + $0x270] sm:$0xff] }
  0x40   : > { %1436 = vmatprep.subr.bf16.mxu0 %v1435_v58  ;;  %v535_v55 = vld [vmem:[%s2646_s1 + $0x660] sm:$0xff]  ;;  %v1455_v56 = vpack.c.bf16 %v538_v49, %v536_v48  ;;  %v537_v57 = vld [vmem:[%s2646_s1 + $0x670] sm:$0xff]  ;;  %v412_v58 = vld [vmem:[%s2646_s1 + $0x288] sm:$0xff]  ;;  %v1329_v62 = vpack.c.bf16 %v409_v54, %v407_v53 }
  0x41   : > { %v414_v59 = vld [vmem:[%s2646_s1 + $0x298] sm:$0xff]  ;;  %v540_v60 = vld [vmem:[%s2646_s1 + $0x688] sm:$0xff]  ;;  %v1457_v63 = vpack.c.bf16 %v537_v57, %v535_v55  ;;  %v539_v3 = vld [vmem:[%s2646_s1 + $0x680] sm:$0xff] }
  0x42   : > { %1310 = vmatpush1.bf16.msra.mxu1 %v1309_v0  ;;  %v542_v61 = vld [vmem:[%s2646_s1 + $0x698] sm:$0xff]  ;;  %v1331_v0 = vpack.c.bf16 %v414_v59, %v412_v58  ;;  %v541_v5 = vld [vmem:[%s2646_s1 + $0x690] sm:$0xff]  ;;  %v544_v8 = vld [vmem:[%s2646_s1 + $0x6a8] sm:$0xff] }
  0x43   : > { %1438 = vmatpush1.bf16.msra.mxu0 %v1437_v1  ;;  %1312 = vmatprep.subr.bf16.mxu1 %v1311_v2  ;;  %v411_v1 = vld [vmem:[%s2646_s1 + $0x280] sm:$0xff]  ;;  %v413_v2 = vld [vmem:[%s2646_s1 + $0x290] sm:$0xff]  ;;  %v1459_v4 = vpack.c.bf16 %v542_v61, %v540_v60  ;;  %v418_v7 = vld [vmem:[%s2646_s1 + $0x2b8] sm:$0xff]  ;;  %v1461_v11 = vpack.c.bf16 %v541_v5, %v539_v3 }
  0x44   : > { %1440 = vmatprep.subr.bf16.mxu0 %v1439_v6  ;;  %v416_v6 = vld [vmem:[%s2646_s1 + $0x2a8] sm:$0xff]  ;;  %v546_v9 = vld [vmem:[%s2646_s1 + $0x6b8] sm:$0xff]  ;;  %v1333_v10 = vpack.c.bf16 %v413_v2, %v411_v1  ;;  %v543_v15 = vld [vmem:[%s2646_s1 + $0x6a0] sm:$0xff] }
  0x45   : > { %v1463_v16 = vpack.c.bf16 %v546_v9, %v544_v8  ;;  %v545_v17 = vld [vmem:[%s2646_s1 + $0x6b0] sm:$0xff]  ;;  %v422_v19 = vld [vmem:[%s2646_s1 + $0x2d8] sm:$0xff]  ;;  %v548_v20 = vld [vmem:[%s2646_s1 + $0x6c8] sm:$0xff] }
  0x46   : > { %1314 = vmatpush1.bf16.msra.mxu1 %v1313_v12  ;;  %v1335_v12 = vpack.c.bf16 %v418_v7, %v416_v6  ;;  %v550_v21 = vld [vmem:[%s2646_s1 + $0x6d8] sm:$0xff]  ;;  %v419_v23 = vld [vmem:[%s2646_s1 + $0x2c0] sm:$0xff]  ;;  %v1465_v24 = vpack.c.bf16 %v545_v17, %v543_v15  ;;  %v424_v30 = vld [vmem:[%s2646_s1 + $0x2e8] sm:$0xff] }
  0x47   : > { %1442 = vmatpush1.bf16.msra.mxu0 %v1441_v13  ;;  %1316 = vmatprep.subr.bf16.mxu1 %v1315_v14  ;;  %v415_v13 = vld [vmem:[%s2646_s1 + $0x2a0] sm:$0xff]  ;;  %v417_v14 = vld [vmem:[%s2646_s1 + $0x2b0] sm:$0xff]  ;;  %v1467_v29 = vpack.c.bf16 %v550_v21, %v548_v20  ;;  %v426_v31 = vld [vmem:[%s2646_s1 + $0x2f8] sm:$0xff] }
  0x48   : > { %1444 = vmatprep.subr.bf16.mxu0 %v1443_v18  ;;  %v420_v18 = vld [vmem:[%s2646_s1 + $0x2c8] sm:$0xff]  ;;  %v554_v33 = vld [vmem:[%s2646_s1 + $0x6f8] sm:$0xff]  ;;  %v2280_v34 = vld [vmem:[%s2646_s1 + $0x2e0] sm:$0xff]  ;;  %v1343_v45 = vpack.c.bf16 %v426_v31, %v424_v30 }
  0x49   : > { %740 = vmatmul.mubr.f32.vlgmr.msra.gmra.mrb[0].mxu1 %v1597_v22  ;;  %v1337_v22 = vpack.c.bf16 %v417_v14, %v415_v13  ;;  %v425_v35 = vld [vmem:[%s2646_s1 + $0x2f0] sm:$0xff]  ;;  %v2288_v37 = vld [vmem:[%s2646_s1 + $0x6e0] sm:$0xff]  ;;  %v237_v42 = vld [vmem:[%s1979_s30 + $0x18] sm:$0xf] }
  0x4a   : > { %1318 = vmatpush1.bf16.msra.mxu1 %v1317_v26  ;;  %894 = vmatmul.mubr.f32.vlgmr.msra.gmra.mrb[0].mxu0 %v1600_v25  ;;  %v1339_v25 = vpack.c.bf16 %v422_v19, %v420_v18  ;;  %v421_v26 = vld [vmem:[%s2646_s1 + $0x2d0] sm:$0xff]  ;;  %v1222_v43 = vld [vmem:[%s1979_s30 + $0x38] sm:$0xf]  ;;  %241 = vst [vmem:[#allocation2 + $0x6c] sm:$0xf] %v237_v42  ;;  %v427_v54 = vld [vmem:[%s2646_s1 + $0x300] sm:$0xff] }
  0x4b   : > { %1446 = vmatpush1.bf16.msra.mxu0 %v1445_v27  ;;  %1320 = vmatprep.subr.bf16.mxu1 %v1319_v28  ;;  %v547_v27 = vld [vmem:[%s2646_s1 + $0x6c0] sm:$0xff]  ;;  %v549_v28 = vld [vmem:[%s2646_s1 + $0x6d0] sm:$0xff]  ;;  %v1341_v36 = vpack.c.bf16 %v421_v26, %v419_v23  ;;  %249 = vst [vmem:[#allocation2 + $0x4c] sm:$0xf] %v1222_v43  ;;  %v1230_v47 = vld [vmem:[%s1979_s30 + $0x88] sm:$0xf] }
  0x4c   : > { %1448 = vmatprep.subr.bf16.mxu0 %v1447_v32  ;;  %v552_v32 = vld [vmem:[%s2646_s1 + $0x6e8] sm:$0xff]  ;;  %v236_v41 = vld [vmem:[%s1979_s30 + $0x10] sm:$0xf]  ;;  %v1223_v46 = vld [vmem:[%s1979_s30 + $0x40] sm:$0xf] }
  0x4d   : > { %240 = vst [vmem:[#allocation2 + $0x48] sm:$0xf] %v236_v41  ;;  %v1231_v48 = vld [vmem:[%s1979_s30 + $0x90] sm:$0xf]  ;;  %v1471_v49 = vpack.c.bf16 %v554_v33, %v552_v32  ;;  %250 = vst [vmem:[#allocation2 + $0x70] sm:$0xf] %v1223_v46 }
  0x4e   : > { %1322 = vmatpush1.bf16.msra.mxu1 %v1321_v38  ;;  %v2293_v38 = vld [vmem:[%s2646_s1 + $0x6f0] sm:$0xff]  ;;  %275 = vst [vmem:[#allocation2 + $0x58] sm:$0xf] %v1230_v47  ;;  %276 = vst [vmem:[#allocation2 + $0x7c] sm:$0xf] %v1231_v48  ;;  %v558_v53 = vld [vmem:[%s2646_s1 + $0x718] sm:$0xff] }
  0x4f   : > { %1450 = vmatpush1.bf16.msra.mxu0 %v1449_v39  ;;  %1324 = vmatprep.subr.bf16.mxu1 %v1323_v40  ;;  %v2298_v39 = vld [vmem:[%s2646_s1 + $0x308] sm:$0xff]  ;;  %v2303_v40 = vld [vmem:[%s2646_s1 + $0x318] sm:$0xff]  ;;  %v429_v55 = vld [vmem:[%s2646_s1 + $0x310] sm:$0xff]  ;;  %v1473_v61 = vpack.c.bf16 %v2293_v38, %v2288_v37 }
  0x50   : > { %1452 = vmatprep.subr.bf16.mxu0 %v1451_v44  ;;  %v1469_v44 = vpack.c.bf16 %v549_v28, %v547_v27  ;;  %v555_v57 = vld [vmem:[%s2646_s1 + $0x700] sm:$0xff]  ;;  %v557_v58 = vld [vmem:[%s2646_s1 + $0x710] sm:$0xff]  ;;  %v432_v59 = vld [vmem:[%s2646_s1 + $0x328] sm:$0xff] }
  0x51   : > { %v434_v60 = vld [vmem:[%s2646_s1 + $0x338] sm:$0xff]  ;;  %v251_v1 = vld [vmem:[%s1979_s30 + $0x1] sm:$0xf]  ;;  %v252_v2 = vld [vmem:[%s1979_s30 + $0x9] sm:$0xf]  ;;  %v1477_v17 = vpack.c.bf16 %v557_v58, %v555_v57 }
  0x52   : > { %1326 = vmatpush1.bf16.msra.mxu1 %v1325_v50  ;;  %v556_v50 = vld [vmem:[%s2646_s1 + $0x708] sm:$0xff]  ;;  %255 = vst [vmem:[#allocation2 + $0x8] sm:$0xf] %v251_v1  ;;  %256 = vst [vmem:[#allocation2 + $0x2c] sm:$0xf] %v252_v2  ;;  %v431_v7 = vld [vmem:[%s2646_s1 + $0x320] sm:$0xff]  ;;  %v1351_v18 = vpack.c.bf16 %v434_v60, %v432_v59 }
  0x53   : > { %1454 = vmatpush1.bf16.msra.mxu0 %v1453_v51  ;;  %1328 = vmatprep.subr.bf16.mxu1 %v1327_v52  ;;  %v1234_v51 = vld [vmem:[%s1979_s30 + $0x61] sm:$0xf]  ;;  %v1235_v52 = vld [vmem:[%s1979_s30 + $0x69] sm:$0xf]  ;;  %v1475_v3 = vpack.c.bf16 %v558_v53, %v556_v50  ;;  %v1225_v5 = vld [vmem:[%s1979_s30 + $0x58] sm:$0xf] }
  0x54   : > { %1456 = vmatprep.subr.bf16.mxu0 %v1455_v56  ;;  %283 = vst [vmem:[#allocation2 + $0x5c] sm:$0xf] %v1234_v51  ;;  %284 = vst [vmem:[#allocation2 + $0x80] sm:$0xf] %v1235_v52  ;;  %v1345_v56 = vpack.c.bf16 %v425_v35, %v2280_v34  ;;  %v1236_v6 = vld [vmem:[%s1979_s30 + $0x8] sm:$0xf] }
  0x55   : > { %v433_v8 = vld [vmem:[%s2646_s1 + $0x330] sm:$0xff]  ;;  %265 = vst [vmem:[#allocation2 + $0x30] sm:$0xf] %v1225_v5  ;;  %290 = vst [vmem:[#allocation2 + $0x18] sm:$0xf] %v1236_v6  ;;  %v559_v13 = vld [vmem:[%s2646_s1 + $0x720] sm:$0xff] }
  0x56   : > { %1330 = vmatpush1.bf16.msra.mxu1 %v1329_v62  ;;  %v1347_v62 = vpack.c.bf16 %v2303_v40, %v2298_v39  ;;  %v1237_v9 = vld [vmem:[%s1979_s30 + $0x10] sm:$0xf]  ;;  %v436_v15 = vld [vmem:[%s2646_s1 + $0x348] sm:$0xff]  ;;  %v566_v20 = vld [vmem:[%s2646_s1 + $0x758] sm:$0xff]  ;;  %v1353_v28 = vpack.c.bf16 %v433_v8, %v431_v7 }
  0x57   : > { %1458 = vmatpush1.bf16.msra.mxu0 %v1457_v63  ;;  %1332 = vmatprep.subr.bf16.mxu1 %v1331_v0  ;;  %v2345_v63 = vld [vmem:[%s2646_s1 + $0x728] sm:$0xff]  ;;  %v2350_v0 = vld [vmem:[%s2646_s1 + $0x738] sm:$0xff]  ;;  %v561_v14 = vld [vmem:[%s2646_s1 + $0x730] sm:$0xff]  ;;  %291 = vst [vmem:[#allocation2 + $0x3c] sm:$0xf] %v1237_v9 }
  0x58   : > { %1460 = vmatprep.subr.bf16.mxu0 %v1459_v4  ;;  %v1224_v4 = vld [vmem:[%s1979_s30 + $0x50] sm:$0xf]  ;;  %v564_v19 = vld [vmem:[%s2646_s1 + $0x748] sm:$0xff]  ;;  %v1479_v23 = vpack.c.bf16 %v2350_v0, %v2345_v63  ;;  %v1608_v27 = vld [vmem:[#allocation2 + $0x58] ss:$36 sps:$4 sm:$0xff]  }
  0x59   : > { %264 = vst [vmem:[#allocation2 + $0xc] sm:$0xf] %v1224_v4  ;;  %v1603_v21 = vld [vmem:[#allocation2 + $0x4c] ss:$36 sps:$4 sm:$0xff]   ;;  %v442_v32 = vld [vmem:[%s2646_s1 + $0x378] sm:$0xff]  ;;  %v1483_v42 = vpack.c.bf16 %v566_v20, %v564_v19  ;;  %v439_v46 = vld [vmem:[%s2646_s1 + $0x360] sm:$0xff] }
  0x5a   : > { %1334 = vmatpush1.bf16.msra.mxu1 %v1333_v10  ;;  %v1240_v10 = vld [vmem:[%s1979_s30 + $0x30] sm:$0xf]  ;;  %745 = vmatprep.mubr.f32.mxu1 %v1603_v21  ;;  %v440_v31 = vld [vmem:[%s2646_s1 + $0x368] sm:$0xff]  ;;  %v254_v34 = vld [vmem:[%s1979_s30 + $0x19] sm:$0xf] }
  0x5b   : > { %1462 = vmatpush1.bf16.msra.mxu0 %v1461_v11  ;;  %1336 = vmatprep.subr.bf16.mxu1 %v1335_v12  ;;  %v1241_v11 = vld [vmem:[%s1979_s30 + $0x38] sm:$0xf]  ;;  %v1349_v12 = vpack.c.bf16 %v429_v55, %v427_v54  ;;  %299 = vst [vmem:[#allocation2 + $0x1c] sm:$0xf] %v1240_v10  ;;  %v437_v26 = vld [vmem:[%s2646_s1 + $0x350] sm:$0xff]  ;;  %v568_v38 = vld [vmem:[%s2646_s1 + $0x768] sm:$0xff]  ;;  %v1359_v50 = vpack.c.bf16 %v442_v32, %v440_v31 }
  0x5c   : > { %1464 = vmatprep.subr.bf16.mxu0 %v1463_v16  ;;  %v438_v16 = vld [vmem:[%s2646_s1 + $0x358] sm:$0xff]  ;;  %300 = vst [vmem:[#allocation2 + $0x40] sm:$0xf] %v1241_v11  ;;  %v565_v30 = vld [vmem:[%s2646_s1 + $0x750] sm:$0xff]  ;;  %v1226_v35 = vld [vmem:[%s1979_s30 + $0x60] sm:$0xf] }
  0x5d   : > { %v253_v33 = vld [vmem:[%s1979_s30 + $0x11] sm:$0xf]  ;;  %v1355_v37 = vpack.c.bf16 %v438_v16, %v436_v15  ;;  %258 = vst [vmem:[#allocation2 + $0x74] sm:$0xf] %v254_v34  ;;  %v1227_v39 = vld [vmem:[%s1979_s30 + $0x68] sm:$0xf] }
  0x5e   : > { %1338 = vmatpush1.bf16.msra.mxu1 %v1337_v22  ;;  %v1607_v22 = vld [vmem:[#allocation2 + $0x48] ss:$36 sps:$4 sm:$0xff]   ;;  %257 = vst [vmem:[#allocation2 + $0x50] sm:$0xf] %v253_v33  ;;  %266 = vst [vmem:[#allocation2 + $0x54] sm:$0xf] %v1226_v35 }
  0x5f   : > { %1466 = vmatpush1.bf16.msra.mxu0 %v1465_v24  ;;  %1340 = vmatprep.subr.bf16.mxu1 %v1339_v25  ;;  %v1605_v24 = vld [vmem:[#allocation2 + $0x5c] ss:$36 sps:$4 sm:$0xff]   ;;  %v1238_v40 = vld [vmem:[%s1979_s30 + $0x18] sm:$0xf]  ;;  %267 = vst [vmem:[#allocation2 + $0x78] sm:$0xf] %v1227_v39 }
  0x60   : > { %1468 = vmatprep.subr.bf16.mxu0 %v1467_v29  ;;  %v435_v25 = vld [vmem:[%s2646_s1 + $0x340] sm:$0xff]  ;;  %899 = vmatprep.mubr.f32.mxu0 %v1605_v24  ;;  %v570_v43 = vld [vmem:[%s2646_s1 + $0x778] sm:$0xff]  ;;  %292 = vst [vmem:[#allocation2 + $0x60] sm:$0xf] %v1238_v40  ;;  %v441_v51 = vld [vmem:[%s2646_s1 + $0x370] sm:$0xff] }
  0x61   : > { %v563_v29 = vld [vmem:[%s2646_s1 + $0x740] sm:$0xff]  ;;  %746 = vmatmul.mubr.f32.gmra.mrb[2].mxu1 %v1607_v22  ;;  %900 = vmatmul.mubr.f32.gmra.mrb[2].mxu0 %v1608_v27  ;;  %v1243_v53 = vld [vmem:[%s1979_s30 + $0x48] sm:$0xf]  ;;  %v1487_v54 = vpack.c.bf16 %v570_v43, %v568_v38  ;;  %v569_v55 = vld [vmem:[%s2646_s1 + $0x770] sm:$0xff]  ;;  %v1361_v60 = vpack.c.bf16 %v441_v51, %v439_v46 }
  0x62   : > { %1342 = vmatpush1.bf16.msra.mxu1 %v1341_v36  ;;  %v1481_v36 = vpack.c.bf16 %v561_v14, %v559_v13  ;;  %v1239_v41 = vld [vmem:[%s1979_s30 + $0x20] sm:$0xf]  ;;  %v446_v57 = vld [vmem:[%s2646_s1 + $0x398] sm:$0xff]  ;;  %302 = vst [vmem:[#allocation2 + $0x88] sm:$0xf] %v1243_v53  ;;  %v572_v58 = vld [vmem:[%s2646_s1 + $0x788] sm:$0xff] }
  0x63   : > { %1470 = vmatpush1.bf16.msra.mxu0 %v1469_v44  ;;  %1344 = vmatprep.subr.bf16.mxu1 %v1343_v45  ;;  %293 = vst [vmem:[#allocation2 + $0x84] sm:$0xf] %v1239_v41  ;;  %v1611_v44 = vld [vmem:[#allocation2 + $0xc] ss:$36 sps:$4 sm:$0xff]   ;;  %v1357_v45 = vpack.c.bf16 %v437_v26, %v435_v25  ;;  %v1614_v47 = vld [vmem:[#allocation2 + $0x1c] ss:$36 sps:$4 sm:$0xff]  }
  0x64   : > { %1472 = vmatprep.subr.bf16.mxu0 %v1471_v49  ;;  %v1242_v48 = vld [vmem:[%s1979_s30 + $0x40] sm:$0xf]  ;;  %v1485_v49 = vpack.c.bf16 %v565_v30, %v563_v29  ;;  %816 = vmatprep.mubr.f32.mxu1 %v1611_v44  ;;  %v574_v59 = vld [vmem:[%s2646_s1 + $0x798] sm:$0xff]  ;;  %v445_v0 = vld [vmem:[%s2646_s1 + $0x390] sm:$0xff] }
  0x65   : > { %v567_v52 = vld [vmem:[%s2646_s1 + $0x760] sm:$0xff]  ;;  %301 = vst [vmem:[#allocation2 + $0x64] sm:$0xf] %v1242_v48  ;;  %970 = vmatprep.mubr.f32.mxu0 %v1614_v47  ;;  %v1491_v2 = vpack.c.bf16 %v574_v59, %v572_v58  ;;  %v448_v4 = vld [vmem:[%s2646_s1 + $0x3a8] sm:$0xff]  ;;  %v450_v5 = vld [vmem:[%s2646_s1 + $0x3b8] sm:$0xff] }
  0x66   : > { %1346 = vmatpush1.bf16.msra.mxu1 %v1345_v56  ;;  %v444_v56 = vld [vmem:[%s2646_s1 + $0x388] sm:$0xff]  ;;  %v571_v1 = vld [vmem:[%s2646_s1 + $0x780] sm:$0xff]  ;;  %v578_v7 = vld [vmem:[%s2646_s1 + $0x7b8] sm:$0xff]  ;;  %v1367_v11 = vpack.c.bf16 %v450_v5, %v448_v4 }
  0x67   : > { %1474 = vmatpush1.bf16.msra.mxu0 %v1473_v61  ;;  %1348 = vmatprep.subr.bf16.mxu1 %v1347_v62  ;;  %v443_v61 = vld [vmem:[%s2646_s1 + $0x380] sm:$0xff]  ;;  %v1489_v62 = vpack.c.bf16 %v569_v55, %v567_v52  ;;  %v1363_v63 = vpack.c.bf16 %v446_v57, %v444_v56  ;;  %v576_v6 = vld [vmem:[%s2646_s1 + $0x7a8] sm:$0xff]  ;;  %v577_v15 = vld [vmem:[%s2646_s1 + $0x7b0] sm:$0xff] }
  0x68   : > { %1476 = vmatprep.subr.bf16.mxu0 %v1475_v3  ;;  %v573_v3 = vld [vmem:[%s2646_s1 + $0x790] sm:$0xff]  ;;  %v1365_v8 = vpack.c.bf16 %v445_v0, %v443_v61  ;;  %v447_v9 = vld [vmem:[%s2646_s1 + $0x3a0] sm:$0xff]  ;;  %v1495_v14 = vpack.c.bf16 %v578_v7, %v576_v6  ;;  %v452_v16 = vld [vmem:[%s2646_s1 + $0x3c8] sm:$0xff] }
  0x69   : > { %v1493_v10 = vpack.c.bf16 %v573_v3, %v571_v1  ;;  %v575_v13 = vld [vmem:[%s2646_s1 + $0x7a0] sm:$0xff]  ;;  %v582_v19 = vld [vmem:[%s2646_s1 + $0x7d8] sm:$0xff]  ;;  %v453_v22 = vld [vmem:[%s2646_s1 + $0x3d0] sm:$0xff] }
  0x6a   : > { %1350 = vmatpush1.bf16.msra.mxu1 %v1349_v12  ;;  %v449_v12 = vld [vmem:[%s2646_s1 + $0x3b0] sm:$0xff]  ;;  %v451_v20 = vld [vmem:[%s2646_s1 + $0x3c0] sm:$0xff]  ;;  %v1497_v25 = vpack.c.bf16 %v577_v15, %v575_v13  ;;  %v456_v27 = vld [vmem:[%s2646_s1 + $0x3e8] sm:$0xff]  ;;  %v1647_v13 = vmov 0.0  }
  0x6b   : > { %1478 = vmatpush1.bf16.msra.mxu0 %v1477_v17  ;;  %1352 = vmatprep.subr.bf16.mxu1 %v1351_v18  ;;  %v454_v17 = vld [vmem:[%s2646_s1 + $0x3d8] sm:$0xff]  ;;  %v580_v18 = vld [vmem:[%s2646_s1 + $0x7c8] sm:$0xff]  ;;  %v1369_v21 = vpack.c.bf16 %v449_v12, %v447_v9  ;;  %v581_v24 = vld [vmem:[%s2646_s1 + $0x7d0] sm:$0xff] }
  0x6c   : > { %1480 = vmatprep.subr.bf16.mxu0 %v1479_v23  ;;  %v579_v23 = vld [vmem:[%s2646_s1 + $0x7c0] sm:$0xff]  ;;  %v1371_v26 = vpack.c.bf16 %v454_v17, %v452_v16  ;;  %v1245_v29 = vld [vmem:[%s1979_s30 + $0x11] sm:$0xf]  ;;  %v1499_v30 = vpack.c.bf16 %v582_v19, %v580_v18  ;;  %v458_v31 = vld [vmem:[%s2646_s1 + $0x3f8] sm:$0xff] }
  0x6d   : > { %308 = vst [vmem:[#allocation2 + $0x44] sm:$0xf] %v1245_v29  ;;  %v1246_v32 = vld [vmem:[%s1979_s30 + $0x19] sm:$0xf]  ;;  %v1247_v33 = vld [vmem:[%s1979_s30 + $0x21] sm:$0xf]  ;;  %v1375_v38 = vpack.c.bf16 %v458_v31, %v456_v27 }
  0x6e   : > { %1354 = vmatpush1.bf16.msra.mxu1 %v1353_v28  ;;  %v1244_v28 = vld [vmem:[%s1979_s30 + $0x9] sm:$0xf]  ;;  %v586_v35 = vld [vmem:[%s2646_s1 + $0x7f8] sm:$0xff]  ;;  %309 = vst [vmem:[#allocation2 + $0x68] sm:$0xf] %v1246_v32  ;;  %v455_v39 = vld [vmem:[%s2646_s1 + $0x3e0] sm:$0xff] }
  0x6f   : > { %1482 = vmatpush1.bf16.msra.mxu0 %v1481_v36  ;;  %1356 = vmatprep.subr.bf16.mxu1 %v1355_v37  ;;  %307 = vst [vmem:[#allocation2 + $0x20] sm:$0xf] %v1244_v28  ;;  %v584_v34 = vld [vmem:[%s2646_s1 + $0x7e8] sm:$0xff]  ;;  %310 = vst [vmem:[#allocation2 + $0x8c] sm:$0xf] %v1247_v33  ;;  %v1373_v36 = vpack.c.bf16 %v453_v22, %v451_v20  ;;  %v1501_v37 = vpack.c.bf16 %v581_v24, %v579_v23  ;;  %v457_v40 = vld [vmem:[%s2646_s1 + $0x3f0] sm:$0xff] }
  0x70   : > { %1484 = vmatprep.subr.bf16.mxu0 %v1483_v42  ;;  %v583_v41 = vld [vmem:[%s2646_s1 + $0x7e0] sm:$0xff]  ;;  %v1503_v42 = vpack.c.bf16 %v586_v35, %v584_v34  ;;  %v585_v43 = vld [vmem:[%s2646_s1 + $0x7f0] sm:$0xff]  ;;  %v588_v44 = vld [vmem:[%s2646_s1 + $0x808] sm:$0xff]  ;;  %v1377_v46 = vpack.c.bf16 %v457_v40, %v455_v39 }
  0x71   : > { %v587_v47 = vld [vmem:[%s2646_s1 + $0x800] sm:$0xff]  ;;  %v1505_v48 = vpack.c.bf16 %v585_v43, %v583_v41  ;;  %v1609_v51 = vld [vmem:[#allocation2 + $0x8] ss:$36 sps:$4 sm:$0xff]   ;;  %v594_v53 = vld [vmem:[%s2646_s1 + $0x838] sm:$0xff] }
  0x72   : > { %1358 = vmatpush1.bf16.msra.mxu1 %v1357_v45  ;;  %v590_v45 = vld [vmem:[%s2646_s1 + $0x818] sm:$0xff]  ;;  %v592_v52 = vld [vmem:[%s2646_s1 + $0x828] sm:$0xff]  ;;  %v591_v57 = vld [vmem:[%s2646_s1 + $0x820] sm:$0xff] }
  0x73   : > { %1486 = vmatpush1.bf16.msra.mxu0 %v1485_v49  ;;  %1360 = vmatprep.subr.bf16.mxu1 %v1359_v50  ;;  %v1507_v49 = vpack.c.bf16 %v590_v45, %v588_v44  ;;  %v589_v50 = vld [vmem:[%s2646_s1 + $0x810] sm:$0xff]  ;;  %v1617_v59 = vld [vmem:[#allocation2 + $0x64] ss:$36 sps:$4 sm:$0xff]   ;;  %v602_v6 = vld [vmem:[%s2646_s1 + $0x878] sm:$0xff] }
  0x74   : > { %1488 = vmatprep.subr.bf16.mxu0 %v1487_v54  ;;  %v1612_v54 = vld [vmem:[#allocation2 + $0x18] ss:$36 sps:$4 sm:$0xff]   ;;  %v1509_v55 = vpack.c.bf16 %v589_v50, %v587_v47  ;;  %v593_v58 = vld [vmem:[%s2646_s1 + $0x830] sm:$0xff]  ;;  %v596_v61 = vld [vmem:[%s2646_s1 + $0x848] sm:$0xff]  ;;  %v1062_v47 = vlaneseq }
  0x75   : > { %v1615_v56 = vld [vmem:[#allocation2 + $0x54] ss:$36 sps:$4 sm:$0xff]   ;;  %v1620_v0 = vld [vmem:[#allocation2 + $0x60] ss:$36 sps:$4 sm:$0xff]   ;;  %v1513_v1 = vpack.c.bf16 %v593_v58, %v591_v57  ;;  %v600_v5 = vld [vmem:[%s2646_s1 + $0x868] sm:$0xff] }
  0x76   : > { %1362 = vmatpush1.bf16.msra.mxu1 %v1361_v60  ;;  %v1511_v60 = vpack.c.bf16 %v594_v53, %v592_v52  ;;  %v595_v3 = vld [vmem:[%s2646_s1 + $0x840] sm:$0xff]  ;;  %v597_v4 = vld [vmem:[%s2646_s1 + $0x850] sm:$0xff]  ;;  %v606_v12 = vld [vmem:[%s2646_s1 + $0x898] sm:$0xff] }
  0x77   : > { %1490 = vmatpush1.bf16.msra.mxu0 %v1489_v62  ;;  %1364 = vmatprep.subr.bf16.mxu1 %v1363_v63  ;;  %v598_v62 = vld [vmem:[%s2646_s1 + $0x858] sm:$0xff]  ;;  %v1619_v63 = vld [vmem:[#allocation2 + $0x50] ss:$36 sps:$4 sm:$0xff]   ;;  %v1517_v7 = vpack.c.bf16 %v597_v4, %v595_v3  ;;  %v599_v9 = vld [vmem:[%s2646_s1 + $0x860] sm:$0xff] }
  0x78   : > { %1492 = vmatprep.subr.bf16.mxu0 %v1491_v2  ;;  %v1515_v2 = vpack.c.bf16 %v598_v62, %v596_v61  ;;  %v603_v16 = vld [vmem:[%s2646_s1 + $0x880] sm:$0xff]  ;;  %v605_v17 = vld [vmem:[%s2646_s1 + $0x890] sm:$0xff]  ;;  %v608_v18 = vld [vmem:[%s2646_s1 + $0x8a8] sm:$0xff] }
  0x79   : > { %v610_v19 = vld [vmem:[%s2646_s1 + $0x8b8] sm:$0xff]  ;;  %v1525_v20 = vpack.c.bf16 %v605_v17, %v603_v16  ;;  %v607_v22 = vld [vmem:[%s2646_s1 + $0x8a0] sm:$0xff]  ;;  %v609_v23 = vld [vmem:[%s2646_s1 + $0x8b0] sm:$0xff] }
  0x7a   : > { %1366 = vmatpush1.bf16.msra.mxu1 %v1365_v8  ;;  %v1519_v8 = vpack.c.bf16 %v602_v6, %v600_v5  ;;  %v612_v24 = vld [vmem:[%s2646_s1 + $0x8c8] sm:$0xff]  ;;  %v611_v28 = vld [vmem:[%s2646_s1 + $0x8c0] sm:$0xff]  ;;  %v613_v29 = vld [vmem:[%s2646_s1 + $0x8d0] sm:$0xff] }
  0x7b   : > { %1494 = vmatpush1.bf16.msra.mxu0 %v1493_v10  ;;  %1368 = vmatprep.subr.bf16.mxu1 %v1367_v11  ;;  %v601_v10 = vld [vmem:[%s2646_s1 + $0x870] sm:$0xff]  ;;  %v604_v11 = vld [vmem:[%s2646_s1 + $0x888] sm:$0xff]  ;;  %v618_v31 = vld [vmem:[%s2646_s1 + $0x8f8] sm:$0xff]  ;;  %v1533_v32 = vpack.c.bf16 %v613_v29, %v611_v28 }
  0x7c   : > { %1496 = vmatprep.subr.bf16.mxu0 %v1495_v14  ;;  %v1521_v14 = vpack.c.bf16 %v601_v10, %v599_v9  ;;  %v1523_v15 = vpack.c.bf16 %v606_v12, %v604_v11  ;;  %v615_v34 = vld [vmem:[%s2646_s1 + $0x8e0] sm:$0xff]  ;;  %v617_v35 = vld [vmem:[%s2646_s1 + $0x8f0] sm:$0xff] }
  0x7d   : > { %v1060_v50 = vld [vmem:[%s2647_s2] sm:$0x3] }
  0x7e   : > { %1370 = vmatpush1.bf16.msra.mxu1 %v1369_v21  ;;  %v1527_v21 = vpack.c.bf16 %v610_v19, %v608_v18  ;;  %v1076_v52 = vld [vmem:[%s2648_s3] sm:$0x3] }
  0x7f   : > { %1498 = vmatpush1.bf16.msra.mxu0 %v1497_v25  ;;  %1372 = vmatprep.subr.bf16.mxu1 %v1371_v26  ;;  %v614_v25 = vld [vmem:[%s2646_s1 + $0x8d8] sm:$0xff]  ;;  %v1529_v26 = vpack.c.bf16 %v609_v23, %v607_v22 }
  0x80   : > { %1500 = vmatprep.subr.bf16.mxu0 %v1499_v30  ;;  %v1531_v27 = vpack.c.bf16 %v614_v25, %v612_v24  ;;  %v616_v30 = vld [vmem:[%s2646_s1 + $0x8e8] sm:$0xff] }
  0x81   : > { %v1535_v33 = vpack.c.bf16 %v618_v31, %v616_v30 }
  0x82   : > { %1374 = vmatpush1.bf16.msra.mxu1 %v1373_v36  ;;  %v1537_v36 = vpack.c.bf16 %v617_v35, %v615_v34 }
  0x83   : > { %1502 = vmatpush1.bf16.msra.mxu0 %v1501_v37  ;;  %1376 = vmatprep.subr.bf16.mxu1 %v1375_v38  ;;  %v1622_v37 = vld [vmem:[#allocation2 + $0x68] ss:$36 sps:$4 sm:$0xff]   ;;  %v1621_v38 = vld [vmem:[#allocation2 + $0x20] ss:$36 sps:$4 sm:$0xff]  }
  0x84   : > { %1504 = vmatprep.subr.bf16.mxu0 %v1503_v42 }
  0x86   : > { %1378 = vmatpush1.bf16.msra.mxu1 %v1377_v46 }
  0x87   : > { %1506 = vmatpush1.bf16.msra.mxu0 %v1505_v48  ;;  %1539 = vmatprep.subr.bf16.mxu1 %v1507_v49  ;;  %v1063_v48 = vshrl.u32 %v1062_v47, 7 }
  0x88   : > { %1508 = vmatprep.subr.bf16.mxu0 %v1507_v49 }
  0x89   : > { %817 = vmatmul.mubr.f32.vlgmr.msra.gmra.mrb[0].mxu1 %v1609_v51  ;;  %v1064_v49 = vsub.s32 0, %v1063_v48  ;;  %v1068_v51 = vsub.s32 1, %v1063_v48 }
  0x8a   : > { %971 = vmatmul.mubr.f32.vlgmr.msra.gmra.mrb[0].mxu0 %v1612_v54  ;;  %1547 = vmatpush1.bf16.msra.mxu1 %v1509_v55 }
  0x8b   : > { %1510 = vmatpush1.bf16.msra.mxu0 %v1509_v55  ;;  %822 = vmatprep.mubr.f32.mxu1 %v1615_v56  ;;  %v1065_v53 = vrot.slane %v1060_v50, %v1064_v49  ;;  %v1069_v55 = vrot.slane %v1060_v50, %v1068_v51  ;;  %v1081_v57 = vrot.slane %v1076_v52, %v1064_v49 }
  0x8c   : > { %976 = vmatprep.mubr.f32.mxu0 %v1617_v59  ;;  %1512 = vmatprep.subr.bf16.mxu0 %v1511_v60  ;;  %v1085_v62 = vrot.slane %v1076_v52, %v1068_v51 }
  0x8d   : > { %823 = vmatmul.mubr.f32.gmra.mrb[2].mxu1 %v1619_v63  ;;  %1540 = vmatprep.subr.bf16.mxu1 %v1511_v60 }
  0x8e   : > { %977 = vmatmul.mubr.f32.gmra.mrb[2].mxu0 %v1620_v0  ;;  %1548 = vmatpush1.bf16.msra.mxu1 %v1513_v1 }
  0x8f   : > { %1514 = vmatpush1.bf16.msra.mxu0 %v1513_v1  ;;  %1541 = vmatprep.subr.bf16.mxu1 %v1515_v2 }
  0x90   : > { %1516 = vmatprep.subr.bf16.mxu0 %v1515_v2  ;;  %1047 = vmatprep.mubr.f32.mxu0 %v1647_v13 }
  0x91   : > { %1053 = vmatprep.mubr.f32.mxu1 %v1647_v13 }
  0x92   : > { %1549 = vmatpush1.bf16.msra.mxu1 %v1517_v7 }
  0x93   : > { %1518 = vmatpush1.bf16.msra.mxu0 %v1517_v7  ;;  %1542 = vmatprep.subr.bf16.mxu1 %v1519_v8 }
  0x94   : > { %1520 = vmatprep.subr.bf16.mxu0 %v1519_v8 }
  0x96   : > { %1550 = vmatpush1.bf16.msra.mxu1 %v1521_v14 }
  0x97   : > { %1522 = vmatpush1.bf16.msra.mxu0 %v1521_v14  ;;  %1543 = vmatprep.subr.bf16.mxu1 %v1523_v15 }
  0x98   : > { %1524 = vmatprep.subr.bf16.mxu0 %v1523_v15 }
  0x9a   : > { %1551 = vmatpush1.bf16.msra.mxu1 %v1525_v20 }
  0x9b   : > { %1526 = vmatpush1.bf16.msra.mxu0 %v1525_v20  ;;  %1544 = vmatprep.subr.bf16.mxu1 %v1527_v21 }
  0x9c   : > { %1528 = vmatprep.subr.bf16.mxu0 %v1527_v21 }
  0x9e   : > { %1552 = vmatpush1.bf16.msra.mxu1 %v1529_v26 }
  0x9f   : > { %1530 = vmatpush1.bf16.msra.mxu0 %v1529_v26  ;;  %1545 = vmatprep.subr.bf16.mxu1 %v1531_v27 }
  0xa0   : > { %1532 = vmatprep.subr.bf16.mxu0 %v1531_v27 }
  0xa2   : > { %1553 = vmatpush1.bf16.msra.mxu1 %v1533_v32 }
  0xa3   : > { %1534 = vmatpush1.bf16.msra.mxu0 %v1533_v32  ;;  %1546 = vmatprep.subr.bf16.mxu1 %v1535_v33 }
  0xa4   : > { %1536 = vmatprep.subr.bf16.mxu0 %v1535_v33 }
  0xa6   : > { %1554 = vmatpush1.bf16.msra.mxu1 %v1537_v36 }
  0xa7   : > { %1538 = vmatpush1.bf16.msra.mxu0 %v1537_v36 }
  0xa9   : > { %1054 = vmatmul.mubr.f32.vlgmr.msra.gmra.mrb[4].mxu1 %v1622_v37 }
  0xaa   : > { %1048 = vmatmul.mubr.f32.vlgmr.msra.gmra.mrb[0].mxu0 %v1621_v38 }
 0x15c   : > { %v818_v39 = vpop.f32.mrb[0].mxu1 }
 0x15d   : > { %v820_v40 = vpop.f32.mrb[1].mxu1 }
 0x160   : > { %v824_v41 = vpop.f32.mrb[2].mxu1 }
 0x161   : > { %v978_v42 = vpop.f32.mrb[2].mxu0  ;;  %v826_v43 = vpop.f32.mrb[3].mxu1 }
 0x162   : > { %v1557_v44 = vadd.f32 %v978_v42, %v824_v41  ;;  %v980_v45 = vpop.f32.mrb[3].mxu0 }
 0x163   : > { %v1559_v46 = vadd.f32 %v980_v45, %v826_v43 }
 0x17c   : > { %v1055_v54 = vpop.f32.mrb[4].mxu1 }
 0x17d   : > { %v1049_v56 = vpop.f32.mrb[0].mxu0  ;;  %v1558_v58 = vadd.f32 %v1557_v44, %v1055_v54  ;;  %v1057_v59 = vpop.f32.mrb[5].mxu1 }
 0x17e   : > { %v1555_v60 = vadd.f32 %v1049_v56, %v818_v39  ;;  %v1051_v61 = vpop.f32.mrb[1].mxu0  ;;  %v1560_v63 = vadd.f32 %v1559_v46, %v1057_v59 }
 0x17f   : > { %v1074_v0 = vmul.f32 %v1558_v58, %v1065_v53  ;;  %v1556_v1 = vadd.f32 %v1051_v61, %v820_v40 }
 0x180   : > { %v1072_v2 = vmul.f32 %v1555_v60, %v1065_v53  ;;  %v1075_v3 = vmul.f32 %v1560_v63, %v1069_v55 }
 0x181   : > { %v1090_v4 = vadd.f32 %v1081_v57, %v1074_v0  ;;  %v1073_v5 = vmul.f32 %v1556_v1, %v1069_v55 }
 0x182   : > { %v1088_v6 = vadd.f32 %v1081_v57, %v1072_v2  ;;  %v1091_v7 = vadd.f32 %v1085_v62, %v1075_v3 }
 0x183   : > { %vm1094_vm0 = vcmp.ge.f32.partialorder %v1090_v4, 0.0  ;;  %v1098_v8 = vmul.f32 0.1, %v1090_v4  ;;  %v1089_v9 = vadd.f32 %v1085_v62, %v1073_v5 }
 0x184   : > { %vm1092_vm1 = vcmp.ge.f32.partialorder %v1088_v6, 0.0  ;;  %v1096_v10 = vmul.f32 0.1, %v1088_v6  ;;  %vm1095_vm2 = vcmp.ge.f32.partialorder %v1091_v7, 0.0  ;;  %v1099_v11 = vmul.f32 0.1, %v1091_v7 }
 0x185   : > { %v1102_v12 = vsel %vm1094_vm0, %v1090_v4, %v1098_v8  ;;  %vm1093_vm3 = vcmp.ge.f32.partialorder %v1089_v9, 0.0  ;;  %v1097_v13 = vmul.f32 0.1, %v1089_v9 }
 0x186   : > { %v1100_v14 = vsel %vm1092_vm1, %v1088_v6, %v1096_v10  ;;  %v1103_v15 = vsel %vm1095_vm2, %v1091_v7, %v1099_v11 }
 0x187   : > { %v1101_v16 = vsel %vm1093_vm3, %v1089_v9, %v1097_v13  ;;  %v1110_v17 = vcombine.low %v1102_v12, %v1103_v15  ;;  %v1111_v18 = vcombine.high %v1102_v12, %v1103_v15 }
 0x188   : > { %v1108_v19 = vcombine.low %v1100_v14, %v1101_v16  ;;  %v1109_v20 = vcombine.high %v1100_v14, %v1101_v16 }
 0x189   : > { %1118 = vst [vmem:[%s233_s26 + $0x10] sm:$0xff] %v1110_v17  ;;  %1119 = vst [vmem:[%s233_s26 + $0x18] sm:$0xff] %v1111_v18 }
 0x18a   : > { %1116 = vst [vmem:[%s233_s26] sm:$0xff] %v1108_v19  ;;  %1117 = vst [vmem:[%s233_s26 + $0x8] sm:$0xff] %v1109_v20 }
 0x18b PF: > { %s14_s17 = sadd.s32 1, %s1645_s17   ;;  %s2650_s15 = smov %s1641_s16 }
 0x18c   : > { %p11_p5 = scmp.ge.s32.totalorder %s14_s17, 4   ;;  %s2651_s16 = smov %s2653_s18 }
 0x18e   :  { %13 = sbr.rel (!%p11_p5) target bundleno = 2 (0x2), region = 71 }

// kernel: decoder_forward.11
= control target key start
LH: loop header
LB: loop body
LE: loop exit
PB: predicated region body
PF: predicated region fallthrough
CT: control target
= control target key end

     0   :  { %9 = vsyncpa [#allocation4], 0  ;;  %s2227_s0 = inlined_call_operand.vmem [shape: f32[2,1,1,6,6,128], index: 0, kind: input, shape index: {}]   ;;  %s2228_s1 = inlined_call_operand.vmem [shape: f32[1152,64], index: 1, kind: input, shape index: {}]   ;;  %s2229_s2 = inlined_call_operand.vmem [shape: f32[1,64], index: 2, kind: input, shape index: {}]   ;;  %s2230_s3 = inlined_call_operand.vmem [shape: f32[1,64], index: 3, kind: input, shape index: {}]   ;;  %s2231_s4 = inlined_call_operand.hbm [shape: f32[2,1,4,4,64], index: 4, kind: output, shape index: {}]  }
   0x1   :  { %11 = vsyncpa [#allocation4 + $0x1], 0  ;;  %s1621_s15 = smov 0   ;;  %s1623_s16 = smov 0  }
   0x2   :  { %s1625_s17 = smov 0   ;;  %s1627_s18 = smov 0  }
   0x3   :  { %s1629_s19 = smov 0   ;;  %s1631_s20 = smov 0  }
   0x4 LB: > { %s1026_s21 = sadd.s32 4294967295, %s1591_s20   ;;  %s1027_s22 = sadd.s32 4294967294, %s1591_s20   ;;  %s1591_s20 = sphi %s1631_s20, %s17_s20   ;;  %s1587_s19 = sphi %s1629_s19, %s2238_s19   ;;  %s1583_s18 = sphi %s1627_s18, %s2237_s18   ;;  %s1579_s17 = sphi %s1625_s17, %s2236_s17   ;;  %s1575_s16 = sphi %s1623_s16, %s2235_s16   ;;  %s1571_s15 = sphi %s1621_s15, %s2234_s15  }
   0x5   : > { %s29_s23 = sadd.s32 1, %s1587_s19  ;;  %s129_s24 = sadd.s32 1, %s1579_s17 }
   0x6   : > { %p31_p0 = scmp.ge.s32.totalorder %s29_s23, 2  ;;  %p139_p1 = scmp.ne.s32.totalorder %s1579_s17, %s1575_s16 }
   0x7   : > { %p140_p2 = scmp.eq.s32.totalorder %s1026_s21, 1  ;;  %p145_p3 = scmp.ne.s32.totalorder %s1575_s16, %s1571_s15 }
   0x8   : > { %s2240_s23 = smov (%p31_p0, %s29_s23), 0  ;;  %p146_p5 = scmp.eq.s32.totalorder %s1027_s22, 1 }
   0x9   : > { %p1661_p4 = por %p140_p2, %p139_p1  ;;  %s124_s26 = ssub.s32 %s1587_s19, %s2240_s23 }
   0xa   : > { %p1030_p6 = scmp.ge.s32.totalorder %s1591_s20, 1  ;;  %p127_p7 = scmp.eq.s32.totalorder %s124_s26, 0 }
   0xb   : > { %p1668_p8 = por %p146_p5, %p145_p3  ;;  %p185_p9 = scmp.lt.s32.totalorder %s1591_s20, 3 }
   0xc   : > { %s1674_s28 = scalar_select %p127_p7, %s1579_s17, %s129_s24  }
   0xd   : > { %p186_p10 = pnand %p1030_p6, %p185_p9 }
   0xe   : > { %v334_v0 = vld [vmem:[%s2228_s1 + $0x80] sm:$0xff] (!%p186_p10)  ;;  %v335_v1 = vld [vmem:[%s2228_s1 + $0x88] sm:$0xff] (!%p186_p10)  ;;  %v336_v11 = vld [vmem:[%s2228_s1 + $0x90] sm:$0xff] (!%p186_p10)  ;;  %p215_p11 = scmp.lt.s32.totalorder (!%p186_p10), %s1583_s18, 1  ;;  %s212_s30 = sand.u32 (!%p186_p10), 1, %s1575_s16   ;;  %vm923_vm1 = vcmask (!%p186_p10), 519168  }
   0xf   : > { %189 = sbr.rel (%p186_p10) target bundleno = 353 (0x161), region = 36  ;;  %v366_v2 = vld [vmem:[%s2228_s1 + $0x180] sm:$0xff] (!%p186_p10)  ;;  %v1270_v3 = vpack.c.bf16 (!%p186_p10), %v335_v1, %v334_v0  ;;  %v367_v4 = vld [vmem:[%s2228_s1 + $0x188] sm:$0xff] (!%p186_p10)  ;;  %v337_v13 = vld [vmem:[%s2228_s1 + $0x98] sm:$0xff] (!%p186_p10)  ;;  %s1031_s8 = sshll.u32 (!%p186_p10), %s212_s30, 4 }
  0x10   : > { %v318_v5 = vld [vmem:[%s2228_s1] sm:$0xff] (!%p186_p10)  ;;  %v319_v6 = vld [vmem:[%s2228_s1 + $0x8] sm:$0xff] (!%p186_p10)  ;;  %v1302_v7 = vpack.c.bf16 (!%p186_p10), %v367_v4, %v366_v2  ;;  %v368_v14 = vld [vmem:[%s2228_s1 + $0x190] sm:$0xff] (!%p186_p10)  ;;  %v1274_v16 = vpack.c.bf16 (!%p186_p10), %v337_v13, %v336_v11  ;;  %s1064_s10 = sshll.u32 (!%p186_p10), %s1583_s18, 8  ;;  %s214_s11 = scalar_lea.vmem (!%p186_p10), [#allocation3], %s1031_s8 }
  0x11   : > { %v1272_v8 = vpack.c.bf16 (!%p186_p10), %v319_v6, %v318_v5  ;;  %v350_v9 = vld [vmem:[%s2228_s1 + $0x100] sm:$0xff] (!%p186_p10)  ;;  %v351_v10 = vld [vmem:[%s2228_s1 + $0x108] sm:$0xff] (!%p186_p10)  ;;  %1271 = vmatprep.subr.bf16.mxu0 (!%p186_p10), %v1270_v3  ;;  %v369_v15 = vld [vmem:[%s2228_s1 + $0x198] sm:$0xff] (!%p186_p10)  ;;  %s944_s12 = sshll.u32 (!%p186_p10), %s214_s11, 4  ;;  %s2175_s22 = scalar_lea.hbm (!%p186_p10), %s2231_s4, %s1064_s10  ;;  %s2177_s12 = int_to_ptr.vmem [resolvable:$true] %s944_s12 }
  0x12   : > { %v1304_v12 = vpack.c.bf16 (!%p186_p10), %v351_v10, %v350_v9  ;;  %1303 = vmatprep.subr.bf16.mxu1 (!%p186_p10), %v1302_v7  ;;  %v1306_v17 = vpack.c.bf16 (!%p186_p10), %v369_v15, %v368_v14  ;;  %v320_v18 = vld [vmem:[%s2228_s1 + $0x10] sm:$0xff] (!%p186_p10)  ;;  %v321_v19 = vld [vmem:[%s2228_s1 + $0x18] sm:$0xff] (!%p186_p10)  ;;  %v338_v23 = vld [vmem:[%s2228_s1 + $0xa0] sm:$0xff] (!%p186_p10)  ;;  %s1593_s24 = smov (!%p186_p10), [#allocation3]  }
  0x13   : > { %1273 = vmatpush3.bf16.msra.mxu0 (!%p186_p10), %v1272_v8  ;;  %v352_v20 = vld [vmem:[%s2228_s1 + $0x110] sm:$0xff] (!%p186_p10)  ;;  %v1276_v21 = vpack.c.bf16 (!%p186_p10), %v321_v19, %v320_v18  ;;  %v353_v22 = vld [vmem:[%s2228_s1 + $0x118] sm:$0xff] (!%p186_p10)  ;;  %v339_v24 = vld [vmem:[%s2228_s1 + $0xa8] sm:$0xff] (!%p186_p10)  ;;  %s1517_s26 = sshll.u32 (!%p186_p10), %s1593_s24, 4  ;;  %s1518_s26 = int_to_ptr.vmem [resolvable:$false] %s1517_s26 }
  0x14   : > { %1305 = vmatpush3.bf16.msra.mxu1 (!%p186_p10), %v1304_v12  ;;  %1275 = vmatprep.subr.bf16.mxu0 (!%p186_p10), %v1274_v16  ;;  %v1308_v25 = vpack.c.bf16 (!%p186_p10), %v353_v22, %v352_v20  ;;  %v1278_v26 = vpack.c.bf16 (!%p186_p10), %v339_v24, %v338_v23  ;;  %v370_v27 = vld [vmem:[%s2228_s1 + $0x1a0] sm:$0xff] (!%p186_p10)  ;;  %v371_v28 = vld [vmem:[%s2228_s1 + $0x1a8] sm:$0xff] (!%p186_p10)  ;;  %v340_v35 = vld [vmem:[%s2228_s1 + $0xb0] sm:$0xff] (!%p186_p10)  ;;  %s1519_s29 = scalar_lea.vmem (!%p186_p10), %s1518_s26, 512  ;;  %p1520_p1 = scmp.lt.s32.totalorder (!%p186_p10), %s2177_s12, %s1518_s26 }
  0x15   : > { %1307 = vmatprep.subr.bf16.mxu1 (!%p186_p10), %v1306_v17  ;;  %v322_v29 = vld [vmem:[%s2228_s1 + $0x20] sm:$0xff] (!%p186_p10)  ;;  %v1310_v30 = vpack.c.bf16 (!%p186_p10), %v371_v28, %v370_v27  ;;  %v323_v31 = vld [vmem:[%s2228_s1 + $0x28] sm:$0xff] (!%p186_p10)  ;;  %v341_v36 = vld [vmem:[%s2228_s1 + $0xb8] sm:$0xff] (!%p186_p10) }
  0x16   : > { %v354_v32 = vld [vmem:[%s2228_s1 + $0x120] sm:$0xff]  ;;  %v355_v33 = vld [vmem:[%s2228_s1 + $0x128] sm:$0xff]  ;;  %v1280_v34 = vpack.c.bf16 %v323_v31, %v322_v29  ;;  %v372_v37 = vld [vmem:[%s2228_s1 + $0x1b0] sm:$0xff]  ;;  %v1282_v39 = vpack.c.bf16 %v341_v36, %v340_v35  ;;  %s1779_s5 = scalar_select %p215_p11, %s1583_s18, 1 }
  0x17   : > { %1277 = vmatpush3.bf16.msra.mxu0 %v1276_v21  ;;  %v1312_v38 = vpack.c.bf16 %v355_v33, %v354_v32  ;;  %v373_v40 = vld [vmem:[%s2228_s1 + $0x1b8] sm:$0xff]  ;;  %v324_v41 = vld [vmem:[%s2228_s1 + $0x30] sm:$0xff]  ;;  %v342_v46 = vld [vmem:[%s2228_s1 + $0xc0] sm:$0xff]  ;;  %s2181_s18 = scalar_lea.sflag [#allocation4], %s212_s30 }
  0x18   : > { %1309 = vmatpush3.bf16.msra.mxu1 %v1308_v25  ;;  %1279 = vmatprep.subr.bf16.mxu0 %v1278_v26  ;;  %v325_v42 = vld [vmem:[%s2228_s1 + $0x38] sm:$0xff]  ;;  %v1314_v43 = vpack.c.bf16 %v373_v40, %v372_v37  ;;  %v356_v44 = vld [vmem:[%s2228_s1 + $0x130] sm:$0xff]  ;;  %v343_v47 = vld [vmem:[%s2228_s1 + $0xc8] sm:$0xff]  ;;  %s1430_s9 = smul.u32 48, %s1779_s5  ;;  %s1513_s5 = scalar_lea.vmem %s2177_s12, 256 }
  0x19   : > { %1311 = vmatprep.subr.bf16.mxu1 %v1310_v30  ;;  %v357_v45 = vld [vmem:[%s2228_s1 + $0x138] sm:$0xff]  ;;  %v374_v48 = vld [vmem:[%s2228_s1 + $0x1c0] sm:$0xff]  ;;  %v375_v49 = vld [vmem:[%s2228_s1 + $0x1c8] sm:$0xff]  ;;  %v1284_v50 = vpack.c.bf16 %v325_v42, %v324_v41  ;;  %v1286_v52 = vpack.c.bf16 %v343_v47, %v342_v46  ;;  %p1514_p12 = scmp.ne.s32.totalorder %s2177_s12, %s1513_s5  ;;  %p1521_p2 = scmp.lt.s32.totalorder %s1519_s29, %s1513_s5 }
  0x1a   : > { %v1316_v51 = vpack.c.bf16 %v357_v45, %v356_v44  ;;  %v326_v53 = vld [vmem:[%s2228_s1 + $0x40] sm:$0xff]  ;;  %v327_v54 = vld [vmem:[%s2228_s1 + $0x48] sm:$0xff]  ;;  %v1318_v56 = vpack.c.bf16 %v375_v49, %v374_v48  ;;  %v344_v58 = vld [vmem:[%s2228_s1 + $0xd0] sm:$0xff]  ;;  %s1839_s21 = scalar_lea.vmem %s2227_s0, %s1430_s9 }
  0x1b   : > { %1281 = vmatpush3.bf16.msra.mxu0 %v1280_v34  ;;  %v358_v55 = vld [vmem:[%s2228_s1 + $0x140] sm:$0xff]  ;;  %v359_v57 = vld [vmem:[%s2228_s1 + $0x148] sm:$0xff]  ;;  %v345_v59 = vld [vmem:[%s2228_s1 + $0xd8] sm:$0xff]  ;;  %v1288_v62 = vpack.c.bf16 %v327_v54, %v326_v53  ;;  %p1515_p13 = pnand %p1514_p12, %p1661_p4  ;;  %p1522_p3 = por %p1521_p2, %p1520_p1 }
  0x1c   : > { %1313 = vmatpush3.bf16.msra.mxu1 %v1312_v38  ;;  %1283 = vmatprep.subr.bf16.mxu0 %v1282_v39  ;;  %v376_v60 = vld [vmem:[%s2228_s1 + $0x1d0] sm:$0xff]  ;;  %v377_v61 = vld [vmem:[%s2228_s1 + $0x1d8] sm:$0xff]  ;;  %v1320_v0 = vpack.c.bf16 %v359_v57, %v358_v55  ;;  %v1290_v1 = vpack.c.bf16 %v345_v59, %v344_v58  ;;  %v346_v6 = vld [vmem:[%s2228_s1 + $0xe0] sm:$0xff] }
  0x1d   : > { %1315 = vmatprep.subr.bf16.mxu1 %v1314_v43  ;;  %v328_v63 = vld [vmem:[%s2228_s1 + $0x50] sm:$0xff]  ;;  %v329_v2 = vld [vmem:[%s2228_s1 + $0x58] sm:$0xff]  ;;  %v1322_v5 = vpack.c.bf16 %v377_v61, %v376_v60  ;;  %v347_v7 = vld [vmem:[%s2228_s1 + $0xe8] sm:$0xff]  ;;  %p1516_p0 = pneg %p1515_p13 }
  0x1e   : > { %v360_v3 = vld [vmem:[%s2228_s1 + $0x150] sm:$0xff]  ;;  %v361_v4 = vld [vmem:[%s2228_s1 + $0x158] sm:$0xff]  ;;  %v378_v8 = vld [vmem:[%s2228_s1 + $0x1e0] sm:$0xff]  ;;  %v1292_v12 = vpack.c.bf16 %v329_v2, %v328_v63  ;;  %v1294_v18 = vpack.c.bf16 %v347_v7, %v346_v6 }
  0x1f   : > { %1285 = vmatpush3.bf16.msra.mxu0 %v1284_v50  ;;  %v379_v9 = vld [vmem:[%s2228_s1 + $0x1e8] sm:$0xff]  ;;  %v330_v10 = vld [vmem:[%s2228_s1 + $0x60] sm:$0xff]  ;;  %v348_v15 = vld [vmem:[%s2228_s1 + $0xf0] sm:$0xff]  ;;  %v1324_v17 = vpack.c.bf16 %v361_v4, %v360_v3  ;;  %p1523_p5 = pnand %p1522_p3, %p1516_p0 }
  0x20   : > { %1317 = vmatpush3.bf16.msra.mxu1 %v1316_v51  ;;  %1287 = vmatprep.subr.bf16.mxu0 %v1286_v52  ;;  %v331_v11 = vld [vmem:[%s2228_s1 + $0x68] sm:$0xff]  ;;  %v362_v13 = vld [vmem:[%s2228_s1 + $0x160] sm:$0xff]  ;;  %v349_v16 = vld [vmem:[%s2228_s1 + $0xf8] sm:$0xff]  ;;  %v1326_v23 = vpack.c.bf16 %v379_v9, %v378_v8 }
  0x21   : > { %1319 = vmatprep.subr.bf16.mxu1 %v1318_v56  ;;  %v363_v14 = vld [vmem:[%s2228_s1 + $0x168] sm:$0xff]  ;;  %v380_v19 = vld [vmem:[%s2228_s1 + $0x1f0] sm:$0xff]  ;;  %v381_v20 = vld [vmem:[%s2228_s1 + $0x1f8] sm:$0xff]  ;;  %v1296_v30 = vpack.c.bf16 %v331_v11, %v330_v10  ;;  %v1298_v32 = vpack.c.bf16 %v349_v16, %v348_v15 }
  0x22   : > { %v224_v21 = vld [vmem:[%s1839_s21] sm:$0xf]  ;;  %v225_v22 = vld [vmem:[%s1839_s21 + $0x8] sm:$0xf]  ;;  %v1034_v29 = vld [vmem:[%s1839_s21 + $0x10] sm:$0xf]  ;;  %v1328_v31 = vpack.c.bf16 %v363_v14, %v362_v13  ;;  %v1330_v36 = vpack.c.bf16 %v381_v20, %v380_v19 }
  0x23   : > { %1289 = vmatpush3.bf16.msra.mxu0 %v1288_v62  ;;  %228 = vst [vmem:[#allocation2] sm:$0xf] %v224_v21  ;;  %229 = vst [vmem:[#allocation2 + $0x24] sm:$0xf] %v225_v22  ;;  %v232_v24 = vld [vmem:[%s1839_s21 + $0x1] sm:$0xf] }
  0x24   : > { %1321 = vmatpush3.bf16.msra.mxu1 %v1320_v0  ;;  %1291 = vmatprep.subr.bf16.mxu0 %v1290_v1  ;;  %v233_v25 = vld [vmem:[%s1839_s21 + $0x9] sm:$0xf]  ;;  %v240_v26 = vld [vmem:[%s1839_s21 + $0x2] sm:$0xf]  ;;  %236 = vst [vmem:[#allocation2 + $0x4] sm:$0xf] %v232_v24 }
  0x25   : > { %1323 = vmatprep.subr.bf16.mxu1 %v1322_v5  ;;  %237 = vst [vmem:[#allocation2 + $0x28] sm:$0xf] %v233_v25  ;;  %v241_v27 = vld [vmem:[%s1839_s21 + $0xa] sm:$0xf]  ;;  %244 = vst [vmem:[#allocation2 + $0x8] sm:$0xf] %v240_v26 }
  0x26   : > { %v1033_v28 = vld [vmem:[%s1839_s21 + $0x8] sm:$0xf]  ;;  %245 = vst [vmem:[#allocation2 + $0x2c] sm:$0xf] %v241_v27  ;;  %254 = vst [vmem:[#allocation2 + $0x30] sm:$0xf] %v1034_v29 }
  0x27   : > { %1293 = vmatpush3.bf16.msra.mxu0 %v1292_v12  ;;  %253 = vst [vmem:[#allocation2 + $0xc] sm:$0xf] %v1033_v28  ;;  %v332_v33 = vld [vmem:[%s2228_s1 + $0x70] sm:$0xff]  ;;  %v333_v34 = vld [vmem:[%s2228_s1 + $0x78] sm:$0xff]  ;;  %v398_v38 = vld [vmem:[%s2228_s1 + $0x280] sm:$0xff] }
  0x28   : > { %1325 = vmatpush3.bf16.msra.mxu1 %v1324_v17  ;;  %1295 = vmatprep.subr.bf16.mxu0 %v1294_v18  ;;  %v364_v35 = vld [vmem:[%s2228_s1 + $0x170] sm:$0xff]  ;;  %v365_v37 = vld [vmem:[%s2228_s1 + $0x178] sm:$0xff]  ;;  %v399_v39 = vld [vmem:[%s2228_s1 + $0x288] sm:$0xff]  ;;  %v1300_v44 = vpack.c.bf16 %v333_v34, %v332_v33 }
  0x29   : > { %1327 = vmatprep.subr.bf16.mxu1 %v1326_v23  ;;  %v382_v40 = vld [vmem:[%s2228_s1 + $0x200] sm:$0xff]  ;;  %v383_v41 = vld [vmem:[%s2228_s1 + $0x208] sm:$0xff]  ;;  %v400_v47 = vld [vmem:[%s2228_s1 + $0x290] sm:$0xff]  ;;  %v1332_v48 = vpack.c.bf16 %v365_v37, %v364_v35  ;;  %v1334_v53 = vpack.c.bf16 %v399_v39, %v398_v38 }
  0x2a   : > { %v430_v42 = vld [vmem:[%s2228_s1 + $0x380] sm:$0xff]  ;;  %v431_v43 = vld [vmem:[%s2228_s1 + $0x388] sm:$0xff]  ;;  %v401_v49 = vld [vmem:[%s2228_s1 + $0x298] sm:$0xff]  ;;  %v1336_v58 = vpack.c.bf16 %v383_v41, %v382_v40 }
  0x2b   : > { %1297 = vmatpush3.bf16.msra.mxu0 %v1296_v30  ;;  %v414_v45 = vld [vmem:[%s2228_s1 + $0x300] sm:$0xff]  ;;  %v415_v46 = vld [vmem:[%s2228_s1 + $0x308] sm:$0xff]  ;;  %v432_v50 = vld [vmem:[%s2228_s1 + $0x390] sm:$0xff]  ;;  %v1366_v55 = vpack.c.bf16 %v431_v43, %v430_v42  ;;  %v1338_v60 = vpack.c.bf16 %v401_v49, %v400_v47 }
  0x2c   : > { %1329 = vmatpush3.bf16.msra.mxu1 %v1328_v31  ;;  %1299 = vmatprep.subr.bf16.mxu0 %v1298_v32  ;;  %v433_v51 = vld [vmem:[%s2228_s1 + $0x398] sm:$0xff]  ;;  %v1488_v52 = vld [vmem:[#allocation2] ss:$36 sps:$4 sm:$0xff]   ;;  %v1368_v59 = vpack.c.bf16 %v415_v46, %v414_v45  ;;  %v384_v61 = vld [vmem:[%s2228_s1 + $0x210] sm:$0xff] }
  0x2d   : > { %1331 = vmatprep.subr.bf16.mxu1 %v1330_v36  ;;  %v1490_v54 = vld [vmem:[#allocation2 + $0x4] ss:$36 sps:$4 sm:$0xff]   ;;  %v385_v62 = vld [vmem:[%s2228_s1 + $0x218] sm:$0xff]  ;;  %v416_v63 = vld [vmem:[%s2228_s1 + $0x310] sm:$0xff]  ;;  %v1370_v0 = vpack.c.bf16 %v433_v51, %v432_v50 }
  0x2e   : > { %v1491_v56 = vld [vmem:[#allocation2 + $0x8] ss:$36 sps:$4 sm:$0xff]   ;;  %582 = vmatprep.mubr.f32.mxu0 %v1490_v54  ;;  %v417_v1 = vld [vmem:[%s2228_s1 + $0x318] sm:$0xff]  ;;  %v402_v2 = vld [vmem:[%s2228_s1 + $0x2a0] sm:$0xff]  ;;  %v1340_v6 = vpack.c.bf16 %v385_v62, %v384_v61 }
  0x2f   : > { %1301 = vmatpush3.bf16.msra.mxu0 %v1300_v44  ;;  %v1493_v57 = vld [vmem:[#allocation2 + $0xc] ss:$36 sps:$4 sm:$0xff]   ;;  %v434_v4 = vld [vmem:[%s2228_s1 + $0x3a0] sm:$0xff]  ;;  %v1372_v7 = vpack.c.bf16 %v417_v1, %v416_v63  ;;  %v405_v15 = vld [vmem:[%s2228_s1 + $0x2b8] sm:$0xff] }
  0x30   : > { %1333 = vmatpush3.bf16.msra.mxu1 %v1332_v48  ;;  %657 = vmatprep.mubr.f32.mxu1 %v1493_v57  ;;  %v403_v3 = vld [vmem:[%s2228_s1 + $0x2a8] sm:$0xff]  ;;  %v386_v9 = vld [vmem:[%s2228_s1 + $0x220] sm:$0xff]  ;;  %v404_v14 = vld [vmem:[%s2228_s1 + $0x2b0] sm:$0xff] }
  0x31   : > { %1335 = vmatprep.subr.bf16.mxu0 %v1334_v53  ;;  %1367 = vmatprep.subr.bf16.mxu1 %v1366_v55  ;;  %v435_v5 = vld [vmem:[%s2228_s1 + $0x3a8] sm:$0xff]  ;;  %v1342_v8 = vpack.c.bf16 %v403_v3, %v402_v2  ;;  %v418_v11 = vld [vmem:[%s2228_s1 + $0x320] sm:$0xff]  ;;  %v436_v16 = vld [vmem:[%s2228_s1 + $0x3b0] sm:$0xff]  ;;  %v1346_v20 = vpack.c.bf16 %v405_v15, %v404_v14 }
  0x32   : > { %583 = vmatmul.mubr.f32.vlgmr.msra.gmra.mrb[0].mxu0 %v1488_v52  ;;  %v387_v10 = vld [vmem:[%s2228_s1 + $0x228] sm:$0xff]  ;;  %v1374_v12 = vpack.c.bf16 %v435_v5, %v434_v4  ;;  %v437_v17 = vld [vmem:[%s2228_s1 + $0x3b8] sm:$0xff]  ;;  %v388_v21 = vld [vmem:[%s2228_s1 + $0x230] sm:$0xff] }
  0x33   : > { %658 = vmatmul.mubr.f32.vlgmr.msra.gmra.mrb[0].mxu1 %v1491_v56  ;;  %1337 = vmatpush3.bf16.msra.mxu0 %v1336_v58  ;;  %v419_v13 = vld [vmem:[%s2228_s1 + $0x328] sm:$0xff]  ;;  %v1344_v18 = vpack.c.bf16 %v387_v10, %v386_v9  ;;  %v389_v22 = vld [vmem:[%s2228_s1 + $0x238] sm:$0xff]  ;;  %v420_v23 = vld [vmem:[%s2228_s1 + $0x330] sm:$0xff]  ;;  %v1378_v24 = vpack.c.bf16 %v437_v17, %v436_v16 }
  0x34   : > { %1369 = vmatpush3.bf16.msra.mxu1 %v1368_v59  ;;  %1339 = vmatprep.subr.bf16.mxu0 %v1338_v60  ;;  %v1376_v19 = vpack.c.bf16 %v419_v13, %v418_v11  ;;  %v421_v25 = vld [vmem:[%s2228_s1 + $0x338] sm:$0xff]  ;;  %v406_v26 = vld [vmem:[%s2228_s1 + $0x2c0] sm:$0xff]  ;;  %v407_v27 = vld [vmem:[%s2228_s1 + $0x2c8] sm:$0xff]  ;;  %v1348_v32 = vpack.c.bf16 %v389_v22, %v388_v21 }
  0x35   : > { %1371 = vmatprep.subr.bf16.mxu1 %v1370_v0  ;;  %v390_v28 = vld [vmem:[%s2228_s1 + $0x240] sm:$0xff]  ;;  %v391_v29 = vld [vmem:[%s2228_s1 + $0x248] sm:$0xff]  ;;  %v408_v35 = vld [vmem:[%s2228_s1 + $0x2d0] sm:$0xff]  ;;  %v1380_v38 = vpack.c.bf16 %v421_v25, %v420_v23  ;;  %v1350_v39 = vpack.c.bf16 %v407_v27, %v406_v26 }
  0x36   : > { %v438_v30 = vld [vmem:[%s2228_s1 + $0x3c0] sm:$0xff]  ;;  %v439_v31 = vld [vmem:[%s2228_s1 + $0x3c8] sm:$0xff]  ;;  %v409_v36 = vld [vmem:[%s2228_s1 + $0x2d8] sm:$0xff]  ;;  %v1352_v50 = vpack.c.bf16 %v391_v29, %v390_v28 }
  0x37   : > { %1341 = vmatpush3.bf16.msra.mxu0 %v1340_v6  ;;  %v422_v33 = vld [vmem:[%s2228_s1 + $0x340] sm:$0xff]  ;;  %v423_v34 = vld [vmem:[%s2228_s1 + $0x348] sm:$0xff]  ;;  %v226_v37 = vld [vmem:[%s1839_s21 + $0x10] sm:$0xf]  ;;  %v1382_v43 = vpack.c.bf16 %v439_v31, %v438_v30  ;;  %v1354_v55 = vpack.c.bf16 %v409_v36, %v408_v35 }
  0x38   : > { %1373 = vmatpush3.bf16.msra.mxu1 %v1372_v7  ;;  %1343 = vmatprep.subr.bf16.mxu0 %v1342_v8  ;;  %v227_v40 = vld [vmem:[%s1839_s21 + $0x18] sm:$0xf]  ;;  %230 = vst [vmem:[#allocation2 + $0x48] sm:$0xf] %v226_v37  ;;  %v234_v41 = vld [vmem:[%s1839_s21 + $0x11] sm:$0xf]  ;;  %v1384_v54 = vpack.c.bf16 %v423_v34, %v422_v33 }
  0x39   : > { %1375 = vmatprep.subr.bf16.mxu1 %v1374_v12  ;;  %v235_v42 = vld [vmem:[%s1839_s21 + $0x19] sm:$0xf]  ;;  %231 = vst [vmem:[#allocation2 + $0x6c] sm:$0xf] %v227_v40  ;;  %238 = vst [vmem:[#allocation2 + $0x4c] sm:$0xf] %v234_v41 }
  0x3a   : > { %239 = vst [vmem:[#allocation2 + $0x70] sm:$0xf] %v235_v42  ;;  %v242_v44 = vld [vmem:[%s1839_s21 + $0x12] sm:$0xf]  ;;  %v243_v45 = vld [vmem:[%s1839_s21 + $0x1a] sm:$0xf] }
  0x3b   : > { %1345 = vmatpush3.bf16.msra.mxu0 %v1344_v18  ;;  %v1035_v46 = vld [vmem:[%s1839_s21 + $0x18] sm:$0xf]  ;;  %v440_v47 = vld [vmem:[%s2228_s1 + $0x3d0] sm:$0xff]  ;;  %246 = vst [vmem:[#allocation2 + $0x50] sm:$0xf] %v242_v44  ;;  %v410_v57 = vld [vmem:[%s2228_s1 + $0x2e0] sm:$0xff] }
  0x3c   : > { %1377 = vmatpush3.bf16.msra.mxu1 %v1376_v19  ;;  %1347 = vmatprep.subr.bf16.mxu0 %v1346_v20  ;;  %v441_v48 = vld [vmem:[%s2228_s1 + $0x3d8] sm:$0xff]  ;;  %247 = vst [vmem:[#allocation2 + $0x74] sm:$0xf] %v243_v45  ;;  %v1036_v49 = vld [vmem:[%s1839_s21 + $0x20] sm:$0xf]  ;;  %v392_v51 = vld [vmem:[%s2228_s1 + $0x250] sm:$0xff] }
  0x3d   : > { %1379 = vmatprep.subr.bf16.mxu1 %v1378_v24  ;;  %255 = vst [vmem:[#allocation2 + $0x54] sm:$0xf] %v1035_v46  ;;  %v393_v52 = vld [vmem:[%s2228_s1 + $0x258] sm:$0xff]  ;;  %v424_v53 = vld [vmem:[%s2228_s1 + $0x350] sm:$0xff]  ;;  %256 = vst [vmem:[#allocation2 + $0x78] sm:$0xf] %v1036_v49  ;;  %v1386_v59 = vpack.c.bf16 %v441_v48, %v440_v47 }
  0x3e   : > { %v425_v56 = vld [vmem:[%s2228_s1 + $0x358] sm:$0xff]  ;;  %v411_v58 = vld [vmem:[%s2228_s1 + $0x2e8] sm:$0xff]  ;;  %v1038_v61 = vld [vmem:[%s1839_s21 + $0x11] sm:$0xf]  ;;  %v1356_v4 = vpack.c.bf16 %v393_v52, %v392_v51 }
  0x3f   : > { %1349 = vmatpush3.bf16.msra.mxu0 %v1348_v32  ;;  %v1037_v60 = vld [vmem:[%s1839_s21 + $0x9] sm:$0xf]  ;;  %v2052_v63 = vld [vmem:[%s2228_s1 + $0x260] sm:$0xff]  ;;  %262 = vst [vmem:[#allocation2 + $0x34] sm:$0xf] %v1038_v61  ;;  %v412_v7 = vld [vmem:[%s2228_s1 + $0x2f0] sm:$0xff]  ;;  %v1388_v10 = vpack.c.bf16 %v425_v56, %v424_v53  ;;  %v1358_v11 = vpack.c.bf16 %v411_v58, %v410_v57 }
  0x40   : > { %1381 = vmatpush3.bf16.msra.mxu1 %v1380_v38  ;;  %1351 = vmatprep.subr.bf16.mxu0 %v1350_v39  ;;  %v1041_v62 = vld [vmem:[%s1839_s21 + $0xa] sm:$0xf]  ;;  %v442_v1 = vld [vmem:[%s2228_s1 + $0x3e0] sm:$0xff]  ;;  %261 = vst [vmem:[#allocation2 + $0x10] sm:$0xf] %v1037_v60  ;;  %v413_v8 = vld [vmem:[%s2228_s1 + $0x2f8] sm:$0xff] }
  0x41   : > { %1383 = vmatprep.subr.bf16.mxu1 %v1382_v43  ;;  %v2057_v0 = vld [vmem:[%s2228_s1 + $0x268] sm:$0xff]  ;;  %v1042_v3 = vld [vmem:[%s1839_s21 + $0x12] sm:$0xf]  ;;  %269 = vst [vmem:[#allocation2 + $0x14] sm:$0xf] %v1041_v62  ;;  %v426_v5 = vld [vmem:[%s2228_s1 + $0x360] sm:$0xff]  ;;  %v1362_v32 = vpack.c.bf16 %v413_v8, %v412_v7 }
  0x42   : > { %v443_v2 = vld [vmem:[%s2228_s1 + $0x3e8] sm:$0xff]  ;;  %270 = vst [vmem:[#allocation2 + $0x38] sm:$0xf] %v1042_v3  ;;  %v1045_v9 = vld [vmem:[%s1839_s21 + $0x10] sm:$0xf]  ;;  %v445_v16 = vld [vmem:[%s2228_s1 + $0x3f8] sm:$0xff]  ;;  %v1360_v25 = vpack.c.bf16 %v2057_v0, %v2052_v63 }
  0x43   : > { %1353 = vmatpush3.bf16.msra.mxu0 %v1352_v50  ;;  %v427_v6 = vld [vmem:[%s2228_s1 + $0x368] sm:$0xff]  ;;  %v444_v15 = vld [vmem:[%s2228_s1 + $0x3f0] sm:$0xff]  ;;  %278 = vst [vmem:[#allocation2 + $0x18] sm:$0xf] %v1045_v9  ;;  %v1390_v17 = vpack.c.bf16 %v443_v2, %v442_v1  ;;  %v1046_v18 = vld [vmem:[%s1839_s21 + $0x18] sm:$0xf] }
  0x44   : > { %1385 = vmatpush3.bf16.msra.mxu1 %v1384_v54  ;;  %1355 = vmatprep.subr.bf16.mxu0 %v1354_v55  ;;  %v308_v12 = vld [vmem:[#allocation2 + $0x48] sm:$0xff]  ;;  %v1049_v19 = vld [vmem:[%s1839_s21 + $0x11] sm:$0xf]  ;;  %v397_v24 = vld [vmem:[%s2228_s1 + $0x278] sm:$0xff]  ;;  %279 = vst [vmem:[#allocation2 + $0x3c] sm:$0xf] %v1046_v18  ;;  %v1392_v31 = vpack.c.bf16 %v427_v6, %v426_v5  ;;  %v1394_v36 = vpack.c.bf16 %v445_v16, %v444_v15 }
  0x45   : > { %v313_v13 = vld [vmem:[#allocation2 + $0x6c] sm:$0xff]  ;;  %1387 = vmatprep.subr.bf16.mxu1 %v1386_v59  ;;  %v1496_v20 = vld [vmem:[#allocation2 + $0x54] ss:$36 sps:$4 sm:$0xff]   ;;  %286 = vst [vmem:[#allocation2 + $0x1c] sm:$0xf] %v1049_v19  ;;  %v446_v33 = vld [vmem:[%s2228_s1 + $0x400] sm:$0xff] }
  0x46   : > { %v1494_v14 = vld [vmem:[#allocation2 + $0x4c] ss:$36 sps:$4 sm:$0xff]   ;;  %v491_v21 = vcombine.low %v308_v12, %v313_v13  ;;  %v429_v27 = vld [vmem:[%s2228_s1 + $0x378] sm:$0xff]  ;;  %v1040_v30 = vld [vmem:[%s1839_s21 + $0x21] sm:$0xf]  ;;  %662 = vmatprep.mubr.f32.mxu1 %v1496_v20 }
  0x47   : > { %587 = vmatprep.mubr.f32.mxu0 %v1494_v14  ;;  %v1498_v22 = vld [vmem:[#allocation2 + $0x50] ss:$36 sps:$4 sm:$0xff]   ;;  %1357 = vmatpush3.bf16.msra.mxu0 %v1356_v4  ;;  %v1050_v28 = vld [vmem:[%s1839_s21 + $0x19] sm:$0xf]  ;;  %264 = vst [vmem:[#allocation2 + $0x7c] sm:$0xf] %v1040_v30 }
  0x48   : > { %v396_v23 = vld [vmem:[%s2228_s1 + $0x270] sm:$0xff]  ;;  %v1039_v29 = vld [vmem:[%s1839_s21 + $0x19] sm:$0xf]  ;;  %1389 = vmatpush3.bf16.msra.mxu1 %v1388_v10  ;;  %1359 = vmatprep.subr.bf16.mxu0 %v1358_v11  ;;  %287 = vst [vmem:[#allocation2 + $0x40] sm:$0xf] %v1050_v28  ;;  %v447_v37 = vld [vmem:[%s2228_s1 + $0x408] sm:$0xff] }
  0x49   : > { %v428_v26 = vld [vmem:[%s2228_s1 + $0x370] sm:$0xff]  ;;  %263 = vst [vmem:[#allocation2 + $0x58] sm:$0xf] %v1039_v29  ;;  %v1043_v34 = vld [vmem:[%s1839_s21 + $0x1a] sm:$0xf]  ;;  %1391 = vmatprep.subr.bf16.mxu1 %v1390_v17  ;;  %588 = vmatmul.mubr.f32.gmra.mrb[2].mxu0 %v491_v21  ;;  %v1364_v40 = vpack.c.bf16 %v397_v24, %v396_v23  ;;  %v1398_v45 = vpack.c.bf16 %v447_v37, %v446_v33  ;;  %v450_v53 = vld [vmem:[%s2228_s1 + $0x420] sm:$0xff] }
  0x4a   : > { %v1044_v35 = vld [vmem:[%s1839_s21 + $0x22] sm:$0xf]  ;;  %271 = vst [vmem:[#allocation2 + $0x5c] sm:$0xf] %v1043_v34  ;;  %663 = vmatmul.mubr.f32.gmra.mrb[2].mxu1 %v1498_v22  ;;  %v1501_v39 = vld [vmem:[#allocation2 + $0x14] ss:$36 sps:$4 sm:$0xff]   ;;  %v1396_v44 = vpack.c.bf16 %v429_v27, %v428_v26 }
  0x4b   : > { %272 = vst [vmem:[#allocation2 + $0x80] sm:$0xf] %v1044_v35  ;;  %v1047_v38 = vld [vmem:[%s1839_s21 + $0x20] sm:$0xf]  ;;  %1361 = vmatpush3.bf16.msra.mxu0 %v1360_v25  ;;  %v1048_v41 = vld [vmem:[%s1839_s21 + $0x28] sm:$0xf]  ;;  %732 = vmatprep.mubr.f32.mxu0 %v1501_v39 }
  0x4c   : > { %280 = vst [vmem:[#allocation2 + $0x60] sm:$0xf] %v1047_v38  ;;  %v1051_v42 = vld [vmem:[%s1839_s21 + $0x21] sm:$0xf]  ;;  %v1052_v43 = vld [vmem:[%s1839_s21 + $0x29] sm:$0xf]  ;;  %1393 = vmatpush3.bf16.msra.mxu1 %v1392_v31  ;;  %1363 = vmatprep.subr.bf16.mxu0 %v1362_v32 }
  0x4d   : > { %281 = vst [vmem:[#allocation2 + $0x84] sm:$0xf] %v1048_v41  ;;  %288 = vst [vmem:[#allocation2 + $0x64] sm:$0xf] %v1051_v42  ;;  %1395 = vmatprep.subr.bf16.mxu1 %v1394_v36  ;;  %v448_v46 = vld [vmem:[%s2228_s1 + $0x410] sm:$0xff]  ;;  %v449_v47 = vld [vmem:[%s2228_s1 + $0x418] sm:$0xff] }
  0x4e   : > { %289 = vst [vmem:[#allocation2 + $0x88] sm:$0xf] %v1052_v43  ;;  %v1499_v48 = vld [vmem:[#allocation2 + $0x10] ss:$36 sps:$4 sm:$0xff]   ;;  %v1502_v49 = vld [vmem:[#allocation2 + $0x18] ss:$36 sps:$4 sm:$0xff]   ;;  %v1402_v52 = vpack.c.bf16 %v449_v47, %v448_v46 }
  0x4f   : > { %1365 = vmatpush3.bf16.msra.mxu0 %v1364_v40  ;;  %v1504_v50 = vld [vmem:[#allocation2 + $0x1c] ss:$36 sps:$4 sm:$0xff]   ;;  %v451_v54 = vld [vmem:[%s2228_s1 + $0x428] sm:$0xff]  ;;  %v1053_v56 = vld [vmem:[%s1839_s21 + $0x12] sm:$0xf] }
  0x50   : > { %1397 = vmatpush3.bf16.msra.mxu1 %v1396_v44  ;;  %1399 = vmatprep.subr.bf16.mxu0 %v1398_v45  ;;  %v1507_v55 = vld [vmem:[#allocation2 + $0x58] ss:$36 sps:$4 sm:$0xff]   ;;  %294 = vst [vmem:[#allocation2 + $0x20] sm:$0xf] %v1053_v56  ;;  %v1406_v59 = vpack.c.bf16 %v451_v54, %v450_v53  ;;  %v1055_v61 = vld [vmem:[%s1839_s21 + $0x22] sm:$0xf] }
  0x51   : > { %807 = vmatprep.mubr.f32.mxu1 %v1504_v50  ;;  %v1054_v60 = vld [vmem:[%s1839_s21 + $0x1a] sm:$0xf]  ;;  %v452_v62 = vld [vmem:[%s2228_s1 + $0x430] sm:$0xff]  ;;  %v1056_v0 = vld [vmem:[%s1839_s21 + $0x2a] sm:$0xf] }
  0x52   : > { %v1505_v51 = vld [vmem:[#allocation2 + $0x5c] ss:$36 sps:$4 sm:$0xff]   ;;  %733 = vmatmul.mubr.f32.vlgmr.msra.gmra.mrb[4].mxu0 %v1499_v48  ;;  %295 = vst [vmem:[#allocation2 + $0x44] sm:$0xf] %v1054_v60  ;;  %296 = vst [vmem:[#allocation2 + $0x68] sm:$0xf] %v1055_v61 }
  0x53   : > { %1401 = vmatpush3.bf16.msra.mxu0 %v1398_v45  ;;  %808 = vmatmul.mubr.f32.vlgmr.msra.gmra.mrb[4].mxu1 %v1502_v49  ;;  %v453_v63 = vld [vmem:[%s2228_s1 + $0x438] sm:$0xff]  ;;  %297 = vst [vmem:[#allocation2 + $0x8c] sm:$0xf] %v1056_v0  ;;  %v454_v2 = vld [vmem:[%s2228_s1 + $0x440] sm:$0xff]  ;;  %v455_v3 = vld [vmem:[%s2228_s1 + $0x448] sm:$0xff] }
  0x54   : > { %737 = vmatprep.mubr.f32.mxu0 %v1505_v51  ;;  %1403 = vmatprep.subr.bf16.mxu0 %v1402_v52  ;;  %v1510_v58 = vld [vmem:[#allocation2 + $0x60] ss:$36 sps:$4 sm:$0xff]   ;;  %v1410_v1 = vpack.c.bf16 %v453_v63, %v452_v62  ;;  %v1414_v4 = vpack.c.bf16 %v455_v3, %v454_v2  ;;  %v456_v6 = vld [vmem:[%s2228_s1 + $0x450] sm:$0xff]  ;;  %v457_v7 = vld [vmem:[%s2228_s1 + $0x458] sm:$0xff] }
  0x55   : > { %v1508_v57 = vld [vmem:[#allocation2 + $0x64] ss:$36 sps:$4 sm:$0xff]   ;;  %v1418_v8 = vpack.c.bf16 %v457_v7, %v456_v6  ;;  %v460_v12 = vld [vmem:[%s2228_s1 + $0x470] sm:$0xff]  ;;  %v461_v13 = vld [vmem:[%s2228_s1 + $0x478] sm:$0xff] }
  0x56   : > { %812 = vmatprep.mubr.f32.mxu1 %v1508_v57  ;;  %738 = vmatmul.mubr.f32.gmra.mrb[6].mxu0 %v1507_v55  ;;  %v458_v9 = vld [vmem:[%s2228_s1 + $0x460] sm:$0xff]  ;;  %v459_v10 = vld [vmem:[%s2228_s1 + $0x468] sm:$0xff]  ;;  %v1426_v14 = vpack.c.bf16 %v461_v13, %v460_v12 }
  0x57   : > { %1405 = vmatpush3.bf16.msra.mxu0 %v1402_v52  ;;  %813 = vmatmul.mubr.f32.gmra.mrb[6].mxu1 %v1510_v58  ;;  %v1422_v11 = vpack.c.bf16 %v459_v10, %v458_v9  ;;  %v1057_v47 = vld [vmem:[%s2229_s2] ss:$0 sm:$0xff] }
  0x58   : > { %1407 = vmatprep.subr.bf16.mxu0 %v1406_v59  ;;  %v1058_v50 = vld [vmem:[%s2230_s3] ss:$0 sm:$0xff] }
  0x59   : > { %v1511_v5 = vld [vmem:[#allocation2 + $0x20] ss:$36 sps:$4 sm:$0xff]  }
  0x5a   : > { %1267 = vmatprep.mubr.f32.mxu0 %v1511_v5  ;;  %v1512_v15 = vld [vmem:[#allocation2 + $0x68] ss:$36 sps:$4 sm:$0xff]  }
  0x5b   : > { %1409 = vmatpush3.bf16.msra.mxu0 %v1406_v59 }
  0x5c   : > { %1411 = vmatprep.subr.bf16.mxu0 %v1410_v1 }
  0x5f   : > { %1413 = vmatpush3.bf16.msra.mxu0 %v1410_v1 }
  0x60   : > { %1415 = vmatprep.subr.bf16.mxu0 %v1414_v4 }
  0x63   : > { %1417 = vmatpush3.bf16.msra.mxu0 %v1414_v4 }
  0x64   : > { %1419 = vmatprep.subr.bf16.mxu0 %v1418_v8 }
  0x67   : > { %1421 = vmatpush3.bf16.msra.mxu0 %v1418_v8 }
  0x68   : > { %1423 = vmatprep.subr.bf16.mxu0 %v1422_v11 }
  0x6b   : > { %1425 = vmatpush3.bf16.msra.mxu0 %v1422_v11 }
  0x6c   : > { %1427 = vmatprep.subr.bf16.mxu0 %v1426_v14 }
  0x6f   : > { %1429 = vmatpush3.bf16.msra.mxu0 %v1426_v14 }
  0x72   : > { %1268 = vmatmul.mubr.f32.vlgmr.msra.gmra.mrb[8].mxu0 %v1512_v15 }
 0x105   : > { %v1097_v16 = vpop.f32.mrb[0].mxu0 }
 0x106   : > { %v1135_v17 = vpop.f32.mrb[0].mxu1  ;;  %v1098_v18 = vpop.f32.mrb[1].mxu0 }
 0x107   : > { %v1099_v19 = vadd.f32 %v1098_v18, %v1097_v16  ;;  %v1136_v20 = vpop.f32.mrb[1].mxu1 }
 0x108   : > { %v1137_v21 = vadd.f32 %v1136_v20, %v1135_v17 }
 0x10a   : > { %v660_v22 = vadd.f32 %v1137_v21, %v1099_v19 }
 0x11c   : > { %v1100_v23 = vpop.f32.mrb[2].mxu0 }
 0x11d   : > { %v1138_v24 = vpop.f32.mrb[2].mxu1  ;;  %v1101_v25 = vpop.f32.mrb[3].mxu0 }
 0x11e   : > { %v1139_v26 = vpop.f32.mrb[3].mxu1  ;;  %v1102_v27 = vadd.f32 %v1101_v25, %v1100_v23 }
 0x11f   : > { %v1140_v28 = vadd.f32 %v1139_v26, %v1138_v24 }
 0x121   : > { %v665_v29 = vadd.f32 %v1140_v28, %v1102_v27 }
 0x125   : > { %v1173_v30 = vpop.f32.mrb[4].mxu0 }
 0x126   : > { %v1174_v31 = vpop.f32.mrb[5].mxu0  ;;  %v1211_v32 = vpop.f32.mrb[4].mxu1 }
 0x127   : > { %v1175_v33 = vadd.f32 %v1174_v31, %v1173_v30  ;;  %v1212_v34 = vpop.f32.mrb[5].mxu1 }
 0x128   : > { %v1213_v35 = vadd.f32 %v1212_v34, %v1211_v32 }
 0x129   : > { %v735_v36 = vadd.f32 %v1175_v33, %v660_v22  ;;  %v1176_v37 = vpop.f32.mrb[6].mxu0 }
 0x12a   : > { %v1177_v38 = vpop.f32.mrb[7].mxu0  ;;  %v1214_v39 = vpop.f32.mrb[6].mxu1 }
 0x12b   : > { %v1178_v40 = vadd.f32 %v1177_v38, %v1176_v37  ;;  %v1215_v41 = vpop.f32.mrb[7].mxu1  ;;  %v810_v42 = vadd.f32 %v1213_v35, %v735_v36 }
 0x12c   : > { %v1216_v43 = vadd.f32 %v1215_v41, %v1214_v39 }
 0x12d   : > { %v740_v44 = vadd.f32 %v1178_v40, %v665_v29 }
 0x12f   : > { %v815_v45 = vadd.f32 %v1216_v43, %v740_v44 }
 0x145   : > { %v1269_v46 = vpop.f32.mrb[8].mxu0 }
 0x146   : > { %v890_v48 = vadd.f32 %v1269_v46, %v815_v45  ;;  %v884_v49 = vpop.f32.mrb[9].mxu0 }
 0x147   : > { %v885_v51 = vadd.f32 %v884_v49, %v810_v42 }
 0x148   : > { %v901_v52 = vmul.f32 %v1057_v47, %v890_v48 }
 0x149   : > { %v900_v53 = vmul.f32 %v1057_v47, %v885_v51 }
 0x14a   : > { %v910_v54 = vadd.f32 %v1058_v50, %v901_v52 }
 0x14b   : > { %v909_v55 = vadd.f32 %v1058_v50, %v900_v53 }
 0x14c   : > { %vm912_vm0 = vcmp.ge.f32.partialorder %v910_v54, 0.0  ;;  %v914_v56 = vmul.f32 0.1, %v910_v54 }
 0x14d   : > { %vm911_vm2 = vcmp.ge.f32.partialorder %v909_v55, 0.0  ;;  %v913_v57 = vmul.f32 0.1, %v909_v55 }
 0x14e   : > { %v916_v58 = vsel %vm912_vm0, %v910_v54, %v914_v56 }
 0x14f   : > { %v920_v59 = vcombine.high %v916_v58, %v916_v58  ;;  %926 = vst.msk [vmem:[%s214_s11 + $0x8] sm:$0xf] %vm923_vm1, %v916_v58  ;;  %v915_v60 = vsel %vm911_vm2, %v909_v55, %v913_v57 }
 0x150   : > { %v919_v61 = vcombine.high %v915_v60, %v915_v60  ;;  %924 = vst.msk [vmem:[%s214_s11] sm:$0xf] %vm923_vm1, %v915_v60 }
 0x151   : > { %927 = vst.msk [vmem:[%s214_s11 + $0xc] sm:$0xf] %vm923_vm1, %v920_v59 }
 0x152   : > { %925 = vst.msk [vmem:[%s214_s11 + $0x4] sm:$0xf] %vm923_vm1, %v919_v61 }
 0x153   : > { %1526 = shalt.err (!%p1523_p5)
}
 0x154   : > { %s1527_s30 = scalar_lea.hbm %s2175_s22, 256  ;;  %s1531_s9 = scalar_lea.hbm %s2231_s4, 512 }
 0x155   : > { %p1528_p6 = scmp.ne.s32.totalorder %s2175_s22, %s1527_s30  ;;  %p1532_p10 = scmp.lt.u32.totalorder %s2175_s22, %s2231_s4 }
 0x156   : > { %p1533_p11 = scmp.lt.u32.totalorder %s1531_s9, %s1527_s30  ;;  %p1535_p13 = scmp.lt.u32.totalorder %s1527_s30, %s2175_s22 }
 0x157   : > { %p1529_p7 = pnand %p1528_p6, %p1661_p4 }
 0x158   : > { %p1534_p12 = por %p1533_p11, %p1532_p10 }
 0x159   : > { %p1530_p9 = pneg %p1529_p7 }
 0x15a   : > { %p1536_p0 = por %p1535_p13, %p1534_p12 }
 0x15c   : > { %p1537_p1 = pnand %p1536_p0, %p1530_p9 }
 0x15e   : > { %1540 = shalt.err (!%p1537_p1)
}
 0x15f   : > { %s1594_s10 = smov 64   ;;  %s1595_s11 = smov 4  }
 0x160   : > { %1431 = dma.vmem_to_hbm [thread:$0]  (%p1661_p4), %s2177_s12, 256, %s2175_s22, %s2181_s18, %s1594_s10, %s1594_s10, %s1595_s11  }
 0x161 PF: > { %p1437_p2 = scmp.ge.s32.totalorder %s1591_s20, 2  ;;  %s959_s13 = sand.u32 1, %s1571_s15  }
 0x162   : > { %s960_s14 = scalar_lea.sflag [#allocation4], %s959_s13 }
 0x163   : > { %p1434_p3 = pnand %p1437_p2, %p1668_p8 }
 0x165   : > { %1566 = dma.done.wait (!%p1434_p3), %s960_s14, 256  }
 0x166   : > { %1568 = vsyncadd (!%p1434_p3), %s960_s14, 4294967040  ;;  %s17_s20 = sadd.s32 1, %s1591_s20   ;;  %s2234_s15 = smov %s1575_s16 }
 0x167   : > { %p14_p5 = scmp.ge.s32.totalorder %s17_s20, 4   ;;  %s2235_s16 = smov %s1579_s17 }
 0x168   : > { %s2236_s17 = smov %s1674_s28  ;;  %s2237_s18 = smov %s1587_s19 }
 0x169   : > { %s2238_s19 = smov %s2240_s23  ;;  %16 = sbr.rel (!%p14_p5) target bundleno = 4 (0x4), region = 73 }
 0x170   :  { %965 = vsyncpa [#allocation4], 1 }
 0x171   :  { %967 = vsyncpa [#allocation4 + $0x1], 1 }

// kernel: decoder_forward.10
= control target key start
LH: loop header
LB: loop body
LE: loop exit
PB: predicated region body
PF: predicated region fallthrough
CT: control target
= control target key end

     0   :  { %s2748_s15 = smov 0   ;;  %s2750_s16 = smov 0   ;;  %s3783_s0 = inlined_call_operand.vmem [shape: f32[2,1,1,6,6,256], index: 0, kind: input, shape index: {}]   ;;  %s3784_s1 = inlined_call_operand.vmem [shape: f32[2304,128], index: 1, kind: input, shape index: {}]   ;;  %s3785_s2 = inlined_call_operand.vmem [shape: f32[1,128], index: 2, kind: input, shape index: {}]   ;;  %s3786_s3 = inlined_call_operand.vmem [shape: f32[1,128], index: 3, kind: input, shape index: {}]   ;;  %s3787_s4 = inlined_call_operand.vmem [shape: f32[2,1,4,4,128], index: 4, kind: output, shape index: {}]  }
   0x1   :  { %s2752_s17 = smov 0  }
   0x2 LB: > { %s26_s18 = sadd.s32 1, %s2717_s16  ;;  %p1851_p0 = scmp.ge.s32.totalorder %s2721_s17, 1  ;;  %s2721_s17 = sphi %s2752_s17, %s14_s17   ;;  %s2717_s16 = sphi %s2750_s16, %s3793_s16   ;;  %s2713_s15 = sphi %s2748_s15, %s3792_s15  }
   0x3   : > { %p28_p1 = scmp.ge.s32.totalorder %s26_s18, 2  ;;  %p182_p2 = scmp.lt.s32.totalorder %s2721_s17, 3 }
   0x5   : > { %s3795_s18 = smov (%p28_p1, %s26_s18), 0  ;;  %p183_p3 = pnand %p1851_p0, %p182_p2 }
   0x6   : > { %v666_v0 = vld [vmem:[%s3784_s1 + $0x80] sm:$0xff] (!%p183_p3)  ;;  %v667_v1 = vld [vmem:[%s3784_s1 + $0x88] sm:$0xff] (!%p183_p3)  ;;  %v668_v11 = vld [vmem:[%s3784_s1 + $0x90] sm:$0xff] (!%p183_p3)  ;;  %p216_p4 = scmp.lt.s32.totalorder (!%p183_p3), %s2713_s15, 1  ;;  %vm286_vm0 = vcmask (!%p183_p3), 1042432   ;;  %vm287_vm1 = vcmask (!%p183_p3), 1046532  }
   0x7   : > { %186 = sbr.rel (%p183_p3) target bundleno = 398 (0x18e), region = 36  ;;  %v698_v2 = vld [vmem:[%s3784_s1 + $0x180] sm:$0xff] (!%p183_p3)  ;;  %v2286_v3 = vpack.c.bf16 (!%p183_p3), %v667_v1, %v666_v0  ;;  %v699_v4 = vld [vmem:[%s3784_s1 + $0x188] sm:$0xff] (!%p183_p3)  ;;  %v669_v13 = vld [vmem:[%s3784_s1 + $0x98] sm:$0xff] (!%p183_p3)  ;;  %vm337_vm3 = vcmask (!%p183_p3), 1041408   ;;  %vm338_vm4 = vcmask (!%p183_p3), 1045508  }
   0x8   : > { %v650_v5 = vld [vmem:[%s3784_s1] sm:$0xff] (!%p183_p3)  ;;  %v651_v6 = vld [vmem:[%s3784_s1 + $0x8] sm:$0xff] (!%p183_p3)  ;;  %v2318_v7 = vpack.c.bf16 (!%p183_p3), %v699_v4, %v698_v2  ;;  %v700_v14 = vld [vmem:[%s3784_s1 + $0x190] sm:$0xff] (!%p183_p3)  ;;  %v2290_v16 = vpack.c.bf16 (!%p183_p3), %v669_v13, %v668_v11 }
   0x9   : > { %v2288_v8 = vpack.c.bf16 (!%p183_p3), %v651_v6, %v650_v5  ;;  %v682_v9 = vld [vmem:[%s3784_s1 + $0x100] sm:$0xff] (!%p183_p3)  ;;  %v683_v10 = vld [vmem:[%s3784_s1 + $0x108] sm:$0xff] (!%p183_p3)  ;;  %2287 = vmatprep.subr.bf16.mxu0 (!%p183_p3), %v2286_v3  ;;  %v701_v15 = vld [vmem:[%s3784_s1 + $0x198] sm:$0xff] (!%p183_p3) }
   0xa   : > { %v2320_v12 = vpack.c.bf16 (!%p183_p3), %v683_v10, %v682_v9  ;;  %2319 = vmatprep.subr.bf16.mxu1 (!%p183_p3), %v2318_v7  ;;  %v2322_v17 = vpack.c.bf16 (!%p183_p3), %v701_v15, %v700_v14  ;;  %v652_v18 = vld [vmem:[%s3784_s1 + $0x10] sm:$0xff] (!%p183_p3)  ;;  %v653_v19 = vld [vmem:[%s3784_s1 + $0x18] sm:$0xff] (!%p183_p3)  ;;  %v670_v23 = vld [vmem:[%s3784_s1 + $0xa0] sm:$0xff] (!%p183_p3) }
   0xb   : > { %2289 = vmatpush3.bf16.msra.mxu0 (!%p183_p3), %v2288_v8  ;;  %v684_v20 = vld [vmem:[%s3784_s1 + $0x110] sm:$0xff] (!%p183_p3)  ;;  %v2292_v21 = vpack.c.bf16 (!%p183_p3), %v653_v19, %v652_v18  ;;  %v685_v22 = vld [vmem:[%s3784_s1 + $0x118] sm:$0xff] (!%p183_p3)  ;;  %v671_v24 = vld [vmem:[%s3784_s1 + $0xa8] sm:$0xff] (!%p183_p3) }
   0xc   : > { %2321 = vmatpush3.bf16.msra.mxu1 (!%p183_p3), %v2320_v12  ;;  %2291 = vmatprep.subr.bf16.mxu0 (!%p183_p3), %v2290_v16  ;;  %v2324_v25 = vpack.c.bf16 (!%p183_p3), %v685_v22, %v684_v20  ;;  %v2294_v26 = vpack.c.bf16 (!%p183_p3), %v671_v24, %v670_v23  ;;  %v702_v27 = vld [vmem:[%s3784_s1 + $0x1a0] sm:$0xff] (!%p183_p3)  ;;  %v703_v28 = vld [vmem:[%s3784_s1 + $0x1a8] sm:$0xff] (!%p183_p3)  ;;  %v672_v35 = vld [vmem:[%s3784_s1 + $0xb0] sm:$0xff] (!%p183_p3) }
   0xd   : > { %2323 = vmatprep.subr.bf16.mxu1 (!%p183_p3), %v2322_v17  ;;  %v654_v29 = vld [vmem:[%s3784_s1 + $0x20] sm:$0xff] (!%p183_p3)  ;;  %v2326_v30 = vpack.c.bf16 (!%p183_p3), %v703_v28, %v702_v27  ;;  %v655_v31 = vld [vmem:[%s3784_s1 + $0x28] sm:$0xff] (!%p183_p3)  ;;  %v673_v36 = vld [vmem:[%s3784_s1 + $0xb8] sm:$0xff] (!%p183_p3) }
   0xe   : > { %v686_v32 = vld [vmem:[%s3784_s1 + $0x120] sm:$0xff]  ;;  %v687_v33 = vld [vmem:[%s3784_s1 + $0x128] sm:$0xff]  ;;  %v2296_v34 = vpack.c.bf16 %v655_v31, %v654_v29  ;;  %v704_v37 = vld [vmem:[%s3784_s1 + $0x1b0] sm:$0xff]  ;;  %v2298_v39 = vpack.c.bf16 %v673_v36, %v672_v35  ;;  %s3797_s15 = smov (!%p216_p4, %s2713_s15), 1 }
   0xf   : > { %2293 = vmatpush3.bf16.msra.mxu0 %v2292_v21  ;;  %v2328_v38 = vpack.c.bf16 %v687_v33, %v686_v32  ;;  %v705_v40 = vld [vmem:[%s3784_s1 + $0x1b8] sm:$0xff]  ;;  %v656_v41 = vld [vmem:[%s3784_s1 + $0x30] sm:$0xff]  ;;  %v674_v46 = vld [vmem:[%s3784_s1 + $0xc0] sm:$0xff]  ;;  %s2590_s21 = smul.u32 96, %s3797_s15  ;;  %s1931_s5 = sshll.u32 %s3797_s15, 4 }
  0x10   : > { %2325 = vmatpush3.bf16.msra.mxu1 %v2324_v25  ;;  %2295 = vmatprep.subr.bf16.mxu0 %v2294_v26  ;;  %v657_v42 = vld [vmem:[%s3784_s1 + $0x38] sm:$0xff]  ;;  %v2330_v43 = vpack.c.bf16 %v705_v40, %v704_v37  ;;  %v688_v44 = vld [vmem:[%s3784_s1 + $0x130] sm:$0xff]  ;;  %v675_v47 = vld [vmem:[%s3784_s1 + $0xc8] sm:$0xff] }
  0x11   : > { %2327 = vmatprep.subr.bf16.mxu1 %v2326_v30  ;;  %v689_v45 = vld [vmem:[%s3784_s1 + $0x138] sm:$0xff]  ;;  %v706_v48 = vld [vmem:[%s3784_s1 + $0x1c0] sm:$0xff]  ;;  %v707_v49 = vld [vmem:[%s3784_s1 + $0x1c8] sm:$0xff]  ;;  %v2300_v50 = vpack.c.bf16 %v657_v42, %v656_v41  ;;  %v2302_v52 = vpack.c.bf16 %v675_v47, %v674_v46  ;;  %s2952_s29 = scalar_lea.vmem %s3783_s0, %s2590_s21  ;;  %s233_s21 = scalar_lea.vmem %s3787_s4, %s1931_s5 }
  0x12   : > { %v2332_v51 = vpack.c.bf16 %v689_v45, %v688_v44  ;;  %v658_v53 = vld [vmem:[%s3784_s1 + $0x40] sm:$0xff]  ;;  %v659_v54 = vld [vmem:[%s3784_s1 + $0x48] sm:$0xff]  ;;  %v2334_v56 = vpack.c.bf16 %v707_v49, %v706_v48  ;;  %v676_v58 = vld [vmem:[%s3784_s1 + $0xd0] sm:$0xff] }
  0x13   : > { %2297 = vmatpush3.bf16.msra.mxu0 %v2296_v34  ;;  %v690_v55 = vld [vmem:[%s3784_s1 + $0x140] sm:$0xff]  ;;  %v691_v57 = vld [vmem:[%s3784_s1 + $0x148] sm:$0xff]  ;;  %v677_v59 = vld [vmem:[%s3784_s1 + $0xd8] sm:$0xff]  ;;  %v2304_v62 = vpack.c.bf16 %v659_v54, %v658_v53 }
  0x14   : > { %2329 = vmatpush3.bf16.msra.mxu1 %v2328_v38  ;;  %2299 = vmatprep.subr.bf16.mxu0 %v2298_v39  ;;  %v708_v60 = vld [vmem:[%s3784_s1 + $0x1d0] sm:$0xff]  ;;  %v709_v61 = vld [vmem:[%s3784_s1 + $0x1d8] sm:$0xff]  ;;  %v2336_v0 = vpack.c.bf16 %v691_v57, %v690_v55  ;;  %v2306_v1 = vpack.c.bf16 %v677_v59, %v676_v58  ;;  %v678_v6 = vld [vmem:[%s3784_s1 + $0xe0] sm:$0xff] }
  0x15   : > { %2331 = vmatprep.subr.bf16.mxu1 %v2330_v43  ;;  %v660_v63 = vld [vmem:[%s3784_s1 + $0x50] sm:$0xff]  ;;  %v661_v2 = vld [vmem:[%s3784_s1 + $0x58] sm:$0xff]  ;;  %v2338_v5 = vpack.c.bf16 %v709_v61, %v708_v60  ;;  %v679_v7 = vld [vmem:[%s3784_s1 + $0xe8] sm:$0xff] }
  0x16   : > { %v692_v3 = vld [vmem:[%s3784_s1 + $0x150] sm:$0xff]  ;;  %v693_v4 = vld [vmem:[%s3784_s1 + $0x158] sm:$0xff]  ;;  %v710_v8 = vld [vmem:[%s3784_s1 + $0x1e0] sm:$0xff]  ;;  %v2308_v12 = vpack.c.bf16 %v661_v2, %v660_v63  ;;  %v2310_v18 = vpack.c.bf16 %v679_v7, %v678_v6 }
  0x17   : > { %2301 = vmatpush3.bf16.msra.mxu0 %v2300_v50  ;;  %v711_v9 = vld [vmem:[%s3784_s1 + $0x1e8] sm:$0xff]  ;;  %v662_v10 = vld [vmem:[%s3784_s1 + $0x60] sm:$0xff]  ;;  %v680_v15 = vld [vmem:[%s3784_s1 + $0xf0] sm:$0xff]  ;;  %v2340_v17 = vpack.c.bf16 %v693_v4, %v692_v3 }
  0x18   : > { %2333 = vmatpush3.bf16.msra.mxu1 %v2332_v51  ;;  %2303 = vmatprep.subr.bf16.mxu0 %v2302_v52  ;;  %v663_v11 = vld [vmem:[%s3784_s1 + $0x68] sm:$0xff]  ;;  %v694_v13 = vld [vmem:[%s3784_s1 + $0x160] sm:$0xff]  ;;  %v681_v16 = vld [vmem:[%s3784_s1 + $0xf8] sm:$0xff]  ;;  %v2342_v21 = vpack.c.bf16 %v711_v9, %v710_v8 }
  0x19   : > { %2335 = vmatprep.subr.bf16.mxu1 %v2334_v56  ;;  %v695_v14 = vld [vmem:[%s3784_s1 + $0x168] sm:$0xff]  ;;  %v712_v19 = vld [vmem:[%s3784_s1 + $0x1f0] sm:$0xff]  ;;  %v713_v20 = vld [vmem:[%s3784_s1 + $0x1f8] sm:$0xff]  ;;  %v2312_v25 = vpack.c.bf16 %v663_v11, %v662_v10  ;;  %v2314_v31 = vpack.c.bf16 %v681_v16, %v680_v15 }
  0x1a   : > { %v2615_v22 = vld [vmem:[%s2952_s29 + $0x8] ss:$16 sps:$4 sm:$0xff]   ;;  %v664_v23 = vld [vmem:[%s3784_s1 + $0x70] sm:$0xff]  ;;  %v2618_v29 = vld [vmem:[%s2952_s29 + $0x4] ss:$8 sps:$4 sm:$0x11]   ;;  %v2344_v30 = vpack.c.bf16 %v695_v14, %v694_v13  ;;  %v2346_v35 = vpack.c.bf16 %v713_v20, %v712_v19 }
  0x1b   : > { %2305 = vmatpush3.bf16.msra.mxu0 %v2304_v62  ;;  %v665_v24 = vld [vmem:[%s3784_s1 + $0x78] sm:$0xff]  ;;  %v696_v26 = vld [vmem:[%s3784_s1 + $0x170] sm:$0xff]  ;;  %1110 = vmatprep.mubr.f32.mxu0 %v2615_v22  ;;  %v2616_v28 = vld [vmem:[%s2952_s29] ss:$8 sps:$4 sm:$0xee]   ;;  %v291_v37 = vrot.slane %v2618_v29, 5 }
  0x1c   : > { %2337 = vmatpush3.bf16.msra.mxu1 %v2336_v0  ;;  %2307 = vmatprep.subr.bf16.mxu0 %v2306_v1  ;;  %v697_v27 = vld [vmem:[%s3784_s1 + $0x178] sm:$0xff]  ;;  %vm2979_vm2 = vmor %vm286_vm0, %vm287_vm1  ;;  %v1855_v36 = vrot.slane %v2616_v28, 9  ;;  %v730_v40 = vld [vmem:[%s3784_s1 + $0x280] sm:$0xff]  ;;  %v2316_v42 = vpack.c.bf16 %v665_v24, %v664_v23 }
  0x1d   : > { %2339 = vmatprep.subr.bf16.mxu1 %v2338_v5  ;;  %v2619_v32 = vld [vmem:[%s2952_s29 + $0x10] ss:$8 sps:$4 sm:$0xee]   ;;  %v2621_v33 = vld [vmem:[%s2952_s29 + $0x14] ss:$8 sps:$4 sm:$0x11]   ;;  %v2348_v46 = vpack.c.bf16 %v697_v27, %v696_v26  ;;  %vm3196_vm5 = vmor %vm337_vm3, %vm338_vm4 }
  0x1e   : > { %v1856_v38 = vrot.slane %v2619_v32, 9  ;;  %v295_v39 = vrot.slane %v2621_v33, 5  ;;  %v731_v41 = vld [vmem:[%s3784_s1 + $0x288] sm:$0xff]  ;;  %v292_v43 = vsel %vm2979_vm2, %v1855_v36, %v291_v37  ;;  %v762_v44 = vld [vmem:[%s3784_s1 + $0x380] sm:$0xff]  ;;  %v732_v55 = vld [vmem:[%s3784_s1 + $0x290] sm:$0xff] }
  0x1f   : > { %2309 = vmatpush3.bf16.msra.mxu0 %v2308_v12  ;;  %v763_v45 = vld [vmem:[%s3784_s1 + $0x388] sm:$0xff]  ;;  %v2350_v48 = vpack.c.bf16 %v731_v41, %v730_v40  ;;  %v714_v49 = vld [vmem:[%s3784_s1 + $0x200] sm:$0xff]  ;;  %v733_v56 = vld [vmem:[%s3784_s1 + $0x298] sm:$0xff] }
  0x20   : > { %2341 = vmatpush3.bf16.msra.mxu1 %v2340_v17  ;;  %2311 = vmatprep.subr.bf16.mxu0 %v2310_v18  ;;  %v296_v47 = vsel %vm2979_vm2, %v1856_v38, %v295_v39  ;;  %v715_v50 = vld [vmem:[%s3784_s1 + $0x208] sm:$0xff]  ;;  %v746_v51 = vld [vmem:[%s3784_s1 + $0x300] sm:$0xff]  ;;  %v2382_v53 = vpack.c.bf16 %v763_v45, %v762_v44  ;;  %v764_v58 = vld [vmem:[%s3784_s1 + $0x390] sm:$0xff]  ;;  %v2354_v63 = vpack.c.bf16 %v733_v56, %v732_v55 }
  0x21   : > { %2343 = vmatprep.subr.bf16.mxu1 %v2342_v21  ;;  %v977_v52 = vcombine.high %v292_v43, %v296_v47  ;;  %v747_v54 = vld [vmem:[%s3784_s1 + $0x308] sm:$0xff]  ;;  %v2622_v57 = vld [vmem:[%s2952_s29] ss:$16 sps:$4 sm:$0xff]   ;;  %v765_v59 = vld [vmem:[%s3784_s1 + $0x398] sm:$0xff]  ;;  %v976_v60 = vcombine.low %v292_v43, %v296_v47  ;;  %v2352_v61 = vpack.c.bf16 %v715_v50, %v714_v49 }
  0x22   : > { %v2384_v62 = vpack.c.bf16 %v747_v54, %v746_v51  ;;  %v716_v0 = vld [vmem:[%s3784_s1 + $0x210] sm:$0xff]  ;;  %v717_v1 = vld [vmem:[%s3784_s1 + $0x218] sm:$0xff]  ;;  %v2386_v3 = vpack.c.bf16 %v765_v59, %v764_v58  ;;  %v734_v5 = vld [vmem:[%s3784_s1 + $0x2a0] sm:$0xff] }
  0x23   : > { %2313 = vmatpush3.bf16.msra.mxu0 %v2312_v25  ;;  %1185 = vmatprep.mubr.f32.mxu1 %v977_v52  ;;  %v748_v2 = vld [vmem:[%s3784_s1 + $0x310] sm:$0xff]  ;;  %v749_v4 = vld [vmem:[%s3784_s1 + $0x318] sm:$0xff]  ;;  %v735_v6 = vld [vmem:[%s3784_s1 + $0x2a8] sm:$0xff]  ;;  %v2356_v9 = vpack.c.bf16 %v717_v1, %v716_v0 }
  0x24   : > { %2345 = vmatpush3.bf16.msra.mxu1 %v2344_v30  ;;  %2315 = vmatprep.subr.bf16.mxu0 %v2314_v31  ;;  %v766_v7 = vld [vmem:[%s3784_s1 + $0x3a0] sm:$0xff]  ;;  %v767_v8 = vld [vmem:[%s3784_s1 + $0x3a8] sm:$0xff]  ;;  %v2388_v10 = vpack.c.bf16 %v749_v4, %v748_v2  ;;  %v2358_v11 = vpack.c.bf16 %v735_v6, %v734_v5  ;;  %v736_v17 = vld [vmem:[%s3784_s1 + $0x2b0] sm:$0xff] }
  0x25   : > { %2347 = vmatprep.subr.bf16.mxu1 %v2346_v35  ;;  %v718_v12 = vld [vmem:[%s3784_s1 + $0x220] sm:$0xff]  ;;  %v719_v13 = vld [vmem:[%s3784_s1 + $0x228] sm:$0xff]  ;;  %v2390_v15 = vpack.c.bf16 %v767_v8, %v766_v7  ;;  %v737_v18 = vld [vmem:[%s3784_s1 + $0x2b8] sm:$0xff] }
  0x26   : > { %v750_v14 = vld [vmem:[%s3784_s1 + $0x320] sm:$0xff]  ;;  %v751_v16 = vld [vmem:[%s3784_s1 + $0x328] sm:$0xff]  ;;  %v768_v19 = vld [vmem:[%s3784_s1 + $0x3b0] sm:$0xff]  ;;  %v2360_v21 = vpack.c.bf16 %v719_v13, %v718_v12  ;;  %v2362_v24 = vpack.c.bf16 %v737_v18, %v736_v17 }
  0x27   : > { %2317 = vmatpush3.bf16.msra.mxu0 %v2316_v42  ;;  %v769_v20 = vld [vmem:[%s3784_s1 + $0x3b8] sm:$0xff]  ;;  %v720_v22 = vld [vmem:[%s3784_s1 + $0x230] sm:$0xff]  ;;  %v2392_v23 = vpack.c.bf16 %v751_v16, %v750_v14  ;;  %v738_v29 = vld [vmem:[%s3784_s1 + $0x2c0] sm:$0xff] }
  0x28   : > { %2349 = vmatpush3.bf16.msra.mxu1 %v2348_v46  ;;  %2351 = vmatprep.subr.bf16.mxu0 %v2350_v48  ;;  %v721_v25 = vld [vmem:[%s3784_s1 + $0x238] sm:$0xff]  ;;  %v752_v26 = vld [vmem:[%s3784_s1 + $0x330] sm:$0xff]  ;;  %v2394_v28 = vpack.c.bf16 %v769_v20, %v768_v19  ;;  %v739_v30 = vld [vmem:[%s3784_s1 + $0x2c8] sm:$0xff] }
  0x29   : > { %2383 = vmatprep.subr.bf16.mxu1 %v2382_v53  ;;  %v753_v27 = vld [vmem:[%s3784_s1 + $0x338] sm:$0xff]  ;;  %v770_v31 = vld [vmem:[%s3784_s1 + $0x3c0] sm:$0xff]  ;;  %v771_v32 = vld [vmem:[%s3784_s1 + $0x3c8] sm:$0xff]  ;;  %v2364_v36 = vpack.c.bf16 %v721_v25, %v720_v22  ;;  %v2366_v41 = vpack.c.bf16 %v739_v30, %v738_v29 }
  0x2a   : > { %1111 = vmatmul.mubr.f32.vlgmr.msra.gmra.mrb[0].mxu0 %v2622_v57  ;;  %v722_v33 = vld [vmem:[%s3784_s1 + $0x240] sm:$0xff]  ;;  %v723_v35 = vld [vmem:[%s3784_s1 + $0x248] sm:$0xff]  ;;  %v740_v39 = vld [vmem:[%s3784_s1 + $0x2d0] sm:$0xff]  ;;  %v2396_v40 = vpack.c.bf16 %v753_v27, %v752_v26  ;;  %v2398_v45 = vpack.c.bf16 %v771_v32, %v770_v31 }
  0x2b   : > { %1186 = vmatmul.mubr.f32.vlgmr.msra.gmra.mrb[0].mxu1 %v976_v60  ;;  %2353 = vmatpush3.bf16.msra.mxu0 %v2352_v61  ;;  %v754_v37 = vld [vmem:[%s3784_s1 + $0x340] sm:$0xff]  ;;  %v755_v38 = vld [vmem:[%s3784_s1 + $0x348] sm:$0xff]  ;;  %v741_v42 = vld [vmem:[%s3784_s1 + $0x2d8] sm:$0xff]  ;;  %v2368_v49 = vpack.c.bf16 %v723_v35, %v722_v33 }
  0x2c   : > { %2385 = vmatpush3.bf16.msra.mxu1 %v2384_v62  ;;  %2355 = vmatprep.subr.bf16.mxu0 %v2354_v63  ;;  %v772_v43 = vld [vmem:[%s3784_s1 + $0x3d0] sm:$0xff]  ;;  %v773_v44 = vld [vmem:[%s3784_s1 + $0x3d8] sm:$0xff]  ;;  %v742_v52 = vld [vmem:[%s3784_s1 + $0x2e0] sm:$0xff]  ;;  %v2400_v55 = vpack.c.bf16 %v755_v38, %v754_v37  ;;  %v2370_v56 = vpack.c.bf16 %v741_v42, %v740_v39 }
  0x2d   : > { %2387 = vmatprep.subr.bf16.mxu1 %v2386_v3  ;;  %v2623_v46 = vld [vmem:[%s2952_s29 + $0x28] ss:$16 sps:$4 sm:$0xff]   ;;  %v724_v47 = vld [vmem:[%s3784_s1 + $0x250] sm:$0xff]  ;;  %v774_v57 = vld [vmem:[%s3784_s1 + $0x3e0] sm:$0xff]  ;;  %v2402_v61 = vpack.c.bf16 %v773_v44, %v772_v43 }
  0x2e   : > { %v725_v48 = vld [vmem:[%s3784_s1 + $0x258] sm:$0xff]  ;;  %v756_v50 = vld [vmem:[%s3784_s1 + $0x350] sm:$0xff]  ;;  %v743_v53 = vld [vmem:[%s3784_s1 + $0x2e8] sm:$0xff]  ;;  %1115 = vmatprep.mubr.f32.mxu0 %v2623_v46 }
  0x2f   : > { %2357 = vmatpush3.bf16.msra.mxu0 %v2356_v9  ;;  %v757_v51 = vld [vmem:[%s3784_s1 + $0x358] sm:$0xff]  ;;  %v2624_v54 = vld [vmem:[%s2952_s29 + $0x20] ss:$8 sps:$4 sm:$0xee]   ;;  %v2372_v4 = vpack.c.bf16 %v725_v48, %v724_v47  ;;  %v744_v12 = vld [vmem:[%s3784_s1 + $0x2f0] sm:$0xff] }
  0x30   : > { %2389 = vmatpush3.bf16.msra.mxu1 %v2388_v10  ;;  %2359 = vmatprep.subr.bf16.mxu0 %v2358_v11  ;;  %v775_v58 = vld [vmem:[%s3784_s1 + $0x3e8] sm:$0xff]  ;;  %v2627_v60 = vld [vmem:[%s2952_s29 + $0x30] ss:$8 sps:$4 sm:$0xee]   ;;  %v1857_v63 = vrot.slane %v2624_v54, 9  ;;  %v726_v0 = vld [vmem:[%s3784_s1 + $0x260] sm:$0xff]  ;;  %v2404_v9 = vpack.c.bf16 %v757_v51, %v756_v50  ;;  %v2374_v10 = vpack.c.bf16 %v743_v53, %v742_v52 }
  0x31   : > { %2391 = vmatprep.subr.bf16.mxu1 %v2390_v15  ;;  %v2626_v59 = vld [vmem:[%s2952_s29 + $0x24] ss:$8 sps:$4 sm:$0x11]   ;;  %v2629_v62 = vld [vmem:[%s2952_s29 + $0x34] ss:$8 sps:$4 sm:$0x11]   ;;  %v2406_v15 = vpack.c.bf16 %v775_v58, %v774_v57 }
  0x32   : > { %v299_v1 = vrot.slane %v2626_v59, 5  ;;  %v1858_v2 = vrot.slane %v2627_v60, 9  ;;  %v2630_v3 = vld [vmem:[%s2952_s29 + $0x20] ss:$16 sps:$4 sm:$0xff]   ;;  %v727_v5 = vld [vmem:[%s3784_s1 + $0x268] sm:$0xff]  ;;  %v303_v8 = vrot.slane %v2629_v62, 5 }
  0x33   : > { %2361 = vmatpush3.bf16.msra.mxu0 %v2360_v21  ;;  %v758_v6 = vld [vmem:[%s3784_s1 + $0x360] sm:$0xff]  ;;  %v759_v7 = vld [vmem:[%s3784_s1 + $0x368] sm:$0xff]  ;;  %v745_v13 = vld [vmem:[%s3784_s1 + $0x2f8] sm:$0xff]  ;;  %v2376_v22 = vpack.c.bf16 %v727_v5, %v726_v0 }
  0x34   : > { %2393 = vmatpush3.bf16.msra.mxu1 %v2392_v23  ;;  %2363 = vmatprep.subr.bf16.mxu0 %v2362_v24  ;;  %v300_v11 = vsel %vm2979_vm2, %v1857_v63, %v299_v1  ;;  %v776_v14 = vld [vmem:[%s3784_s1 + $0x3f0] sm:$0xff]  ;;  %v304_v16 = vsel %vm2979_vm2, %v1858_v2, %v303_v8  ;;  %v777_v17 = vld [vmem:[%s3784_s1 + $0x3f8] sm:$0xff]  ;;  %v2631_v25 = vld [vmem:[%s2952_s29] ss:$8 sps:$4 sm:$0xcc]   ;;  %v2408_v27 = vpack.c.bf16 %v759_v7, %v758_v6 }
  0x35   : > { %2395 = vmatprep.subr.bf16.mxu1 %v2394_v28  ;;  %1116 = vmatmul.mubr.f32.gmra.mrb[2].mxu0 %v2630_v3  ;;  %v995_v18 = vcombine.high %v300_v11, %v304_v16  ;;  %v994_v19 = vcombine.low %v300_v11, %v304_v16  ;;  %v728_v20 = vld [vmem:[%s3784_s1 + $0x270] sm:$0xff]  ;;  %v729_v21 = vld [vmem:[%s3784_s1 + $0x278] sm:$0xff]  ;;  %v2633_v26 = vld [vmem:[%s2952_s29 + $0x4] ss:$8 sps:$4 sm:$0x33]   ;;  %v2378_v28 = vpack.c.bf16 %v745_v13, %v744_v12  ;;  %v1859_v33 = vrot.slane %v2631_v25, 10 }
  0x36   : > { %v760_v23 = vld [vmem:[%s3784_s1 + $0x370] sm:$0xff]  ;;  %v761_v24 = vld [vmem:[%s3784_s1 + $0x378] sm:$0xff]  ;;  %v2410_v32 = vpack.c.bf16 %v777_v17, %v776_v14  ;;  %v342_v35 = vrot.slane %v2633_v26, 6  ;;  %v2380_v39 = vpack.c.bf16 %v729_v21, %v728_v20  ;;  %v795_v42 = vld [vmem:[%s3784_s1 + $0x488] sm:$0xff] }
  0x37   : > { %2365 = vmatpush3.bf16.msra.mxu0 %v2364_v36  ;;  %v2634_v29 = vld [vmem:[%s2952_s29 + $0x10] ss:$8 sps:$4 sm:$0xcc]   ;;  %v2636_v30 = vld [vmem:[%s2952_s29 + $0x14] ss:$8 sps:$4 sm:$0x33]   ;;  %1190 = vmatprep.mubr.f32.mxu1 %v995_v18  ;;  %v2412_v43 = vpack.c.bf16 %v761_v24, %v760_v23 }
  0x38   : > { %2397 = vmatpush3.bf16.msra.mxu1 %v2396_v40  ;;  %2367 = vmatprep.subr.bf16.mxu0 %v2366_v41  ;;  %v2637_v36 = vld [vmem:[%s2952_s29 + $0x18] ss:$16 sps:$4 sm:$0xff]   ;;  %v1860_v37 = vrot.slane %v2634_v29, 10  ;;  %v346_v38 = vrot.slane %v2636_v30, 6  ;;  %v343_v40 = vsel %vm3196_vm5, %v1859_v33, %v342_v35  ;;  %v794_v41 = vld [vmem:[%s3784_s1 + $0x480] sm:$0xff]  ;;  %v796_v58 = vld [vmem:[%s3784_s1 + $0x490] sm:$0xff] }
  0x39   : > { %2399 = vmatprep.subr.bf16.mxu1 %v2398_v45  ;;  %1191 = vmatmul.mubr.f32.gmra.mrb[2].mxu1 %v994_v19  ;;  %v2414_v45 = vpack.c.bf16 %v795_v42, %v794_v41  ;;  %v826_v46 = vld [vmem:[%s3784_s1 + $0x580] sm:$0xff]  ;;  %v827_v47 = vld [vmem:[%s3784_s1 + $0x588] sm:$0xff]  ;;  %v2644_v62 = vld [vmem:[%s2952_s29 + $0x34] ss:$8 sps:$4 sm:$0x33]  }
  0x3a   : > { %1335 = vmatprep.mubr.f32.mxu1 %v2637_v36  ;;  %v347_v44 = vsel %vm3196_vm5, %v1860_v37, %v346_v38  ;;  %v778_v48 = vld [vmem:[%s3784_s1 + $0x400] sm:$0xff]  ;;  %v2446_v51 = vpack.c.bf16 %v827_v47, %v826_v46  ;;  %v779_v52 = vld [vmem:[%s3784_s1 + $0x408] sm:$0xff]  ;;  %v797_v0 = vld [vmem:[%s3784_s1 + $0x498] sm:$0xff]  ;;  %v354_v7 = vrot.slane %v2644_v62, 6 }
  0x3b   : > { %2369 = vmatpush3.bf16.msra.mxu0 %v2368_v49  ;;  %v979_v49 = vcombine.high %v343_v40, %v347_v44  ;;  %v2638_v50 = vld [vmem:[%s2952_s29 + $0x10] ss:$16 sps:$4 sm:$0xff]   ;;  %v811_v54 = vld [vmem:[%s3784_s1 + $0x508] sm:$0xff]  ;;  %v829_v5 = vld [vmem:[%s3784_s1 + $0x598] sm:$0xff] }
  0x3c   : > { %2401 = vmatpush3.bf16.msra.mxu1 %v2400_v55  ;;  %2371 = vmatprep.subr.bf16.mxu0 %v2370_v56  ;;  %v810_v53 = vld [vmem:[%s3784_s1 + $0x500] sm:$0xff]  ;;  %v978_v55 = vcombine.low %v343_v40, %v347_v44  ;;  %v2416_v56 = vpack.c.bf16 %v779_v52, %v778_v48  ;;  %v828_v1 = vld [vmem:[%s3784_s1 + $0x590] sm:$0xff]  ;;  %v813_v14 = vld [vmem:[%s3784_s1 + $0x518] sm:$0xff] }
  0x3d   : > { %2403 = vmatprep.subr.bf16.mxu1 %v2402_v61  ;;  %1260 = vmatprep.mubr.f32.mxu0 %v979_v49  ;;  %v2639_v57 = vld [vmem:[%s2952_s29 + $0x20] ss:$8 sps:$4 sm:$0xcc]   ;;  %v2448_v59 = vpack.c.bf16 %v811_v54, %v810_v53  ;;  %v2641_v60 = vld [vmem:[%s2952_s29 + $0x24] ss:$8 sps:$4 sm:$0x33]   ;;  %v2450_v8 = vpack.c.bf16 %v829_v5, %v828_v1 }
  0x3e   : > { %v2642_v61 = vld [vmem:[%s2952_s29 + $0x30] ss:$8 sps:$4 sm:$0xcc]   ;;  %v1861_v63 = vrot.slane %v2639_v57, 10  ;;  %v350_v2 = vrot.slane %v2641_v60, 6  ;;  %v798_v18 = vld [vmem:[%s3784_s1 + $0x4a0] sm:$0xff] }
  0x3f   : > { %2373 = vmatpush3.bf16.msra.mxu0 %v2372_v4  ;;  %v1862_v3 = vrot.slane %v2642_v61, 10  ;;  %v2418_v4 = vpack.c.bf16 %v797_v0, %v796_v58  ;;  %v780_v6 = vld [vmem:[%s3784_s1 + $0x410] sm:$0xff]  ;;  %v799_v21 = vld [vmem:[%s3784_s1 + $0x4a8] sm:$0xff]  ;;  %v782_v26 = vld [vmem:[%s3784_s1 + $0x420] sm:$0xff] }
  0x40   : > { %2405 = vmatpush3.bf16.msra.mxu1 %v2404_v9  ;;  %2375 = vmatprep.subr.bf16.mxu0 %v2374_v10  ;;  %v2645_v9 = vld [vmem:[%s2952_s29 + $0x38] ss:$16 sps:$4 sm:$0xff]   ;;  %v351_v11 = vsel %vm3196_vm5, %v1861_v63, %v350_v2  ;;  %v812_v13 = vld [vmem:[%s3784_s1 + $0x510] sm:$0xff]  ;;  %v2422_v24 = vpack.c.bf16 %v799_v21, %v798_v18  ;;  %v834_v47 = vld [vmem:[%s3784_s1 + $0x5c0] sm:$0xff] }
  0x41   : > { %2407 = vmatprep.subr.bf16.mxu1 %v2406_v15  ;;  %v781_v10 = vld [vmem:[%s3784_s1 + $0x418] sm:$0xff]  ;;  %v355_v15 = vsel %vm3196_vm5, %v1862_v3, %v354_v7  ;;  %v2452_v16 = vpack.c.bf16 %v813_v14, %v812_v13  ;;  %v2646_v17 = vld [vmem:[%s2952_s29 + $0x30] ss:$16 sps:$4 sm:$0xff]   ;;  %v831_v23 = vld [vmem:[%s3784_s1 + $0x5a8] sm:$0xff] }
  0x42   : > { %v2420_v12 = vpack.c.bf16 %v781_v10, %v780_v6  ;;  %v997_v19 = vcombine.high %v351_v11, %v355_v15  ;;  %v996_v20 = vcombine.low %v351_v11, %v355_v15  ;;  %v815_v30 = vld [vmem:[%s3784_s1 + $0x528] sm:$0xff]  ;;  %v801_v33 = vld [vmem:[%s3784_s1 + $0x4b8] sm:$0xff]  ;;  %v832_v37 = vld [vmem:[%s3784_s1 + $0x5b0] sm:$0xff] }
  0x43   : > { %2377 = vmatpush3.bf16.msra.mxu0 %v2376_v22  ;;  %v830_v22 = vld [vmem:[%s3784_s1 + $0x5a0] sm:$0xff]  ;;  %v833_v38 = vld [vmem:[%s3784_s1 + $0x5b8] sm:$0xff]  ;;  %v816_v42 = vld [vmem:[%s3784_s1 + $0x530] sm:$0xff] }
  0x44   : > { %2409 = vmatpush3.bf16.msra.mxu1 %v2408_v27  ;;  %2379 = vmatprep.subr.bf16.mxu0 %v2378_v28  ;;  %v2454_v25 = vpack.c.bf16 %v831_v23, %v830_v22  ;;  %v783_v27 = vld [vmem:[%s3784_s1 + $0x428] sm:$0xff]  ;;  %v814_v28 = vld [vmem:[%s3784_s1 + $0x520] sm:$0xff]  ;;  %v2458_v40 = vpack.c.bf16 %v833_v38, %v832_v37  ;;  %v785_v41 = vld [vmem:[%s3784_s1 + $0x438] sm:$0xff] }
  0x45   : > { %2411 = vmatprep.subr.bf16.mxu1 %v2410_v32  ;;  %v2424_v29 = vpack.c.bf16 %v783_v27, %v782_v26  ;;  %v800_v32 = vld [vmem:[%s3784_s1 + $0x4b0] sm:$0xff]  ;;  %v2456_v35 = vpack.c.bf16 %v815_v30, %v814_v28  ;;  %v803_v46 = vld [vmem:[%s3784_s1 + $0x4c8] sm:$0xff]  ;;  %v818_v54 = vld [vmem:[%s3784_s1 + $0x540] sm:$0xff] }
  0x46   : > { %v2426_v36 = vpack.c.bf16 %v801_v33, %v800_v32  ;;  %v787_v52 = vld [vmem:[%s3784_s1 + $0x448] sm:$0xff]  ;;  %v805_v57 = vld [vmem:[%s3784_s1 + $0x4d8] sm:$0xff]  ;;  %v836_v58 = vld [vmem:[%s3784_s1 + $0x5d0] sm:$0xff] }
  0x47   : > { %2381 = vmatpush3.bf16.msra.mxu0 %v2380_v39  ;;  %v784_v39 = vld [vmem:[%s3784_s1 + $0x430] sm:$0xff]  ;;  %v789_v0 = vld [vmem:[%s3784_s1 + $0x458] sm:$0xff]  ;;  %v807_v5 = vld [vmem:[%s3784_s1 + $0x4e8] sm:$0xff] }
  0x48   : > { %2413 = vmatpush3.bf16.msra.mxu1 %v2412_v43  ;;  %2415 = vmatprep.subr.bf16.mxu0 %v2414_v45  ;;  %v817_v43 = vld [vmem:[%s3784_s1 + $0x538] sm:$0xff]  ;;  %v2428_v44 = vpack.c.bf16 %v785_v41, %v784_v39  ;;  %v802_v45 = vld [vmem:[%s3784_s1 + $0x4c0] sm:$0xff]  ;;  %v788_v63 = vld [vmem:[%s3784_s1 + $0x450] sm:$0xff] }
  0x49   : > { %2447 = vmatprep.subr.bf16.mxu1 %v2446_v51  ;;  %v2460_v48 = vpack.c.bf16 %v817_v43, %v816_v42  ;;  %v2430_v49 = vpack.c.bf16 %v803_v46, %v802_v45  ;;  %v786_v51 = vld [vmem:[%s3784_s1 + $0x440] sm:$0xff]  ;;  %v820_v1 = vld [vmem:[%s3784_s1 + $0x550] sm:$0xff]  ;;  %v821_v3 = vld [vmem:[%s3784_s1 + $0x558] sm:$0xff] }
  0x4a   : > { %1261 = vmatmul.mubr.f32.vlgmr.msra.gmra.mrb[4].mxu0 %v978_v55  ;;  %v819_v55 = vld [vmem:[%s3784_s1 + $0x548] sm:$0xff]  ;;  %v2432_v60 = vpack.c.bf16 %v787_v52, %v786_v51  ;;  %v838_v6 = vld [vmem:[%s3784_s1 + $0x5e0] sm:$0xff]  ;;  %v808_v15 = vld [vmem:[%s3784_s1 + $0x4f0] sm:$0xff] }
  0x4b   : > { %1336 = vmatmul.mubr.f32.vlgmr.msra.gmra.mrb[4].mxu1 %v2638_v50  ;;  %2417 = vmatpush3.bf16.msra.mxu0 %v2416_v56  ;;  %v835_v50 = vld [vmem:[%s3784_s1 + $0x5c8] sm:$0xff]  ;;  %v804_v56 = vld [vmem:[%s3784_s1 + $0x4d0] sm:$0xff]  ;;  %v2464_v61 = vpack.c.bf16 %v819_v55, %v818_v54  ;;  %v822_v11 = vld [vmem:[%s3784_s1 + $0x560] sm:$0xff] }
  0x4c   : > { %2449 = vmatpush3.bf16.msra.mxu1 %v2448_v59  ;;  %2419 = vmatprep.subr.bf16.mxu0 %v2418_v4  ;;  %v2462_v53 = vpack.c.bf16 %v835_v50, %v834_v47  ;;  %v837_v59 = vld [vmem:[%s3784_s1 + $0x5d8] sm:$0xff]  ;;  %v2434_v62 = vpack.c.bf16 %v805_v57, %v804_v56  ;;  %v806_v4 = vld [vmem:[%s3784_s1 + $0x4e0] sm:$0xff]  ;;  %v839_v7 = vld [vmem:[%s3784_s1 + $0x5e8] sm:$0xff] }
  0x4d   : > { %2451 = vmatprep.subr.bf16.mxu1 %v2450_v8  ;;  %1340 = vmatprep.mubr.f32.mxu1 %v2645_v9  ;;  %v2466_v2 = vpack.c.bf16 %v837_v59, %v836_v58  ;;  %v2436_v8 = vpack.c.bf16 %v789_v0, %v788_v63  ;;  %v790_v9 = vld [vmem:[%s3784_s1 + $0x460] sm:$0xff]  ;;  %v791_v10 = vld [vmem:[%s3784_s1 + $0x468] sm:$0xff]  ;;  %v2438_v13 = vpack.c.bf16 %v807_v5, %v806_v4  ;;  %v840_v18 = vld [vmem:[%s3784_s1 + $0x5f0] sm:$0xff] }
  0x4e   : > { %1265 = vmatprep.mubr.f32.mxu0 %v997_v19  ;;  %v823_v14 = vld [vmem:[%s3784_s1 + $0x568] sm:$0xff]  ;;  %v841_v19 = vld [vmem:[%s3784_s1 + $0x5f8] sm:$0xff]  ;;  %v2440_v22 = vpack.c.bf16 %v791_v10, %v790_v9  ;;  %v824_v23 = vld [vmem:[%s3784_s1 + $0x570] sm:$0xff] }
  0x4f   : > { %2421 = vmatpush3.bf16.msra.mxu0 %v2420_v12  ;;  %1341 = vmatmul.mubr.f32.gmra.mrb[6].mxu1 %v2646_v17  ;;  %v2468_v12 = vpack.c.bf16 %v821_v3, %v820_v1  ;;  %v2470_v17 = vpack.c.bf16 %v839_v7, %v838_v6  ;;  %v793_v21 = vld [vmem:[%s3784_s1 + $0x478] sm:$0xff]  ;;  %v2472_v27 = vpack.c.bf16 %v823_v14, %v822_v11  ;;  %v2652_v30 = vld [vmem:[%s2952_s29 + $0x24] ss:$8 sps:$4 sm:$0x11]   ;;  %v860_v10 = vld [vmem:[%s3784_s1 + $0x690] sm:$0xff] }
  0x50   : > { %2453 = vmatpush3.bf16.msra.mxu1 %v2452_v16  ;;  %1266 = vmatmul.mubr.f32.gmra.mrb[6].mxu0 %v996_v20  ;;  %v809_v16 = vld [vmem:[%s3784_s1 + $0x4f8] sm:$0xff]  ;;  %v792_v20 = vld [vmem:[%s3784_s1 + $0x470] sm:$0xff]  ;;  %v2474_v32 = vpack.c.bf16 %v841_v19, %v840_v18  ;;  %v423_v37 = vrot.slane %v2652_v30, 5  ;;  %v2658_v45 = vld [vmem:[%s2952_s29 + $0x24] ss:$8 sps:$4 sm:$0x33]  }
  0x51   : > { %2423 = vmatprep.subr.bf16.mxu0 %v2422_v24  ;;  %2455 = vmatprep.subr.bf16.mxu1 %v2454_v25  ;;  %v825_v24 = vld [vmem:[%s3784_s1 + $0x578] sm:$0xff]  ;;  %v2442_v28 = vpack.c.bf16 %v809_v16, %v808_v15  ;;  %v2444_v38 = vpack.c.bf16 %v793_v21, %v792_v20  ;;  %v859_v50 = vld [vmem:[%s3784_s1 + $0x688] sm:$0xff]  ;;  %v890_v51 = vld [vmem:[%s3784_s1 + $0x780] sm:$0xff]  ;;  %v471_v54 = vrot.slane %v2658_v45, 6 }
  0x52   : > { %v2647_v25 = vld [vmem:[%s2952_s29 + $0x10] ss:$8 sps:$4 sm:$0xee]   ;;  %v2649_v26 = vld [vmem:[%s2952_s29 + $0x14] ss:$8 sps:$4 sm:$0x11]   ;;  %v2476_v42 = vpack.c.bf16 %v825_v24, %v824_v23 }
  0x53   : > { %2425 = vmatpush3.bf16.msra.mxu0 %v2424_v29  ;;  %v2650_v29 = vld [vmem:[%s2952_s29 + $0x20] ss:$8 sps:$4 sm:$0xee]   ;;  %v1879_v33 = vrot.slane %v2647_v25, 9  ;;  %v861_v11 = vld [vmem:[%s3784_s1 + $0x698] sm:$0xff]  ;;  %v876_v30 = vld [vmem:[%s3784_s1 + $0x710] sm:$0xff] }
  0x54   : > { %2457 = vmatpush3.bf16.msra.mxu1 %v2456_v35  ;;  %2427 = vmatprep.subr.bf16.mxu0 %v2426_v36  ;;  %v419_v35 = vrot.slane %v2649_v26, 5  ;;  %v1880_v36 = vrot.slane %v2650_v29, 9  ;;  %v2655_v41 = vld [vmem:[%s2952_s29 + $0x14] ss:$8 sps:$4 sm:$0x33]   ;;  %v891_v56 = vld [vmem:[%s3784_s1 + $0x788] sm:$0xff]  ;;  %v2482_v15 = vpack.c.bf16 %v861_v11, %v860_v10 }
  0x55   : > { %2459 = vmatprep.subr.bf16.mxu1 %v2458_v40  ;;  %v2653_v40 = vld [vmem:[%s2952_s29 + $0x10] ss:$8 sps:$4 sm:$0xcc]   ;;  %v842_v57 = vld [vmem:[%s3784_s1 + $0x600] sm:$0xff]  ;;  %v843_v58 = vld [vmem:[%s3784_s1 + $0x608] sm:$0xff] }
  0x56   : > { %v420_v39 = vsel %vm2979_vm2, %v1879_v33, %v419_v35  ;;  %v424_v43 = vsel %vm2979_vm2, %v1880_v36, %v423_v37  ;;  %v1891_v47 = vrot.slane %v2653_v40, 10  ;;  %v875_v63 = vld [vmem:[%s3784_s1 + $0x708] sm:$0xff]  ;;  %v2659_v4 = vld [vmem:[%s2952_s29 + $0x30] ss:$8 sps:$4 sm:$0xee]   ;;  %v894_v40 = vld [vmem:[%s3784_s1 + $0x7a0] sm:$0xff] }
  0x57   : > { %2429 = vmatpush3.bf16.msra.mxu0 %v2428_v44  ;;  %v2656_v44 = vld [vmem:[%s2952_s29 + $0x20] ss:$8 sps:$4 sm:$0xcc]   ;;  %v983_v46 = vcombine.high %v420_v39, %v424_v43  ;;  %v982_v52 = vcombine.low %v420_v39, %v424_v43  ;;  %v2661_v5 = vld [vmem:[%s2952_s29 + $0x34] ss:$8 sps:$4 sm:$0x11]  }
  0x58   : > { %2461 = vmatpush3.bf16.msra.mxu1 %v2460_v48  ;;  %2431 = vmatprep.subr.bf16.mxu0 %v2430_v49  ;;  %v467_v48 = vrot.slane %v2655_v41, 6  ;;  %v858_v49 = vld [vmem:[%s3784_s1 + $0x680] sm:$0xff]  ;;  %v427_v9 = vrot.slane %v2661_v5, 5  ;;  %v893_v16 = vld [vmem:[%s3784_s1 + $0x798] sm:$0xff]  ;;  %v863_v39 = vld [vmem:[%s3784_s1 + $0x6a8] sm:$0xff] }
  0x59   : > { %2463 = vmatprep.subr.bf16.mxu1 %v2462_v53  ;;  %v1892_v53 = vrot.slane %v2656_v44, 10  ;;  %v2478_v55 = vpack.c.bf16 %v859_v50, %v858_v49  ;;  %1410 = vmatprep.mubr.f32.mxu0 %v983_v46  ;;  %v2662_v6 = vld [vmem:[%s2952_s29 + $0x40] ss:$8 sps:$4 sm:$0xee]   ;;  %v845_v29 = vld [vmem:[%s3784_s1 + $0x618] sm:$0xff]  ;;  %v912_v34 = vld [vmem:[%s3784_s1 + $0x830] sm:$0xff] }
  0x5a   : > { %v468_v59 = vsel %vm3196_vm5, %v1891_v47, %v467_v48  ;;  %v2664_v7 = vld [vmem:[%s2952_s29 + $0x44] ss:$8 sps:$4 sm:$0x11]   ;;  %v2665_v21 = vld [vmem:[%s2952_s29 + $0x30] ss:$8 sps:$4 sm:$0xcc]  }
  0x5b   : > { %2433 = vmatpush3.bf16.msra.mxu0 %v2432_v60  ;;  %v2510_v60 = vpack.c.bf16 %v891_v56, %v890_v51  ;;  %v472_v0 = vsel %vm3196_vm5, %v1892_v53, %v471_v54  ;;  %v431_v14 = vrot.slane %v2664_v7, 5  ;;  %v2668_v25 = vld [vmem:[%s2952_s29 + $0x40] ss:$8 sps:$4 sm:$0xcc]   ;;  %v864_v51 = vld [vmem:[%s3784_s1 + $0x6b0] sm:$0xff] }
  0x5c   : > { %2465 = vmatpush3.bf16.msra.mxu1 %v2464_v61  ;;  %2435 = vmatprep.subr.bf16.mxu0 %v2434_v62  ;;  %v2480_v61 = vpack.c.bf16 %v843_v58, %v842_v57  ;;  %v874_v62 = vld [vmem:[%s3784_s1 + $0x700] sm:$0xff]  ;;  %v984_v1 = vcombine.low %v468_v59, %v472_v0  ;;  %v1894_v33 = vrot.slane %v2668_v25, 10  ;;  %v895_v43 = vld [vmem:[%s3784_s1 + $0x7a8] sm:$0xff]  ;;  %v896_v56 = vld [vmem:[%s3784_s1 + $0x7b0] sm:$0xff] }
  0x5d   : > { %2467 = vmatprep.subr.bf16.mxu1 %v2466_v2  ;;  %v985_v2 = vcombine.high %v468_v59, %v472_v0  ;;  %v2512_v3 = vpack.c.bf16 %v875_v63, %v874_v62  ;;  %v2670_v26 = vld [vmem:[%s2952_s29 + $0x44] ss:$8 sps:$4 sm:$0x33]   ;;  %v2518_v47 = vpack.c.bf16 %v895_v43, %v894_v40  ;;  %v897_v57 = vld [vmem:[%s3784_s1 + $0x7b8] sm:$0xff]  ;;  %v880_v62 = vld [vmem:[%s3784_s1 + $0x730] sm:$0xff] }
  0x5e   : > { %v479_v35 = vrot.slane %v2670_v26, 6  ;;  %v846_v44 = vld [vmem:[%s3784_s1 + $0x620] sm:$0xff]  ;;  %v847_v45 = vld [vmem:[%s3784_s1 + $0x628] sm:$0xff]  ;;  %v2522_v59 = vpack.c.bf16 %v897_v57, %v896_v56  ;;  %v881_v63 = vld [vmem:[%s3784_s1 + $0x738] sm:$0xff] }
  0x5f   : > { %2437 = vmatpush3.bf16.msra.mxu0 %v2436_v8  ;;  %1485 = vmatprep.mubr.f32.mxu1 %v985_v2  ;;  %v1881_v8 = vrot.slane %v2659_v4, 9  ;;  %v2488_v48 = vpack.c.bf16 %v847_v45, %v846_v44  ;;  %v878_v49 = vld [vmem:[%s3784_s1 + $0x720] sm:$0xff]  ;;  %v879_v50 = vld [vmem:[%s3784_s1 + $0x728] sm:$0xff]  ;;  %v2524_v5 = vpack.c.bf16 %v881_v63, %v880_v62  ;;  %v905_v40 = vld [vmem:[%s3784_s1 + $0x7f8] sm:$0xff] }
  0x60   : > { %2469 = vmatpush3.bf16.msra.mxu1 %v2468_v12  ;;  %2439 = vmatprep.subr.bf16.mxu0 %v2438_v13  ;;  %v892_v12 = vld [vmem:[%s3784_s1 + $0x790] sm:$0xff]  ;;  %v1882_v13 = vrot.slane %v2662_v6, 9  ;;  %v480_v46 = vsel %vm3196_vm5, %v1894_v33, %v479_v35  ;;  %v2520_v54 = vpack.c.bf16 %v879_v50, %v878_v49  ;;  %v866_v0 = vld [vmem:[%s3784_s1 + $0x6c0] sm:$0xff]  ;;  %v899_v4 = vld [vmem:[%s3784_s1 + $0x7c8] sm:$0xff] }
  0x61   : > { %2471 = vmatprep.subr.bf16.mxu1 %v2470_v17  ;;  %v844_v17 = vld [vmem:[%s3784_s1 + $0x610] sm:$0xff]  ;;  %v428_v18 = vsel %vm2979_vm2, %v1881_v8, %v427_v9  ;;  %v2514_v19 = vpack.c.bf16 %v893_v16, %v892_v12  ;;  %v850_v7 = vld [vmem:[%s3784_s1 + $0x640] sm:$0xff]  ;;  %v851_v8 = vld [vmem:[%s3784_s1 + $0x648] sm:$0xff] }
  0x62   : > { %v432_v20 = vsel %vm2979_vm2, %v1882_v13, %v431_v14  ;;  %v2484_v36 = vpack.c.bf16 %v845_v29, %v844_v17  ;;  %v882_v9 = vld [vmem:[%s3784_s1 + $0x740] sm:$0xff]  ;;  %v883_v11 = vld [vmem:[%s3784_s1 + $0x748] sm:$0xff]  ;;  %v868_v12 = vld [vmem:[%s3784_s1 + $0x6d0] sm:$0xff]  ;;  %v2496_v16 = vpack.c.bf16 %v851_v8, %v850_v7 }
  0x63   : > { %2441 = vmatpush3.bf16.msra.mxu0 %v2440_v22  ;;  %v2667_v22 = vld [vmem:[%s2952_s29 + $0x34] ss:$8 sps:$4 sm:$0x33]   ;;  %v1001_v23 = vcombine.high %v428_v18, %v432_v20  ;;  %v1000_v24 = vcombine.low %v428_v18, %v432_v20  ;;  %v2528_v18 = vpack.c.bf16 %v883_v11, %v882_v9  ;;  %v871_v25 = vld [vmem:[%s3784_s1 + $0x6e8] sm:$0xff]  ;;  %v902_v26 = vld [vmem:[%s3784_s1 + $0x7e0] sm:$0xff] }
  0x64   : > { %2473 = vmatpush3.bf16.msra.mxu1 %v2472_v27  ;;  %2443 = vmatprep.subr.bf16.mxu0 %v2442_v28  ;;  %v1893_v27 = vrot.slane %v2665_v21, 10  ;;  %v475_v28 = vrot.slane %v2667_v22, 6  ;;  %v869_v13 = vld [vmem:[%s3784_s1 + $0x6d8] sm:$0xff]  ;;  %v900_v14 = vld [vmem:[%s3784_s1 + $0x7d0] sm:$0xff]  ;;  %v855_v29 = vld [vmem:[%s3784_s1 + $0x668] sm:$0xff] }
  0x65   : > { %2475 = vmatprep.subr.bf16.mxu1 %v2474_v32  ;;  %v877_v32 = vld [vmem:[%s3784_s1 + $0x718] sm:$0xff]  ;;  %v852_v17 = vld [vmem:[%s3784_s1 + $0x650] sm:$0xff]  ;;  %v887_v33 = vld [vmem:[%s3784_s1 + $0x768] sm:$0xff] }
  0x66   : > { %v2516_v37 = vpack.c.bf16 %v877_v32, %v876_v30  ;;  %v476_v41 = vsel %vm3196_vm5, %v1893_v27, %v475_v28  ;;  %v853_v20 = vld [vmem:[%s3784_s1 + $0x658] sm:$0xff]  ;;  %v884_v21 = vld [vmem:[%s3784_s1 + $0x750] sm:$0xff]  ;;  %v903_v27 = vld [vmem:[%s3784_s1 + $0x7e8] sm:$0xff] }
  0x67   : > { %2445 = vmatpush3.bf16.msra.mxu0 %v2444_v38  ;;  %v862_v38 = vld [vmem:[%s3784_s1 + $0x6a0] sm:$0xff]  ;;  %v1002_v53 = vcombine.low %v476_v41, %v480_v46  ;;  %v885_v22 = vld [vmem:[%s3784_s1 + $0x758] sm:$0xff]  ;;  %v2500_v30 = vpack.c.bf16 %v853_v20, %v852_v17  ;;  %v872_v35 = vld [vmem:[%s3784_s1 + $0x6f0] sm:$0xff] }
  0x68   : > { %2477 = vmatpush3.bf16.msra.mxu1 %v2476_v42  ;;  %2479 = vmatprep.subr.bf16.mxu0 %v2478_v55  ;;  %v2486_v42 = vpack.c.bf16 %v863_v39, %v862_v38  ;;  %v865_v55 = vld [vmem:[%s3784_s1 + $0x6b8] sm:$0xff]  ;;  %v854_v28 = vld [vmem:[%s3784_s1 + $0x660] sm:$0xff]  ;;  %v904_v39 = vld [vmem:[%s3784_s1 + $0x7f0] sm:$0xff] }
  0x69   : > { %2511 = vmatprep.subr.bf16.mxu1 %v2510_v60  ;;  %v2490_v58 = vpack.c.bf16 %v865_v55, %v864_v51  ;;  %v848_v60 = vld [vmem:[%s3784_s1 + $0x630] sm:$0xff]  ;;  %v886_v32 = vld [vmem:[%s3784_s1 + $0x760] sm:$0xff]  ;;  %v873_v38 = vld [vmem:[%s3784_s1 + $0x6f8] sm:$0xff]  ;;  %v2504_v45 = vpack.c.bf16 %v855_v29, %v854_v28 }
  0x6a   : > { %1411 = vmatmul.mubr.f32.vlgmr.msra.gmra.mrb[8].mxu0 %v982_v52  ;;  %v1003_v52 = vcombine.high %v476_v41, %v480_v46  ;;  %v2534_v41 = vpack.c.bf16 %v903_v27, %v902_v26  ;;  %v856_v43 = vld [vmem:[%s3784_s1 + $0x670] sm:$0xff]  ;;  %v857_v44 = vld [vmem:[%s3784_s1 + $0x678] sm:$0xff]  ;;  %v2536_v49 = vpack.c.bf16 %v887_v33, %v886_v32  ;;  %v2506_v50 = vpack.c.bf16 %v873_v38, %v872_v35  ;;  %v2674_v51 = vld [vmem:[%s2952_s29 + $0x24] ss:$8 sps:$4 sm:$0x11]  }
  0x6b   : > { %2481 = vmatpush3.bf16.msra.mxu0 %v2480_v61  ;;  %1486 = vmatmul.mubr.f32.vlgmr.msra.gmra.mrb[8].mxu1 %v984_v1  ;;  %v849_v61 = vld [vmem:[%s3784_s1 + $0x638] sm:$0xff]  ;;  %v867_v1 = vld [vmem:[%s3784_s1 + $0x6c8] sm:$0xff]  ;;  %v888_v46 = vld [vmem:[%s3784_s1 + $0x770] sm:$0xff]  ;;  %v544_v56 = vrot.slane %v2674_v51, 5 }
  0x6c   : > { %2513 = vmatpush3.bf16.msra.mxu1 %v2512_v3  ;;  %2483 = vmatprep.subr.bf16.mxu0 %v2482_v15  ;;  %v2492_v2 = vpack.c.bf16 %v849_v61, %v848_v60  ;;  %v898_v3 = vld [vmem:[%s3784_s1 + $0x7c0] sm:$0xff]  ;;  %v2494_v6 = vpack.c.bf16 %v867_v1, %v866_v0  ;;  %v901_v15 = vld [vmem:[%s3784_s1 + $0x7d8] sm:$0xff]  ;;  %v923_v61 = vld [vmem:[%s3784_s1 + $0x888] sm:$0xff] }
  0x6d   : > { %2515 = vmatprep.subr.bf16.mxu1 %v2514_v19  ;;  %1415 = vmatprep.mubr.f32.mxu0 %v1001_v23  ;;  %v2526_v10 = vpack.c.bf16 %v899_v4, %v898_v3  ;;  %v2498_v19 = vpack.c.bf16 %v869_v13, %v868_v12  ;;  %v2530_v23 = vpack.c.bf16 %v901_v15, %v900_v14  ;;  %v906_v62 = vld [vmem:[%s3784_s1 + $0x800] sm:$0xff]  ;;  %v907_v1 = vld [vmem:[%s3784_s1 + $0x808] sm:$0xff]  ;;  %v924_v7 = vld [vmem:[%s3784_s1 + $0x890] sm:$0xff] }
  0x6e   : > { %1416 = vmatmul.mubr.f32.gmra.mrb[10].mxu0 %v1000_v24  ;;  %1490 = vmatprep.mubr.f32.mxu1 %v1003_v52  ;;  %v870_v24 = vld [vmem:[%s3784_s1 + $0x6e0] sm:$0xff]  ;;  %v2675_v52 = vld [vmem:[%s2952_s29 + $0x30] ss:$8 sps:$4 sm:$0xee]   ;;  %v911_v28 = vld [vmem:[%s3784_s1 + $0x828] sm:$0xff] }
  0x6f   : > { %2485 = vmatpush3.bf16.msra.mxu0 %v2484_v36  ;;  %1491 = vmatmul.mubr.f32.gmra.mrb[10].mxu1 %v1002_v53  ;;  %v2532_v36 = vpack.c.bf16 %v885_v22, %v884_v21  ;;  %v2538_v53 = vpack.c.bf16 %v905_v40, %v904_v39  ;;  %v1912_v57 = vrot.slane %v2675_v52, 9  ;;  %v2678_v3 = vld [vmem:[%s2952_s29 + $0x20] ss:$16 sps:$4 sm:$0xff]   ;;  %v925_v8 = vld [vmem:[%s3784_s1 + $0x898] sm:$0xff] }
  0x70   : > { %2517 = vmatpush3.bf16.msra.mxu1 %v2516_v37  ;;  %2487 = vmatprep.subr.bf16.mxu0 %v2486_v42  ;;  %v2502_v37 = vpack.c.bf16 %v871_v25, %v870_v24  ;;  %v2671_v42 = vld [vmem:[%s2952_s29 + $0x28] ss:$16 sps:$4 sm:$0xff]   ;;  %v2680_v11 = vld [vmem:[%s2952_s29 + $0x40] ss:$16 sps:$4 sm:$0xff]   ;;  %v2546_v14 = vpack.c.bf16 %v925_v8, %v924_v7 }
  0x71   : > { %2519 = vmatprep.subr.bf16.mxu1 %v2518_v47  ;;  %v889_v47 = vld [vmem:[%s3784_s1 + $0x778] sm:$0xff]  ;;  %1560 = vmatprep.mubr.f32.mxu0 %v2671_v42  ;;  %v2681_v12 = vld [vmem:[%s2952_s29 + $0x40] ss:$8 sps:$4 sm:$0xee]   ;;  %v928_v32 = vld [vmem:[%s3784_s1 + $0x8b0] sm:$0xff] }
  0x72   : > { %v2540_v63 = vpack.c.bf16 %v889_v47, %v888_v46  ;;  %v2683_v13 = vld [vmem:[%s2952_s29 + $0x44] ss:$8 sps:$4 sm:$0x11]   ;;  %v2684_v15 = vld [vmem:[%s2952_s29 + $0x50] ss:$8 sps:$4 sm:$0xee]  }
  0x73   : > { %2489 = vmatpush3.bf16.msra.mxu0 %v2488_v48  ;;  %v2672_v48 = vld [vmem:[%s2952_s29 + $0x20] ss:$8 sps:$4 sm:$0xee]   ;;  %v1913_v17 = vrot.slane %v2681_v12, 9  ;;  %v909_v20 = vld [vmem:[%s3784_s1 + $0x818] sm:$0xff]  ;;  %v1914_v22 = vrot.slane %v2684_v15, 9 }
  0x74   : > { %2521 = vmatpush3.bf16.msra.mxu1 %v2520_v54  ;;  %2491 = vmatprep.subr.bf16.mxu0 %v2490_v58  ;;  %v2677_v54 = vld [vmem:[%s2952_s29 + $0x34] ss:$8 sps:$4 sm:$0x11]   ;;  %v1911_v55 = vrot.slane %v2672_v48, 9  ;;  %v922_v58 = vld [vmem:[%s3784_s1 + $0x880] sm:$0xff]  ;;  %v927_v25 = vld [vmem:[%s3784_s1 + $0x8a8] sm:$0xff] }
  0x75   : > { %2523 = vmatprep.subr.bf16.mxu1 %v2522_v59  ;;  %v2508_v59 = vpack.c.bf16 %v857_v44, %v856_v43  ;;  %v548_v60 = vrot.slane %v2677_v54, 5  ;;  %v2542_v4 = vpack.c.bf16 %v923_v61, %v922_v58  ;;  %v926_v21 = vld [vmem:[%s3784_s1 + $0x8a0] sm:$0xff]  ;;  %v929_v33 = vld [vmem:[%s3784_s1 + $0x8b8] sm:$0xff]  ;;  %v915_v43 = vld [vmem:[%s3784_s1 + $0x848] sm:$0xff] }
  0x76   : > { %v545_v0 = vsel %vm2979_vm2, %v1911_v55, %v544_v56  ;;  %v910_v27 = vld [vmem:[%s3784_s1 + $0x820] sm:$0xff]  ;;  %v2554_v38 = vpack.c.bf16 %v929_v33, %v928_v32  ;;  %v913_v39 = vld [vmem:[%s3784_s1 + $0x838] sm:$0xff]  ;;  %v916_v52 = vld [vmem:[%s3784_s1 + $0x850] sm:$0xff] }
  0x77   : > { %2493 = vmatpush3.bf16.msra.mxu0 %v2492_v2  ;;  %v549_v2 = vsel %vm2979_vm2, %v1912_v57, %v548_v60  ;;  %v930_v40 = vld [vmem:[%s3784_s1 + $0x8c0] sm:$0xff]  ;;  %v2556_v44 = vpack.c.bf16 %v913_v39, %v912_v34  ;;  %v933_v46 = vld [vmem:[%s3784_s1 + $0x8d8] sm:$0xff]  ;;  %v935_v58 = vld [vmem:[%s3784_s1 + $0x8e8] sm:$0xff] }
  0x78   : > { %2525 = vmatpush3.bf16.msra.mxu1 %v2524_v5  ;;  %2495 = vmatprep.subr.bf16.mxu0 %v2494_v6  ;;  %v989_v5 = vcombine.high %v545_v0, %v549_v2  ;;  %v2679_v6 = vld [vmem:[%s2952_s29 + $0x48] ss:$16 sps:$4 sm:$0xff]   ;;  %v988_v9 = vcombine.low %v545_v0, %v549_v2  ;;  %v914_v42 = vld [vmem:[%s3784_s1 + $0x840] sm:$0xff]  ;;  %v2692_v51 = vld [vmem:[%s2952_s29 + $0x34] ss:$8 sps:$4 sm:$0x33]  }
  0x79   : > { %2527 = vmatprep.subr.bf16.mxu1 %v2526_v10  ;;  %v2544_v10 = vpack.c.bf16 %v907_v1, %v906_v62  ;;  %v2687_v48 = vld [vmem:[%s2952_s29 + $0x20] ss:$8 sps:$4 sm:$0xcc]   ;;  %v2560_v56 = vpack.c.bf16 %v915_v43, %v914_v42  ;;  %v596_v60 = vrot.slane %v2692_v51, 6  ;;  %v937_v15 = vld [vmem:[%s3784_s1 + $0x8f8] sm:$0xff] }
  0x7a   : > { %1635 = vmatprep.mubr.f32.mxu1 %v989_v5  ;;  %v1923_v54 = vrot.slane %v2687_v48, 10  ;;  %v934_v57 = vld [vmem:[%s3784_s1 + $0x8e0] sm:$0xff]  ;;  %v2696_v2 = vld [vmem:[%s2952_s29 + $0x50] ss:$8 sps:$4 sm:$0xcc]   ;;  %v919_v12 = vld [vmem:[%s3784_s1 + $0x868] sm:$0xff] }
  0x7b   : > { %2497 = vmatpush3.bf16.msra.mxu0 %v2496_v16  ;;  %v2686_v16 = vld [vmem:[%s2952_s29 + $0x54] ss:$8 sps:$4 sm:$0x11]   ;;  %v2695_v0 = vld [vmem:[%s2952_s29 + $0x44] ss:$8 sps:$4 sm:$0x33]  }
  0x7c   : > { %2529 = vmatpush3.bf16.msra.mxu1 %v2528_v18  ;;  %2499 = vmatprep.subr.bf16.mxu0 %v2498_v19  ;;  %v552_v18 = vrot.slane %v2683_v13, 5  ;;  %v908_v19 = vld [vmem:[%s3784_s1 + $0x810] sm:$0xff]  ;;  %v1926_v8 = vrot.slane %v2696_v2, 10 }
  0x7d   : > { %2531 = vmatprep.subr.bf16.mxu1 %v2530_v23  ;;  %v556_v23 = vrot.slane %v2686_v16, 5  ;;  %v2548_v24 = vpack.c.bf16 %v909_v20, %v908_v19  ;;  %v920_v20 = vld [vmem:[%s3784_s1 + $0x870] sm:$0xff] }
  0x7e   : > { %v553_v26 = vsel %vm2979_vm2, %v1913_v17, %v552_v18 }
  0x7f   : > { %2501 = vmatpush3.bf16.msra.mxu0 %v2500_v30  ;;  %v557_v29 = vsel %vm2979_vm2, %v1914_v22, %v556_v23  ;;  %v2550_v30 = vpack.c.bf16 %v927_v25, %v926_v21  ;;  %v921_v21 = vld [vmem:[%s3784_s1 + $0x878] sm:$0xff] }
  0x80   : > { %2533 = vmatpush3.bf16.msra.mxu1 %v2532_v36  ;;  %2503 = vmatprep.subr.bf16.mxu0 %v2502_v37  ;;  %v1007_v35 = vcombine.high %v553_v26, %v557_v29  ;;  %v1006_v36 = vcombine.low %v553_v26, %v557_v29  ;;  %v2552_v37 = vpack.c.bf16 %v911_v28, %v910_v27 }
  0x81   : > { %2535 = vmatprep.subr.bf16.mxu1 %v2534_v41  ;;  %v931_v41 = vld [vmem:[%s3784_s1 + $0x8c8] sm:$0xff]  ;;  %v2572_v22 = vpack.c.bf16 %v921_v21, %v920_v20 }
  0x82   : > { %v2558_v47 = vpack.c.bf16 %v931_v41, %v930_v40 }
  0x83   : > { %2505 = vmatpush3.bf16.msra.mxu0 %v2504_v45  ;;  %v932_v45 = vld [vmem:[%s3784_s1 + $0x8d0] sm:$0xff] }
  0x84   : > { %2537 = vmatpush3.bf16.msra.mxu1 %v2536_v49  ;;  %2507 = vmatprep.subr.bf16.mxu0 %v2506_v50  ;;  %v2689_v49 = vld [vmem:[%s2952_s29 + $0x24] ss:$8 sps:$4 sm:$0x33]   ;;  %v2690_v50 = vld [vmem:[%s2952_s29 + $0x30] ss:$8 sps:$4 sm:$0xcc]   ;;  %v2562_v61 = vpack.c.bf16 %v933_v46, %v932_v45 }
  0x85   : > { %2539 = vmatprep.subr.bf16.mxu1 %v2538_v53  ;;  %v917_v53 = vld [vmem:[%s3784_s1 + $0x858] sm:$0xff]  ;;  %v592_v55 = vrot.slane %v2689_v49, 6 }
  0x86   : > { %v2564_v7 = vpack.c.bf16 %v917_v53, %v916_v52 }
  0x87   : > { %2509 = vmatpush3.bf16.msra.mxu0 %v2508_v59  ;;  %v1924_v59 = vrot.slane %v2690_v50, 10  ;;  %v593_v62 = vsel %vm3196_vm5, %v1923_v54, %v592_v55 }
  0x88   : > { %2541 = vmatpush3.bf16.msra.mxu1 %v2540_v63  ;;  %2543 = vmatprep.subr.bf16.mxu0 %v2542_v4  ;;  %v2693_v63 = vld [vmem:[%s2952_s29 + $0x40] ss:$8 sps:$4 sm:$0xcc]  }
  0x89   : > { %2574 = vmatprep.subr.bf16.mxu1 %v2542_v4  ;;  %v597_v1 = vsel %vm3196_vm5, %v1924_v59, %v596_v60  ;;  %v1925_v5 = vrot.slane %v2693_v63, 10 }
  0x8a   : > { %1561 = vmatmul.mubr.f32.vlgmr.msra.gmra.mrb[12].mxu0 %v2678_v3  ;;  %v2698_v3 = vld [vmem:[%s2952_s29 + $0x54] ss:$8 sps:$4 sm:$0x33]   ;;  %v991_v4 = vcombine.high %v593_v62, %v597_v1  ;;  %v990_v31 = vcombine.low %v593_v62, %v597_v1 }
  0x8b   : > { %1636 = vmatmul.mubr.f32.vlgmr.msra.gmra.mrb[12].mxu1 %v988_v9  ;;  %2545 = vmatpush3.bf16.msra.mxu0 %v2544_v10  ;;  %v604_v9 = vrot.slane %v2698_v3, 6 }
  0x8c   : > { %2582 = vmatpush3.bf16.msra.mxu1 %v2544_v10  ;;  %1565 = vmatprep.mubr.f32.mxu0 %v2679_v6  ;;  %v600_v6 = vrot.slane %v2695_v0, 6  ;;  %v2566_v10 = vpack.c.bf16 %v935_v58, %v934_v57 }
  0x8d   : > { %2547 = vmatprep.subr.bf16.mxu0 %v2546_v14  ;;  %2575 = vmatprep.subr.bf16.mxu1 %v2546_v14  ;;  %v936_v14 = vld [vmem:[%s3784_s1 + $0x8f0] sm:$0xff]  ;;  %v605_v16 = vsel %vm3196_vm5, %v1926_v8, %v604_v9 }
  0x8e   : > { %1566 = vmatmul.mubr.f32.gmra.mrb[14].mxu0 %v2680_v11  ;;  %1640 = vmatprep.mubr.f32.mxu1 %v1007_v35  ;;  %v918_v11 = vld [vmem:[%s3784_s1 + $0x860] sm:$0xff]  ;;  %v601_v13 = vsel %vm3196_vm5, %v1925_v5, %v600_v6  ;;  %v2570_v19 = vpack.c.bf16 %v937_v15, %v936_v14 }
  0x8f   : > { %2549 = vmatpush3.bf16.msra.mxu0 %v2548_v24  ;;  %1641 = vmatmul.mubr.f32.gmra.mrb[14].mxu1 %v1006_v36  ;;  %v1009_v17 = vcombine.high %v601_v13, %v605_v16  ;;  %v2568_v18 = vpack.c.bf16 %v919_v12, %v918_v11  ;;  %v1008_v23 = vcombine.low %v601_v13, %v605_v16 }
  0x90   : > { %2583 = vmatpush3.bf16.msra.mxu1 %v2548_v24  ;;  %2551 = vmatprep.subr.bf16.mxu0 %v2550_v30 }
  0x91   : > { %2576 = vmatprep.subr.bf16.mxu1 %v2550_v30  ;;  %1710 = vmatprep.mubr.f32.mxu0 %v991_v4 }
  0x92   : > { %1715 = vmatprep.mubr.f32.mxu1 %v1009_v17 }
  0x93   : > { %2553 = vmatpush3.bf16.msra.mxu0 %v2552_v37 }
  0x94   : > { %2584 = vmatpush3.bf16.msra.mxu1 %v2552_v37  ;;  %2555 = vmatprep.subr.bf16.mxu0 %v2554_v38 }
  0x95   : > { %2577 = vmatprep.subr.bf16.mxu1 %v2554_v38 }
  0x97   : > { %2557 = vmatpush3.bf16.msra.mxu0 %v2556_v44 }
  0x98   : > { %2585 = vmatpush3.bf16.msra.mxu1 %v2556_v44  ;;  %2559 = vmatprep.subr.bf16.mxu0 %v2558_v47 }
  0x99   : > { %2578 = vmatprep.subr.bf16.mxu1 %v2558_v47 }
  0x9b   : > { %2561 = vmatpush3.bf16.msra.mxu0 %v2560_v56 }
  0x9c   : > { %2586 = vmatpush3.bf16.msra.mxu1 %v2560_v56  ;;  %2563 = vmatprep.subr.bf16.mxu0 %v2562_v61 }
  0x9d   : > { %2579 = vmatprep.subr.bf16.mxu1 %v2562_v61 }
  0x9f   : > { %2565 = vmatpush3.bf16.msra.mxu0 %v2564_v7 }
  0xa0   : > { %2587 = vmatpush3.bf16.msra.mxu1 %v2564_v7  ;;  %2567 = vmatprep.subr.bf16.mxu0 %v2566_v10 }
  0xa1   : > { %2580 = vmatprep.subr.bf16.mxu1 %v2566_v10 }
  0xa3   : > { %2569 = vmatpush3.bf16.msra.mxu0 %v2568_v18 }
  0xa4   : > { %2588 = vmatpush3.bf16.msra.mxu1 %v2568_v18  ;;  %2571 = vmatprep.subr.bf16.mxu0 %v2570_v19 }
  0xa5   : > { %2581 = vmatprep.subr.bf16.mxu1 %v2570_v19 }
  0xa7   : > { %2573 = vmatpush3.bf16.msra.mxu0 %v2572_v22 }
  0xa8   : > { %2589 = vmatpush3.bf16.msra.mxu1 %v2572_v22 }
  0xaa   : > { %1711 = vmatmul.mubr.f32.vlgmr.msra.gmra.mrb[16].mxu0 %v990_v31 }
  0xab   : > { %1716 = vmatmul.mubr.f32.vlgmr.msra.gmra.mrb[16].mxu1 %v1008_v23 }
  0xfd   : > { %v1976_v24 = vpop.f32.mrb[0].mxu0 }
  0xfe   : > { %v2014_v25 = vpop.f32.mrb[0].mxu1  ;;  %v1977_v26 = vpop.f32.mrb[1].mxu0 }
  0xff   : > { %v1978_v27 = vadd.f32 %v1977_v26, %v1976_v24  ;;  %v2015_v28 = vpop.f32.mrb[1].mxu1 }
 0x100   : > { %v2016_v29 = vadd.f32 %v2015_v28, %v2014_v25 }
 0x102   : > { %v1188_v30 = vadd.f32 %v2016_v29, %v1978_v27  ;;  %v1927_v27 = vld [vmem:[%s3785_s2] ss:$0 sm:$0xff] }
 0x108   : > { %v1979_v32 = vpop.f32.mrb[2].mxu0 }
 0x109   : > { %v1980_v33 = vpop.f32.mrb[3].mxu0 }
 0x10a   : > { %v1981_v35 = vadd.f32 %v1980_v33, %v1979_v32 }
 0x10c   : > { %v2017_v36 = vpop.f32.mrb[2].mxu1 }
 0x10d   : > { %v2018_v37 = vpop.f32.mrb[3].mxu1 }
 0x10e   : > { %v2019_v38 = vadd.f32 %v2018_v37, %v2017_v36 }
 0x110   : > { %v1193_v34 = vadd.f32 %v2019_v38, %v1981_v35 }
 0x11d   : > { %v2052_v39 = vpop.f32.mrb[4].mxu0 }
 0x11e   : > { %v2090_v40 = vpop.f32.mrb[4].mxu1  ;;  %v2053_v41 = vpop.f32.mrb[5].mxu0 }
 0x11f   : > { %v2054_v42 = vadd.f32 %v2053_v41, %v2052_v39  ;;  %v2091_v43 = vpop.f32.mrb[5].mxu1 }
 0x120   : > { %v2092_v44 = vadd.f32 %v2091_v43, %v2090_v40 }
 0x121   : > { %v1263_v45 = vadd.f32 %v2054_v42, %v1188_v30  ;;  %v1928_v30 = vld [vmem:[%s3786_s3] ss:$0 sm:$0xff] }
 0x122   : > { %v2093_v46 = vpop.f32.mrb[6].mxu1 }
 0x123   : > { %v1338_v47 = vadd.f32 %v2092_v44, %v1263_v45  ;;  %v2094_v48 = vpop.f32.mrb[7].mxu1  ;;  %v2055_v49 = vpop.f32.mrb[6].mxu0 }
 0x124   : > { %v2095_v50 = vadd.f32 %v2094_v48, %v2093_v46  ;;  %v2056_v51 = vpop.f32.mrb[7].mxu0 }
 0x125   : > { %v2057_v52 = vadd.f32 %v2056_v51, %v2055_v49 }
 0x127   : > { %v1268_v53 = vadd.f32 %v2057_v52, %v1193_v34 }
 0x129   : > { %v1343_v54 = vadd.f32 %v2095_v50, %v1268_v53 }
 0x13d   : > { %v2128_v55 = vpop.f32.mrb[8].mxu0 }
 0x13e   : > { %v2129_v56 = vpop.f32.mrb[9].mxu0  ;;  %v2166_v57 = vpop.f32.mrb[8].mxu1 }
 0x13f   : > { %v2130_v58 = vadd.f32 %v2129_v56, %v2128_v55  ;;  %v2167_v59 = vpop.f32.mrb[9].mxu1 }
 0x140   : > { %v2168_v61 = vadd.f32 %v2167_v59, %v2166_v57 }
 0x141   : > { %v1413_v60 = vadd.f32 %v2130_v58, %v1338_v47  ;;  %v2131_v63 = vpop.f32.mrb[10].mxu0 }
 0x142   : > { %v2132_v0 = vpop.f32.mrb[11].mxu0  ;;  %v2169_v3 = vpop.f32.mrb[10].mxu1 }
 0x143   : > { %v1488_v62 = vadd.f32 %v2168_v61, %v1413_v60  ;;  %v2133_v1 = vadd.f32 %v2132_v0, %v2131_v63  ;;  %v2170_v4 = vpop.f32.mrb[11].mxu1 }
 0x144   : > { %v2171_v5 = vadd.f32 %v2170_v4, %v2169_v3 }
 0x145   : > { %v1418_v2 = vadd.f32 %v2133_v1, %v1343_v54 }
 0x147   : > { %v1493_v6 = vadd.f32 %v2171_v5, %v1418_v2 }
 0x15d   : > { %v2204_v7 = vpop.f32.mrb[12].mxu0 }
 0x15e   : > { %v2242_v8 = vpop.f32.mrb[12].mxu1  ;;  %v2205_v9 = vpop.f32.mrb[13].mxu0 }
 0x15f   : > { %v2206_v10 = vadd.f32 %v2205_v9, %v2204_v7  ;;  %v2243_v11 = vpop.f32.mrb[13].mxu1 }
 0x160   : > { %v2244_v12 = vadd.f32 %v2243_v11, %v2242_v8 }
 0x161   : > { %v1563_v13 = vadd.f32 %v2206_v10, %v1488_v62  ;;  %v2207_v14 = vpop.f32.mrb[14].mxu0 }
 0x162   : > { %v2208_v15 = vpop.f32.mrb[15].mxu0  ;;  %v2245_v18 = vpop.f32.mrb[14].mxu1 }
 0x163   : > { %v1638_v16 = vadd.f32 %v2244_v12, %v1563_v13  ;;  %v2209_v17 = vadd.f32 %v2208_v15, %v2207_v14  ;;  %v2246_v20 = vpop.f32.mrb[15].mxu1 }
 0x164   : > { %v2247_v21 = vadd.f32 %v2246_v20, %v2245_v18 }
 0x165   : > { %v1568_v19 = vadd.f32 %v2209_v17, %v1493_v6 }
 0x167   : > { %v1643_v22 = vadd.f32 %v2247_v21, %v1568_v19 }
 0x17d   : > { %v2280_v31 = vpop.f32.mrb[16].mxu0 }
 0x17e   : > { %v2283_v23 = vpop.f32.mrb[16].mxu1  ;;  %v2281_v24 = vpop.f32.mrb[17].mxu0 }
 0x17f   : > { %v2282_v25 = vadd.f32 %v2281_v24, %v2280_v31  ;;  %v2284_v26 = vpop.f32.mrb[17].mxu1 }
 0x180   : > { %v2285_v28 = vadd.f32 %v2284_v26, %v2283_v23 }
 0x181   : > { %v1713_v29 = vadd.f32 %v2282_v25, %v1638_v16 }
 0x182   : > { %v1718_v32 = vadd.f32 %v2285_v28, %v1643_v22 }
 0x183   : > { %v1728_v33 = vmul.f32 %v1927_v27, %v1713_v29 }
 0x184   : > { %v1729_v35 = vmul.f32 %v1927_v27, %v1718_v32 }
 0x185   : > { %v1737_v36 = vadd.f32 %v1928_v30, %v1728_v33 }
 0x186   : > { %v1738_v37 = vadd.f32 %v1928_v30, %v1729_v35 }
 0x187   : > { %vm1739_vm6 = vcmp.ge.f32.partialorder %v1737_v36, 0.0  ;;  %v1741_v38 = vmul.f32 0.1, %v1737_v36 }
 0x188   : > { %vm1740_vm7 = vcmp.ge.f32.partialorder %v1738_v37, 0.0  ;;  %v1742_v34 = vmul.f32 0.1, %v1738_v37 }
 0x189   : > { %v1743_v39 = vsel %vm1739_vm6, %v1737_v36, %v1741_v38 }
 0x18a   : > { %v1747_v40 = vcombine.high %v1743_v39, %v1743_v39  ;;  %1751 = vst [vmem:[%s233_s21] sm:$0xf] %v1743_v39  ;;  %v1744_v41 = vsel %vm1740_vm7, %v1738_v37, %v1742_v34 }
 0x18b   : > { %v1748_v42 = vcombine.high %v1744_v41, %v1744_v41  ;;  %1753 = vst [vmem:[%s233_s21 + $0x8] sm:$0xf] %v1744_v41 }
 0x18c   : > { %1752 = vst [vmem:[%s233_s21 + $0x4] sm:$0xf] %v1747_v40 }
 0x18d   : > { %1754 = vst [vmem:[%s233_s21 + $0xc] sm:$0xf] %v1748_v42 }
 0x18e PF: > { %s14_s17 = sadd.s32 1, %s2721_s17   ;;  %s3792_s15 = smov %s2717_s16 }
 0x18f   : > { %p11_p5 = scmp.ge.s32.totalorder %s14_s17, 4   ;;  %s3793_s16 = smov %s3795_s18 }
 0x191   :  { %13 = sbr.rel (!%p11_p5) target bundleno = 2 (0x2), region = 68 }

</bundles_post_ra>
